<compile_context>
chip_gen: v7x
topology: tpu7x:2x2x1
jax: 0.10.0
libtpu: 0.0.40
codegen_flags: <defaults>
</compile_context>

<pallas_src>
import jax
import jax.numpy as jnp
from jax import lax
from jax.experimental import pallas as pl
from jax.experimental.pallas import tpu as pltpu

LANE = 128


def _round_up(x, m):
    return (x + m - 1) // m * m


# ----------------------------------------------------------------------------
# Fused kernel
# ----------------------------------------------------------------------------
def single_block_kernel(x_ref, w1a_ref, w1b_ref, w2_ref,
                        s1a_ref, b1a_ref, s1b_ref, b1b_ref, s2_ref, b2_ref,
                        out_ref, apad_ref):
    # x_ref   : (1, RX, Cin_p) bf16 -- spatially pre-padded input, rows
    #           flattened; RX = (H+3)*(W+2) (1 top + 2 bottom halo rows,
    #           1 left + 1 right halo cols; extra bottom rows keep the tap
    #           slabs in-bounds).
    # w*_ref  : (9, Cin_p|Cp, Cp) bf16 -- per-tap weights, zero padded.
    # s*/b*   : (1, Cp) f32          -- folded BN scale/bias, zero padded.
    # out_ref : (1, H, W, Cp) f32    -- lane-dense (Cp multiple of 128).
    # apad_ref: (RX, Cp) bf16 VMEM scratch -- padded intermediate activation.
    H, W, Cp = out_ref.shape[1], out_ref.shape[2], out_ref.shape[3]
    Wp = W + 2                     # padded row width
    L = H * Wp                     # matmul M (includes 2 garbage cols per row)
    interior = Wp + 1              # flat offset of padded position (row=1, col=1)
    RX = apad_ref.shape[0]

    def conv3x3(src, w_ref):
        # 3x3 conv as 9 chained MXU matmuls over contiguous row slabs of the
        # flat padded buffer.  Accumulation stays in a traced f32 value.
        acc = None
        for t in range(9):
            dy, dx = divmod(t, 3)
            off = dy * Wp + dx
            d = jnp.dot(src(off), w_ref[t], preferred_element_type=jnp.float32)
            acc = d if acc is None else acc + d
        return acc                                            # (L, Cp) f32

    def bn_relu(acc, s_ref, b_ref):
        # fused folded-BN + ReLU epilogue on the f32 accumulator value
        return jnp.maximum(acc * s_ref[...] + b_ref[...], 0.0)

    def valid_cols(v):
        # drop the 2 garbage columns per padded row -> (H, W, Cp)
        return v.reshape(H, Wp, Cp)[:, :W, :]

    x_src = lambda off: x_ref[0, off:off + L, :]              # bf16, contiguous
    a_src = lambda off: apad_ref[off:off + L, :]              # bf16, contiguous

    # ---- branch 2: conv -> BN -> ReLU, stored straight into out_ref ----
    x2 = bn_relu(conv3x3(x_src, w2_ref), s2_ref, b2_ref)
    out_ref[0] = valid_cols(x2)

    # ---- branch 1, first conv -> BN -> ReLU, re-padded into VMEM scratch ----
    a = bn_relu(conv3x3(x_src, w1a_ref), s1a_ref, b1a_ref)    # (L, Cp) f32
    # Zero the 2 garbage columns so that, written contiguously at `interior`,
    # they land exactly on the right/left halo columns of apad (which must be 0).
    colmask = lax.broadcasted_iota(jnp.int32, (H, Wp, 1), 1) < W
    a = jnp.where(colmask, a.reshape(H, Wp, Cp), 0.0).reshape(L, Cp)
    # Zero only the halo strips the interior write does not cover:
    #   [0, Wp+1)           -> top halo row + left halo of row 1
    #   [(H+1)*Wp + 1, RX)  -> bottom halo rows
    bot = (H + 1) * Wp + 1
    apad_ref[0:interior, :] = jnp.zeros((interior, Cp), jnp.bfloat16)
    apad_ref[bot:RX, :] = jnp.zeros((RX - bot, Cp), jnp.bfloat16)
    apad_ref[interior:interior + L, :] = a.astype(jnp.bfloat16)

    # ---- branch 1, second conv -> BN -> ReLU -> Dropout (identity in eval);
    #      residual add into out_ref ----
    x1 = bn_relu(conv3x3(a_src, w1b_ref), s1b_ref, b1b_ref)
    out_ref[0] = out_ref[0] + valid_cols(x1)


# ----------------------------------------------------------------------------
# Wrapper
# ----------------------------------------------------------------------------
def single_block_forward(x_nhwc, params):
    """Forward pass of singleBlock (eval mode). x_nhwc: (N, H, W, Cin) f32."""
    N, H, W, Cin = x_nhwc.shape
    cin_p, cp, cout = params["cin_p"], params["cp"], params["cout"]
    Wp = W + 2
    RX = (H + 3) * Wp

    # One prep op: spatial halo pad (1 top, 2 bottom, 1 left/right), channel pad
    # to a lane multiple, bf16 cast, flatten rows.  The kernel's conv taps are
    # then contiguous row slabs of this block (no in-kernel copy of x).
    x_p = jnp.pad(x_nhwc, ((0, 0), (1, 2), (1, 1), (0, cin_p - Cin)))
    x_p = x_p.astype(jnp.bfloat16).reshape(N, RX, cin_p)

    single = pl.Buffered(1)   # grid-invariant operands: no double buffering
    def w_spec(ci):
        return pl.BlockSpec((9, ci, cp), lambda n: (0, 0, 0),
                            pipeline_mode=single)
    bn_spec = pl.BlockSpec((1, cp), lambda n: (0, 0), pipeline_mode=single)

    out = pl.pallas_call(
        single_block_kernel,
        out_shape=jax.ShapeDtypeStruct((N, H, W, cp), jnp.float32),
        grid_spec=pltpu.PrefetchScalarGridSpec(
            num_scalar_prefetch=0,
            grid=(N,),
            in_specs=[
                pl.BlockSpec((1, RX, cin_p), lambda n: (n, 0, 0)),
                w_spec(cin_p), w_spec(cp), w_spec(cin_p),
                bn_spec, bn_spec, bn_spec, bn_spec, bn_spec, bn_spec,
            ],
            out_specs=pl.BlockSpec((1, H, W, cp), lambda n: (n, 0, 0, 0)),
            scratch_shapes=[
                pltpu.VMEM((RX, cp), jnp.bfloat16),   # padded intermediate `a`
            ],
        ),
        compiler_params=pltpu.CompilerParams(
            dimension_semantics=("parallel",),
            vmem_limit_bytes=64 * 1024 * 1024),
    )(x_p, params["w1a"], params["w1b"], params["w2"],
      *params["bn1a"], *params["bn1b"], *params["bn2"])

    # drop padded channels (their weights/scale/bias are zero, so this is exact)
    return out[..., :cout]


# ----------------------------------------------------------------------------
# Parameter preparation (BN folding, channel padding, per-tap weight layout)
# ----------------------------------------------------------------------------
def fold_bn(gamma, beta, mean, var, eps=1e-5):
    scale = gamma / jnp.sqrt(var + eps)
    bias = beta - mean * scale
    return scale, bias


def _prep_conv_w(w, cin_p, cp):
    # w: (3, 3, Cin, Cout) -> (9, cin_p, cp) bf16, zero padded
    kh, kw, cin, cout = w.shape
    wp = jnp.zeros((kh, kw, cin_p, cp), jnp.float32)
    wp = wp.at[:, :, :cin, :cout].set(w)
    return wp.reshape(kh * kw, cin_p, cp).astype(jnp.bfloat16)


def _prep_bn(bn, cp, cout):
    scale, bias = fold_bn(*bn)
    sp = jnp.zeros((1, cp), jnp.float32).at[0, :cout].set(scale)
    bp = jnp.zeros((1, cp), jnp.float32).at[0, :cout].set(bias)
    return sp, bp


def make_params(key, in_ch, out_ch):
    ks = jax.random.split(key, 15)

    def conv_w(k, cin, cout):
        return 0.1 * jax.random.normal(k, (3, 3, cin, cout), jnp.float32)

    def bn(k1, k2, k3, k4, c):
        gamma = 1.0 + 0.1 * jax.random.normal(k1, (c,), jnp.float32)
        beta = 0.1 * jax.random.normal(k2, (c,), jnp.float32)
        mean = 0.1 * jax.random.normal(k3, (c,), jnp.float32)
        var = jnp.abs(jax.random.normal(k4, (c,), jnp.float32)) + 0.5
        return gamma, beta, mean, var

    w1a = conv_w(ks[0], in_ch, out_ch)
    w1b = conv_w(ks[1], out_ch, out_ch)
    w2 = conv_w(ks[2], in_ch, out_ch)
    bn1a = bn(ks[3], ks[4], ks[5], ks[6], out_ch)
    bn1b = bn(ks[7], ks[8], ks[9], ks[10], out_ch)
    bn2 = bn(ks[11], ks[12], ks[13], ks[14], out_ch)

    cin_p = _round_up(in_ch, LANE)
    cp = _round_up(out_ch, LANE)
    params = {
        "w1a": _prep_conv_w(w1a, cin_p, cp),
        "w1b": _prep_conv_w(w1b, cp, cp),
        "w2": _prep_conv_w(w2, cin_p, cp),
        "bn1a": _prep_bn(bn1a, cp, out_ch),
        "bn1b": _prep_bn(bn1b, cp, out_ch),
        "bn2": _prep_bn(bn2, cp, out_ch),
        "cin": in_ch, "cout": out_ch, "cin_p": cin_p, "cp": cp,
    }
    raw = {"w1a": w1a, "w1b": w1b, "w2": w2, "bn1a": bn1a, "bn1b": bn1b, "bn2": bn2}
    return params, raw


# ----------------------------------------------------------------------------
# Pure-JAX reference (f32, eval mode)
# ----------------------------------------------------------------------------
def _ref_conv_bn_relu(x, w, bn, eps=1e-5):
    y = lax.conv_general_dilated(
        x, w, window_strides=(1, 1), padding="SAME",
        dimension_numbers=("NHWC", "HWIO", "NHWC"))
    gamma, beta, mean, var = bn
    y = gamma * (y - mean) / jnp.sqrt(var + eps) + beta
    return jnp.maximum(y, 0.0)


def reference_forward(x, raw):
    a = _ref_conv_bn_relu(x, raw["w1a"], raw["bn1a"])
    x1 = _ref_conv_bn_relu(a, raw["w1b"], raw["bn1b"])
    x2 = _ref_conv_bn_relu(x, raw["w2"], raw["bn2"])
    return x1 + x2


# ----------------------------------------------------------------------------
if __name__ == "__main__":
    N, Cin, Cout, H, W = 2, 4, 8, 16, 16
    key = jax.random.PRNGKey(0)
    kx, kp = jax.random.split(key)

    x_nchw = jax.random.normal(kx, (N, Cin, H, W), jnp.float32)   # PyTorch layout
    x_nhwc = jnp.transpose(x_nchw, (0, 2, 3, 1))                  # kernel layout

    params, raw = make_params(kp, Cin, Cout)

    out = single_block_forward(x_nhwc, params)
    out = jax.block_until_ready(out)

    ref = reference_forward(x_nhwc, raw)
    assert out.shape == (N, H, W, Cout)
    # bf16 MXU operands (f32 accumulation) vs. f32 XLA reference -> relaxed tol.
    max_err = float(jnp.max(jnp.abs(out - ref)))
    assert jnp.allclose(out, ref, atol=5e-2, rtol=5e-2), (
        f"mismatch vs. XLA reference, max abs err {max_err}")

    print("KERNEL_OK")
</pallas_src>

<mosaic_0001>
module attributes {stable_mosaic.version = 11 : i64} {
  func.func @single_block_kernel(%arg0: i32, %arg1: memref<1x342x128xbf16, #tpu.memory_space<vmem>>, %arg2: memref<9x128x128xbf16, #tpu.memory_space<vmem>>, %arg3: memref<9x128x128xbf16, #tpu.memory_space<vmem>>, %arg4: memref<9x128x128xbf16, #tpu.memory_space<vmem>>, %arg5: memref<1x128xf32, #tpu.memory_space<vmem>>, %arg6: memref<1x128xf32, #tpu.memory_space<vmem>>, %arg7: memref<1x128xf32, #tpu.memory_space<vmem>>, %arg8: memref<1x128xf32, #tpu.memory_space<vmem>>, %arg9: memref<1x128xf32, #tpu.memory_space<vmem>>, %arg10: memref<1x128xf32, #tpu.memory_space<vmem>>, %arg11: memref<1x16x16x128xf32, #tpu.memory_space<vmem>>, %arg12: memref<342x128xbf16, #tpu.memory_space<vmem>>) attributes {dimension_semantics = [#tpu.dimension_semantics<parallel>], iteration_bounds = array<i64: 2>, scalar_prefetch = 0 : i64, scratch_operands = 1 : i64, tpu.core_type = #tpu.core_type<tc>, window_params = [{transform_indices = @transform_0, window_bounds = array<i64: 1, 342, 128>}, {pipeline_mode = #tpu.pipeline_mode<synchronous>, transform_indices = @transform_1, window_bounds = array<i64: 9, 128, 128>}, {pipeline_mode = #tpu.pipeline_mode<synchronous>, transform_indices = @transform_2, window_bounds = array<i64: 9, 128, 128>}, {pipeline_mode = #tpu.pipeline_mode<synchronous>, transform_indices = @transform_3, window_bounds = array<i64: 9, 128, 128>}, {pipeline_mode = #tpu.pipeline_mode<synchronous>, transform_indices = @transform_4, window_bounds = array<i64: 1, 128>}, {pipeline_mode = #tpu.pipeline_mode<synchronous>, transform_indices = @transform_5, window_bounds = array<i64: 1, 128>}, {pipeline_mode = #tpu.pipeline_mode<synchronous>, transform_indices = @transform_6, window_bounds = array<i64: 1, 128>}, {pipeline_mode = #tpu.pipeline_mode<synchronous>, transform_indices = @transform_7, window_bounds = array<i64: 1, 128>}, {pipeline_mode = #tpu.pipeline_mode<synchronous>, transform_indices = @transform_8, window_bounds = array<i64: 1, 128>}, {pipeline_mode = #tpu.pipeline_mode<synchronous>, transform_indices = @transform_9, window_bounds = array<i64: 1, 128>}, {transform_indices = @transform_10, window_bounds = array<i64: 1, 16, 16, 128>}]} {
    %c0 = arith.constant 0 : index
    %c0_0 = arith.constant 0 : index
    %c0_1 = arith.constant 0 : index
    %0 = vector.load %arg1[%c0, %c0_0, %c0_1] : memref<1x342x128xbf16, #tpu.memory_space<vmem>>, vector<1x288x128xbf16>
    %1 = vector.shape_cast %0 : vector<1x288x128xbf16> to vector<288x128xbf16>
    %c0_2 = arith.constant 0 : index
    %c0_3 = arith.constant 0 : index
    %c0_4 = arith.constant 0 : index
    %2 = vector.load %arg4[%c0_2, %c0_3, %c0_4] : memref<9x128x128xbf16, #tpu.memory_space<vmem>>, vector<1x128x128xbf16>
    %3 = vector.shape_cast %2 : vector<1x128x128xbf16> to vector<128x128xbf16>
    %cst = arith.constant dense<0.000000e+00> : vector<288x128xf32>
    %4 = tpu.matmul %1, %3, %cst {dimension_numbers = #tpu.dot_dimension_numbers<[1], [0], [0], [1], [0, 0, 1, 1], [], []>} : vector<288x128xbf16>, vector<128x128xbf16>, vector<288x128xf32> -> vector<288x128xf32>
    %c0_5 = arith.constant 0 : index
    %c1 = arith.constant 1 : index
    %c0_6 = arith.constant 0 : index
    %5 = vector.load %arg1[%c0_5, %c1, %c0_6] : memref<1x342x128xbf16, #tpu.memory_space<vmem>>, vector<1x288x128xbf16>
    %6 = vector.shape_cast %5 : vector<1x288x128xbf16> to vector<288x128xbf16>
    %c1_7 = arith.constant 1 : index
    %c0_8 = arith.constant 0 : index
    %c0_9 = arith.constant 0 : index
    %7 = vector.load %arg4[%c1_7, %c0_8, %c0_9] : memref<9x128x128xbf16, #tpu.memory_space<vmem>>, vector<1x128x128xbf16>
    %8 = vector.shape_cast %7 : vector<1x128x128xbf16> to vector<128x128xbf16>
    %cst_10 = arith.constant dense<0.000000e+00> : vector<288x128xf32>
    %9 = tpu.matmul %6, %8, %cst_10 {dimension_numbers = #tpu.dot_dimension_numbers<[1], [0], [0], [1], [0, 0, 1, 1], [], []>} : vector<288x128xbf16>, vector<128x128xbf16>, vector<288x128xf32> -> vector<288x128xf32>
    %10 = arith.addf %4, %9 : vector<288x128xf32>
    %c0_11 = arith.constant 0 : index
    %c2 = arith.constant 2 : index
    %c0_12 = arith.constant 0 : index
    %11 = vector.load %arg1[%c0_11, %c2, %c0_12] : memref<1x342x128xbf16, #tpu.memory_space<vmem>>, vector<1x288x128xbf16>
    %12 = vector.shape_cast %11 : vector<1x288x128xbf16> to vector<288x128xbf16>
    %c2_13 = arith.constant 2 : index
    %c0_14 = arith.constant 0 : index
    %c0_15 = arith.constant 0 : index
    %13 = vector.load %arg4[%c2_13, %c0_14, %c0_15] : memref<9x128x128xbf16, #tpu.memory_space<vmem>>, vector<1x128x128xbf16>
    %14 = vector.shape_cast %13 : vector<1x128x128xbf16> to vector<128x128xbf16>
    %cst_16 = arith.constant dense<0.000000e+00> : vector<288x128xf32>
    %15 = tpu.matmul %12, %14, %cst_16 {dimension_numbers = #tpu.dot_dimension_numbers<[1], [0], [0], [1], [0, 0, 1, 1], [], []>} : vector<288x128xbf16>, vector<128x128xbf16>, vector<288x128xf32> -> vector<288x128xf32>
    %16 = arith.addf %10, %15 : vector<288x128xf32>
    %c0_17 = arith.constant 0 : index
    %c18 = arith.constant 18 : index
    %c0_18 = arith.constant 0 : index
    %17 = vector.load %arg1[%c0_17, %c18, %c0_18] : memref<1x342x128xbf16, #tpu.memory_space<vmem>>, vector<1x288x128xbf16>
    %18 = vector.shape_cast %17 : vector<1x288x128xbf16> to vector<288x128xbf16>
    %c3 = arith.constant 3 : index
    %c0_19 = arith.constant 0 : index
    %c0_20 = arith.constant 0 : index
    %19 = vector.load %arg4[%c3, %c0_19, %c0_20] : memref<9x128x128xbf16, #tpu.memory_space<vmem>>, vector<1x128x128xbf16>
    %20 = vector.shape_cast %19 : vector<1x128x128xbf16> to vector<128x128xbf16>
    %cst_21 = arith.constant dense<0.000000e+00> : vector<288x128xf32>
    %21 = tpu.matmul %18, %20, %cst_21 {dimension_numbers = #tpu.dot_dimension_numbers<[1], [0], [0], [1], [0, 0, 1, 1], [], []>} : vector<288x128xbf16>, vector<128x128xbf16>, vector<288x128xf32> -> vector<288x128xf32>
    %22 = arith.addf %16, %21 : vector<288x128xf32>
    %c0_22 = arith.constant 0 : index
    %c19 = arith.constant 19 : index
    %c0_23 = arith.constant 0 : index
    %23 = vector.load %arg1[%c0_22, %c19, %c0_23] : memref<1x342x128xbf16, #tpu.memory_space<vmem>>, vector<1x288x128xbf16>
    %24 = vector.shape_cast %23 : vector<1x288x128xbf16> to vector<288x128xbf16>
    %c4 = arith.constant 4 : index
    %c0_24 = arith.constant 0 : index
    %c0_25 = arith.constant 0 : index
    %25 = vector.load %arg4[%c4, %c0_24, %c0_25] : memref<9x128x128xbf16, #tpu.memory_space<vmem>>, vector<1x128x128xbf16>
    %26 = vector.shape_cast %25 : vector<1x128x128xbf16> to vector<128x128xbf16>
    %cst_26 = arith.constant dense<0.000000e+00> : vector<288x128xf32>
    %27 = tpu.matmul %24, %26, %cst_26 {dimension_numbers = #tpu.dot_dimension_numbers<[1], [0], [0], [1], [0, 0, 1, 1], [], []>} : vector<288x128xbf16>, vector<128x128xbf16>, vector<288x128xf32> -> vector<288x128xf32>
    %28 = arith.addf %22, %27 : vector<288x128xf32>
    %c0_27 = arith.constant 0 : index
    %c20 = arith.constant 20 : index
    %c0_28 = arith.constant 0 : index
    %29 = vector.load %arg1[%c0_27, %c20, %c0_28] : memref<1x342x128xbf16, #tpu.memory_space<vmem>>, vector<1x288x128xbf16>
    %30 = vector.shape_cast %29 : vector<1x288x128xbf16> to vector<288x128xbf16>
    %c5 = arith.constant 5 : index
    %c0_29 = arith.constant 0 : index
    %c0_30 = arith.constant 0 : index
    %31 = vector.load %arg4[%c5, %c0_29, %c0_30] : memref<9x128x128xbf16, #tpu.memory_space<vmem>>, vector<1x128x128xbf16>
    %32 = vector.shape_cast %31 : vector<1x128x128xbf16> to vector<128x128xbf16>
    %cst_31 = arith.constant dense<0.000000e+00> : vector<288x128xf32>
    %33 = tpu.matmul %30, %32, %cst_31 {dimension_numbers = #tpu.dot_dimension_numbers<[1], [0], [0], [1], [0, 0, 1, 1], [], []>} : vector<288x128xbf16>, vector<128x128xbf16>, vector<288x128xf32> -> vector<288x128xf32>
    %34 = arith.addf %28, %33 : vector<288x128xf32>
    %c0_32 = arith.constant 0 : index
    %c36 = arith.constant 36 : index
    %c0_33 = arith.constant 0 : index
    %35 = vector.load %arg1[%c0_32, %c36, %c0_33] : memref<1x342x128xbf16, #tpu.memory_space<vmem>>, vector<1x288x128xbf16>
    %36 = vector.shape_cast %35 : vector<1x288x128xbf16> to vector<288x128xbf16>
    %c6 = arith.constant 6 : index
    %c0_34 = arith.constant 0 : index
    %c0_35 = arith.constant 0 : index
    %37 = vector.load %arg4[%c6, %c0_34, %c0_35] : memref<9x128x128xbf16, #tpu.memory_space<vmem>>, vector<1x128x128xbf16>
    %38 = vector.shape_cast %37 : vector<1x128x128xbf16> to vector<128x128xbf16>
    %cst_36 = arith.constant dense<0.000000e+00> : vector<288x128xf32>
    %39 = tpu.matmul %36, %38, %cst_36 {dimension_numbers = #tpu.dot_dimension_numbers<[1], [0], [0], [1], [0, 0, 1, 1], [], []>} : vector<288x128xbf16>, vector<128x128xbf16>, vector<288x128xf32> -> vector<288x128xf32>
    %40 = arith.addf %34, %39 : vector<288x128xf32>
    %c0_37 = arith.constant 0 : index
    %c37 = arith.constant 37 : index
    %c0_38 = arith.constant 0 : index
    %41 = vector.load %arg1[%c0_37, %c37, %c0_38] : memref<1x342x128xbf16, #tpu.memory_space<vmem>>, vector<1x288x128xbf16>
    %42 = vector.shape_cast %41 : vector<1x288x128xbf16> to vector<288x128xbf16>
    %c7 = arith.constant 7 : index
    %c0_39 = arith.constant 0 : index
    %c0_40 = arith.constant 0 : index
    %43 = vector.load %arg4[%c7, %c0_39, %c0_40] : memref<9x128x128xbf16, #tpu.memory_space<vmem>>, vector<1x128x128xbf16>
    %44 = vector.shape_cast %43 : vector<1x128x128xbf16> to vector<128x128xbf16>
    %cst_41 = arith.constant dense<0.000000e+00> : vector<288x128xf32>
    %45 = tpu.matmul %42, %44, %cst_41 {dimension_numbers = #tpu.dot_dimension_numbers<[1], [0], [0], [1], [0, 0, 1, 1], [], []>} : vector<288x128xbf16>, vector<128x128xbf16>, vector<288x128xf32> -> vector<288x128xf32>
    %46 = arith.addf %40, %45 : vector<288x128xf32>
    %c0_42 = arith.constant 0 : index
    %c38 = arith.constant 38 : index
    %c0_43 = arith.constant 0 : index
    %47 = vector.load %arg1[%c0_42, %c38, %c0_43] : memref<1x342x128xbf16, #tpu.memory_space<vmem>>, vector<1x288x128xbf16>
    %48 = vector.shape_cast %47 : vector<1x288x128xbf16> to vector<288x128xbf16>
    %c8 = arith.constant 8 : index
    %c0_44 = arith.constant 0 : index
    %c0_45 = arith.constant 0 : index
    %49 = vector.load %arg4[%c8, %c0_44, %c0_45] : memref<9x128x128xbf16, #tpu.memory_space<vmem>>, vector<1x128x128xbf16>
    %50 = vector.shape_cast %49 : vector<1x128x128xbf16> to vector<128x128xbf16>
    %cst_46 = arith.constant dense<0.000000e+00> : vector<288x128xf32>
    %51 = tpu.matmul %48, %50, %cst_46 {dimension_numbers = #tpu.dot_dimension_numbers<[1], [0], [0], [1], [0, 0, 1, 1], [], []>} : vector<288x128xbf16>, vector<128x128xbf16>, vector<288x128xf32> -> vector<288x128xf32>
    %52 = arith.addf %46, %51 : vector<288x128xf32>
    %c0_47 = arith.constant 0 : index
    %c0_48 = arith.constant 0 : index
    %53 = vector.load %arg9[%c0_47, %c0_48] : memref<1x128xf32, #tpu.memory_space<vmem>>, vector<1x128xf32>
    %54 = vector.broadcast %53 : vector<1x128xf32> to vector<288x128xf32>
    %55 = arith.mulf %52, %54 : vector<288x128xf32>
    %c0_49 = arith.constant 0 : index
    %c0_50 = arith.constant 0 : index
    %56 = vector.load %arg10[%c0_49, %c0_50] : memref<1x128xf32, #tpu.memory_space<vmem>>, vector<1x128xf32>
    %57 = vector.broadcast %56 : vector<1x128xf32> to vector<288x128xf32>
    %58 = arith.addf %55, %57 : vector<288x128xf32>
    %cst_51 = arith.constant 0.000000e+00 : f32
    %59 = vector.broadcast %cst_51 : f32 to vector<288x128xf32>
    %60 = arith.maximumf %58, %59 : vector<288x128xf32>
    %61 = vector.shape_cast %60 : vector<288x128xf32> to vector<16x18x128xf32>
    %62 = vector.extract_strided_slice %61 {offsets = [0, 0, 0], sizes = [16, 16, 128], strides = [1, 1, 1]} : vector<16x18x128xf32> to vector<16x16x128xf32>
    %c0_52 = arith.constant 0 : index
    %c0_53 = arith.constant 0 : index
    %c0_54 = arith.constant 0 : index
    %c0_55 = arith.constant 0 : index
    %63 = vector.load %arg11[%c0_52, %c0_53, %c0_54, %c0_55] : memref<1x16x16x128xf32, #tpu.memory_space<vmem>>, vector<1x16x16x128xf32>
    %64 = vector.shape_cast %63 : vector<1x16x16x128xf32> to vector<16x16x128xf32>
    %65 = vector.shape_cast %62 : vector<16x16x128xf32> to vector<1x16x16x128xf32>
    tpu.vector_store %arg11[%c0_52, %c0_53, %c0_54, %c0_55], %65 {strides = array<i32>} : memref<1x16x16x128xf32, #tpu.memory_space<vmem>>, vector<1x16x16x128xf32>,
    %c0_56 = arith.constant 0 : index
    %c0_57 = arith.constant 0 : index
    %c0_58 = arith.constant 0 : index
    %66 = vector.load %arg1[%c0_56, %c0_57, %c0_58] : memref<1x342x128xbf16, #tpu.memory_space<vmem>>, vector<1x288x128xbf16>
    %67 = vector.shape_cast %66 : vector<1x288x128xbf16> to vector<288x128xbf16>
    %c0_59 = arith.constant 0 : index
    %c0_60 = arith.constant 0 : index
    %c0_61 = arith.constant 0 : index
    %68 = vector.load %arg2[%c0_59, %c0_60, %c0_61] : memref<9x128x128xbf16, #tpu.memory_space<vmem>>, vector<1x128x128xbf16>
    %69 = vector.shape_cast %68 : vector<1x128x128xbf16> to vector<128x128xbf16>
    %cst_62 = arith.constant dense<0.000000e+00> : vector<288x128xf32>
    %70 = tpu.matmul %67, %69, %cst_62 {dimension_numbers = #tpu.dot_dimension_numbers<[1], [0], [0], [1], [0, 0, 1, 1], [], []>} : vector<288x128xbf16>, vector<128x128xbf16>, vector<288x128xf32> -> vector<288x128xf32>
    %c0_63 = arith.constant 0 : index
    %c1_64 = arith.constant 1 : index
    %c0_65 = arith.constant 0 : index
    %71 = vector.load %arg1[%c0_63, %c1_64, %c0_65] : memref<1x342x128xbf16, #tpu.memory_space<vmem>>, vector<1x288x128xbf16>
    %72 = vector.shape_cast %71 : vector<1x288x128xbf16> to vector<288x128xbf16>
    %c1_66 = arith.constant 1 : index
    %c0_67 = arith.constant 0 : index
    %c0_68 = arith.constant 0 : index
    %73 = vector.load %arg2[%c1_66, %c0_67, %c0_68] : memref<9x128x128xbf16, #tpu.memory_space<vmem>>, vector<1x128x128xbf16>
    %74 = vector.shape_cast %73 : vector<1x128x128xbf16> to vector<128x128xbf16>
    %cst_69 = arith.constant dense<0.000000e+00> : vector<288x128xf32>
    %75 = tpu.matmul %72, %74, %cst_69 {dimension_numbers = #tpu.dot_dimension_numbers<[1], [0], [0], [1], [0, 0, 1, 1], [], []>} : vector<288x128xbf16>, vector<128x128xbf16>, vector<288x128xf32> -> vector<288x128xf32>
    %76 = arith.addf %70, %75 : vector<288x128xf32>
    %c0_70 = arith.constant 0 : index
    %c2_71 = arith.constant 2 : index
    %c0_72 = arith.constant 0 : index
    %77 = vector.load %arg1[%c0_70, %c2_71, %c0_72] : memref<1x342x128xbf16, #tpu.memory_space<vmem>>, vector<1x288x128xbf16>
    %78 = vector.shape_cast %77 : vector<1x288x128xbf16> to vector<288x128xbf16>
    %c2_73 = arith.constant 2 : index
    %c0_74 = arith.constant 0 : index
    %c0_75 = arith.constant 0 : index
    %79 = vector.load %arg2[%c2_73, %c0_74, %c0_75] : memref<9x128x128xbf16, #tpu.memory_space<vmem>>, vector<1x128x128xbf16>
    %80 = vector.shape_cast %79 : vector<1x128x128xbf16> to vector<128x128xbf16>
    %cst_76 = arith.constant dense<0.000000e+00> : vector<288x128xf32>
    %81 = tpu.matmul %78, %80, %cst_76 {dimension_numbers = #tpu.dot_dimension_numbers<[1], [0], [0], [1], [0, 0, 1, 1], [], []>} : vector<288x128xbf16>, vector<128x128xbf16>, vector<288x128xf32> -> vector<288x128xf32>
    %82 = arith.addf %76, %81 : vector<288x128xf32>
    %c0_77 = arith.constant 0 : index
    %c18_78 = arith.constant 18 : index
    %c0_79 = arith.constant 0 : index
    %83 = vector.load %arg1[%c0_77, %c18_78, %c0_79] : memref<1x342x128xbf16, #tpu.memory_space<vmem>>, vector<1x288x128xbf16>
    %84 = vector.shape_cast %83 : vector<1x288x128xbf16> to vector<288x128xbf16>
    %c3_80 = arith.constant 3 : index
    %c0_81 = arith.constant 0 : index
    %c0_82 = arith.constant 0 : index
    %85 = vector.load %arg2[%c3_80, %c0_81, %c0_82] : memref<9x128x128xbf16, #tpu.memory_space<vmem>>, vector<1x128x128xbf16>
    %86 = vector.shape_cast %85 : vector<1x128x128xbf16> to vector<128x128xbf16>
    %cst_83 = arith.constant dense<0.000000e+00> : vector<288x128xf32>
    %87 = tpu.matmul %84, %86, %cst_83 {dimension_numbers = #tpu.dot_dimension_numbers<[1], [0], [0], [1], [0, 0, 1, 1], [], []>} : vector<288x128xbf16>, vector<128x128xbf16>, vector<288x128xf32> -> vector<288x128xf32>
    %88 = arith.addf %82, %87 : vector<288x128xf32>
    %c0_84 = arith.constant 0 : index
    %c19_85 = arith.constant 19 : index
    %c0_86 = arith.constant 0 : index
    %89 = vector.load %arg1[%c0_84, %c19_85, %c0_86] : memref<1x342x128xbf16, #tpu.memory_space<vmem>>, vector<1x288x128xbf16>
    %90 = vector.shape_cast %89 : vector<1x288x128xbf16> to vector<288x128xbf16>
    %c4_87 = arith.constant 4 : index
    %c0_88 = arith.constant 0 : index
    %c0_89 = arith.constant 0 : index
    %91 = vector.load %arg2[%c4_87, %c0_88, %c0_89] : memref<9x128x128xbf16, #tpu.memory_space<vmem>>, vector<1x128x128xbf16>
    %92 = vector.shape_cast %91 : vector<1x128x128xbf16> to vector<128x128xbf16>
    %cst_90 = arith.constant dense<0.000000e+00> : vector<288x128xf32>
    %93 = tpu.matmul %90, %92, %cst_90 {dimension_numbers = #tpu.dot_dimension_numbers<[1], [0], [0], [1], [0, 0, 1, 1], [], []>} : vector<288x128xbf16>, vector<128x128xbf16>, vector<288x128xf32> -> vector<288x128xf32>
    %94 = arith.addf %88, %93 : vector<288x128xf32>
    %c0_91 = arith.constant 0 : index
    %c20_92 = arith.constant 20 : index
    %c0_93 = arith.constant 0 : index
    %95 = vector.load %arg1[%c0_91, %c20_92, %c0_93] : memref<1x342x128xbf16, #tpu.memory_space<vmem>>, vector<1x288x128xbf16>
    %96 = vector.shape_cast %95 : vector<1x288x128xbf16> to vector<288x128xbf16>
    %c5_94 = arith.constant 5 : index
    %c0_95 = arith.constant 0 : index
    %c0_96 = arith.constant 0 : index
    %97 = vector.load %arg2[%c5_94, %c0_95, %c0_96] : memref<9x128x128xbf16, #tpu.memory_space<vmem>>, vector<1x128x128xbf16>
    %98 = vector.shape_cast %97 : vector<1x128x128xbf16> to vector<128x128xbf16>
    %cst_97 = arith.constant dense<0.000000e+00> : vector<288x128xf32>
    %99 = tpu.matmul %96, %98, %cst_97 {dimension_numbers = #tpu.dot_dimension_numbers<[1], [0], [0], [1], [0, 0, 1, 1], [], []>} : vector<288x128xbf16>, vector<128x128xbf16>, vector<288x128xf32> -> vector<288x128xf32>
    %100 = arith.addf %94, %99 : vector<288x128xf32>
    %c0_98 = arith.constant 0 : index
    %c36_99 = arith.constant 36 : index
    %c0_100 = arith.constant 0 : index
    %101 = vector.load %arg1[%c0_98, %c36_99, %c0_100] : memref<1x342x128xbf16, #tpu.memory_space<vmem>>, vector<1x288x128xbf16>
    %102 = vector.shape_cast %101 : vector<1x288x128xbf16> to vector<288x128xbf16>
    %c6_101 = arith.constant 6 : index
    %c0_102 = arith.constant 0 : index
    %c0_103 = arith.constant 0 : index
    %103 = vector.load %arg2[%c6_101, %c0_102, %c0_103] : memref<9x128x128xbf16, #tpu.memory_space<vmem>>, vector<1x128x128xbf16>
    %104 = vector.shape_cast %103 : vector<1x128x128xbf16> to vector<128x128xbf16>
    %cst_104 = arith.constant dense<0.000000e+00> : vector<288x128xf32>
    %105 = tpu.matmul %102, %104, %cst_104 {dimension_numbers = #tpu.dot_dimension_numbers<[1], [0], [0], [1], [0, 0, 1, 1], [], []>} : vector<288x128xbf16>, vector<128x128xbf16>, vector<288x128xf32> -> vector<288x128xf32>
    %106 = arith.addf %100, %105 : vector<288x128xf32>
    %c0_105 = arith.constant 0 : index
    %c37_106 = arith.constant 37 : index
    %c0_107 = arith.constant 0 : index
    %107 = vector.load %arg1[%c0_105, %c37_106, %c0_107] : memref<1x342x128xbf16, #tpu.memory_space<vmem>>, vector<1x288x128xbf16>
    %108 = vector.shape_cast %107 : vector<1x288x128xbf16> to vector<288x128xbf16>
    %c7_108 = arith.constant 7 : index
    %c0_109 = arith.constant 0 : index
    %c0_110 = arith.constant 0 : index
    %109 = vector.load %arg2[%c7_108, %c0_109, %c0_110] : memref<9x128x128xbf16, #tpu.memory_space<vmem>>, vector<1x128x128xbf16>
    %110 = vector.shape_cast %109 : vector<1x128x128xbf16> to vector<128x128xbf16>
    %cst_111 = arith.constant dense<0.000000e+00> : vector<288x128xf32>
    %111 = tpu.matmul %108, %110, %cst_111 {dimension_numbers = #tpu.dot_dimension_numbers<[1], [0], [0], [1], [0, 0, 1, 1], [], []>} : vector<288x128xbf16>, vector<128x128xbf16>, vector<288x128xf32> -> vector<288x128xf32>
    %112 = arith.addf %106, %111 : vector<288x128xf32>
    %c0_112 = arith.constant 0 : index
    %c38_113 = arith.constant 38 : index
    %c0_114 = arith.constant 0 : index
    %113 = vector.load %arg1[%c0_112, %c38_113, %c0_114] : memref<1x342x128xbf16, #tpu.memory_space<vmem>>, vector<1x288x128xbf16>
    %114 = vector.shape_cast %113 : vector<1x288x128xbf16> to vector<288x128xbf16>
    %c8_115 = arith.constant 8 : index
    %c0_116 = arith.constant 0 : index
    %c0_117 = arith.constant 0 : index
    %115 = vector.load %arg2[%c8_115, %c0_116, %c0_117] : memref<9x128x128xbf16, #tpu.memory_space<vmem>>, vector<1x128x128xbf16>
    %116 = vector.shape_cast %115 : vector<1x128x128xbf16> to vector<128x128xbf16>
    %cst_118 = arith.constant dense<0.000000e+00> : vector<288x128xf32>
    %117 = tpu.matmul %114, %116, %cst_118 {dimension_numbers = #tpu.dot_dimension_numbers<[1], [0], [0], [1], [0, 0, 1, 1], [], []>} : vector<288x128xbf16>, vector<128x128xbf16>, vector<288x128xf32> -> vector<288x128xf32>
    %118 = arith.addf %112, %117 : vector<288x128xf32>
    %c0_119 = arith.constant 0 : index
    %c0_120 = arith.constant 0 : index
    %119 = vector.load %arg5[%c0_119, %c0_120] : memref<1x128xf32, #tpu.memory_space<vmem>>, vector<1x128xf32>
    %120 = vector.broadcast %119 : vector<1x128xf32> to vector<288x128xf32>
    %121 = arith.mulf %118, %120 : vector<288x128xf32>
    %c0_121 = arith.constant 0 : index
    %c0_122 = arith.constant 0 : index
    %122 = vector.load %arg6[%c0_121, %c0_122] : memref<1x128xf32, #tpu.memory_space<vmem>>, vector<1x128xf32>
    %123 = vector.broadcast %122 : vector<1x128xf32> to vector<288x128xf32>
    %124 = arith.addf %121, %123 : vector<288x128xf32>
    %cst_123 = arith.constant 0.000000e+00 : f32
    %125 = vector.broadcast %cst_123 : f32 to vector<288x128xf32>
    %126 = arith.maximumf %124, %125 : vector<288x128xf32>
    %127 = tpu.iota {dimensions = array<i32: 1>} : vector<16x18x1xi32>
    %c16_i32 = arith.constant 16 : i32
    %128 = vector.broadcast %c16_i32 : i32 to vector<16x18x1xi32>
    %129 = arith.cmpi slt, %127, %128 : vector<16x18x1xi32>
    %130 = vector.shape_cast %126 : vector<288x128xf32> to vector<16x18x128xf32>
    %cst_124 = arith.constant 0.000000e+00 : f32
    %131 = vector.shape_cast %129 : vector<16x18x1xi1> to vector<16x18x1xi1>
    %132 = vector.broadcast %131 : vector<16x18x1xi1> to vector<16x18x128xi1>
    %133 = vector.broadcast %cst_124 : f32 to vector<16x18x128xf32>
    %134 = arith.select %132, %130, %133 : vector<16x18x128xi1>, vector<16x18x128xf32>
    %135 = vector.shape_cast %134 : vector<16x18x128xf32> to vector<288x128xf32>
    %cst_125 = arith.constant 0.000000e+00 : bf16
    %136 = vector.broadcast %cst_125 : bf16 to vector<19x128xbf16>
    %c0_126 = arith.constant 0 : index
    %c0_127 = arith.constant 0 : index
    %137 = vector.load %arg12[%c0_126, %c0_127] : memref<342x128xbf16, #tpu.memory_space<vmem>>, vector<19x128xbf16>
    tpu.vector_store %arg12[%c0_126, %c0_127], %136 {strides = array<i32>} : memref<342x128xbf16, #tpu.memory_space<vmem>>, vector<19x128xbf16>,
    %cst_128 = arith.constant 0.000000e+00 : bf16
    %138 = vector.broadcast %cst_128 : bf16 to vector<35x128xbf16>
    %c307 = arith.constant 307 : index
    %c0_129 = arith.constant 0 : index
    %139 = vector.load %arg12[%c307, %c0_129] : memref<342x128xbf16, #tpu.memory_space<vmem>>, vector<35x128xbf16>
    tpu.vector_store %arg12[%c307, %c0_129], %138 {strides = array<i32>} : memref<342x128xbf16, #tpu.memory_space<vmem>>, vector<35x128xbf16>,
    %140 = arith.truncf %135 : vector<288x128xf32> to vector<288x128xbf16>
    %c19_130 = arith.constant 19 : index
    %c0_131 = arith.constant 0 : index
    %141 = vector.load %arg12[%c19_130, %c0_131] : memref<342x128xbf16, #tpu.memory_space<vmem>>, vector<288x128xbf16>
    tpu.vector_store %arg12[%c19_130, %c0_131], %140 {strides = array<i32>} : memref<342x128xbf16, #tpu.memory_space<vmem>>, vector<288x128xbf16>,
    %c0_132 = arith.constant 0 : index
    %c0_133 = arith.constant 0 : index
    %142 = vector.load %arg12[%c0_132, %c0_133] : memref<342x128xbf16, #tpu.memory_space<vmem>>, vector<288x128xbf16>
    %c0_134 = arith.constant 0 : index
    %c0_135 = arith.constant 0 : index
    %c0_136 = arith.constant 0 : index
    %143 = vector.load %arg3[%c0_134, %c0_135, %c0_136] : memref<9x128x128xbf16, #tpu.memory_space<vmem>>, vector<1x128x128xbf16>
    %144 = vector.shape_cast %143 : vector<1x128x128xbf16> to vector<128x128xbf16>
    %cst_137 = arith.constant dense<0.000000e+00> : vector<288x128xf32>
    %145 = tpu.matmul %142, %144, %cst_137 {dimension_numbers = #tpu.dot_dimension_numbers<[1], [0], [0], [1], [0, 0, 1, 1], [], []>} : vector<288x128xbf16>, vector<128x128xbf16>, vector<288x128xf32> -> vector<288x128xf32>
    %c1_138 = arith.constant 1 : index
    %c0_139 = arith.constant 0 : index
    %146 = vector.load %arg12[%c1_138, %c0_139] : memref<342x128xbf16, #tpu.memory_space<vmem>>, vector<288x128xbf16>
    %c1_140 = arith.constant 1 : index
    %c0_141 = arith.constant 0 : index
    %c0_142 = arith.constant 0 : index
    %147 = vector.load %arg3[%c1_140, %c0_141, %c0_142] : memref<9x128x128xbf16, #tpu.memory_space<vmem>>, vector<1x128x128xbf16>
    %148 = vector.shape_cast %147 : vector<1x128x128xbf16> to vector<128x128xbf16>
    %cst_143 = arith.constant dense<0.000000e+00> : vector<288x128xf32>
    %149 = tpu.matmul %146, %148, %cst_143 {dimension_numbers = #tpu.dot_dimension_numbers<[1], [0], [0], [1], [0, 0, 1, 1], [], []>} : vector<288x128xbf16>, vector<128x128xbf16>, vector<288x128xf32> -> vector<288x128xf32>
    %150 = arith.addf %145, %149 : vector<288x128xf32>
    %c2_144 = arith.constant 2 : index
    %c0_145 = arith.constant 0 : index
    %151 = vector.load %arg12[%c2_144, %c0_145] : memref<342x128xbf16, #tpu.memory_space<vmem>>, vector<288x128xbf16>
    %c2_146 = arith.constant 2 : index
    %c0_147 = arith.constant 0 : index
    %c0_148 = arith.constant 0 : index
    %152 = vector.load %arg3[%c2_146, %c0_147, %c0_148] : memref<9x128x128xbf16, #tpu.memory_space<vmem>>, vector<1x128x128xbf16>
    %153 = vector.shape_cast %152 : vector<1x128x128xbf16> to vector<128x128xbf16>
    %cst_149 = arith.constant dense<0.000000e+00> : vector<288x128xf32>
    %154 = tpu.matmul %151, %153, %cst_149 {dimension_numbers = #tpu.dot_dimension_numbers<[1], [0], [0], [1], [0, 0, 1, 1], [], []>} : vector<288x128xbf16>, vector<128x128xbf16>, vector<288x128xf32> -> vector<288x128xf32>
    %155 = arith.addf %150, %154 : vector<288x128xf32>
    %c18_150 = arith.constant 18 : index
    %c0_151 = arith.constant 0 : index
    %156 = vector.load %arg12[%c18_150, %c0_151] : memref<342x128xbf16, #tpu.memory_space<vmem>>, vector<288x128xbf16>
    %c3_152 = arith.constant 3 : index
    %c0_153 = arith.constant 0 : index
    %c0_154 = arith.constant 0 : index
    %157 = vector.load %arg3[%c3_152, %c0_153, %c0_154] : memref<9x128x128xbf16, #tpu.memory_space<vmem>>, vector<1x128x128xbf16>
    %158 = vector.shape_cast %157 : vector<1x128x128xbf16> to vector<128x128xbf16>
    %cst_155 = arith.constant dense<0.000000e+00> : vector<288x128xf32>
    %159 = tpu.matmul %156, %158, %cst_155 {dimension_numbers = #tpu.dot_dimension_numbers<[1], [0], [0], [1], [0, 0, 1, 1], [], []>} : vector<288x128xbf16>, vector<128x128xbf16>, vector<288x128xf32> -> vector<288x128xf32>
    %160 = arith.addf %155, %159 : vector<288x128xf32>
    %c19_156 = arith.constant 19 : index
    %c0_157 = arith.constant 0 : index
    %161 = vector.load %arg12[%c19_156, %c0_157] : memref<342x128xbf16, #tpu.memory_space<vmem>>, vector<288x128xbf16>
    %c4_158 = arith.constant 4 : index
    %c0_159 = arith.constant 0 : index
    %c0_160 = arith.constant 0 : index
    %162 = vector.load %arg3[%c4_158, %c0_159, %c0_160] : memref<9x128x128xbf16, #tpu.memory_space<vmem>>, vector<1x128x128xbf16>
    %163 = vector.shape_cast %162 : vector<1x128x128xbf16> to vector<128x128xbf16>
    %cst_161 = arith.constant dense<0.000000e+00> : vector<288x128xf32>
    %164 = tpu.matmul %161, %163, %cst_161 {dimension_numbers = #tpu.dot_dimension_numbers<[1], [0], [0], [1], [0, 0, 1, 1], [], []>} : vector<288x128xbf16>, vector<128x128xbf16>, vector<288x128xf32> -> vector<288x128xf32>
    %165 = arith.addf %160, %164 : vector<288x128xf32>
    %c20_162 = arith.constant 20 : index
    %c0_163 = arith.constant 0 : index
    %166 = vector.load %arg12[%c20_162, %c0_163] : memref<342x128xbf16, #tpu.memory_space<vmem>>, vector<288x128xbf16>
    %c5_164 = arith.constant 5 : index
    %c0_165 = arith.constant 0 : index
    %c0_166 = arith.constant 0 : index
    %167 = vector.load %arg3[%c5_164, %c0_165, %c0_166] : memref<9x128x128xbf16, #tpu.memory_space<vmem>>, vector<1x128x128xbf16>
    %168 = vector.shape_cast %167 : vector<1x128x128xbf16> to vector<128x128xbf16>
    %cst_167 = arith.constant dense<0.000000e+00> : vector<288x128xf32>
    %169 = tpu.matmul %166, %168, %cst_167 {dimension_numbers = #tpu.dot_dimension_numbers<[1], [0], [0], [1], [0, 0, 1, 1], [], []>} : vector<288x128xbf16>, vector<128x128xbf16>, vector<288x128xf32> -> vector<288x128xf32>
    %170 = arith.addf %165, %169 : vector<288x128xf32>
    %c36_168 = arith.constant 36 : index
    %c0_169 = arith.constant 0 : index
    %171 = vector.load %arg12[%c36_168, %c0_169] : memref<342x128xbf16, #tpu.memory_space<vmem>>, vector<288x128xbf16>
    %c6_170 = arith.constant 6 : index
    %c0_171 = arith.constant 0 : index
    %c0_172 = arith.constant 0 : index
    %172 = vector.load %arg3[%c6_170, %c0_171, %c0_172] : memref<9x128x128xbf16, #tpu.memory_space<vmem>>, vector<1x128x128xbf16>
    %173 = vector.shape_cast %172 : vector<1x128x128xbf16> to vector<128x128xbf16>
    %cst_173 = arith.constant dense<0.000000e+00> : vector<288x128xf32>
    %174 = tpu.matmul %171, %173, %cst_173 {dimension_numbers = #tpu.dot_dimension_numbers<[1], [0], [0], [1], [0, 0, 1, 1], [], []>} : vector<288x128xbf16>, vector<128x128xbf16>, vector<288x128xf32> -> vector<288x128xf32>
    %175 = arith.addf %170, %174 : vector<288x128xf32>
    %c37_174 = arith.constant 37 : index
    %c0_175 = arith.constant 0 : index
    %176 = vector.load %arg12[%c37_174, %c0_175] : memref<342x128xbf16, #tpu.memory_space<vmem>>, vector<288x128xbf16>
    %c7_176 = arith.constant 7 : index
    %c0_177 = arith.constant 0 : index
    %c0_178 = arith.constant 0 : index
    %177 = vector.load %arg3[%c7_176, %c0_177, %c0_178] : memref<9x128x128xbf16, #tpu.memory_space<vmem>>, vector<1x128x128xbf16>
    %178 = vector.shape_cast %177 : vector<1x128x128xbf16> to vector<128x128xbf16>
    %cst_179 = arith.constant dense<0.000000e+00> : vector<288x128xf32>
    %179 = tpu.matmul %176, %178, %cst_179 {dimension_numbers = #tpu.dot_dimension_numbers<[1], [0], [0], [1], [0, 0, 1, 1], [], []>} : vector<288x128xbf16>, vector<128x128xbf16>, vector<288x128xf32> -> vector<288x128xf32>
    %180 = arith.addf %175, %179 : vector<288x128xf32>
    %c38_180 = arith.constant 38 : index
    %c0_181 = arith.constant 0 : index
    %181 = vector.load %arg12[%c38_180, %c0_181] : memref<342x128xbf16, #tpu.memory_space<vmem>>, vector<288x128xbf16>
    %c8_182 = arith.constant 8 : index
    %c0_183 = arith.constant 0 : index
    %c0_184 = arith.constant 0 : index
    %182 = vector.load %arg3[%c8_182, %c0_183, %c0_184] : memref<9x128x128xbf16, #tpu.memory_space<vmem>>, vector<1x128x128xbf16>
    %183 = vector.shape_cast %182 : vector<1x128x128xbf16> to vector<128x128xbf16>
    %cst_185 = arith.constant dense<0.000000e+00> : vector<288x128xf32>
    %184 = tpu.matmul %181, %183, %cst_185 {dimension_numbers = #tpu.dot_dimension_numbers<[1], [0], [0], [1], [0, 0, 1, 1], [], []>} : vector<288x128xbf16>, vector<128x128xbf16>, vector<288x128xf32> -> vector<288x128xf32>
    %185 = arith.addf %180, %184 : vector<288x128xf32>
    %c0_186 = arith.constant 0 : index
    %c0_187 = arith.constant 0 : index
    %186 = vector.load %arg7[%c0_186, %c0_187] : memref<1x128xf32, #tpu.memory_space<vmem>>, vector<1x128xf32>
    %187 = vector.broadcast %186 : vector<1x128xf32> to vector<288x128xf32>
    %188 = arith.mulf %185, %187 : vector<288x128xf32>
    %c0_188 = arith.constant 0 : index
    %c0_189 = arith.constant 0 : index
    %189 = vector.load %arg8[%c0_188, %c0_189] : memref<1x128xf32, #tpu.memory_space<vmem>>, vector<1x128xf32>
    %190 = vector.broadcast %189 : vector<1x128xf32> to vector<288x128xf32>
    %191 = arith.addf %188, %190 : vector<288x128xf32>
    %cst_190 = arith.constant 0.000000e+00 : f32
    %192 = vector.broadcast %cst_190 : f32 to vector<288x128xf32>
    %193 = arith.maximumf %191, %192 : vector<288x128xf32>
    %c0_191 = arith.constant 0 : index
    %c0_192 = arith.constant 0 : index
    %c0_193 = arith.constant 0 : index
    %c0_194 = arith.constant 0 : index
    %194 = vector.load %arg11[%c0_191, %c0_192, %c0_193, %c0_194] : memref<1x16x16x128xf32, #tpu.memory_space<vmem>>, vector<1x16x16x128xf32>
    %195 = vector.shape_cast %194 : vector<1x16x16x128xf32> to vector<16x16x128xf32>
    %196 = vector.shape_cast %193 : vector<288x128xf32> to vector<16x18x128xf32>
    %197 = vector.extract_strided_slice %196 {offsets = [0, 0, 0], sizes = [16, 16, 128], strides = [1, 1, 1]} : vector<16x18x128xf32> to vector<16x16x128xf32>
    %198 = arith.addf %195, %197 : vector<16x16x128xf32>
    %c0_195 = arith.constant 0 : index
    %c0_196 = arith.constant 0 : index
    %c0_197 = arith.constant 0 : index
    %c0_198 = arith.constant 0 : index
    %199 = vector.load %arg11[%c0_195, %c0_196, %c0_197, %c0_198] : memref<1x16x16x128xf32, #tpu.memory_space<vmem>>, vector<1x16x16x128xf32>
    %200 = vector.shape_cast %199 : vector<1x16x16x128xf32> to vector<16x16x128xf32>
    %201 = vector.shape_cast %198 : vector<16x16x128xf32> to vector<1x16x16x128xf32>
    tpu.vector_store %arg11[%c0_195, %c0_196, %c0_197, %c0_198], %201 {strides = array<i32>} : memref<1x16x16x128xf32, #tpu.memory_space<vmem>>, vector<1x16x16x128xf32>,
    return
  }
  func.func @transform_0(%arg0: i32) -> (i32, i32, i32) {
    %c0_i32 = arith.constant 0 : i32
    %c0_i32_0 = arith.constant 0 : i32
    %c0_i32_1 = arith.constant 0 : i32
    return %arg0, %c0_i32, %c0_i32_0 : i32, i32, i32
  }
  func.func @transform_1(%arg0: i32) -> (i32, i32, i32) {
    %c0_i32 = arith.constant 0 : i32
    %c0_i32_0 = arith.constant 0 : i32
    %c0_i32_1 = arith.constant 0 : i32
    %c0_i32_2 = arith.constant 0 : i32
    return %c0_i32, %c0_i32_0, %c0_i32_1 : i32, i32, i32
  }
  func.func @transform_2(%arg0: i32) -> (i32, i32, i32) {
    %c0_i32 = arith.constant 0 : i32
    %c0_i32_0 = arith.constant 0 : i32
    %c0_i32_1 = arith.constant 0 : i32
    %c0_i32_2 = arith.constant 0 : i32
    return %c0_i32, %c0_i32_0, %c0_i32_1 : i32, i32, i32
  }
  func.func @transform_3(%arg0: i32) -> (i32, i32, i32) {
    %c0_i32 = arith.constant 0 : i32
    %c0_i32_0 = arith.constant 0 : i32
    %c0_i32_1 = arith.constant 0 : i32
    %c0_i32_2 = arith.constant 0 : i32
    return %c0_i32, %c0_i32_0, %c0_i32_1 : i32, i32, i32
  }
  func.func @transform_4(%arg0: i32) -> (i32, i32) {
    %c0_i32 = arith.constant 0 : i32
    %c0_i32_0 = arith.constant 0 : i32
    %c0_i32_1 = arith.constant 0 : i32
    return %c0_i32, %c0_i32_0 : i32, i32
  }
  func.func @transform_5(%arg0: i32) -> (i32, i32) {
    %c0_i32 = arith.constant 0 : i32
    %c0_i32_0 = arith.constant 0 : i32
    %c0_i32_1 = arith.constant 0 : i32
    return %c0_i32, %c0_i32_0 : i32, i32
  }
  func.func @transform_6(%arg0: i32) -> (i32, i32) {
    %c0_i32 = arith.constant 0 : i32
    %c0_i32_0 = arith.constant 0 : i32
    %c0_i32_1 = arith.constant 0 : i32
    return %c0_i32, %c0_i32_0 : i32, i32
  }
  func.func @transform_7(%arg0: i32) -> (i32, i32) {
    %c0_i32 = arith.constant 0 : i32
    %c0_i32_0 = arith.constant 0 : i32
    %c0_i32_1 = arith.constant 0 : i32
    return %c0_i32, %c0_i32_0 : i32, i32
  }
  func.func @transform_8(%arg0: i32) -> (i32, i32) {
    %c0_i32 = arith.constant 0 : i32
    %c0_i32_0 = arith.constant 0 : i32
    %c0_i32_1 = arith.constant 0 : i32
    return %c0_i32, %c0_i32_0 : i32, i32
  }
  func.func @transform_9(%arg0: i32) -> (i32, i32) {
    %c0_i32 = arith.constant 0 : i32
    %c0_i32_0 = arith.constant 0 : i32
    %c0_i32_1 = arith.constant 0 : i32
    return %c0_i32, %c0_i32_0 : i32, i32
  }
  func.func @transform_10(%arg0: i32) -> (i32, i32, i32, i32) {
    %c0_i32 = arith.constant 0 : i32
    %c0_i32_0 = arith.constant 0 : i32
    %c0_i32_1 = arith.constant 0 : i32
    %c0_i32_2 = arith.constant 0 : i32
    return %arg0, %c0_i32, %c0_i32_0, %c0_i32_1 : i32, i32, i32, i32
  }
}

</mosaic_0001>

<bundles_post_ra>
// kernel: tpu_custom_call.1
= control target key start
LH: loop header
LB: loop body
LE: loop exit
PB: predicated region body
PF: predicated region fallthrough
CT: control target
= control target key end

     0   :  { %s26731_s0 = inlined_call_operand.hbm [shape: bf16[2,342,128], index: 0, kind: input, shape index: {}]   ;;  %s26732_s1 = inlined_call_operand.hbm [shape: bf16[9,128,128], index: 1, kind: input, shape index: {}]   ;;  %s26733_s2 = inlined_call_operand.hbm [shape: bf16[9,128,128], index: 2, kind: input, shape index: {}]   ;;  %s26734_s3 = inlined_call_operand.hbm [shape: bf16[9,128,128], index: 3, kind: input, shape index: {}]   ;;  %s26735_s4 = inlined_call_operand.hbm [shape: f32[1,128], index: 4, kind: input, shape index: {}]   ;;  %s26736_s5 = inlined_call_operand.hbm [shape: f32[1,128], index: 5, kind: input, shape index: {}]   ;;  %s26737_s6 = inlined_call_operand.hbm [shape: f32[1,128], index: 6, kind: input, shape index: {}]   ;;  %s26738_s7 = inlined_call_operand.hbm [shape: f32[1,128], index: 7, kind: input, shape index: {}]   ;;  %s26739_s8 = inlined_call_operand.hbm [shape: f32[1,128], index: 8, kind: input, shape index: {}]   ;;  %s26740_s9 = inlined_call_operand.hbm [shape: f32[1,128], index: 9, kind: input, shape index: {}]   ;;  %s26741_s10 = inlined_call_operand.hbm [shape: f32[2,16,16,128], index: 10, kind: output, shape index: {}]  }
   0x1   :  { %26758 = sst [smem:[#allocation95_spill]] %s26732_s1 }
   0x2   :  { %26759 = sst [smem:[#allocation96_spill]] %s26733_s2 }
   0x3   :  { %26760 = sst [smem:[#allocation97_spill]] %s26734_s3 }
   0x4   :  { %26761 = sst [smem:[#allocation98_spill]] %s26741_s10 }
   0x5   :  { %15 = vsyncpa [#allocation4], 0 }
   0x6   :  { %17 = vsyncpa [#allocation4 + $0x1], 0 }
   0x7   :  { %18 = vsyncpa [#allocation7], 0 }
   0x8   :  { %19 = vsyncpa [#allocation10], 0 }
   0x9   :  { %20 = vsyncpa [#allocation13], 0 }
   0xa   :  { %21 = vsyncpa [#allocation16], 0 }
   0xb   :  { %22 = vsyncpa [#allocation19], 0 }
   0xc   :  { %23 = vsyncpa [#allocation5], 0 }
   0xd   :  { %25 = vsyncpa [#allocation5 + $0x1], 0  ;;  %s22565_s13 = smov 0   ;;  %s22567_s14 = smov 0  }
   0xe   :  { %s22569_s15 = smov 0   ;;  %s22571_s16 = smov 0  }
   0xf LB: > { %s22492_s17 = smov [#allocation6]   ;;  %s22586_s19 = sadd.s32 4294967295, %s22490_s16   ;;  %s22490_s16 = sphi %s22571_s16, %s26941_s16   ;;  %s22486_s15 = sphi %s22569_s15, %s26940_s15   ;;  %s22482_s14 = sphi %s22567_s14, %s26939_s14   ;;  %s22478_s13 = sphi %s22565_s13, %s26938_s13  }
  0x10   : > { %s289_s18 = sshll.u32 %s22492_s17, 4  ;;  %p17956_p0 = scmp.ge.s32.totalorder %s22490_s16, 1  ;;  %s22591_s18 = int_to_ptr.vmem [resolvable:$true] %s289_s18 }
  0x11   : > { %p26746_p1 = scmp.eq.s32.totalorder %s22586_s19, 0  ;;  %p277_p2 = scmp.lt.s32.totalorder %s22490_s16, 3 }
  0x12   : > { %s22493_s21 = smov [#allocation9]   ;;  %s22494_s24 = smov [#allocation12]  }
  0x13   : > { %p22593_p3 = pnand %p17956_p0, %p277_p2  ;;  %s315_s22 = sshll.u32 %s22493_s21, 4  ;;  %s22606_s22 = int_to_ptr.vmem [resolvable:$true] %s315_s22 }
  0x14   : > { %s340_s25 = sshll.u32 %s22494_s24, 4  ;;  %s26765_s1 = sld [smem:[#allocation95_spill]]  ;;  %s22608_s25 = int_to_ptr.vmem [resolvable:$true] %s340_s25 }
  0x15   : > { %s26762_s20 = scalar_select %p22593_p3, 1, 0 }
  0x16   : > { %p21526_p5 = pneg %p22593_p3 }
  0x17   : > { %26763 = sst [smem:[#allocation28_spill]] %s26762_s20 }
  0x18   : > { %p22602_p6 = pnand %p21526_p5, %p26746_p1 }
  0x1a   : > { %s22122_s28 = scalar_lea.hbm %s26765_s1, 9216  ;;  %p22618_p8 = pneg %p22602_p6 }
  0x1b   : > { %p22123_p7 = scmp.ne.s32.totalorder %s26765_s1, %s22122_s28  ;;  %p22129_p11 = scmp.lt.u32.totalorder %s22122_s28, %s26765_s1 }
  0x1d   : > { %p22125_p9 = pnand %p22618_p8, %p22123_p7 }
  0x1f   : > { %p22126_p10 = pneg %p22125_p9 }
  0x21   : > { %p22131_p12 = pnand %p22129_p11, %p22126_p10 }
  0x23   : > { %22134 = shalt.err (!%p22131_p12)
}
  0x24   : > { %s22135_s21 = scalar_lea.vmem %s22591_s18, 9216  ;;  %p22143_p5 = scmp.lt.s32.totalorder %s22591_s18, %s22591_s18 }
  0x25   : > { %p22136_p13 = scmp.ne.s32.totalorder %s22591_s18, %s22135_s21  ;;  %p22144_p4 = scmp.lt.s32.totalorder %s22135_s21, %s22135_s21 }
  0x27   : > { %p22138_p0 = pnand %p22136_p13, %p22618_p8  ;;  %p22145_p7 = por %p22144_p4, %p22143_p5 }
  0x29   : > { %p22139_p2 = pneg %p22138_p0 }
  0x2b   : > { %p22146_p9 = pnand %p22145_p7, %p22139_p2 }
  0x2d   : > { %22149 = shalt.err (!%p22146_p9)
}
  0x2e   : > { %s26744_s24 = smov 64   ;;  %s26748_s26 = smov 4  }
  0x2f   : > { %21529 = dma.hbm_to_vmem [thread:$0]  (!%p22602_p6), %s26765_s1, 9216, %s22591_s18, [#allocation7], %s26744_s24, %s26744_s24, %s26748_s26  }
  0x30   : > { %s26767_s3 = sld [smem:[#allocation97_spill]] }
  0x36   : > { %s22150_s12 = scalar_lea.hbm %s26767_s3, 9216 }
  0x37   : > { %p22151_p4 = scmp.ne.s32.totalorder %s26767_s3, %s22150_s12  ;;  %p22157_p12 = scmp.lt.u32.totalorder %s22150_s12, %s26767_s3 }
  0x39   : > { %p22153_p10 = pnand %p22151_p4, %p22618_p8 }
  0x3b   : > { %p22154_p11 = pneg %p22153_p10 }
  0x3d   : > { %p22159_p13 = pnand %p22157_p12, %p22154_p11 }
  0x3f   : > { %22162 = shalt.err (!%p22159_p13)
}
  0x40   : > { %s22163_s18 = scalar_lea.vmem %s22606_s22, 9216  ;;  %p22171_p7 = scmp.lt.s32.totalorder %s22606_s22, %s22606_s22 }
  0x41   : > { %p22164_p0 = scmp.ne.s32.totalorder %s22606_s22, %s22163_s18  ;;  %p22172_p9 = scmp.lt.s32.totalorder %s22163_s18, %s22163_s18 }
  0x43   : > { %p22166_p2 = pnand %p22164_p0, %p22618_p8  ;;  %p22173_p4 = por %p22172_p9, %p22171_p7 }
  0x45   : > { %p22167_p5 = pneg %p22166_p2 }
  0x47   : > { %p22174_p10 = pnand %p22173_p4, %p22167_p5 }
  0x49   : > { %22177 = shalt.err (!%p22174_p10)
}
  0x4a   : > { %21535 = dma.hbm_to_vmem [thread:$0]  (!%p22602_p6), %s26767_s3, 9216, %s22606_s22, [#allocation10], %s26744_s24, %s26744_s24, %s26748_s26  }
  0x4b   : > { %s22178_s29 = scalar_lea.hbm %s26736_s5, 16 }
  0x4c   : > { %p22179_p11 = scmp.ne.s32.totalorder %s26736_s5, %s22178_s29  ;;  %p22185_p0 = scmp.lt.u32.totalorder %s22178_s29, %s26736_s5 }
  0x4e   : > { %p22181_p12 = pnand %p22179_p11, %p22618_p8 }
  0x50   : > { %p22182_p13 = pneg %p22181_p12 }
  0x52   : > { %p22187_p2 = pnand %p22185_p0, %p22182_p13 }
  0x54   : > { %22190 = shalt.err (!%p22187_p2)
}
  0x55   : > { %s22191_s22 = scalar_lea.vmem %s22608_s25, 16  ;;  %s22198_s18 = scalar_lea.vmem %s22608_s25, 32 }
  0x56   : > { %p22192_p5 = scmp.ne.s32.totalorder %s22608_s25, %s22191_s22  ;;  %p22199_p4 = scmp.lt.s32.totalorder %s22608_s25, %s22608_s25 }
  0x57   : > { %p22200_p10 = scmp.lt.s32.totalorder %s22198_s18, %s22191_s22 }
  0x58   : > { %p22194_p7 = pnand %p22192_p5, %p22618_p8 }
  0x59   : > { %p22201_p11 = por %p22200_p10, %p22199_p4 }
  0x5a   : > { %p22195_p9 = pneg %p22194_p7 }
  0x5c   : > { %p22202_p12 = pnand %p22201_p11, %p22195_p9 }
  0x5e   : > { %22205 = shalt.err (!%p22202_p12)
}
  0x5f   : > { %21541 = dma.hbm_to_vmem [thread:$0]  (!%p22602_p6), %s26736_s5, 16, %s22608_s25, [#allocation13]  }
  0x60   : > { %s22497_s27 = smov [#allocation15]   ;;  %s22498_s29 = smov [#allocation8]  }
  0x61   : > { %s362_s28 = sshll.u32 %s22497_s27, 4  ;;  %s302_s30 = sshll.u32 %s22498_s29, 4  ;;  %s363_s28 = int_to_ptr.vmem [resolvable:$true] %s362_s28  ;;  %s303_s30 = int_to_ptr.vmem [resolvable:$true] %s302_s30 }
  0x62   : > { %s22206_s21 = scalar_lea.hbm %s26738_s7, 16 }
  0x63   : > { %p22207_p13 = scmp.ne.s32.totalorder %s26738_s7, %s22206_s21  ;;  %p22213_p5 = scmp.lt.u32.totalorder %s22206_s21, %s26738_s7 }
  0x65   : > { %p22209_p0 = pnand %p22207_p13, %p22618_p8 }
  0x67   : > { %p22210_p2 = pneg %p22209_p0 }
  0x69   : > { %p22215_p7 = pnand %p22213_p5, %p22210_p2 }
  0x6b   : > { %22218 = shalt.err (!%p22215_p7)
}
  0x6c   : > { %s22219_s25 = scalar_lea.vmem %s363_s28, 16  ;;  %s22226_s20 = scalar_lea.vmem %s363_s28, 32 }
  0x6d   : > { %p22220_p9 = scmp.ne.s32.totalorder %s363_s28, %s22219_s25  ;;  %p22227_p11 = scmp.lt.s32.totalorder %s363_s28, %s363_s28 }
  0x6e   : > { %p22228_p12 = scmp.lt.s32.totalorder %s22226_s20, %s22219_s25 }
  0x6f   : > { %p22222_p4 = pnand %p22220_p9, %p22618_p8 }
  0x70   : > { %p22229_p1 = por %p22228_p12, %p22227_p11 }
  0x71   : > { %p22223_p10 = pneg %p22222_p4 }
  0x73   : > { %p22230_p3 = pnand %p22229_p1, %p22223_p10 }
  0x75   : > { %22233 = shalt.err (!%p22230_p3)
}
  0x76   : > { %21547 = dma.hbm_to_vmem [thread:$0]  (!%p22602_p6), %s26738_s7, 16, %s363_s28, [#allocation16]  }
  0x77   : > { %s26768_s2 = sld [smem:[#allocation96_spill]] }
  0x7d   : > { %s22234_s17 = scalar_lea.hbm %s26768_s2, 9216 }
  0x7e   : > { %p22235_p13 = scmp.ne.s32.totalorder %s26768_s2, %s22234_s17  ;;  %p22241_p3 = scmp.lt.u32.totalorder %s22234_s17, %s26768_s2 }
  0x80   : > { %p22237_p0 = pnand %p22235_p13, %p22618_p8 }
  0x82   : > { %p22238_p1 = pneg %p22237_p0 }
  0x84   : > { %p22243_p2 = pnand %p22241_p3, %p22238_p1 }
  0x86   : > { %22246 = shalt.err (!%p22243_p2)
}
  0x87   : > { %s22247_s25 = scalar_lea.vmem %s303_s30, 9216  ;;  %p22255_p4 = scmp.lt.s32.totalorder %s303_s30, %s303_s30 }
  0x88   : > { %p22248_p5 = scmp.ne.s32.totalorder %s303_s30, %s22247_s25  ;;  %p22256_p10 = scmp.lt.s32.totalorder %s22247_s25, %s22247_s25 }
  0x8a   : > { %p22250_p7 = pnand %p22248_p5, %p22618_p8  ;;  %p22257_p11 = por %p22256_p10, %p22255_p4 }
  0x8c   : > { %p22251_p9 = pneg %p22250_p7 }
  0x8e   : > { %p22258_p12 = pnand %p22257_p11, %p22251_p9 }
  0x90   : > { %22261 = shalt.err (!%p22258_p12)
}
  0x91   : > { %s26769_s28 = smov 64   ;;  %s22499_s29 = smov [#allocation11]  }
  0x92   : > { %21532 = dma.hbm_to_vmem [thread:$0]  (!%p22602_p6), %s26768_s2, 9216, %s303_s30, [#allocation7], %s26769_s28, %s26769_s28, %s26748_s26  }
  0x93   : > { %s329_s24 = sshll.u32 %s22499_s29, 4  ;;  %s22500_s12 = smov [#allocation14]   ;;  %s330_s24 = int_to_ptr.vmem [resolvable:$true] %s329_s24 }
  0x94   : > { %s351_s17 = sshll.u32 %s22500_s12, 4  ;;  %s22262_s18 = scalar_lea.hbm %s26735_s4, 16  ;;  %s352_s17 = int_to_ptr.vmem [resolvable:$true] %s351_s17 }
  0x95   : > { %p22263_p13 = scmp.ne.s32.totalorder %s26735_s4, %s22262_s18  ;;  %p22269_p3 = scmp.lt.u32.totalorder %s22262_s18, %s26735_s4 }
  0x97   : > { %p22265_p0 = pnand %p22263_p13, %p22618_p8 }
  0x99   : > { %p22266_p1 = pneg %p22265_p0 }
  0x9b   : > { %p22271_p2 = pnand %p22269_p3, %p22266_p1 }
  0x9d   : > { %22274 = shalt.err (!%p22271_p2)
}
  0x9e   : > { %s22275_s30 = scalar_lea.vmem %s330_s24, 16  ;;  %s22282_s27 = scalar_lea.vmem %s330_s24, 32 }
  0x9f   : > { %p22276_p5 = scmp.ne.s32.totalorder %s330_s24, %s22275_s30  ;;  %p22283_p4 = scmp.lt.s32.totalorder %s330_s24, %s330_s24 }
  0xa0   : > { %p22284_p10 = scmp.lt.s32.totalorder %s22282_s27, %s22275_s30 }
  0xa1   : > { %p22278_p7 = pnand %p22276_p5, %p22618_p8 }
  0xa2   : > { %p22285_p11 = por %p22284_p10, %p22283_p4 }
  0xa3   : > { %p22279_p9 = pneg %p22278_p7 }
  0xa5   : > { %p22286_p12 = pnand %p22285_p11, %p22279_p9 }
  0xa7   : > { %22289 = shalt.err (!%p22286_p12)
}
  0xa8   : > { %21538 = dma.hbm_to_vmem [thread:$0]  (!%p22602_p6), %s26735_s4, 16, %s330_s24, [#allocation10]  }
  0xa9   : > { %s22290_s22 = scalar_lea.hbm %s26737_s6, 16 }
  0xaa   : > { %p22291_p13 = scmp.ne.s32.totalorder %s26737_s6, %s22290_s22  ;;  %p22297_p3 = scmp.lt.u32.totalorder %s22290_s22, %s26737_s6 }
  0xac   : > { %p22293_p0 = pnand %p22291_p13, %p22618_p8 }
  0xae   : > { %p22294_p1 = pneg %p22293_p0 }
  0xb0   : > { %p22299_p2 = pnand %p22297_p3, %p22294_p1 }
  0xb2   : > { %22302 = shalt.err (!%p22299_p2)
}
  0xb3   : > { %s22303_s30 = scalar_lea.vmem %s352_s17, 16  ;;  %s22310_s24 = scalar_lea.vmem %s352_s17, 32 }
  0xb4   : > { %p22304_p5 = scmp.ne.s32.totalorder %s352_s17, %s22303_s30  ;;  %p22311_p4 = scmp.lt.s32.totalorder %s352_s17, %s352_s17 }
  0xb5   : > { %p22312_p10 = scmp.lt.s32.totalorder %s22310_s24, %s22303_s30 }
  0xb6   : > { %p22306_p7 = pnand %p22304_p5, %p22618_p8 }
  0xb7   : > { %p22313_p11 = por %p22312_p10, %p22311_p4 }
  0xb8   : > { %p22307_p9 = pneg %p22306_p7 }
  0xba   : > { %p22314_p12 = pnand %p22313_p11, %p22307_p9 }
  0xbc   : > { %22317 = shalt.err (!%p22314_p12)
}
  0xbd   : > { %21544 = dma.hbm_to_vmem [thread:$0]  (!%p22602_p6), %s26737_s6, 16, %s352_s17, [#allocation13]  }
  0xbe   : > { %s22501_s12 = smov [#allocation17]   ;;  %s22502_s21 = smov [#allocation18]  }
  0xbf   : > { %s373_s1 = sshll.u32 %s22501_s12, 4  ;;  %s384_s22 = sshll.u32 %s22502_s21, 4  ;;  %s374_s1 = int_to_ptr.vmem [resolvable:$true] %s373_s1  ;;  %s385_s22 = int_to_ptr.vmem [resolvable:$true] %s384_s22 }
  0xc0   : > { %s22318_s25 = scalar_lea.hbm %s26739_s8, 16 }
  0xc1   : > { %p22319_p13 = scmp.ne.s32.totalorder %s26739_s8, %s22318_s25  ;;  %p22325_p3 = scmp.lt.u32.totalorder %s22318_s25, %s26739_s8 }
  0xc3   : > { %p22321_p0 = pnand %p22319_p13, %p22618_p8 }
  0xc5   : > { %p22322_p1 = pneg %p22321_p0 }
  0xc7   : > { %p22327_p2 = pnand %p22325_p3, %p22322_p1 }
  0xc9   : > { %22330 = shalt.err (!%p22327_p2)
}
  0xca   : > { %s22331_s17 = scalar_lea.vmem %s374_s1, 16  ;;  %s22338_s29 = scalar_lea.vmem %s374_s1, 32 }
  0xcb   : > { %p22332_p5 = scmp.ne.s32.totalorder %s374_s1, %s22331_s17  ;;  %p22339_p4 = scmp.lt.s32.totalorder %s374_s1, %s374_s1 }
  0xcc   : > { %p22340_p10 = scmp.lt.s32.totalorder %s22338_s29, %s22331_s17 }
  0xcd   : > { %p22334_p7 = pnand %p22332_p5, %p22618_p8 }
  0xce   : > { %p22341_p11 = por %p22340_p10, %p22339_p4 }
  0xcf   : > { %p22335_p9 = pneg %p22334_p7 }
  0xd1   : > { %p22342_p12 = pnand %p22341_p11, %p22335_p9 }
  0xd3   : > { %22345 = shalt.err (!%p22342_p12)
}
  0xd4   : > { %21550 = dma.hbm_to_vmem [thread:$0]  (!%p22602_p6), %s26739_s8, 16, %s374_s1, [#allocation16]  }
  0xd5   : > { %s22346_s25 = scalar_lea.hbm %s26740_s9, 16 }
  0xd6   : > { %p22347_p13 = scmp.ne.s32.totalorder %s26740_s9, %s22346_s25  ;;  %p22353_p3 = scmp.lt.u32.totalorder %s22346_s25, %s26740_s9 }
  0xd8   : > { %p22349_p0 = pnand %p22347_p13, %p22618_p8 }
  0xda   : > { %p22350_p1 = pneg %p22349_p0 }
  0xdc   : > { %p22355_p2 = pnand %p22353_p3, %p22350_p1 }
  0xde   : > { %22358 = shalt.err (!%p22355_p2)
}
  0xdf   : > { %s22359_s17 = scalar_lea.vmem %s385_s22, 16  ;;  %s22366_s1 = scalar_lea.vmem %s385_s22, 32 }
  0xe0   : > { %p22360_p5 = scmp.ne.s32.totalorder %s385_s22, %s22359_s17  ;;  %p22367_p4 = scmp.lt.s32.totalorder %s385_s22, %s385_s22 }
  0xe1   : > { %p22368_p10 = scmp.lt.s32.totalorder %s22366_s1, %s22359_s17 }
  0xe2   : > { %p22362_p7 = pnand %p22360_p5, %p22618_p8 }
  0xe3   : > { %p22369_p11 = por %p22368_p10, %p22367_p4 }
  0xe4   : > { %p22363_p9 = pneg %p22362_p7 }
  0xe6   : > { %p22370_p12 = pnand %p22369_p11, %p22363_p9 }
  0xe8   : > { %22373 = shalt.err (!%p22370_p12)
}
  0xe9   : > { %21553 = dma.hbm_to_vmem [thread:$0]  (!%p22602_p6), %s26740_s9, 16, %s385_s22, [#allocation19]  }
  0xea   : > { %s17955_s11 = sadd.s32 4294967294, %s22490_s16   ;;  %s22805_s23 = sadd.s32 1, %s22490_s16  }
  0xeb   : > { %s38_s21 = sadd.s32 1, %s22486_s15  ;;  %s35_s18 = ssub.s32 %s22490_s16, %s22805_s23 }
  0xec   : > { %p45_p8 = scmp.ne.s32.totalorder %s22486_s15, %s22482_s14  ;;  %p36_p13 = scmp.eq.s32.totalorder %s35_s18, 0 }
  0xed   : > { %p46_p0 = scmp.eq.s32.totalorder %s22490_s16, 0  ;;  %p51_p1 = scmp.ne.s32.totalorder %s22482_s14, %s22478_s13 }
  0xee   : > { %p264_p3 = scmp.eq.s32.totalorder %s22586_s19, 1  ;;  %p26770_p5 = scmp.eq.s32.totalorder %s22586_s19, 0 }
  0xef   : > { %s22817_s10 = scalar_select %p36_p13, %s22486_s15, %s38_s21  }
  0xf0   : > { %p47_p2 = por %p46_p0, %p45_p8  ;;  %p22821_p7 = por %p26770_p5, %p51_p1 }
  0xf1   : > { %p22825_p6 = por %p264_p3, %p45_p8  ;;  %p270_p9 = scmp.eq.s32.totalorder %s17955_s11, 1 }
  0xf2   : > { %p21571_p4 = scmp.lt.s32.totalorder %s22490_s16, 2  ;;  %s395_s20 = sand.u32 1, %s22486_s15  }
  0xf3   : > { %s26772_s22 = scalar_select %p22825_p6, 1, 0 }
  0xf4   : > { %p22831_p10 = por %p270_p9, %p51_p1  ;;  %s21483_s24 = smul.u32 172, %s395_s20 }
  0xf5   : > { %p22835_p11 = pnand %p21571_p4, %p47_p2  ;;  %s21484_s17 = smul.u32 2752, %s22490_s16 }
  0xf6   : > { %s26773_s30 = scalar_select %p22831_p10, 1, 0 }
  0xf7   : > { %s22843_s12 = scalar_lea.hbm %s26731_s0, %s21484_s17  ;;  %s399_s11 = scalar_lea.vmem [#allocation3], %s21483_s24 }
  0xf8   : > { %s406_s21 = sshll.u32 %s399_s11, 4  ;;  %s22847_s18 = scalar_lea.sflag [#allocation4], %s395_s20  ;;  %s22845_s21 = int_to_ptr.vmem [resolvable:$true] %s406_s21 }
  0xf9   : > { %s22374_s26 = scalar_lea.hbm %s22843_s12, 2752  ;;  %p22376_p8 = pneg %p22835_p11 }
  0xfa   : > { %p22375_p12 = scmp.ne.s32.totalorder %s22843_s12, %s22374_s26  ;;  %s22379_s29 = scalar_lea.hbm %s26731_s0, 5504 }
  0xfb   : > { %p22380_p1 = scmp.lt.u32.totalorder %s22843_s12, %s26731_s0  ;;  %p22381_p3 = scmp.lt.u32.totalorder %s22379_s29, %s22374_s26 }
  0xfc   : > { %p22377_p13 = pnand %p22376_p8, %p22375_p12  ;;  %p22383_p5 = scmp.lt.u32.totalorder %s22374_s26, %s22843_s12 }
  0xfd   : > { %p22382_p2 = por %p22381_p3, %p22380_p1 }
  0xfe   : > { %p22378_p0 = pneg %p22377_p13 }
  0xff   : > { %p22384_p9 = por %p22383_p5, %p22382_p2 }
 0x101   : > { %p22385_p4 = pnand %p22384_p9, %p22378_p0 }
 0x103   : > { %22388 = shalt.err (!%p22385_p4)
}
 0x104   : > { %s22389_s20 = scalar_lea.vmem %s22845_s21, 2752  ;;  %s22503_s24 = smov [#allocation3]  }
 0x105   : > { %p22390_p12 = scmp.ne.s32.totalorder %s22845_s21, %s22389_s20  ;;  %s22394_s11 = sshll.u32 %s22503_s24, 4  ;;  %s22395_s11 = int_to_ptr.vmem [resolvable:$false] %s22394_s11 }
 0x106   : > { %s22396_s2 = scalar_lea.vmem %s22395_s11, 5504  ;;  %p22397_p6 = scmp.lt.s32.totalorder %s22845_s21, %s22395_s11 }
 0x107   : > { %p22392_p13 = pnand %p22390_p12, %p22376_p8  ;;  %p22398_p1 = scmp.lt.s32.totalorder %s22396_s2, %s22389_s20 }
 0x109   : > { %p22393_p10 = pneg %p22392_p13  ;;  %p22399_p3 = por %p22398_p1, %p22397_p6 }
 0x10b   : > { %p22400_p2 = pnand %p22399_p3, %p22393_p10 }
 0x10d   : > { %22403 = shalt.err (!%p22400_p2)
}
 0x10e   : > { %s26775_s3 = smov 4   ;;  %s26776_s26 = sld [smem:[#allocation28_spill]] }
 0x10f   : > { %21557 = dma.hbm_to_vmem [thread:$0]  (!%p22835_p11), %s22843_s12, 2752, %s22845_s21, %s22847_s18, %s26769_s28, %s26769_s28, %s26775_s3  }
 0x114   : > { %p26777_p8 = scmp.ne.s32.totalorder %s26776_s26, 0 }
 0x116   : > { %418 = sbr.rel (%p26777_p8) target bundleno = 2654 (0xa5e), region = 60 }
 0x11d   : > { %s22881_s17 = sand.u32 1, %s22482_s14  }
 0x11e   : > { %s21485_s1 = smul.u32 172, %s22881_s17  ;;  %s421_s29 = scalar_lea.sflag [#allocation4], %s22881_s17 }
 0x120   : > { %s22885_s20 = scalar_lea.vmem [#allocation3], %s21485_s1 }
 0x121   : > { %22449 = dma.done.wait (%p22821_p7), %s421_s29, 2752  }
 0x122   : > { %22451 = vsyncadd (%p22821_p7), %s421_s29, 4294964544  ;;  %p26778_p6 = scmp.eq.s32.totalorder %s22586_s19, 0 }
 0x124   : > { %22453 = dma.done.wait (%p26778_p6), [#allocation7], 18432   ;;  %p26779_p10 = pmov %p26778_p6 }
 0x125   : > { %p26780_p11 = pmov %p26778_p6 }
 0x126   : > { %22455 = vsyncadd (%p26779_p10), [#allocation7], 4294948864 }
 0x127   : > { %22457 = dma.done.wait (%p26780_p11), [#allocation10], 9232   ;;  %p26781_p0 = pmov %p26778_p6 }
 0x129   : > { %22459 = vsyncadd (%p26781_p0), [#allocation10], 4294958064  ;;  %p26782_p5 = pmov %p26781_p0 }
 0x12a   : > { %p26783_p9 = pmov %p26781_p0 }
 0x12b   : > { %22461 = dma.done.wait (%p26782_p5), [#allocation13], 32  }
 0x12c   : > { %22463 = vsyncadd (%p26783_p9), [#allocation13], 4294967264  ;;  %p26784_p7 = pmov %p26781_p0 }
 0x12d   : > { %p26785_p4 = pmov %p26781_p0 }
 0x12e   : > { %22465 = dma.done.wait (%p26784_p7), [#allocation16], 32  }
 0x12f   : > { %22467 = vsyncadd (%p26785_p4), [#allocation16], 4294967264  ;;  %p26786_p12 = pmov %p26781_p0 }
 0x130   : > { %p26787_p13 = pmov %p26781_p0 }
 0x131   : > { %22469 = dma.done.wait (%p26786_p12), [#allocation19], 16  }
 0x132   : > { %22471 = vsyncadd (%p26787_p13), [#allocation19], 4294967280  ;;  %v21630_v0 = vld [vmem:[#allocation9 + $0x40] sm:$0xff]   ;;  %v21632_v2 = vld [vmem:[#allocation9 + $0x48] sm:$0xff]   ;;  %vm661_vm0 = vsmask.f32 7424 }
 0x133   : > { %v21631_v1 = vld [vmem:[#allocation9 + $0x100] sm:$0xff]   ;;  %19199 = vmatprep.subr.bf16.mxu1 %v21630_v0  ;;  %v21633_v3 = vld [vmem:[#allocation9 + $0x108] sm:$0xff]   ;;  %v21634_v4 = vld [vmem:[#allocation9 + $0x50] sm:$0xff]   ;;  %vm2118_vm1 = vsmask.f32 6400  ;;  %vm2589_vm2 = vcmask 1045504  }
 0x134   : > { %19407 = vmatprep.subr.bf16.mxu0 %v21631_v1  ;;  %19200 = vmatpush3.bf16.msra.mxu1 %v21630_v0  ;;  %v21635_v5 = vld [vmem:[#allocation9 + $0x110] sm:$0xff]   ;;  %v21636_v6 = vld [vmem:[#allocation9 + $0x58] sm:$0xff]   ;;  %v21638_v8 = vld [vmem:[#allocation9 + $0x60] sm:$0xff]   ;;  %vm3390_vm3 = vsmask.f32 5376  ;;  %vm1317_vm4 = vcmask 1046528  }
 0x135   : > { %19408 = vmatpush3.bf16.msra.mxu0 %v21631_v1  ;;  %19201 = vmatprep.subr.bf16.mxu1 %v21632_v2  ;;  %v21637_v7 = vld [vmem:[#allocation9 + $0x118] sm:$0xff]   ;;  %v21639_v9 = vld [vmem:[#allocation9 + $0x120] sm:$0xff]   ;;  %v21640_v10 = vld [vmem:[#allocation9 + $0x68] sm:$0xff]   ;;  %vm3861_vm5 = vcmask 1044480   ;;  %s17978_s28 = sshll.u32 %s22881_s17, 8  ;;  %vm11463_vm6 = vcmask 1041408  }
 0x136   : > { %19409 = vmatprep.subr.bf16.mxu0 %v21633_v3  ;;  %v21641_v11 = vld [vmem:[#allocation9 + $0x128] sm:$0xff]   ;;  %v22916_v15 = vld [vmem:[%s22885_s20 + $0x8] sm:$0xff]   ;;  %s23835_s25 = scalar_lea.vmem [#allocation20], %s17978_s28  ;;  %vm11464_vm7 = vsmask.f32 1280  ;;  %vm11469_vm8 = vcmask 1043457  }
 0x137   : > { %v498_v12 = vld [vmem:[%s22885_s20] sm:$0xf]  ;;  %v499_v13 = vld [vmem:[%s22885_s20 + $0x4] sm:$0xf]  ;;  %v1634_v16 = vld [vmem:[%s22885_s20 + $0x8] sm:$0xe] }
 0x138   : > { %19202 = vmatpush3.bf16.msra.mxu1 %v21632_v2  ;;  %v22913_v14 = vcombine.low %v498_v12, %v499_v13  ;;  %v21642_v17 = vld [vmem:[#allocation9 + $0x70] sm:$0xff]   ;;  %v670_v22 = vshll.u32 %v22916_v15, 16  ;;  %v22929_v24 = vld [vmem:[%s22885_s20 + $0x10] sm:$0xff]   ;;  %v674_v32 = vshrl.u32 %v22916_v15, 16  ;;  %vm24729_vm9 = vmand %vm11463_vm6, %vm11464_vm7  ;;  %vm11470_vm10 = vsmask.f32 7942 }
 0x139   : > { %19410 = vmatpush3.bf16.msra.mxu0 %v21633_v3  ;;  %19203 = vmatprep.subr.bf16.mxu1 %v21634_v4  ;;  %v22920_v18 = vld [vmem:[%s22885_s20 + $0xc] sm:$0xf]  ;;  %v22932_v25 = vld [vmem:[%s22885_s20 + $0x10] sm:$0xff]   ;;  %v2128_v30 = vshrl.u32 %v22929_v24, 16  ;;  %v2131_v31 = vshll.u32 %v22929_v24, 16  ;;  %v22941_v38 = vld [vmem:[%s22885_s20 + $0x18] sm:$0xff]  }
 0x13a   : > { %19411 = vmatprep.subr.bf16.mxu0 %v21635_v5  ;;  %v21643_v19 = vld [vmem:[#allocation9 + $0x130] sm:$0xff]   ;;  %v663_v20 = vshrl.u32 %v22913_v14, 16  ;;  %v665_v21 = vshll.u32 %v22913_v14, 16  ;;  %v22926_v23 = vcombine.low %v1634_v16, %v22920_v18  ;;  %v672_v27 = vrot.slane %v670_v22, 1  ;;  %v21644_v34 = vld [vmem:[#allocation9 + $0x78] sm:$0xff]   ;;  %v21651_v49 = vld [vmem:[#allocation9] sm:$0xff]  }
 0x13b   : > { %v678_v33 = vshll.u32 %v22932_v25, 16  ;;  %v21645_v39 = vld [vmem:[#allocation9 + $0x138] sm:$0xff]   ;;  %v2130_v40 = vrot.slane %v2128_v30, 1  ;;  %v2133_v41 = vrot.slane %v2131_v31, 2  ;;  %v2137_v45 = vshrl.u32 %v22941_v38, 16  ;;  %v21653_v52 = vld [vmem:[#allocation9 + $0x140] sm:$0xff]   ;;  %vm24735_vm11 = vmand %vm11469_vm8, %vm11470_vm10 }
 0x13c   : > { %19204 = vmatpush3.bf16.msra.mxu1 %v21634_v4  ;;  %v667_v26 = vrot.slane %v665_v21, 1  ;;  %v2120_v28 = vshrl.u32 %v22926_v23, 16  ;;  %v2123_v29 = vshll.u32 %v22926_v23, 16  ;;  %v2140_v46 = vshll.u32 %v22941_v38, 16  ;;  %v22947_v53 = vld [vmem:[%s22885_s20 + $0x18] sm:$0xff]   ;;  %v22952_v56 = vld [vmem:[%s22885_s20 + $0x20] sm:$0xff]  }
 0x13d   : > { %19412 = vmatpush3.bf16.msra.mxu0 %v21635_v5  ;;  %19205 = vmatprep.subr.bf16.mxu1 %v21636_v6  ;;  %v680_v42 = vrot.slane %v678_v33, 1  ;;  %v2134_v47 = vor.u32 %v2133_v41, %v2130_v40  ;;  %v676_v48 = vor.u32 %v674_v32, %v672_v27  ;;  %v2139_v50 = vrot.slane %v2137_v45, 1  ;;  %v22956_v60 = vld [vmem:[%s22885_s20 + $0x20] sm:$0xff]   ;;  %v22959_v61 = vld [vmem:[%s22885_s20 + $0x28] sm:$0xff]   ;;  %v22980_v31 = vld [vmem:[%s22885_s20 + $0x30] sm:$0xff]   ;;  %s18496_s27 = sshll.u32 %s22586_s19, 12 }
 0x13e   : > { %19413 = vmatprep.subr.bf16.mxu0 %v21637_v7  ;;  %v668_v35 = vor.u32 %v667_v26, %v663_v20  ;;  %v2122_v36 = vrot.slane %v2120_v28, 1  ;;  %v2125_v37 = vrot.slane %v2123_v29, 2  ;;  %v2142_v51 = vrot.slane %v2140_v46, 2  ;;  %v21660_v12 = vld [vmem:[#allocation9 + $0x8] sm:$0xff]   ;;  %v21659_v20 = vld [vmem:[#allocation9 + $0x150] sm:$0xff]   ;;  %v21661_v45 = vld [vmem:[#allocation9 + $0x158] sm:$0xff]  }
 0x13f   : > { %v682_v54 = vshrl.u32 %v22932_v25, 16  ;;  %v686_v59 = vshll.u32 %v22947_v53, 16  ;;  %v681_v62 = vsel %vm661_vm0, %v676_v48, %v680_v42  ;;  %v2146_v63 = vshrl.u32 %v22952_v56, 16  ;;  %v22971_v21 = vld [vmem:[%s22885_s20 + $0x28] sm:$0xff]   ;;  %v22976_v28 = vld [vmem:[%s22885_s20 + $0x30] sm:$0xff]   ;;  %s17796_s12 = sshll.u32 %s23835_s25, 4  ;;  %s26685_s12 = int_to_ptr.vmem [resolvable:$true] %s17796_s12 }
 0x140   : > { %19206 = vmatpush3.bf16.msra.mxu1 %v21636_v6  ;;  %v673_v43 = vsel %vm661_vm0, %v668_v35, %v672_v27  ;;  %v2126_v44 = vor.u32 %v2125_v37, %v2122_v36  ;;  %v2143_v57 = vor.u32 %v2142_v51, %v2139_v50  ;;  %v2149_v0 = vshll.u32 %v22952_v56, 16  ;;  %v21654_v6 = vld [vmem:[#allocation9 + $0x148] sm:$0xff]   ;;  %v21667_v51 = vld [vmem:[#allocation9 + $0x10] sm:$0xff]   ;;  %s26934_s24 = sld [smem:[#allocation98_spill]]  ;;  %s17783_s19 = scalar_lea.sflag [#allocation5], %s22881_s17 }
 0x141   : > { %19414 = vmatpush3.bf16.msra.mxu0 %v21637_v7  ;;  %19207 = vmatprep.subr.bf16.mxu1 %v21638_v8  ;;  %v684_v58 = vor.u32 %v682_v54, %v680_v42  ;;  %v688_v1 = vrot.slane %v686_v59, 1  ;;  %v690_v2 = vshrl.u32 %v22947_v53, 16  ;;  %v694_v3 = vshll.u32 %v22956_v60, 16  ;;  %v22986_v35 = vld [vmem:[%s22885_s20 + $0x38] sm:$0xff]   ;;  %s22404_s2 = scalar_lea.vmem %s26685_s12, 4096  ;;  %p26935_p3 = scmp.ne.s32.totalorder %s26772_s22, 0 }
 0x142   : > { %19415 = vmatprep.subr.bf16.mxu0 %v21639_v9  ;;  %19215 = vmatprep.mubr.bf16.mxu1 %v673_v43  ;;  %v2135_v55 = vsel %vm2118_vm1, %v2126_v44, %v2134_v47  ;;  %v2155_v4 = vshrl.u32 %v22959_v61, 16  ;;  %v2144_v5 = vsel %vm2118_vm1, %v2134_v47, %v2143_v57  ;;  %v2148_v7 = vrot.slane %v2146_v63, 1  ;;  %v21666_v54 = vld [vmem:[#allocation9 + $0x160] sm:$0xff]   ;;  %p22405_p1 = scmp.ne.s32.totalorder %s26685_s12, %s22404_s2  ;;  %s22507_s3 = smov [#allocation20]  }
 0x143   : > { %19423 = vmatprep.mubr.bf16.mxu0 %v2135_v55  ;;  %v696_v16 = vrot.slane %v694_v3, 1  ;;  %v698_v22 = vshrl.u32 %v22956_v60, 16  ;;  %v702_v30 = vshll.u32 %v22971_v21, 16  ;;  %v2164_v32 = vshrl.u32 %v22976_v28, 16  ;;  %v23008_v3 = vld [vmem:[%s22885_s20 + $0x48] sm:$0xff]   ;;  %s22408_s26 = sshll.u32 %s22507_s3, 4  ;;  %s22409_s26 = int_to_ptr.vmem [resolvable:$false] %s22408_s26 }
 0x144   : > { %19208 = vmatpush3.bf16.msra.mxu1 %v21638_v8  ;;  %v2151_v8 = vrot.slane %v2149_v0, 2  ;;  %v2167_v33 = vshll.u32 %v22976_v28, 16  ;;  %v710_v40 = vshll.u32 %v22980_v31, 16  ;;  %v2173_v43 = vshrl.u32 %v22986_v35, 16  ;;  %p22406_p2 = pnand %p22405_p1, %p26935_p3  ;;  %s22410_s1 = scalar_lea.vmem %s22409_s26, 8192 }
 0x145   : > { %19416 = vmatpush3.bf16.msra.mxu0 %v21639_v9  ;;  %19209 = vmatprep.subr.bf16.mxu1 %v21640_v10  ;;  %v2158_v9 = vshll.u32 %v22959_v61, 16  ;;  %v700_v29 = vor.u32 %v698_v22, %v696_v16  ;;  %v2166_v41 = vrot.slane %v2164_v32, 1  ;;  %v2176_v44 = vshll.u32 %v22986_v35, 16  ;;  %v23019_v32 = vld [vmem:[%s22885_s20 + $0x48] sm:$0xff]   ;;  %p22411_p6 = scmp.lt.s32.totalorder %s26685_s12, %s22409_s26  ;;  %p22412_p10 = scmp.lt.s32.totalorder %s22410_s1, %s22404_s2 }
 0x146   : > { %19417 = vmatprep.subr.bf16.mxu0 %v21641_v11  ;;  %v2152_v13 = vor.u32 %v2151_v8, %v2148_v7  ;;  %v2169_v42 = vrot.slane %v2167_v33, 2  ;;  %v712_v48 = vrot.slane %v710_v40, 1  ;;  %v714_v59 = vshrl.u32 %v22980_v31, 16  ;;  %s26683_s11 = scalar_lea.hbm %s26934_s24, %s18496_s27  ;;  %p22407_p8 = pneg %p22406_p2 }
 0x147   : > { %v2178_v50 = vrot.slane %v2176_v44, 2  ;;  %v2591_v40 = vrot.slane %v22929_v24, 2  ;;  %v738_v44 = vshrl.u32 %v23019_v32, 16  ;;  %vm12235_vm12 = vsmask.f32 5392  ;;  %p22413_p11 = por %p22412_p10, %p22411_p6 }
 0x148   : > { %19210 = vmatpush3.bf16.msra.mxu1 %v21640_v10  ;;  %v689_v10 = vsel %vm661_vm0, %v684_v58, %v688_v1  ;;  %v2153_v26 = vsel %vm2118_vm1, %v2143_v57, %v2152_v13  ;;  %v2170_v47 = vor.u32 %v2169_v42, %v2166_v41  ;;  %v22996_v58 = vld [vmem:[%s22885_s20 + $0x38] sm:$0xff]   ;;  %v716_v63 = vor.u32 %v714_v59, %v712_v48  ;;  %v23029_v41 = vld [vmem:[%s22885_s20 + $0x50] sm:$0xff]   ;;  %vm24856_vm13 = vmor %vm11464_vm7, %vm12235_vm12 }
 0x149   : > { %19418 = vmatpush3.bf16.msra.mxu0 %v21641_v11  ;;  %19211 = vmatprep.subr.bf16.mxu1 %v21642_v17  ;;  %v2157_v11 = vrot.slane %v2155_v4, 1  ;;  %v718_v0 = vshll.u32 %v22996_v58, 16  ;;  %p22414_p0 = pnand %p22413_p11, %p22407_p8 }
 0x14a   : > { %19419 = vmatprep.subr.bf16.mxu0 %v21643_v19 }
 0x14b   : > { %v720_v8 = vrot.slane %v718_v0, 1 }
 0x14c   : > { %19212 = vmatpush3.bf16.msra.mxu1 %v21642_v17  ;;  %v2160_v17 = vrot.slane %v2158_v9, 2 }
 0x14d   : > { %19420 = vmatpush3.bf16.msra.mxu0 %v21643_v19  ;;  %19213 = vmatprep.subr.bf16.mxu1 %v21644_v34  ;;  %v692_v19 = vor.u32 %v690_v2, %v688_v1  ;;  %v23004_v1 = vld [vmem:[%s22885_s20 + $0x40] sm:$0xff]   ;;  %v722_v2 = vshrl.u32 %v22996_v58, 16 }
 0x14e   : > { %19421 = vmatprep.subr.bf16.mxu0 %v21645_v39  ;;  %v2161_v27 = vor.u32 %v2160_v17, %v2157_v11  ;;  %v726_v9 = vshll.u32 %v23004_v1, 16  ;;  %v2194_v11 = vshll.u32 %v23008_v3, 16  ;;  %v21674_v17 = vld [vmem:[#allocation9 + $0x18] sm:$0xff]   ;;  %v730_v33 = vshrl.u32 %v23004_v1, 16 }
 0x14f   : > { %v697_v36 = vsel %vm661_vm0, %v692_v19, %v696_v16  ;;  %v721_v19 = vsel %vm661_vm0, %v716_v63, %v720_v8  ;;  %v21682_v63 = vld [vmem:[#allocation9 + $0x28] sm:$0xff]  }
 0x150   : > { %19214 = vmatpush3.bf16.msra.mxu1 %v21644_v34  ;;  %v706_v34 = vshrl.u32 %v22971_v21, 16  ;;  %v2162_v37 = vsel %vm2118_vm1, %v2152_v13, %v2161_v27  ;;  %v2171_v55 = vsel %vm2118_vm1, %v2161_v27, %v2170_v47  ;;  %v728_v27 = vrot.slane %v726_v9, 1  ;;  %v21685_v9 = vld [vmem:[#allocation9 + $0x30] sm:$0xff]  }
 0x151   : > { %19422 = vmatpush3.bf16.msra.mxu0 %v21645_v39  ;;  %19251 = vmatprep.subr.bf16.mxu1 %v21651_v49  ;;  %v704_v39 = vrot.slane %v702_v30, 1  ;;  %v21673_v30 = vld [vmem:[#allocation9 + $0x170] sm:$0xff]  }
 0x152   : > { %19459 = vmatprep.subr.bf16.mxu0 %v21653_v52  ;;  %v732_v42 = vor.u32 %v730_v33, %v728_v27  ;;  %v2599_v33 = vrot.slane %v22976_v28, 2  ;;  %v2601_v28 = vrot.slane %v22986_v35, 2 }
 0x153   : > { %19216 = vmatmul.mubr.bf16.vlgmr.msra.gmra.mrb[0].mxu1 %v681_v62  ;;  %v705_v46 = vsel %vm661_vm0, %v700_v29, %v704_v39  ;;  %v23000_v62 = vld [vmem:[%s22885_s20 + $0x40] sm:$0xff]   ;;  %v2196_v29 = vrot.slane %v2194_v11, 2 }
 0x154   : > { %19424 = vmatmul.mubr.bf16.vlgmr.msra.gmra.mrb[0].mxu0 %v2144_v5  ;;  %19252 = vmatpush3.bf16.msra.mxu1 %v21651_v49  ;;  %v2175_v49 = vrot.slane %v2173_v43, 1  ;;  %v2185_v7 = vshll.u32 %v23000_v62, 16  ;;  %v734_v43 = vshll.u32 %v23019_v32, 16  ;;  %v2603_v35 = vrot.slane %v23000_v62, 2 }
 0x155   : > { %19460 = vmatpush3.bf16.msra.mxu0 %v21653_v52  ;;  %19219 = vmatprep.mubr.bf16.mxu1 %v689_v10  ;;  %v708_v52 = vor.u32 %v706_v34, %v704_v39  ;;  %v2191_v10 = vshrl.u32 %v23008_v3, 16  ;;  %v2568_v34 = vld [vmem:[%s22885_s20 + $0x8] sm:$0xc] }
 0x156   : > { %19461 = vmatprep.subr.bf16.mxu0 %v21654_v6  ;;  %19427 = vmatprep.mubr.bf16.mxu0 %v2153_v26  ;;  %v2179_v57 = vor.u32 %v2178_v50, %v2175_v49  ;;  %v2187_v16 = vrot.slane %v2185_v7, 2  ;;  %v724_v26 = vor.u32 %v722_v2, %v720_v8  ;;  %v18059_v39 = vcombine.low %v2568_v34, %v22920_v18  ;;  %v23036_v49 = vld [vmem:[%s22885_s20 + $0x58] sm:$0xff]  }
 0x157   : > { %19253 = vmatprep.subr.bf16.mxu1 %v21660_v12  ;;  %v713_v4 = vsel %vm661_vm0, %v708_v52, %v712_v48  ;;  %v21679_v48 = vld [vmem:[#allocation9 + $0x20] sm:$0xff]   ;;  %v736_v24 = vrot.slane %v734_v43, 1  ;;  %v746_v50 = vshrl.u32 %v23029_v41, 16  ;;  %v2593_v2 = vrot.slane %v22941_v38, 2 }
 0x158   : > { %19254 = vmatpush3.bf16.msra.mxu1 %v21660_v12  ;;  %v2180_v5 = vsel %vm2118_vm1, %v2170_v47, %v2179_v57  ;;  %v21668_v12 = vld [vmem:[#allocation9 + $0x168] sm:$0xff]   ;;  %v742_v47 = vshll.u32 %v23029_v41, 16  ;;  %v2595_v7 = vrot.slane %v22952_v56, 2  ;;  %v754_v38 = vshrl.u32 %v23036_v49, 16 }
 0x159   : > { %19462 = vmatpush3.bf16.msra.mxu0 %v21654_v6  ;;  %19255 = vmatprep.subr.bf16.mxu1 %v21667_v51  ;;  %v2182_v6 = vshrl.u32 %v23000_v62, 16  ;;  %v740_v0 = vor.u32 %v738_v44, %v736_v24  ;;  %v2594_v11 = vsel %vm2589_vm2, %v2591_v40, %v2593_v2  ;;  %v2604_v62 = vsel %vm2589_vm2, %v2601_v28, %v2603_v35 }
 0x15a   : > { %19463 = vmatprep.subr.bf16.mxu0 %v21659_v20  ;;  %v744_v59 = vrot.slane %v742_v47, 1  ;;  %v2596_v56 = vsel %vm2589_vm2, %v2593_v2, %v2595_v7 }
 0x15b   : > { %19220 = vmatmul.mubr.bf16.gmra.mrb[4].mxu1 %v697_v36  ;;  %v2184_v13 = vrot.slane %v2182_v6, 1  ;;  %v23049_v6 = vld [vmem:[%s22885_s20 + $0x68] sm:$0xff]  }
 0x15c   : > { %19428 = vmatmul.mubr.bf16.gmra.mrb[4].mxu0 %v2162_v37  ;;  %19223 = vmatprep.mubr.bf16.mxu1 %v705_v46  ;;  %v2590_v46 = vrot.slane %v18059_v39, 2  ;;  %v770_v39 = vshrl.u32 %v23049_v6, 16 }
 0x15d   : > { %19464 = vmatpush3.bf16.msra.mxu0 %v21659_v20  ;;  %19431 = vmatprep.mubr.bf16.mxu0 %v2171_v55  ;;  %v2193_v20 = vrot.slane %v2191_v10, 1  ;;  %v2188_v22 = vor.u32 %v2187_v16, %v2184_v13  ;;  %v23044_v55 = vld [vmem:[%s22885_s20 + $0x60] sm:$0xff]   ;;  %v745_v10 = vsel %vm661_vm0, %v740_v0, %v744_v59  ;;  %v766_v16 = vshll.u32 %v23049_v6, 16 }
 0x15e   : > { %19465 = vmatprep.subr.bf16.mxu0 %v21661_v45  ;;  %19256 = vmatpush3.bf16.msra.mxu1 %v21667_v51  ;;  %v21675_v51 = vld [vmem:[#allocation9 + $0x178] sm:$0xff]   ;;  %v2592_v52 = vsel %vm2589_vm2, %v2590_v46, %v2591_v40  ;;  %v758_v8 = vshll.u32 %v23044_v55, 16  ;;  %v762_v13 = vshrl.u32 %v23044_v55, 16  ;;  %v23080_v46 = vld [vmem:[#allocation9 + $0x80] sm:$0xff]   ;;  %v2602_v0 = vsel %vm2589_vm2, %v2599_v33, %v2601_v28  ;;  %v21710_v28 = vld [vmem:[#allocation9 + $0x1b0] sm:$0xff]  }
 0x15f   : > { %19257 = vmatprep.subr.bf16.mxu1 %v21674_v17  ;;  %v2189_v36 = vsel %vm2118_vm1, %v2179_v57, %v2188_v22  ;;  %v23024_v37 = vor.u32 %v2196_v29, %v2193_v20  ;;  %v737_v57 = vsel %vm661_vm0, %v732_v42, %v736_v24 }
 0x161   : > { %19466 = vmatpush3.bf16.msra.mxu0 %v21661_v45  ;;  %v729_v45 = vsel %vm661_vm0, %v724_v26, %v728_v27  ;;  %v2198_v18 = vsel %vm2118_vm1, %v2188_v22, %v23024_v37  ;;  %v23064_v22 = vld [vmem:[%s22885_s20 + $0x78] sm:$0xff]   ;;  %v21689_v26 = vld [vmem:[#allocation9 + $0x38] sm:$0xff]   ;;  %v2597_v27 = vrot.slane %v22959_v61, 2 }
 0x162   : > { %19467 = vmatprep.subr.bf16.mxu0 %v21666_v54  ;;  %19258 = vmatpush3.bf16.msra.mxu1 %v21674_v17  ;;  %v760_v17 = vrot.slane %v758_v8, 1  ;;  %v782_v40 = vshll.u32 %v23064_v22, 16  ;;  %v21691_v8 = vld [vmem:[%s22885_s20 + $0x90] ss:$0 sps:$4 sm:$0x11]  }
 0x163   : > { %19224 = vmatmul.mubr.bf16.gmra.mrb[8].mxu1 %v713_v4  ;;  %19259 = vmatprep.subr.bf16.mxu1 %v21679_v48  ;;  %v748_v4 = vor.u32 %v746_v50, %v744_v59  ;;  %v2598_v42 = vsel %vm2589_vm2, %v2595_v7, %v2597_v27  ;;  %v2600_v44 = vsel %vm2589_vm2, %v2597_v27, %v2599_v33  ;;  %v786_v59 = vshrl.u32 %v23064_v22, 16  ;;  %v21690_v7 = vld [vmem:[%s22885_s20 + $0x50] sm:$0xff]   ;;  %v21693_v33 = vld [vmem:[%s22885_s20 + $0x60] sm:$0xff]  }
 0x164   : > { %19432 = vmatmul.mubr.bf16.gmra.mrb[8].mxu0 %v2180_v5  ;;  %19227 = vmatprep.mubr.bf16.mxu1 %v721_v19  ;;  %v23061_v19 = vld [vmem:[%s22885_s20 + $0x70] sm:$0xff]   ;;  %v764_v29 = vor.u32 %v762_v13, %v760_v17  ;;  %v784_v50 = vrot.slane %v782_v40, 1 }
 0x165   : > { %19468 = vmatpush3.bf16.msra.mxu0 %v21666_v54  ;;  %19435 = vmatprep.mubr.bf16.mxu0 %v2189_v36  ;;  %v750_v54 = vshll.u32 %v23036_v49, 16  ;;  %v774_v34 = vshll.u32 %v23061_v19, 16  ;;  %v778_v61 = vshrl.u32 %v23061_v19, 16 }
 0x166   : > { %19469 = vmatprep.subr.bf16.mxu0 %v21668_v12  ;;  %19260 = vmatpush3.bf16.msra.mxu1 %v21679_v48  ;;  %v23083_v48 = vld [vmem:[%s22885_s20 + $0x88] sm:$0xff]  }
 0x167   : > { %v752_v5 = vrot.slane %v750_v54, 1  ;;  %19261 = vmatprep.subr.bf16.mxu1 %v21682_v63  ;;  %v776_v47 = vrot.slane %v774_v34, 1 }
 0x169   : > { %19470 = vmatpush3.bf16.msra.mxu0 %v21668_v12  ;;  %v753_v12 = vsel %vm661_vm0, %v748_v4, %v752_v5  ;;  %v756_v20 = vor.u32 %v754_v38, %v752_v5  ;;  %v798_v4 = vshll.u32 %v23083_v48, 16  ;;  %v21700_v5 = vld [vmem:[#allocation9 + $0x190] sm:$0xff]   ;;  %v21702_v38 = vld [vmem:[#allocation9 + $0x198] sm:$0xff]  }
 0x16a   : > { %19471 = vmatprep.subr.bf16.mxu0 %v21673_v30  ;;  %19262 = vmatpush3.bf16.msra.mxu1 %v21682_v63 }
 0x16b   : > { %19228 = vmatmul.mubr.bf16.gmra.mrb[12].mxu1 %v729_v45  ;;  %19263 = vmatprep.subr.bf16.mxu1 %v21685_v9  ;;  %v761_v36 = vsel %vm661_vm0, %v756_v20, %v760_v17  ;;  %v23078_v45 = vld [vmem:[%s22885_s20 + $0x80] sm:$0xff]   ;;  %v800_v13 = vrot.slane %v798_v4, 1  ;;  %v802_v17 = vshrl.u32 %v23083_v48, 16  ;;  %v806_v20 = vshll.u32 %v21691_v8, 16  ;;  %v23119_v4 = vld [vmem:[#allocation9 + $0x1c0] sm:$0xff]  }
 0x16c   : > { %19436 = vmatmul.mubr.bf16.gmra.mrb[12].mxu0 %v2198_v18  ;;  %19231 = vmatprep.mubr.bf16.mxu1 %v737_v57  ;;  %v21696_v18 = vld [vmem:[#allocation9 + $0x180] sm:$0xff]   ;;  %v790_v54 = vshll.u32 %v23078_v45, 16  ;;  %v794_v63 = vshrl.u32 %v23078_v45, 16  ;;  %v2907_v8 = vld [vmem:[%s22885_s20 + $0x14] sm:$0xf] }
 0x16d   : > { %19472 = vmatpush3.bf16.msra.mxu0 %v21673_v30  ;;  %19475 = vmatprep.mubr.bf16.mxu0 %v2592_v52  ;;  %v768_v30 = vrot.slane %v766_v16, 1  ;;  %v780_v52 = vor.u32 %v778_v61, %v776_v47  ;;  %v2607_v16 = vrot.slane %v21690_v7, 2  ;;  %v804_v34 = vor.u32 %v802_v17, %v800_v13  ;;  %v21695_v61 = vld [vmem:[%s22885_s20 + $0x68] sm:$0xff]   ;;  %v2906_v7 = vld [vmem:[%s22885_s20 + $0x10] sm:$0xc] }
 0x16e   : > { %19473 = vmatprep.subr.bf16.mxu0 %v21675_v51  ;;  %19264 = vmatpush3.bf16.msra.mxu1 %v21685_v9  ;;  %v792_v9 = vrot.slane %v790_v54, 1  ;;  %v21701_v54 = vld [vmem:[#allocation9 + $0x88] sm:$0xff]   ;;  %v23141_v17 = vld [vmem:[%s22885_s20 + $0x28] sm:$0xff]  }
 0x16f   : > { %19265 = vmatprep.subr.bf16.mxu1 %v21689_v26  ;;  %v769_v43 = vsel %vm661_vm0, %v764_v29, %v768_v30  ;;  %v772_v24 = vor.u32 %v770_v39, %v768_v30  ;;  %v785_v2 = vsel %vm661_vm0, %v780_v52, %v784_v50  ;;  %v21705_v30 = vld [vmem:[#allocation9 + $0x1a0] sm:$0xff]   ;;  %v21707_v39 = vld [vmem:[#allocation9 + $0x1a8] sm:$0xff]  }
 0x170   : > { %v21699_v52 = vld [vmem:[%s22885_s20 + $0x78] sm:$0xff]  }
 0x171   : > { %19474 = vmatpush3.bf16.msra.mxu0 %v21675_v51  ;;  %v21697_v51 = vld [vmem:[#allocation9 + $0x188] sm:$0xff]   ;;  %v777_v57 = vsel %vm661_vm0, %v772_v24, %v776_v47  ;;  %v21712_v24 = vld [vmem:[#allocation9 + $0x1b8] sm:$0xff]  }
 0x172   : > { %19266 = vmatpush3.bf16.msra.mxu1 %v21689_v26  ;;  %19511 = vmatprep.subr.bf16.mxu0 %v21696_v18  ;;  %v21692_v26 = vld [vmem:[%s22885_s20 + $0x58] sm:$0xff]  }
 0x173   : > { %19232 = vmatmul.mubr.bf16.gmra.mrb[16].mxu1 %v745_v10  ;;  %19303 = vmatprep.subr.bf16.mxu1 %v23080_v46  ;;  %v788_v10 = vor.u32 %v786_v59, %v784_v50  ;;  %v2609_v40 = vrot.slane %v21692_v26, 2  ;;  %v2613_v50 = vrot.slane %v21695_v61, 2  ;;  %v21703_v59 = vld [vmem:[%s22885_s20 + $0x80] sm:$0xff]  }
 0x174   : > { %19476 = vmatmul.mubr.bf16.vlgmr.msra.gmra.mrb[0].mxu0 %v2594_v11  ;;  %19235 = vmatprep.mubr.bf16.mxu1 %v753_v12  ;;  %v2605_v11 = vrot.slane %v23008_v3, 2  ;;  %v796_v12 = vor.u32 %v794_v63, %v792_v9  ;;  %v21706_v63 = vld [vmem:[#allocation9 + $0x90] sm:$0xff]  }
 0x175   : > { %19479 = vmatprep.mubr.bf16.mxu0 %v2596_v56  ;;  %19512 = vmatpush3.bf16.msra.mxu0 %v21696_v18  ;;  %v793_v56 = vsel %vm661_vm0, %v788_v10, %v792_v9  ;;  %v21698_v18 = vld [vmem:[%s22885_s20 + $0x70] sm:$0xff]   ;;  %v21709_v10 = vld [vmem:[%s22885_s20 + $0x98] ss:$0 sps:$4 sm:$0x33]   ;;  %v23145_v26 = vld [vmem:[%s22885_s20 + $0x20] sm:$0xff]  }
 0x176   : > { %19513 = vmatprep.subr.bf16.mxu0 %v21697_v51  ;;  %v2606_v27 = vsel %vm2589_vm2, %v2603_v35, %v2605_v11  ;;  %v801_v29 = vsel %vm661_vm0, %v796_v12, %v800_v13  ;;  %v2608_v3 = vsel %vm2589_vm2, %v2605_v11, %v2607_v16  ;;  %v23131_v12 = vcombine.low %v2906_v7, %v2907_v8  ;;  %v21719_v13 = vld [vmem:[#allocation9 + $0xa8] sm:$0xff]  }
 0x177   : > { %v23201_v8 = vld [vmem:[%s22885_s20 + $0x50] sm:$0xff]  }
 0x179   : > { %19514 = vmatpush3.bf16.msra.mxu0 %v21697_v51  ;;  %v2615_v51 = vrot.slane %v21698_v18, 2 }
 0x17a   : > { %19515 = vmatprep.subr.bf16.mxu0 %v21700_v5 }
 0x17b   : > { %19236 = vmatmul.mubr.bf16.gmra.mrb[20].mxu1 %v761_v36  ;;  %v808_v36 = vrot.slane %v806_v20, 1 }
 0x17c   : > { %19480 = vmatmul.mubr.bf16.gmra.mrb[4].mxu0 %v2598_v42  ;;  %19239 = vmatprep.mubr.bf16.mxu1 %v769_v43  ;;  %v2611_v42 = vrot.slane %v21693_v33, 2 }
 0x17d   : > { %19483 = vmatprep.mubr.bf16.mxu0 %v2600_v44  ;;  %19516 = vmatpush3.bf16.msra.mxu0 %v21700_v5  ;;  %v809_v43 = vsel %vm661_vm0, %v804_v34, %v808_v36  ;;  %v2610_v44 = vsel %vm2589_vm2, %v2607_v16, %v2609_v40  ;;  %v21711_v5 = vld [vmem:[#allocation9 + $0x98] sm:$0xff]   ;;  %v2625_v16 = vrot.slane %v21709_v10, 2  ;;  %v3068_v10 = vrot.slane %v23201_v8, 2 }
 0x17e   : > { %19517 = vmatprep.subr.bf16.mxu0 %v21702_v38  ;;  %v2612_v47 = vsel %vm2589_vm2, %v2609_v40, %v2611_v42  ;;  %v2614_v35 = vsel %vm2589_vm2, %v2611_v42, %v2613_v50 }
 0x181   : > { %19518 = vmatpush3.bf16.msra.mxu0 %v21702_v38  ;;  %v21716_v38 = vld [vmem:[#allocation9 + $0xa0] sm:$0xff]  }
 0x182   : > { %19519 = vmatprep.subr.bf16.mxu0 %v21705_v30 }
 0x183   : > { %19240 = vmatmul.mubr.bf16.gmra.mrb[24].mxu1 %v777_v57  ;;  %v2616_v57 = vsel %vm2589_vm2, %v2613_v50, %v2615_v51  ;;  %v3058_v50 = vrot.slane %v23141_v17, 2 }
 0x184   : > { %19484 = vmatmul.mubr.bf16.gmra.mrb[8].mxu0 %v2602_v0  ;;  %19243 = vmatprep.mubr.bf16.mxu1 %v785_v2  ;;  %v2619_v0 = vrot.slane %v21703_v59, 2  ;;  %v21704_v2 = vld [vmem:[%s22885_s20 + $0x88] sm:$0xff]  }
 0x185   : > { %19487 = vmatprep.mubr.bf16.mxu0 %v2604_v62  ;;  %19520 = vmatpush3.bf16.msra.mxu0 %v21705_v30  ;;  %v2621_v62 = vrot.slane %v21704_v2, 2  ;;  %v23151_v30 = vld [vmem:[%s22885_s20 + $0x38] sm:$0xff]  }
 0x186   : > { %19521 = vmatprep.subr.bf16.mxu0 %v21707_v39  ;;  %v3436_v42 = vshrl.u32 %v23151_v30, 16  ;;  %v21736_v2 = vld [vmem:[#allocation9 + $0x1d0] sm:$0xff]  }
 0x187   : > { %v2622_v11 = vsel %vm2589_vm2, %v2619_v0, %v2621_v62 }
 0x188   : > { %v3438_v18 = vrot.slane %v3436_v42, 2  ;;  %v3871_v42 = vrot.slane %v23151_v30, 3 }
 0x189   : > { %19522 = vmatpush3.bf16.msra.mxu0 %v21707_v39  ;;  %v21725_v39 = vld [vmem:[#allocation9 + $0xb8] sm:$0xff]  }
 0x18a   : > { %19523 = vmatprep.subr.bf16.mxu0 %v21710_v28 }
 0x18b   : > { %19244 = vmatmul.mubr.bf16.gmra.mrb[28].mxu1 %v793_v56  ;;  %v3053_v56 = vrot.slane %v23131_v12, 2 }
 0x18c   : > { %19488 = vmatmul.mubr.bf16.gmra.mrb[12].mxu0 %v2606_v27  ;;  %19247 = vmatprep.mubr.bf16.mxu1 %v801_v29  ;;  %v21722_v27 = vld [vmem:[#allocation9 + $0xb0] sm:$0xff]   ;;  %v23148_v29 = vld [vmem:[%s22885_s20 + $0x30] sm:$0xff]  }
 0x18d   : > { %19491 = vmatprep.mubr.bf16.mxu0 %v2608_v3  ;;  %19524 = vmatpush3.bf16.msra.mxu0 %v21710_v28  ;;  %v3421_v3 = vshll.u32 %v23141_v17, 16  ;;  %v3427_v33 = vshrl.u32 %v23148_v29, 16  ;;  %v3430_v34 = vshll.u32 %v23148_v29, 16 }
 0x18e   : > { %19525 = vmatprep.subr.bf16.mxu0 %v21712_v24 }
 0x18f   : > { %v3423_v61 = vrot.slane %v3421_v3, 3  ;;  %v3432_v28 = vrot.slane %v3430_v34, 3  ;;  %v21748_v3 = vld [vmem:[#allocation9 + $0x1f8] sm:$0xff]  }
 0x191   : > { %19526 = vmatpush3.bf16.msra.mxu0 %v21712_v24 }
 0x192   : > { %19563 = vmatprep.subr.bf16.mxu0 %v23119_v4 }
 0x193   : > { %19248 = vmatmul.mubr.bf16.gmra.mrb[32].mxu1 %v809_v43  ;;  %v3439_v43 = vshll.u32 %v23151_v30, 16 }
 0x194   : > { %19492 = vmatmul.mubr.bf16.gmra.mrb[16].mxu0 %v2610_v44  ;;  %19267 = vmatprep.mubr.bf16.mxu1 %v22913_v14  ;;  %v2617_v14 = vrot.slane %v21699_v52, 2  ;;  %v3429_v44 = vrot.slane %v3427_v33, 2  ;;  %v3867_v33 = vrot.slane %v23141_v17, 3 }
 0x195   : > { %19495 = vmatprep.mubr.bf16.mxu0 %v2612_v47  ;;  %v3056_v47 = vrot.slane %v23145_v26, 2  ;;  %v3441_v24 = vrot.slane %v3439_v43, 3 }
 0x197   : > { %v3059_v59 = vsel %vm2589_vm2, %v3056_v47, %v3058_v50 }
 0x19b   : > { %19268 = vmatmul.mubr.bf16.vlgmr.msra.gmra.mrb[0].mxu1 %v22916_v15  ;;  %v2618_v15 = vsel %vm2589_vm2, %v2615_v51, %v2617_v14  ;;  %v23165_v51 = vld [vmem:[#allocation9 + $0xc0] sm:$0xff]  }
 0x19c   : > { %19496 = vmatmul.mubr.bf16.gmra.mrb[20].mxu0 %v2614_v35  ;;  %19304 = vmatpush3.bf16.msra.mxu1 %v23080_v46  ;;  %v21708_v46 = vld [vmem:[%s22885_s20 + $0x90] sm:$0xff]   ;;  %v3433_v35 = vor.u32 %v3432_v28, %v3429_v44 }
 0x19d   : > { %19271 = vmatprep.mubr.bf16.mxu1 %v22932_v25  ;;  %19499 = vmatprep.mubr.bf16.mxu0 %v2616_v57  ;;  %v2620_v25 = vsel %vm2589_vm2, %v2617_v14, %v2619_v0  ;;  %v2623_v9 = vrot.slane %v21708_v46, 2  ;;  %v21733_v14 = vld [vmem:[#allocation9 + $0x1c8] sm:$0xff]   ;;  %v3062_v0 = vrot.slane %v23151_v30, 2 }
 0x19e   : > { %19305 = vmatprep.subr.bf16.mxu1 %v21701_v54  ;;  %v23189_v46 = vld [vmem:[%s22885_s20 + $0x40] sm:$0xff]   ;;  %v22034_v44 = vld [vmem:[%s22885_s20 + $0x10] sm:$0xff]  }
 0x19f   : > { %v1321_v28 = vrot.slane %v22034_v44, 1  ;;  %v21749_v44 = vld [vmem:[#allocation9 + $0xe0] sm:$0xff]  }
 0x1a0   : > { %19306 = vmatpush3.bf16.msra.mxu1 %v21701_v54 }
 0x1a1   : > { %19307 = vmatprep.subr.bf16.mxu1 %v21706_v63 }
 0x1a3   : > { %19272 = vmatmul.mubr.bf16.gmra.mrb[4].mxu1 %v22947_v53  ;;  %v23134_v53 = vld [vmem:[%s22885_s20 + $0x18] sm:$0xff]  }
 0x1a4   : > { %19500 = vmatmul.mubr.bf16.gmra.mrb[24].mxu0 %v2618_v15  ;;  %19275 = vmatprep.mubr.bf16.mxu1 %v22956_v60  ;;  %v2624_v60 = vsel %vm2589_vm2, %v2621_v62, %v2623_v9  ;;  %v3054_v20 = vrot.slane %v23134_v53, 2  ;;  %v21741_v62 = vld [vmem:[#allocation9 + $0x1e0] sm:$0xff]  }
 0x1a5   : > { %19503 = vmatprep.mubr.bf16.mxu0 %v2620_v25  ;;  %19308 = vmatpush3.bf16.msra.mxu1 %v21706_v63  ;;  %v3060_v63 = vrot.slane %v23148_v29, 2  ;;  %v23193_v25 = vld [vmem:[%s22885_s20 + $0x48] sm:$0xff]  }
 0x1a6   : > { %19309 = vmatprep.subr.bf16.mxu1 %v21711_v5  ;;  %v3055_v36 = vsel %vm2589_vm2, %v3053_v56, %v3054_v20  ;;  %v3057_v57 = vsel %vm2589_vm2, %v3054_v20, %v3056_v47  ;;  %v23248_v47 = vld [vmem:[%s22885_s20 + $0x78] sm:$0xff]  }
 0x1a7   : > { %v3061_v15 = vsel %vm2589_vm2, %v3058_v50, %v3060_v63 }
 0x1a9   : > { %19310 = vmatpush3.bf16.msra.mxu1 %v21711_v5  ;;  %v3066_v5 = vrot.slane %v23193_v25, 2 }
 0x1aa   : > { %19311 = vmatprep.subr.bf16.mxu1 %v21716_v38 }
 0x1ab   : > { %19276 = vmatmul.mubr.bf16.gmra.mrb[8].mxu1 %v22971_v21  ;;  %v3418_v21 = vshrl.u32 %v23141_v17, 16  ;;  %v3069_v20 = vsel %vm2589_vm2, %v3066_v5, %v3068_v10 }
 0x1ac   : > { %19504 = vmatmul.mubr.bf16.gmra.mrb[28].mxu0 %v2622_v11  ;;  %19279 = vmatprep.mubr.bf16.mxu1 %v22980_v31  ;;  %v2626_v31 = vsel %vm2589_vm2, %v2623_v9, %v2625_v16  ;;  %v23205_v9 = vld [vmem:[%s22885_s20 + $0x58] sm:$0xff]   ;;  %v1296_v11 = vld [vmem:[%s22885_s20] sm:$0xe]  ;;  %v22032_v16 = vld [vmem:[%s22885_s20 + $0x4] sm:$0xf] }
 0x1ad   : > { %19507 = vmatprep.mubr.bf16.mxu0 %v2624_v60  ;;  %19312 = vmatpush3.bf16.msra.mxu1 %v21716_v38  ;;  %v3420_v40 = vrot.slane %v3418_v21, 2  ;;  %v23211_v38 = vld [vmem:[%s22885_s20 + $0x60] sm:$0xff]   ;;  %v3070_v60 = vrot.slane %v23205_v9, 2  ;;  %v18014_v56 = vcombine.low %v1296_v11, %v22032_v16  ;;  %v22033_v21 = vld [vmem:[%s22885_s20 + $0x8] sm:$0xff]   ;;  %v3400_v11 = vshrl.u32 %v23134_v53, 16 }
 0x1ae   : > { %19313 = vmatprep.subr.bf16.mxu1 %v21719_v13  ;;  %v21747_v16 = vld [vmem:[#allocation9 + $0xd8] sm:$0xff]  }
 0x1af   : > { %v23167_v52 = vor.u32 %v3423_v61, %v3420_v40  ;;  %v1318_v34 = vrot.slane %v18014_v56, 1  ;;  %v23228_v40 = vld [vmem:[#allocation9 + $0x200] sm:$0xff]  }
 0x1b1   : > { %19314 = vmatpush3.bf16.msra.mxu1 %v21719_v13  ;;  %v21746_v13 = vld [vmem:[#allocation9 + $0x1f0] sm:$0xff]  }
 0x1b2   : > { %19315 = vmatprep.subr.bf16.mxu1 %v21722_v27 }
 0x1b3   : > { %19280 = vmatmul.mubr.bf16.gmra.mrb[12].mxu1 %v22996_v58  ;;  %v23169_v58 = vor.u32 %v3441_v24, %v3438_v18  ;;  %v22035_v24 = vld [vmem:[%s22885_s20 + $0x18] sm:$0xff]  }
 0x1b4   : > { %19508 = vmatmul.mubr.bf16.gmra.mrb[32].mxu0 %v2626_v31  ;;  %19283 = vmatprep.mubr.bf16.mxu1 %v23004_v1  ;;  %v23173_v1 = vsel %vm3390_vm3, %v23167_v52, %v3433_v35  ;;  %v1319_v31 = vrot.slane %v22033_v21, 1  ;;  %v1323_v50 = vrot.slane %v22035_v24, 1  ;;  %v22039_v21 = vld [vmem:[%s22885_s20 + $0x38] sm:$0xff]  }
 0x1b5   : > { %19527 = vmatprep.mubr.bf16.mxu0 %v3055_v36  ;;  %19316 = vmatpush3.bf16.msra.mxu1 %v21722_v27  ;;  %v23177_v54 = vsel %vm3390_vm3, %v3433_v35, %v23169_v58  ;;  %v3072_v27 = vrot.slane %v23211_v38, 2  ;;  %v3869_v36 = vrot.slane %v23148_v29, 3  ;;  %v22036_v35 = vld [vmem:[%s22885_s20 + $0x20] sm:$0xff]  }
 0x1b6   : > { %19317 = vmatprep.subr.bf16.mxu1 %v21725_v39  ;;  %v1320_v61 = vsel %vm1317_vm4, %v1318_v34, %v1319_v31 }
 0x1b7   : > { %v23242_v29 = vsel %vm3861_vm5, %v3869_v36, %v3871_v42  ;;  %v3073_v43 = vsel %vm2589_vm2, %v3070_v60, %v3072_v27 }
 0x1b9   : > { %19318 = vmatpush3.bf16.msra.mxu1 %v21725_v39 }
 0x1ba   : > { %19355 = vmatprep.subr.bf16.mxu1 %v23165_v51 }
 0x1bb   : > { %19284 = vmatmul.mubr.bf16.gmra.mrb[16].mxu1 %v23019_v32  ;;  %v3063_v32 = vsel %vm2589_vm2, %v3060_v63, %v3062_v0  ;;  %v23258_v63 = vld [vmem:[%s22885_s20 + $0x80] sm:$0xff]  }
 0x1bc   : > { %19528 = vmatmul.mubr.bf16.vlgmr.msra.gmra.mrb[0].mxu0 %v3057_v57  ;;  %19287 = vmatprep.mubr.bf16.mxu1 %v23029_v41  ;;  %v21738_v41 = vld [vmem:[#allocation9 + $0x1d8] sm:$0xff]   ;;  %v1325_v57 = vrot.slane %v22036_v35, 1 }
 0x1bd   : > { %19531 = vmatprep.mubr.bf16.mxu0 %v3059_v59  ;;  %19564 = vmatpush3.bf16.msra.mxu0 %v23119_v4  ;;  %v3064_v4 = vrot.slane %v23189_v46, 2 }
 0x1be   : > { %19565 = vmatprep.subr.bf16.mxu0 %v21733_v14 }
 0x1bf   : > { %v3065_v7 = vsel %vm2589_vm2, %v3062_v0, %v3064_v4  ;;  %v1322_v0 = vsel %vm1317_vm4, %v1319_v31, %v1321_v28  ;;  %v1331_v31 = vrot.slane %v22039_v21, 1 }
 0x1c1   : > { %19566 = vmatpush3.bf16.msra.mxu0 %v21733_v14  ;;  %v3078_v14 = vrot.slane %v23248_v47, 2 }
 0x1c2   : > { %19567 = vmatprep.subr.bf16.mxu0 %v21736_v2 }
 0x1c3   : > { %19288 = vmatmul.mubr.bf16.gmra.mrb[20].mxu1 %v23036_v49  ;;  %v3067_v49 = vsel %vm2589_vm2, %v3064_v4, %v3066_v5  ;;  %v1324_v4 = vsel %vm1317_vm4, %v1321_v28, %v1323_v50  ;;  %v21745_v28 = vld [vmem:[%s22885_s20 + $0xa0] ss:$0 sps:$4 sm:$0x33]  }
 0x1c4   : > { %19532 = vmatmul.mubr.bf16.gmra.mrb[4].mxu0 %v3061_v15  ;;  %19291 = vmatprep.mubr.bf16.mxu1 %v23044_v55  ;;  %v21743_v55 = vld [vmem:[#allocation9 + $0x1e8] sm:$0xff]  }
 0x1c5   : > { %19535 = vmatprep.mubr.bf16.mxu0 %v3063_v32  ;;  %19568 = vmatpush3.bf16.msra.mxu0 %v21736_v2  ;;  %v21737_v2 = vld [vmem:[#allocation9 + $0xc8] sm:$0xff]  }
 0x1c6   : > { %19569 = vmatprep.subr.bf16.mxu0 %v21738_v41 }
 0x1c9   : > { %19570 = vmatpush3.bf16.msra.mxu0 %v21738_v41  ;;  %v23264_v41 = vld [vmem:[%s22885_s20 + $0x88] sm:$0xff]  }
 0x1ca   : > { %19571 = vmatprep.subr.bf16.mxu0 %v21741_v62 }
 0x1cb   : > { %19292 = vmatmul.mubr.bf16.gmra.mrb[24].mxu1 %v23049_v6  ;;  %v23218_v6 = vld [vmem:[%s22885_s20 + $0x68] sm:$0xff]  }
 0x1cc   : > { %19536 = vmatmul.mubr.bf16.gmra.mrb[8].mxu0 %v3065_v7  ;;  %19295 = vmatprep.mubr.bf16.mxu1 %v23061_v19  ;;  %v3071_v19 = vsel %vm2589_vm2, %v3068_v10, %v3070_v60  ;;  %v3074_v39 = vrot.slane %v23218_v6, 2  ;;  %v21742_v7 = vld [vmem:[#allocation9 + $0xd0] sm:$0xff]   ;;  %v3082_v10 = vrot.slane %v23264_v41, 2  ;;  %v23275_v60 = vld [vmem:[%s22885_s20 + $0x90] sm:$0xff]  }
 0x1cd   : > { %19539 = vmatprep.mubr.bf16.mxu0 %v3067_v49  ;;  %19572 = vmatpush3.bf16.msra.mxu0 %v21741_v62  ;;  %v3080_v62 = vrot.slane %v23258_v63, 2  ;;  %v3392_v49 = vshrl.u32 %v23131_v12, 16 }
 0x1ce   : > { %19573 = vmatprep.subr.bf16.mxu0 %v21743_v55  ;;  %v3075_v18 = vsel %vm2589_vm2, %v3072_v27, %v3074_v39 }
 0x1cf   : > { %v3081_v56 = vsel %vm2589_vm2, %v3078_v14, %v3080_v62 }
 0x1d1   : > { %19574 = vmatpush3.bf16.msra.mxu0 %v21743_v55  ;;  %v3395_v55 = vshll.u32 %v23131_v12, 16 }
 0x1d2   : > { %19575 = vmatprep.subr.bf16.mxu0 %v21746_v13 }
 0x1d3   : > { %19296 = vmatmul.mubr.bf16.gmra.mrb[28].mxu1 %v23064_v22  ;;  %v23234_v22 = vsel %vm3861_vm5, %v3867_v33, %v3869_v36  ;;  %v3397_v34 = vrot.slane %v3395_v55, 3  ;;  %v3402_v36 = vrot.slane %v3400_v11, 2 }
 0x1d4   : > { %19540 = vmatmul.mubr.bf16.gmra.mrb[12].mxu0 %v3069_v20  ;;  %19299 = vmatprep.mubr.bf16.mxu1 %v23078_v45  ;;  %v23237_v45 = vld [vmem:[%s22885_s20 + $0x70] sm:$0xff]   ;;  %v3083_v20 = vsel %vm2589_vm2, %v3080_v62, %v3082_v10  ;;  %v21751_v62 = vld [vmem:[#allocation9 + $0xf0] sm:$0xff]  }
 0x1d5   : > { %19543 = vmatprep.mubr.bf16.mxu0 %v3071_v19  ;;  %19576 = vmatpush3.bf16.msra.mxu0 %v21746_v13  ;;  %v3076_v59 = vrot.slane %v23237_v45, 2  ;;  %v23279_v13 = vld [vmem:[%s22885_s20 + $0x98] sm:$0xff]   ;;  %v22038_v19 = vld [vmem:[%s22885_s20 + $0x30] sm:$0xff]  }
 0x1d6   : > { %19577 = vmatprep.subr.bf16.mxu0 %v21748_v3  ;;  %v1329_v27 = vrot.slane %v22038_v19, 1 }
 0x1d7   : > { %v3077_v15 = vsel %vm2589_vm2, %v3074_v39, %v3076_v59  ;;  %v3079_v5 = vsel %vm2589_vm2, %v3076_v59, %v3078_v14  ;;  %v3084_v39 = vrot.slane %v23275_v60, 2 }
 0x1d9   : > { %19578 = vmatpush3.bf16.msra.mxu0 %v21748_v3  ;;  %v3394_v3 = vrot.slane %v3392_v49, 2  ;;  %v3085_v24 = vsel %vm2589_vm2, %v3082_v10, %v3084_v39 }
 0x1da   : > { %19615 = vmatprep.subr.bf16.mxu0 %v23228_v40 }
 0x1db   : > { %19300 = vmatmul.mubr.bf16.gmra.mrb[32].mxu1 %v23083_v48  ;;  %v22037_v48 = vld [vmem:[%s22885_s20 + $0x28] sm:$0xff]  }
 0x1dc   : > { %19544 = vmatmul.mubr.bf16.gmra.mrb[16].mxu0 %v3073_v43  ;;  %19319 = vmatprep.mubr.bf16.mxu1 %v1320_v61  ;;  %v1327_v32 = vrot.slane %v22037_v48, 1  ;;  %v3403_v43 = vshll.u32 %v23134_v53, 16  ;;  %v3086_v61 = vrot.slane %v23279_v13, 2  ;;  %v22040_v53 = vld [vmem:[%s22885_s20 + $0x40] sm:$0xff]   ;;  %v3088_v48 = vrot.slane %v21745_v28, 2 }
 0x1dd   : > { %19547 = vmatprep.mubr.bf16.mxu0 %v3075_v18  ;;  %v1333_v14 = vrot.slane %v22040_v53, 1 }
 0x1de   : > { %v1328_v12 = vsel %vm1317_vm4, %v1325_v57, %v1327_v32  ;;  %v1330_v18 = vsel %vm1317_vm4, %v1327_v32, %v1329_v27  ;;  %v3405_v35 = vrot.slane %v3403_v43, 3  ;;  %v3087_v59 = vsel %vm2589_vm2, %v3084_v39, %v3086_v61  ;;  %v23311_v43 = vld [vmem:[#allocation9 + $0x100] sm:$0xff]  }
 0x1df   : > { %v3412_v32 = vshll.u32 %v23145_v26, 16  ;;  %v3089_v55 = vsel %vm2589_vm2, %v3086_v61, %v3088_v48  ;;  %v3454_v61 = vshrl.u32 %v23193_v25, 16  ;;  %v22048_v48 = vld [vmem:[%s22885_s20 + $0x78] sm:$0xff]  }
 0x1e1   : > { %v3414_v11 = vrot.slane %v3412_v32, 3  ;;  %v1347_v32 = vrot.slane %v22048_v48, 1 }
 0x1e3   : > { %19320 = vmatmul.mubr.bf16.vlgmr.msra.gmra.mrb[0].mxu1 %v1322_v0  ;;  %v22041_v0 = vld [vmem:[%s22885_s20 + $0x48] sm:$0xff]  }
 0x1e4   : > { %19548 = vmatmul.mubr.bf16.gmra.mrb[20].mxu0 %v3077_v15  ;;  %19356 = vmatpush3.bf16.msra.mxu1 %v23165_v51  ;;  %v1326_v51 = vsel %vm1317_vm4, %v1323_v50, %v1325_v57  ;;  %v1332_v50 = vsel %vm1317_vm4, %v1329_v27, %v1331_v31  ;;  %v21750_v57 = vld [vmem:[#allocation9 + $0xe8] sm:$0xff]   ;;  %v3409_v15 = vshrl.u32 %v23145_v26, 16  ;;  %v3445_v27 = vshrl.u32 %v23189_v46, 16 }
 0x1e5   : > { %19323 = vmatprep.mubr.bf16.mxu1 %v1324_v4  ;;  %19551 = vmatprep.mubr.bf16.mxu0 %v3079_v5  ;;  %v3398_v4 = vor.u32 %v3397_v34, %v3394_v3  ;;  %v3406_v5 = vor.u32 %v3405_v35, %v3402_v36  ;;  %v22042_v26 = vld [vmem:[%s22885_s20 + $0x50] sm:$0xff]   ;;  %v3448_v34 = vshll.u32 %v23189_v46, 16  ;;  %v3457_v46 = vshll.u32 %v23193_v25, 16  ;;  %v21755_v35 = vld [vmem:[#allocation9 + $0x210] sm:$0xff]  }
 0x1e6   : > { %19357 = vmatprep.subr.bf16.mxu1 %v21737_v2  ;;  %v3411_v49 = vrot.slane %v3409_v15, 2  ;;  %v21754_v36 = vld [vmem:[#allocation9 + $0x208] sm:$0xff]  }
 0x1e7   : > { %v22047_v25 = vld [vmem:[%s22885_s20 + $0x70] sm:$0xff]  }
 0x1e8   : > { %19358 = vmatpush3.bf16.msra.mxu1 %v21737_v2  ;;  %v1335_v2 = vrot.slane %v22041_v0, 1  ;;  %v3459_v0 = vrot.slane %v3457_v46, 3  ;;  %v22051_v46 = vld [vmem:[%s22885_s20 + $0x90] ss:$0 sps:$4 sm:$0x11]  }
 0x1e9   : > { %19359 = vmatprep.subr.bf16.mxu1 %v21742_v7 }
 0x1ea   : > { %v1336_v10 = vsel %vm1317_vm4, %v1333_v14, %v1335_v2 }
 0x1eb   : > { %19324 = vmatmul.mubr.bf16.gmra.mrb[4].mxu1 %v1326_v51  ;;  %v21752_v51 = vld [vmem:[#allocation9 + $0xf8] sm:$0xff]  }
 0x1ec   : > { %19552 = vmatmul.mubr.bf16.gmra.mrb[24].mxu0 %v3081_v56  ;;  %19327 = vmatprep.mubr.bf16.mxu1 %v1328_v12  ;;  %v1337_v56 = vrot.slane %v22042_v26, 1  ;;  %v3415_v12 = vor.u32 %v3414_v11, %v3411_v49 }
 0x1ed   : > { %19555 = vmatprep.mubr.bf16.mxu0 %v3083_v20  ;;  %19360 = vmatpush3.bf16.msra.mxu1 %v21742_v7  ;;  %v1334_v7 = vsel %vm1317_vm4, %v1331_v31, %v1333_v14  ;;  %v22043_v20 = vld [vmem:[%s22885_s20 + $0x58] sm:$0xff]  }
 0x1ee   : > { %19361 = vmatprep.subr.bf16.mxu1 %v21747_v16  ;;  %v1339_v19 = vrot.slane %v22043_v20, 1  ;;  %v1338_v21 = vsel %vm1317_vm4, %v1335_v2, %v1337_v56  ;;  %v3416_v31 = vsel %vm3390_vm3, %v3406_v5, %v3415_v12  ;;  %v3425_v39 = vsel %vm3390_vm3, %v3415_v12, %v23167_v52  ;;  %v21756_v2 = vld [vmem:[#allocation9 + $0x218] sm:$0xff]  }
 0x1ef   : > { %v3447_v52 = vrot.slane %v3445_v27, 2  ;;  %v3490_v12 = vshrl.u32 %v23218_v6, 16 }
 0x1f0   : > { %v1340_v3 = vsel %vm1317_vm4, %v1337_v56, %v1339_v19  ;;  %v3484_v56 = vshll.u32 %v23211_v38, 16 }
 0x1f1   : > { %19362 = vmatpush3.bf16.msra.mxu1 %v21747_v16  ;;  %v3407_v16 = vsel %vm3390_vm3, %v3398_v4, %v3406_v5  ;;  %v3466_v4 = vshll.u32 %v23201_v8, 16  ;;  %v3472_v5 = vshrl.u32 %v23205_v9, 16 }
 0x1f2   : > { %19363 = vmatprep.subr.bf16.mxu1 %v21749_v44 }
 0x1f3   : > { %19328 = vmatmul.mubr.bf16.gmra.mrb[8].mxu1 %v1330_v18  ;;  %v22046_v18 = vld [vmem:[%s22885_s20 + $0x68] sm:$0xff]  }
 0x1f4   : > { %19556 = vmatmul.mubr.bf16.gmra.mrb[28].mxu0 %v3085_v24  ;;  %19331 = vmatprep.mubr.bf16.mxu1 %v1332_v50  ;;  %v1343_v24 = vrot.slane %v22046_v18, 1  ;;  %v3450_v50 = vrot.slane %v3448_v34, 3 }
 0x1f5   : > { %19559 = vmatprep.mubr.bf16.mxu0 %v3087_v59  ;;  %19364 = vmatpush3.bf16.msra.mxu1 %v21749_v44  ;;  %v22045_v44 = vld [vmem:[%s22885_s20 + $0x60] sm:$0xff]   ;;  %v3463_v59 = vshrl.u32 %v23201_v8, 16  ;;  %v3468_v8 = vrot.slane %v3466_v4, 3 }
 0x1f6   : > { %19365 = vmatprep.subr.bf16.mxu1 %v21750_v57  ;;  %v1341_v28 = vrot.slane %v22045_v44, 1  ;;  %v3451_v15 = vor.u32 %v3450_v50, %v3447_v52  ;;  %v1353_v52 = vrot.slane %v22051_v46, 1  ;;  %v3499_v50 = vshrl.u32 %v23237_v45, 16 }
 0x1f7   : > { %v3465_v49 = vrot.slane %v3463_v59, 2  ;;  %v3511_v59 = vshll.u32 %v23248_v47, 16 }
 0x1f8   : > { %v1342_v53 = vsel %vm1317_vm4, %v1339_v19, %v1341_v28  ;;  %v1344_v14 = vsel %vm1317_vm4, %v1341_v28, %v1343_v24  ;;  %v3493_v19 = vshll.u32 %v23218_v6, 16  ;;  %v21761_v28 = vld [vmem:[#allocation9 + $0x238] sm:$0xff]  }
 0x1f9   : > { %19366 = vmatpush3.bf16.msra.mxu1 %v21750_v57  ;;  %v3456_v57 = vrot.slane %v3454_v61, 2  ;;  %v3469_v27 = vor.u32 %v3468_v8, %v3465_v49  ;;  %v3520_v49 = vshll.u32 %v23258_v63, 16 }
 0x1fa   : > { %19367 = vmatprep.subr.bf16.mxu1 %v21751_v62  ;;  %v3495_v44 = vrot.slane %v3493_v19, 3  ;;  %v3535_v19 = vshrl.u32 %v23275_v60, 16 }
 0x1fb   : > { %19332 = vmatmul.mubr.bf16.gmra.mrb[12].mxu1 %v1334_v7  ;;  %v3460_v7 = vor.u32 %v3459_v0, %v3456_v57  ;;  %v3508_v57 = vshrl.u32 %v23248_v47, 16  ;;  %v22052_v0 = vld [vmem:[%s22885_s20 + $0x10] sm:$0xff]  }
 0x1fc   : > { %19560 = vmatmul.mubr.bf16.gmra.mrb[32].mxu0 %v3089_v55  ;;  %19335 = vmatprep.mubr.bf16.mxu1 %v1336_v10  ;;  %v21757_v55 = vld [vmem:[#allocation9 + $0x220] sm:$0xff]   ;;  %v3452_v10 = vsel %vm3390_vm3, %v23169_v58, %v3451_v15  ;;  %v22049_v58 = vld [vmem:[%s22885_s20 + $0x80] sm:$0xff]  }
 0x1fd   : > { %19579 = vmatprep.mubr.bf16.mxu0 %v3407_v16  ;;  %19368 = vmatpush3.bf16.msra.mxu1 %v21751_v62  ;;  %v3475_v62 = vshll.u32 %v23205_v9, 16  ;;  %v3481_v16 = vshrl.u32 %v23211_v38, 16  ;;  %v21758_v9 = vld [vmem:[#allocation9 + $0x228] sm:$0xff]   ;;  %v3461_v26 = vsel %vm3390_vm3, %v3451_v15, %v3460_v7  ;;  %v1349_v20 = vrot.slane %v22049_v58, 1 }
 0x1fe   : > { %19369 = vmatprep.subr.bf16.mxu1 %v21752_v51  ;;  %v3492_v38 = vrot.slane %v3490_v12, 2  ;;  %v3470_v18 = vsel %vm3390_vm3, %v3460_v7, %v3469_v27  ;;  %v3510_v48 = vrot.slane %v3508_v57, 2  ;;  %v3517_v7 = vshrl.u32 %v23258_v63, 16 }
 0x1ff   : > { %v3483_v34 = vrot.slane %v3481_v16, 2  ;;  %v1350_v61 = vsel %vm1317_vm4, %v1347_v32, %v1349_v20  ;;  %v3522_v16 = vrot.slane %v3520_v49, 3 }
 0x201   : > { %19370 = vmatpush3.bf16.msra.mxu1 %v21752_v51  ;;  %v3474_v51 = vrot.slane %v3472_v5, 2  ;;  %v22053_v5 = vld [vmem:[%s22885_s20 + $0x18] sm:$0xff]  }
 0x202   : > { %20603 = vmatprep.subr.bf16.mxu1 %v23311_v43 }
 0x203   : > { %19336 = vmatmul.mubr.bf16.gmra.mrb[16].mxu1 %v1338_v21  ;;  %v22050_v21 = vld [vmem:[%s22885_s20 + $0x88] sm:$0xff]  }
 0x204   : > { %19580 = vmatmul.mubr.bf16.vlgmr.msra.gmra.mrb[0].mxu0 %v3416_v31  ;;  %19339 = vmatprep.mubr.bf16.mxu1 %v1340_v3  ;;  %v1351_v31 = vrot.slane %v22050_v21, 1  ;;  %v3544_v21 = vshrl.u32 %v23279_v13, 16 }
 0x205   : > { %19583 = vmatprep.mubr.bf16.mxu0 %v3425_v39  ;;  %19616 = vmatpush3.bf16.msra.mxu0 %v23228_v40  ;;  %v1345_v40 = vrot.slane %v22047_v25, 1  ;;  %v3486_v39 = vrot.slane %v3484_v56, 3  ;;  %v3496_v25 = vor.u32 %v3495_v44, %v3492_v38  ;;  %v3537_v44 = vrot.slane %v3535_v19, 2 }
 0x206   : > { %19617 = vmatprep.subr.bf16.mxu0 %v21754_v36  ;;  %v1352_v6 = vsel %vm1317_vm4, %v1349_v20, %v1351_v31 }
 0x207   : > { %v1348_v11 = vsel %vm1317_vm4, %v1345_v40, %v1347_v32  ;;  %v3513_v32 = vrot.slane %v3511_v59, 3 }
 0x209   : > { %19618 = vmatpush3.bf16.msra.mxu0 %v21754_v36  ;;  %v21760_v36 = vld [vmem:[#allocation9 + $0x230] sm:$0xff]  }
 0x20a   : > { %19619 = vmatprep.subr.bf16.mxu0 %v21755_v35 }
 0x20b   : > { %19340 = vmatmul.mubr.bf16.gmra.mrb[20].mxu1 %v1342_v53  ;;  %v3487_v53 = vor.u32 %v3486_v39, %v3483_v34  ;;  %v22056_v34 = vld [vmem:[%s22885_s20 + $0x30] sm:$0xff]  }
 0x20c   : > { %19584 = vmatmul.mubr.bf16.gmra.mrb[4].mxu0 %v23173_v1  ;;  %19343 = vmatprep.mubr.bf16.mxu1 %v1344_v14  ;;  %v1346_v1 = vsel %vm1317_vm4, %v1343_v24, %v1345_v40  ;;  %v1781_v14 = vrot.slane %v22926_v23, 1  ;;  %v3501_v40 = vrot.slane %v3499_v50, 2  ;;  %v22057_v39 = vld [vmem:[#allocation9 + $0x108] sm:$0xff]  }
 0x20d   : > { %19587 = vmatprep.mubr.bf16.mxu0 %v23177_v54  ;;  %19620 = vmatpush3.bf16.msra.mxu0 %v21755_v35  ;;  %v3477_v54 = vrot.slane %v3475_v62, 3  ;;  %v3502_v35 = vshll.u32 %v23237_v45, 16  ;;  %v1354_v45 = vsel %vm1317_vm4, %v1351_v31, %v1353_v52  ;;  %v3497_v23 = vsel %vm3390_vm3, %v3487_v53, %v3496_v25  ;;  %v22059_v52 = vld [vmem:[%s22885_s20 + $0x38] sm:$0xff]  }
 0x20e   : > { %19621 = vmatprep.subr.bf16.mxu0 %v21756_v2  ;;  %v1784_v62 = vrot.slane %v22053_v5, 1  ;;  %v3547_v31 = vshll.u32 %v23279_v13, 16  ;;  %v1792_v50 = vrot.slane %v22059_v52, 1  ;;  %v22063_v5 = vld [vmem:[#allocation9 + $0x120] sm:$0xff]  }
 0x20f   : > { %v3478_v3 = vor.u32 %v3477_v54, %v3474_v51  ;;  %v3504_v15 = vrot.slane %v3502_v35, 3  ;;  %v3514_v51 = vor.u32 %v3513_v32, %v3510_v48  ;;  %v3519_v54 = vrot.slane %v3517_v7, 2  ;;  %v22078_v52 = vld [vmem:[%s22885_s20 + $0x48] sm:$0xff]  }
 0x211   : > { %19622 = vmatpush3.bf16.msra.mxu0 %v21756_v2  ;;  %v3479_v24 = vsel %vm3390_vm3, %v3469_v27, %v3478_v3  ;;  %v1782_v2 = vrot.slane %v22052_v0, 1  ;;  %v3488_v4 = vsel %vm3390_vm3, %v3478_v3, %v3487_v53  ;;  %v3538_v27 = vshll.u32 %v23275_v60, 16  ;;  %v22060_v53 = vld [vmem:[%s22885_s20 + $0x40] sm:$0xff]  }
 0x212   : > { %19623 = vmatprep.subr.bf16.mxu0 %v21757_v55  ;;  %v3523_v3 = vor.u32 %v3522_v16, %v3519_v54 }
 0x213   : > { %19344 = vmatmul.mubr.bf16.gmra.mrb[24].mxu1 %v1346_v1  ;;  %v1783_v47 = vsel %vm1317_vm4, %v1781_v14, %v1782_v2  ;;  %v3529_v1 = vshll.u32 %v23264_v41, 16  ;;  %v3540_v60 = vrot.slane %v3538_v27, 3  ;;  %v1794_v14 = vrot.slane %v22060_v53, 1  ;;  %v22072_v27 = vld [vmem:[%s22885_s20 + $0x68] sm:$0xff]  }
 0x214   : > { %19588 = vmatmul.mubr.bf16.gmra.mrb[8].mxu0 %v3452_v10  ;;  %19347 = vmatprep.mubr.bf16.mxu1 %v1348_v11  ;;  %v3505_v10 = vor.u32 %v3504_v15, %v3501_v40  ;;  %v22054_v11 = vld [vmem:[%s22885_s20 + $0x20] sm:$0xff]   ;;  %v3524_v13 = vsel %vm3390_vm3, %v3514_v51, %v3523_v3 }
 0x215   : > { %19591 = vmatprep.mubr.bf16.mxu0 %v3461_v26  ;;  %19624 = vmatpush3.bf16.msra.mxu0 %v21757_v55  ;;  %v3526_v55 = vshrl.u32 %v23264_v41, 16  ;;  %v1786_v8 = vrot.slane %v22054_v11, 1  ;;  %v3531_v56 = vrot.slane %v3529_v1, 3  ;;  %v22055_v41 = vld [vmem:[%s22885_s20 + $0x28] sm:$0xff]   ;;  %v3541_v59 = vor.u32 %v3540_v60, %v3537_v44  ;;  %v22066_v11 = vld [vmem:[%s22885_s20 + $0x18] sm:$0xff]  }
 0x216   : > { %19625 = vmatprep.subr.bf16.mxu0 %v21758_v9  ;;  %v3506_v63 = vsel %vm3390_vm3, %v3496_v25, %v3505_v10  ;;  %v3515_v58 = vsel %vm3390_vm3, %v3505_v10, %v3514_v51  ;;  %v1788_v20 = vrot.slane %v22055_v41, 1  ;;  %v3840_v25 = vld [vmem:[%s22885_s20 + $0x10] sm:$0x8]  ;;  %v1795_v32 = vsel %vm1317_vm4, %v1792_v50, %v1794_v14  ;;  %v22067_v51 = vld [vmem:[#allocation9 + $0x128] sm:$0xff]  }
 0x217   : > { %v3528_v26 = vrot.slane %v3526_v55, 2  ;;  %v1787_v12 = vsel %vm1317_vm4, %v1784_v62, %v1786_v8  ;;  %v23391_v55 = vld [vmem:[%s22885_s20 + $0x50] sm:$0xff]  }
 0x218   : > { %v1798_v1 = vrot.slane %v23391_v55, 1 }
 0x219   : > { %19626 = vmatpush3.bf16.msra.mxu0 %v21758_v9  ;;  %v1785_v9 = vsel %vm1317_vm4, %v1782_v2, %v1784_v62  ;;  %v3532_v38 = vor.u32 %v3531_v56, %v3528_v26  ;;  %v22061_v2 = vld [vmem:[#allocation9 + $0x118] sm:$0xff]   ;;  %v22068_v56 = vld [vmem:[#allocation9 + $0x130] sm:$0xff]  }
 0x21a   : > { %19627 = vmatprep.subr.bf16.mxu0 %v21760_v36  ;;  %v22064_v62 = vld [vmem:[%s22885_s20 + $0x48] sm:$0xff]  }
 0x21b   : > { %19348 = vmatmul.mubr.bf16.gmra.mrb[28].mxu1 %v1350_v61  ;;  %v23373_v61 = vld [vmem:[%s22885_s20 + $0xa0] ss:$0 sps:$4 sm:$0x77]   ;;  %v3533_v46 = vsel %vm3390_vm3, %v3523_v3, %v3532_v38  ;;  %v3542_v48 = vsel %vm3390_vm3, %v3532_v38, %v3541_v59  ;;  %v1796_v7 = vrot.slane %v22064_v62, 1  ;;  %v23413_v38 = vld [vmem:[%s22885_s20 + $0x78] sm:$0xff]  }
 0x21c   : > { %19592 = vmatmul.mubr.bf16.gmra.mrb[12].mxu0 %v3470_v18  ;;  %19351 = vmatprep.mubr.bf16.mxu1 %v1352_v6  ;;  %v3549_v18 = vrot.slane %v3547_v31, 3  ;;  %v3553_v35 = vshrl.u32 %v23373_v61, 16  ;;  %v3556_v57 = vshll.u32 %v23373_v61, 16  ;;  %v22073_v31 = vld [vmem:[#allocation9 + $0x138] sm:$0xff]   ;;  %v1808_v44 = vrot.slane %v23413_v38, 1 }
 0x21d   : > { %19595 = vmatprep.mubr.bf16.mxu0 %v3479_v24  ;;  %19628 = vmatpush3.bf16.msra.mxu0 %v21760_v36  ;;  %v1790_v36 = vrot.slane %v22056_v34, 1  ;;  %v22058_v24 = vld [vmem:[#allocation9 + $0x110] sm:$0xff]   ;;  %v1797_v54 = vsel %vm1317_vm4, %v1794_v14, %v1796_v7  ;;  %v23404_v3 = vld [vmem:[%s22885_s20 + $0x98] ss:$0 sps:$4 sm:$0x11]   ;;  %v23435_v14 = vld [vmem:[%s22885_s20 + $0x90] sm:$0xff]  }
 0x21e   : > { %19629 = vmatprep.subr.bf16.mxu0 %v21761_v28  ;;  %v3555_v15 = vrot.slane %v3553_v35, 2  ;;  %v23406_v34 = vld [vmem:[#allocation6 + $0x40] sm:$0xff]   ;;  %v1816_v17 = vrot.slane %v23404_v3, 1  ;;  %v2245_v30 = vshrl.u32 %v23413_v38, 16 }
 0x21f   : > { %v1791_v6 = vsel %vm1317_vm4, %v1788_v20, %v1790_v36  ;;  %v1793_v40 = vsel %vm1317_vm4, %v1790_v36, %v1792_v50  ;;  %v23409_v36 = vld [vmem:[%s22885_s20 + $0x70] sm:$0xff]   ;;  %v3875_v50 = vrot.slane %v22078_v52, 3  ;;  %v23430_v35 = vld [vmem:[%s22885_s20 + $0x88] sm:$0xff]  }
 0x221   : > { %19630 = vmatpush3.bf16.msra.mxu0 %v21761_v28  ;;  %v1789_v28 = vsel %vm1317_vm4, %v1786_v8, %v1788_v20  ;;  %v3863_v8 = vrot.slane %v22066_v11, 3  ;;  %v22071_v20 = vld [vmem:[%s22885_s20 + $0x60] sm:$0xff]  }
 0x222   : > { %v1802_v19 = vrot.slane %v22071_v20, 1 }
 0x223   : > { %19352 = vmatmul.mubr.bf16.gmra.mrb[32].mxu1 %v1354_v45  ;;  %v3558_v45 = vrot.slane %v3556_v57, 3  ;;  %v1812_v57 = vrot.slane %v23430_v35, 1 }
 0x224   : > { %19596 = vmatmul.mubr.bf16.gmra.mrb[16].mxu0 %v3488_v4  ;;  %19371 = vmatprep.mubr.bf16.mxu1 %v1783_v47  ;;  %v22062_v47 = vld [vmem:[%s22885_s20 + $0x14] sm:$0xf] }
 0x225   : > { %19599 = vmatprep.mubr.bf16.mxu0 %v3497_v23  ;;  %v18104_v23 = vcombine.low %v3840_v25, %v22062_v47  ;;  %v3559_v49 = vor.u32 %v3558_v45, %v3555_v15  ;;  %v22082_v25 = vld [vmem:[%s22885_s20 + $0x58] sm:$0xff]   ;;  %v2227_v47 = vshrl.u32 %v22072_v27, 16 }
 0x227   : > { %v3862_v10 = vrot.slane %v18104_v23, 3  ;;  %v2230_v23 = vshll.u32 %v22072_v27, 16 }
 0x229   : > { %v3864_v26 = vsel %vm3861_vm5, %v3862_v10, %v3863_v8 }
 0x22b   : > { %19372 = vmatmul.mubr.bf16.vlgmr.msra.gmra.mrb[0].mxu1 %v1785_v9  ;;  %v1799_v9 = vsel %vm1317_vm4, %v1796_v7, %v1798_v1 }
 0x22c   : > { %19600 = vmatmul.mubr.bf16.gmra.mrb[20].mxu0 %v3506_v63  ;;  %20611 = vmatpush3.bf16.msra.mxu1 %v23311_v43  ;;  %v3546_v43 = vrot.slane %v3544_v21, 2  ;;  %v22069_v63 = vld [vmem:[%s22885_s20 + $0x58] sm:$0xff]   ;;  %v1804_v21 = vrot.slane %v22072_v27, 1 }
 0x22d   : > { %19375 = vmatprep.mubr.bf16.mxu1 %v1787_v12  ;;  %19603 = vmatprep.mubr.bf16.mxu0 %v3515_v58  ;;  %v1800_v12 = vrot.slane %v22069_v63, 1  ;;  %v22070_v58 = vld [vmem:[%s22885_s20 + $0x20] sm:$0xff]   ;;  %v2209_v15 = vshrl.u32 %v22069_v63, 16  ;;  %v2212_v45 = vshll.u32 %v22069_v63, 16  ;;  %v2236_v63 = vshrl.u32 %v23409_v36, 16 }
 0x22e   : > { %20604 = vmatprep.subr.bf16.mxu1 %v22057_v39  ;;  %v3550_v0 = vor.u32 %v3549_v18, %v3546_v43  ;;  %v3865_v41 = vrot.slane %v22070_v58, 3  ;;  %v23419_v18 = vld [vmem:[%s22885_s20 + $0x80] sm:$0xff]   ;;  %v23453_v58 = vld [vmem:[%s22885_s20 + $0x78] sm:$0xff]  }
 0x22f   : > { %v1801_v60 = vsel %vm1317_vm4, %v1798_v1, %v1800_v12  ;;  %v22083_v1 = vld [vmem:[%s22885_s20 + $0x60] sm:$0xff]  }
 0x230   : > { %20612 = vmatpush3.bf16.msra.mxu1 %v22057_v39  ;;  %v3551_v4 = vsel %vm3390_vm3, %v3541_v59, %v3550_v0  ;;  %v3560_v16 = vsel %vm3390_vm3, %v3550_v0, %v3559_v49  ;;  %v1806_v39 = vrot.slane %v23409_v36, 1  ;;  %v22080_v59 = vld [vmem:[%s22885_s20 + $0x50] sm:$0xff]   ;;  %v1814_v0 = vrot.slane %v23435_v14, 1 }
 0x231   : > { %20605 = vmatprep.subr.bf16.mxu1 %v22058_v24  ;;  %v3877_v53 = vrot.slane %v22080_v59, 3  ;;  %v2211_v49 = vrot.slane %v2209_v15, 1  ;;  %v3881_v10 = vrot.slane %v22083_v1, 3  ;;  %v2254_v59 = vshrl.u32 %v23419_v18, 16 }
 0x232   : > { %v2272_v1 = vshrl.u32 %v23435_v14, 16 }
 0x233   : > { %19376 = vmatmul.mubr.bf16.gmra.mrb[4].mxu1 %v1789_v28  ;;  %v22076_v28 = vld [vmem:[%s22885_s20 + $0x40] sm:$0xff]  }
 0x234   : > { %19604 = vmatmul.mubr.bf16.gmra.mrb[24].mxu0 %v3524_v13  ;;  %19379 = vmatprep.mubr.bf16.mxu1 %v1791_v6  ;;  %v3873_v43 = vrot.slane %v22076_v28, 3  ;;  %v1810_v13 = vrot.slane %v23419_v18, 1  ;;  %v3866_v6 = vsel %vm3861_vm5, %v3863_v8, %v3865_v41 }
 0x235   : > { %19607 = vmatprep.mubr.bf16.mxu0 %v3533_v46  ;;  %20613 = vmatpush3.bf16.msra.mxu1 %v22058_v24  ;;  %v1803_v24 = vsel %vm1317_vm4, %v1800_v12, %v1802_v19  ;;  %v3868_v46 = vsel %vm3861_vm5, %v3865_v41, %v3867_v33  ;;  %v2200_v33 = vshrl.u32 %v23391_v55, 16  ;;  %v2239_v12 = vshll.u32 %v23409_v36, 16 }
 0x236   : > { %20606 = vmatprep.subr.bf16.mxu1 %v22061_v2  ;;  %v3887_v41 = vrot.slane %v23453_v58, 3  ;;  %v1813_v27 = vsel %vm1317_vm4, %v1810_v13, %v1812_v57 }
 0x237   : > { %v2202_v62 = vrot.slane %v2200_v33, 1  ;;  %v22087_v33 = vld [vmem:[%s22885_s20 + $0x80] sm:$0xff]  }
 0x239   : > { %20614 = vmatpush3.bf16.msra.mxu1 %v22061_v2  ;;  %v2203_v2 = vshll.u32 %v23391_v55, 16  ;;  %v2214_v55 = vrot.slane %v2212_v45, 2  ;;  %v2247_v45 = vrot.slane %v2245_v30, 1  ;;  %v23504_v30 = vld [vmem:[%s22885_s20 + $0x8] sm:$0xff]  }
 0x23a   : > { %20607 = vmatprep.subr.bf16.mxu1 %v22063_v5 }
 0x23b   : > { %19380 = vmatmul.mubr.bf16.gmra.mrb[8].mxu1 %v1793_v40  ;;  %v3879_v40 = vrot.slane %v22082_v25, 3  ;;  %v2205_v7 = vrot.slane %v2203_v2, 2  ;;  %v3889_v2 = vrot.slane %v22087_v33, 3  ;;  %v22088_v25 = vld [vmem:[%s22885_s20 + $0x88] sm:$0xff]  }
 0x23c   : > { %19608 = vmatmul.mubr.bf16.gmra.mrb[28].mxu0 %v3542_v48  ;;  %19383 = vmatprep.mubr.bf16.mxu1 %v1795_v32  ;;  %v2218_v48 = vshrl.u32 %v22071_v20, 16  ;;  %v2221_v32 = vshll.u32 %v22071_v20, 16  ;;  %v1811_v20 = vsel %vm1317_vm4, %v1808_v44, %v1810_v13  ;;  %v2241_v13 = vrot.slane %v2239_v12, 2 }
 0x23d   : > { %19611 = vmatprep.mubr.bf16.mxu0 %v3551_v4  ;;  %20615 = vmatpush3.bf16.msra.mxu1 %v22063_v5  ;;  %v1805_v4 = vsel %vm1317_vm4, %v1802_v19, %v1804_v21  ;;  %v1807_v5 = vsel %vm1317_vm4, %v1804_v21, %v1806_v39  ;;  %v3876_v19 = vsel %vm3861_vm5, %v3873_v43, %v3875_v50  ;;  %v2274_v12 = vrot.slane %v2272_v1, 1 }
 0x23e   : > { %20608 = vmatprep.subr.bf16.mxu1 %v22067_v51  ;;  %v2220_v11 = vrot.slane %v2218_v48, 1  ;;  %v2223_v8 = vrot.slane %v2221_v32, 2  ;;  %v3878_v21 = vsel %vm3861_vm5, %v3875_v50, %v3877_v53  ;;  %v3880_v3 = vsel %vm3861_vm5, %v3877_v53, %v3879_v40  ;;  %v21766_v50 = vld [vmem:[#allocation6 + $0x50] sm:$0xff]   ;;  %v21767_v32 = vld [vmem:[#allocation6 + $0x58] sm:$0xff]  }
 0x23f   : > { %v2206_v36 = vor.u32 %v2205_v7, %v2202_v62  ;;  %v2257_v53 = vshll.u32 %v23419_v18, 16  ;;  %v2263_v62 = vshrl.u32 %v23430_v35, 16  ;;  %v2266_v7 = vshll.u32 %v23430_v35, 16 }
 0x241   : > { %20616 = vmatpush3.bf16.msra.mxu1 %v22067_v51  ;;  %v2229_v51 = vrot.slane %v2227_v47, 1  ;;  %v3890_v47 = vsel %vm3861_vm5, %v3887_v41, %v3889_v2  ;;  %v2265_v35 = vrot.slane %v2263_v62, 1 }
 0x242   : > { %20609 = vmatprep.subr.bf16.mxu1 %v22068_v56 }
 0x243   : > { %19384 = vmatmul.mubr.bf16.gmra.mrb[12].mxu1 %v1797_v54  ;;  %v22084_v54 = vld [vmem:[%s22885_s20 + $0x68] sm:$0xff]  }
 0x244   : > { %19612 = vmatmul.mubr.bf16.gmra.mrb[32].mxu0 %v3560_v16  ;;  %19387 = vmatprep.mubr.bf16.mxu1 %v1799_v9  ;;  %v3883_v16 = vrot.slane %v22084_v54, 3  ;;  %v2232_v9 = vrot.slane %v2230_v23, 2  ;;  %v23492_v54 = vld [vmem:[%s22885_s20 + $0x4] sm:$0xf] }
 0x245   : > { %19631 = vmatprep.mubr.bf16.mxu0 %v3864_v26  ;;  %20617 = vmatpush3.bf16.msra.mxu1 %v22068_v56  ;;  %v22085_v26 = vld [vmem:[%s22885_s20 + $0x70] sm:$0xff]  }
 0x246   : > { %20610 = vmatprep.subr.bf16.mxu1 %v22073_v31  ;;  %v3885_v56 = vrot.slane %v22085_v26, 3  ;;  %v3884_v28 = vsel %vm3861_vm5, %v3881_v10, %v3883_v16 }
 0x249   : > { %20618 = vmatpush3.bf16.msra.mxu1 %v22073_v31  ;;  %v1815_v31 = vsel %vm1317_vm4, %v1812_v57, %v1814_v0  ;;  %v3888_v57 = vsel %vm3861_vm5, %v3885_v56, %v3887_v41 }
 0x24a   : > { %19667 = vmatprep.subr.bf16.mxu1 %v23406_v34 }
 0x24b   : > { %19388 = vmatmul.mubr.bf16.gmra.mrb[16].mxu1 %v1801_v60  ;;  %v3882_v60 = vsel %vm3861_vm5, %v3879_v40, %v3881_v10  ;;  %v3891_v40 = vrot.slane %v22088_v25, 3  ;;  %v2275_v10 = vshll.u32 %v23435_v14, 16 }
 0x24c   : > { %19632 = vmatmul.mubr.bf16.vlgmr.msra.gmra.mrb[0].mxu0 %v3866_v6  ;;  %19391 = vmatprep.mubr.bf16.mxu1 %v1803_v24  ;;  %v2215_v6 = vor.u32 %v2214_v55, %v2211_v49  ;;  %v21765_v24 = vld [vmem:[#allocation6 + $0x48] sm:$0xff]   ;;  %v21768_v49 = vld [vmem:[#allocation6 + $0x60] sm:$0xff]  }
 0x24d   : > { %19635 = vmatprep.mubr.bf16.mxu0 %v3868_v46  ;;  %v3892_v23 = vsel %vm3861_vm5, %v3889_v2, %v3891_v40  ;;  %v2277_v14 = vrot.slane %v2275_v10, 2 }
 0x24e   : > { %v2216_v46 = vsel %vm2118_vm1, %v2206_v36, %v2215_v6 }
 0x253   : > { %19392 = vmatmul.mubr.bf16.gmra.mrb[20].mxu1 %v1805_v4  ;;  %v2259_v4 = vrot.slane %v2257_v53, 2 }
 0x254   : > { %19636 = vmatmul.mubr.bf16.gmra.mrb[4].mxu0 %v23234_v22  ;;  %19395 = vmatprep.mubr.bf16.mxu1 %v1807_v5  ;;  %v1809_v22 = vsel %vm1317_vm4, %v1806_v39, %v1808_v44  ;;  %v1817_v39 = vsel %vm1317_vm4, %v1814_v0, %v1816_v17  ;;  %v2207_v44 = vsel %vm2118_vm1, %v23024_v37, %v2206_v36  ;;  %v3897_v36 = vrot.slane %v23373_v61, 3 }
 0x255   : > { %19639 = vmatprep.mubr.bf16.mxu0 %v23242_v29  ;;  %v3874_v29 = vsel %vm3861_vm5, %v3871_v42, %v3873_v43  ;;  %v2248_v42 = vshll.u32 %v23413_v38, 16  ;;  %v2238_v43 = vrot.slane %v2236_v63, 1  ;;  %v2224_v38 = vor.u32 %v2223_v8, %v2220_v11  ;;  %v22089_v11 = vld [vmem:[%s22885_s20 + $0x90] sm:$0xff]  }
 0x256   : > { %v3886_v37 = vsel %vm3861_vm5, %v3883_v16, %v3885_v56  ;;  %v2233_v0 = vor.u32 %v2232_v9, %v2229_v51  ;;  %v3893_v8 = vrot.slane %v22089_v11, 3  ;;  %v5548_v51 = vld [vmem:[%s22885_s20] sm:$0xf]  ;;  %v22090_v16 = vld [vmem:[%s22885_s20 + $0x98] sm:$0xff]   ;;  %v2268_v56 = vrot.slane %v2266_v7, 2 }
 0x257   : > { %v2225_v52 = vsel %vm2118_vm1, %v2215_v6, %v2224_v38  ;;  %v2242_v17 = vor.u32 %v2241_v13, %v2238_v43  ;;  %v2250_v48 = vrot.slane %v2248_v42, 2  ;;  %v3895_v9 = vrot.slane %v22090_v16, 3  ;;  %v21771_v43 = vld [vmem:[#allocation6 + $0x78] sm:$0xff]   ;;  %v21781_v11 = vld [vmem:[#allocation6 + $0x10] sm:$0xff]  }
 0x258   : > { %v2234_v15 = vsel %vm2118_vm1, %v2224_v38, %v2233_v0  ;;  %v23498_v58 = vcombine.low %v5548_v51, %v23492_v54  ;;  %v3894_v41 = vsel %vm3861_vm5, %v3891_v40, %v3893_v8  ;;  %v5719_v38 = vshll.u32 %v23504_v30, 16  ;;  %v23526_v40 = vld [vmem:[%s22885_s20 + $0x20] sm:$0xff]  }
 0x259   : > { %v2243_v18 = vsel %vm2118_vm1, %v2233_v0, %v2242_v17  ;;  %v2251_v5 = vor.u32 %v2250_v48, %v2247_v45  ;;  %v5723_v0 = vshrl.u32 %v23504_v30, 16 }
 0x25a   : > { %v5714_v42 = vshll.u32 %v23498_v58, 16  ;;  %v5712_v13 = vshrl.u32 %v23498_v58, 16 }
 0x25b   : > { %19396 = vmatmul.mubr.bf16.gmra.mrb[24].mxu1 %v1809_v22  ;;  %v2252_v26 = vsel %vm2118_vm1, %v2242_v17, %v2251_v5  ;;  %v21769_v22 = vld [vmem:[#allocation6 + $0x68] sm:$0xff]  }
 0x25c   : > { %19640 = vmatmul.mubr.bf16.gmra.mrb[8].mxu0 %v3874_v29  ;;  %19399 = vmatprep.mubr.bf16.mxu1 %v1811_v20  ;;  %v3896_v29 = vsel %vm3861_vm5, %v3893_v8, %v3895_v9  ;;  %v2269_v20 = vor.u32 %v2268_v56, %v2265_v35  ;;  %v5716_v6 = vrot.slane %v5714_v42, 1  ;;  %v23541_v8 = vld [vmem:[%s22885_s20 + $0x38] sm:$0xff]  }
 0x25d   : > { %19643 = vmatprep.mubr.bf16.mxu0 %v3876_v19  ;;  %v22091_v19 = vld [vmem:[%s22885_s20 + $0x98] ss:$0 sps:$4 sm:$0x33]   ;;  %v5767_v56 = vshll.u32 %v23541_v8, 16 }
 0x263   : > { %19400 = vmatmul.mubr.bf16.gmra.mrb[28].mxu1 %v1813_v27  ;;  %v2281_v27 = vshrl.u32 %v22091_v19, 16 }
 0x264   : > { %19644 = vmatmul.mubr.bf16.gmra.mrb[12].mxu0 %v3878_v21  ;;  %19403 = vmatprep.mubr.bf16.mxu1 %v1815_v31  ;;  %v2284_v21 = vshll.u32 %v22091_v19, 16  ;;  %v21770_v31 = vld [vmem:[#allocation6 + $0x70] sm:$0xff]   ;;  %v21787_v19 = vld [vmem:[#allocation6 + $0x20] sm:$0xff]  }
 0x265   : > { %19647 = vmatprep.mubr.bf16.mxu0 %v3880_v3  ;;  %v2278_v3 = vor.u32 %v2277_v14, %v2274_v12  ;;  %v23550_v12 = vld [vmem:[%s22885_s20 + $0x40] sm:$0xff]  }
 0x266   : > { %v5779_v42 = vshrl.u32 %v23550_v12, 16 }
 0x26b   : > { %19404 = vmatmul.mubr.bf16.gmra.mrb[32].mxu1 %v1817_v39 }
 0x26c   : > { %19439 = vmatprep.mubr.bf16.mxu1 %v2207_v44  ;;  %19648 = vmatmul.mubr.bf16.gmra.mrb[16].mxu0 %v3882_v60  ;;  %v2283_v44 = vrot.slane %v2281_v27, 1  ;;  %v2286_v60 = vrot.slane %v2284_v21, 2  ;;  %v5775_v27 = vshll.u32 %v23550_v12, 16 }
 0x26d   : > { %19651 = vmatprep.mubr.bf16.mxu0 %v3884_v28  ;;  %v2279_v28 = vsel %vm2118_vm1, %v2269_v20, %v2278_v3 }
 0x26e   : > { %v2287_v61 = vor.u32 %v2286_v60, %v2283_v44  ;;  %v5777_v44 = vrot.slane %v5775_v27, 1  ;;  %v23562_v60 = vld [vmem:[%s22885_s20 + $0x50] sm:$0xff]  }
 0x270   : > { %v2288_v53 = vsel %vm2118_vm1, %v2278_v3, %v2287_v61 }
 0x273   : > { %19440 = vmatmul.mubr.bf16.vlgmr.msra.gmra.mrb[16].mxu1 %v2216_v46  ;;  %v23514_v46 = vld [vmem:[%s22885_s20 + $0x10] sm:$0xff]  }
 0x274   : > { %19668 = vmatpush3.bf16.msra.mxu1 %v23406_v34  ;;  %19443 = vmatprep.mubr.bf16.mxu1 %v2225_v52  ;;  %v2256_v34 = vrot.slane %v2254_v59, 1  ;;  %v5717_v52 = vor.u32 %v5716_v6, %v5712_v13  ;;  %v5727_v59 = vshll.u32 %v23514_v46, 16  ;;  %v5731_v33 = vshrl.u32 %v23514_v46, 16  ;;  %v23565_v6 = vld [vmem:[%s22885_s20 + $0x58] sm:$0xff]  }
 0x275   : > { %19669 = vmatprep.subr.bf16.mxu1 %v21765_v24  ;;  %19652 = vmatmul.mubr.bf16.gmra.mrb[20].mxu0 %v3886_v37  ;;  %v5721_v37 = vrot.slane %v5719_v38, 1  ;;  %v21793_v38 = vld [vmem:[#allocation6 + $0x30] sm:$0xff]  }
 0x276   : > { %19655 = vmatprep.mubr.bf16.mxu0 %v3888_v57  ;;  %v2260_v55 = vor.u32 %v2259_v4, %v2256_v34  ;;  %v23517_v57 = vld [vmem:[%s22885_s20 + $0x18] sm:$0xff]   ;;  %v5729_v25 = vrot.slane %v5727_v59, 1  ;;  %v5799_v59 = vshll.u32 %v23565_v6, 16 }
 0x277   : > { %v5722_v17 = vsel %vm661_vm0, %v5717_v52, %v5721_v37  ;;  %v5735_v2 = vshll.u32 %v23517_v57, 16  ;;  %v5739_v4 = vshrl.u32 %v23517_v57, 16 }
 0x278   : > { %19670 = vmatpush3.bf16.msra.mxu1 %v21765_v24  ;;  %v2261_v63 = vsel %vm2118_vm1, %v2251_v5, %v2260_v55  ;;  %v2270_v39 = vsel %vm2118_vm1, %v2260_v55, %v2269_v20  ;;  %v3898_v24 = vsel %vm3861_vm5, %v3895_v9, %v3897_v36  ;;  %v5733_v45 = vor.u32 %v5731_v33, %v5729_v25  ;;  %v23553_v20 = vld [vmem:[%s22885_s20 + $0x48] sm:$0xff]  }
 0x279   : > { %19671 = vmatprep.subr.bf16.mxu1 %v21766_v50  ;;  %v5737_v48 = vrot.slane %v5735_v2, 1  ;;  %v5747_v5 = vshrl.u32 %v23526_v40, 16  ;;  %v5783_v36 = vshll.u32 %v23553_v20, 16  ;;  %v5787_v52 = vshrl.u32 %v23553_v20, 16 }
 0x27b   : > { %19444 = vmatmul.mubr.bf16.gmra.mrb[20].mxu1 %v2234_v15  ;;  %v5725_v15 = vor.u32 %v5723_v0, %v5721_v37  ;;  %v5741_v55 = vor.u32 %v5739_v4, %v5737_v48  ;;  %v5785_v13 = vrot.slane %v5783_v36, 1 }
 0x27c   : > { %19672 = vmatpush3.bf16.msra.mxu1 %v21766_v50  ;;  %19447 = vmatprep.mubr.bf16.mxu1 %v2243_v18  ;;  %v21775_v50 = vld [vmem:[#allocation6] sm:$0xff]  }
 0x27d   : > { %19673 = vmatprep.subr.bf16.mxu1 %v21767_v32  ;;  %19656 = vmatmul.mubr.bf16.gmra.mrb[24].mxu0 %v3890_v47  ;;  %v23529_v18 = vld [vmem:[%s22885_s20 + $0x28] sm:$0xff]   ;;  %v5730_v34 = vsel %vm661_vm0, %v5725_v15, %v5729_v25  ;;  %v5738_v47 = vsel %vm661_vm0, %v5733_v45, %v5737_v48  ;;  %v5789_v33 = vor.u32 %v5787_v52, %v5785_v13  ;;  %v5801_v25 = vrot.slane %v5799_v59, 1  ;;  %v21800_v59 = vld [vmem:[#allocation6 + $0x88] sm:$0xff]  }
 0x27e   : > { %19659 = vmatprep.mubr.bf16.mxu0 %v3892_v23  ;;  %v21778_v23 = vld [vmem:[#allocation6 + $0x8] sm:$0xff]   ;;  %v5751_v62 = vshll.u32 %v23529_v18, 16  ;;  %v5755_v9 = vshrl.u32 %v23529_v18, 16  ;;  %v23577_v15 = vld [vmem:[%s22885_s20 + $0x68] sm:$0xff]  }
 0x27f   : > { %v21799_v45 = vld [vmem:[#allocation6 + $0x80] sm:$0xff]  }
 0x280   : > { %19674 = vmatpush3.bf16.msra.mxu1 %v21767_v32  ;;  %v5743_v32 = vshll.u32 %v23526_v40, 16  ;;  %v5753_v10 = vrot.slane %v5751_v62, 1  ;;  %v23586_v62 = vld [vmem:[%s22885_s20 + $0x70] sm:$0xff]  }
 0x281   : > { %19675 = vmatprep.subr.bf16.mxu1 %v21768_v49 }
 0x282   : > { %v5745_v7 = vrot.slane %v5743_v32, 1  ;;  %v5757_v14 = vor.u32 %v5755_v9, %v5753_v10 }
 0x283   : > { %19448 = vmatmul.mubr.bf16.gmra.mrb[24].mxu1 %v2252_v26 }
 0x284   : > { %19676 = vmatpush3.bf16.msra.mxu1 %v21768_v49  ;;  %19451 = vmatprep.mubr.bf16.mxu1 %v2261_v63  ;;  %v23538_v49 = vld [vmem:[%s22885_s20 + $0x30] sm:$0xff]   ;;  %v5749_v1 = vor.u32 %v5747_v5, %v5745_v7  ;;  %v5746_v16 = vsel %vm661_vm0, %v5741_v55, %v5745_v7 }
 0x285   : > { %19660 = vmatmul.mubr.bf16.gmra.mrb[28].mxu0 %v3894_v41  ;;  %19677 = vmatprep.subr.bf16.mxu1 %v21769_v22  ;;  %v5759_v51 = vshll.u32 %v23538_v49, 16  ;;  %v5763_v35 = vshrl.u32 %v23538_v49, 16  ;;  %v21784_v63 = vld [vmem:[#allocation6 + $0x18] sm:$0xff]  }
 0x286   : > { %19663 = vmatprep.mubr.bf16.mxu0 %v3896_v29  ;;  %v5754_v26 = vsel %vm661_vm0, %v5749_v1, %v5753_v10  ;;  %v5769_v29 = vrot.slane %v5767_v56, 1  ;;  %v23589_v10 = vld [vmem:[%s22885_s20 + $0x78] sm:$0xff]  }
 0x288   : > { %19678 = vmatpush3.bf16.msra.mxu1 %v21769_v22  ;;  %v5761_v22 = vrot.slane %v5759_v51, 1 }
 0x289   : > { %19679 = vmatprep.subr.bf16.mxu1 %v21770_v31 }
 0x28a   : > { %v5765_v41 = vor.u32 %v5763_v35, %v5761_v22  ;;  %v5762_v21 = vsel %vm661_vm0, %v5757_v14, %v5761_v22  ;;  %v5831_v35 = vshll.u32 %v23589_v10, 16 }
 0x28b   : > { %19452 = vmatmul.mubr.bf16.gmra.mrb[28].mxu1 %v2270_v39  ;;  %v21790_v39 = vld [vmem:[#allocation6 + $0x28] sm:$0xff]  }
 0x28c   : > { %19455 = vmatprep.mubr.bf16.mxu1 %v2279_v28  ;;  %19680 = vmatpush3.bf16.msra.mxu1 %v21770_v31  ;;  %v5771_v31 = vshrl.u32 %v23541_v8, 16  ;;  %v5770_v3 = vsel %vm661_vm0, %v5765_v41, %v5769_v29  ;;  %v5833_v41 = vrot.slane %v5831_v35, 1  ;;  %v4340_v35 = vlaneseq }
 0x28d   : > { %19664 = vmatmul.mubr.bf16.gmra.mrb[32].mxu0 %v3898_v24  ;;  %19681 = vmatprep.subr.bf16.mxu1 %v21771_v43  ;;  %v5791_v24 = vshll.u32 %v23562_v60, 16 }
 0x28e   : > { %v5773_v28 = vor.u32 %v5771_v31, %v5769_v29  ;;  %v23601_v29 = vld [vmem:[%s22885_s20 + $0x88] sm:$0xff]  }
 0x28f   : > { %v5793_v0 = vrot.slane %v5791_v24, 1 }
 0x290   : > { %19682 = vmatpush3.bf16.msra.mxu1 %v21771_v43  ;;  %v5781_v43 = vor.u32 %v5779_v42, %v5777_v44  ;;  %v5778_v61 = vsel %vm661_vm0, %v5773_v28, %v5777_v44  ;;  %v5847_v42 = vshll.u32 %v23601_v29, 16  ;;  %v23610_v44 = vld [vmem:[%s22885_s20 + $0x90] ss:$0 sps:$4 sm:$0x11]  }
 0x291   : > { %19719 = vmatprep.subr.bf16.mxu1 %v21775_v50  ;;  %v5794_v32 = vsel %vm661_vm0, %v5789_v33, %v5793_v0  ;;  %v5855_v24 = vshll.u32 %v23610_v44, 16  ;;  %v21803_v33 = vld [vmem:[#allocation6 + $0xa0] sm:$0xff]  }
 0x292   : > { %v5786_v37 = vsel %vm661_vm0, %v5781_v43, %v5785_v13  ;;  %v5849_v43 = vrot.slane %v5847_v42, 1  ;;  %v6371_v42 = vrot.slane %v23517_v57, 1 }
 0x293   : > { %19456 = vmatmul.mubr.bf16.gmra.mrb[32].mxu1 %v2288_v53  ;;  %v21797_v53 = vld [vmem:[#allocation6 + $0x38] sm:$0xff]  }
 0x294   : > { %19683 = vmatprep.mubr.bf16.mxu1 %v5722_v17  ;;  %v23574_v17 = vld [vmem:[%s22885_s20 + $0x60] sm:$0xff]  }
 0x295   : > { %v5807_v48 = vshll.u32 %v23574_v17, 16 }
 0x297   : > { %v5809_v5 = vrot.slane %v5807_v48, 1 }
 0x29b   : > { %19684 = vmatmul.mubr.bf16.vlgmr.msra.gmra.mrb[36].mxu1 %v5730_v34  ;;  %v5803_v34 = vshrl.u32 %v23565_v6, 16 }
 0x29c   : > { %19720 = vmatpush3.bf16.msra.mxu1 %v21775_v50  ;;  %19687 = vmatprep.mubr.bf16.mxu1 %v5738_v47  ;;  %v5795_v50 = vshrl.u32 %v23562_v60, 16  ;;  %v5811_v47 = vshrl.u32 %v23574_v17, 16 }
 0x29d   : > { %19721 = vmatprep.subr.bf16.mxu1 %v21778_v23  ;;  %v5805_v7 = vor.u32 %v5803_v34, %v5801_v25 }
 0x29e   : > { %v5797_v2 = vor.u32 %v5795_v50, %v5793_v0  ;;  %v5813_v55 = vor.u32 %v5811_v47, %v5809_v5  ;;  %v21802_v0 = vld [vmem:[#allocation6 + $0x98] sm:$0xff]  }
 0x29f   : > { %v5810_v51 = vsel %vm661_vm0, %v5805_v7, %v5809_v5 }
 0x2a0   : > { %19722 = vmatpush3.bf16.msra.mxu1 %v21778_v23  ;;  %v5802_v4 = vsel %vm661_vm0, %v5797_v2, %v5801_v25  ;;  %v5815_v23 = vshll.u32 %v23577_v15, 16  ;;  %v21805_v2 = vld [vmem:[#allocation6 + $0xb0] sm:$0xff]   ;;  %v21806_v25 = vld [vmem:[#allocation6 + $0xb8] sm:$0xff]  }
 0x2a1   : > { %19723 = vmatprep.subr.bf16.mxu1 %v21781_v11 }
 0x2a2   : > { %v5817_v1 = vrot.slane %v5815_v23, 1 }
 0x2a3   : > { %19688 = vmatmul.mubr.bf16.gmra.mrb[40].mxu1 %v5746_v16  ;;  %v5819_v16 = vshrl.u32 %v23577_v15, 16 }
 0x2a4   : > { %19691 = vmatprep.mubr.bf16.mxu1 %v5754_v26  ;;  %19724 = vmatpush3.bf16.msra.mxu1 %v21781_v11  ;;  %v5823_v11 = vshll.u32 %v23586_v62, 16  ;;  %v5818_v9 = vsel %vm661_vm0, %v5813_v55, %v5817_v1  ;;  %v5827_v26 = vshrl.u32 %v23586_v62, 16 }
 0x2a5   : > { %19725 = vmatprep.subr.bf16.mxu1 %v21784_v63  ;;  %v5821_v22 = vor.u32 %v5819_v16, %v5817_v1 }
 0x2a6   : > { %v5825_v56 = vrot.slane %v5823_v11, 1 }
 0x2a8   : > { %19726 = vmatpush3.bf16.msra.mxu1 %v21784_v63  ;;  %v23598_v63 = vld [vmem:[%s22885_s20 + $0x80] sm:$0xff]   ;;  %v5829_v14 = vor.u32 %v5827_v26, %v5825_v56  ;;  %v5826_v27 = vsel %vm661_vm0, %v5821_v22, %v5825_v56 }
 0x2a9   : > { %19727 = vmatprep.subr.bf16.mxu1 %v21787_v19 }
 0x2aa   : > { %v5834_v31 = vsel %vm661_vm0, %v5829_v14, %v5833_v41 }
 0x2ab   : > { %19692 = vmatmul.mubr.bf16.gmra.mrb[44].mxu1 %v5762_v21  ;;  %v5835_v21 = vshrl.u32 %v23589_v10, 16 }
 0x2ac   : > { %19695 = vmatprep.mubr.bf16.mxu1 %v5770_v3  ;;  %19728 = vmatpush3.bf16.msra.mxu1 %v21787_v19  ;;  %v5839_v19 = vshll.u32 %v23598_v63, 16  ;;  %v5843_v3 = vshrl.u32 %v23598_v63, 16 }
 0x2ad   : > { %19729 = vmatprep.subr.bf16.mxu1 %v21790_v39 }
 0x2ae   : > { %v5841_v36 = vrot.slane %v5839_v19, 1  ;;  %v4341_v19 = vshrl.u32 %v4340_v35, 7  ;;  %v6397_v35 = vrot.slane %v23598_v63, 1 }
 0x2b0   : > { %19730 = vmatpush3.bf16.msra.mxu1 %v21790_v39  ;;  %v5837_v39 = vor.u32 %v5835_v21, %v5833_v41  ;;  %v5845_v28 = vor.u32 %v5843_v3, %v5841_v36  ;;  %v6367_v21 = vrot.slane %v23504_v30, 1  ;;  %v6369_v3 = vrot.slane %v23514_v46, 1 }
 0x2b1   : > { %19731 = vmatprep.subr.bf16.mxu1 %v21793_v38 }
 0x2b2   : > { %v5842_v13 = vsel %vm661_vm0, %v5837_v39, %v5841_v36  ;;  %v6375_v36 = vrot.slane %v23529_v18, 1 }
 0x2b3   : > { %19696 = vmatmul.mubr.bf16.gmra.mrb[48].mxu1 %v5778_v61  ;;  %v5850_v61 = vsel %vm661_vm0, %v5845_v28, %v5849_v43  ;;  %v6377_v28 = vrot.slane %v23538_v49, 1 }
 0x2b4   : > { %19699 = vmatprep.mubr.bf16.mxu1 %v5786_v37  ;;  %19732 = vmatpush3.bf16.msra.mxu1 %v21793_v38  ;;  %v5851_v38 = vshrl.u32 %v23601_v29, 16  ;;  %v5857_v37 = vrot.slane %v5855_v24, 1  ;;  %v6682_v24 = vld [vmem:[%s22885_s20 + $0x8] sm:$0xe] }
 0x2b5   : > { %19733 = vmatprep.subr.bf16.mxu1 %v21797_v53 }
 0x2b6   : > { %v5853_v52 = vor.u32 %v5851_v38, %v5849_v43  ;;  %v6379_v43 = vrot.slane %v23541_v8, 1  ;;  %v6385_v38 = vrot.slane %v23562_v60, 1 }
 0x2b8   : > { %19734 = vmatpush3.bf16.msra.mxu1 %v21797_v53  ;;  %v5858_v50 = vsel %vm661_vm0, %v5853_v52, %v5857_v37  ;;  %v21801_v53 = vld [vmem:[#allocation6 + $0x90] sm:$0xff]   ;;  %v21817_v37 = vld [vmem:[%s22885_s20 + $0x10] sm:$0xff]  }
 0x2b9   : > { %19771 = vmatprep.subr.bf16.mxu1 %v21799_v45 }
 0x2bb   : > { %19700 = vmatmul.mubr.bf16.gmra.mrb[52].mxu1 %v5794_v32 }
 0x2bc   : > { %19703 = vmatprep.mubr.bf16.mxu1 %v5802_v4 }
 0x2c3   : > { %19704 = vmatmul.mubr.bf16.gmra.mrb[56].mxu1 %v5810_v51  ;;  %v6345_v51 = vld [vmem:[%s22885_s20] sm:$0xe] }
 0x2c4   : > { %19707 = vmatprep.mubr.bf16.mxu1 %v5818_v9  ;;  %v22504_v9 = vmov 1983009808   ;;  %v18150_v56 = vcombine.low %v6345_v51, %v23492_v54  ;;  %v6373_v54 = vrot.slane %v23526_v40, 1 }
 0x2c5   : > { %v4338_v26 = vunpack.c.l.s4 %v22504_v9 }
 0x2c7   : > { %v4339_v41 = vunpack.c.0.s8 %v4338_v26  ;;  %v6395_v26 = vrot.slane %v23589_v10, 1 }
 0x2cb   : > { %19708 = vmatmul.mubr.bf16.gmra.mrb[60].mxu1 %v5826_v27  ;;  %v6366_v27 = vrot.slane %v18150_v56, 1 }
 0x2cc   : > { %19711 = vmatprep.mubr.bf16.mxu1 %v5834_v31 }
 0x2d3   : > { %19712 = vmatmul.mubr.bf16.gmra.mrb[64].mxu1 %v5842_v13  ;;  %v6381_v13 = vrot.slane %v23550_v12, 1 }
 0x2d4   : > { %19715 = vmatprep.mubr.bf16.mxu1 %v5850_v61  ;;  %v23700_v61 = vsel %vm1317_vm4, %v6373_v54, %v6375_v36 }
 0x2db   : > { %19716 = vmatmul.mubr.bf16.gmra.mrb[68].mxu1 %v5858_v50  ;;  %v21818_v50 = vld [vmem:[%s22885_s20 + $0x18] sm:$0xff]  }
 0x2dc   : > { %19735 = vmatprep.mubr.bf16.mxu1 %v23498_v58  ;;  %v21804_v58 = vld [vmem:[#allocation6 + $0xa8] sm:$0xff]  }
 0x2e3   : > { %19736 = vmatmul.mubr.bf16.vlgmr.msra.gmra.mrb[36].mxu1 %v23504_v30  ;;  %v6383_v30 = vrot.slane %v23553_v20, 1 }
 0x2e4   : > { %19772 = vmatpush3.bf16.msra.mxu1 %v21799_v45  ;;  %19739 = vmatprep.mubr.bf16.mxu1 %v23514_v46  ;;  %v23626_v45 = vld [vmem:[#allocation6 + $0xc0] sm:$0xff]   ;;  %v6387_v46 = vrot.slane %v23565_v6, 1 }
 0x2e5   : > { %19773 = vmatprep.subr.bf16.mxu1 %v21800_v59 }
 0x2e8   : > { %19774 = vmatpush3.bf16.msra.mxu1 %v21800_v59  ;;  %v23713_v59 = vsel %vm1317_vm4, %v6379_v43, %v6381_v13 }
 0x2e9   : > { %19775 = vmatprep.subr.bf16.mxu1 %v21801_v53 }
 0x2eb   : > { %19740 = vmatmul.mubr.bf16.gmra.mrb[40].mxu1 %v23517_v57  ;;  %v6683_v57 = vld [vmem:[%s22885_s20 + $0xc] sm:$0xf] }
 0x2ec   : > { %19743 = vmatprep.mubr.bf16.mxu1 %v23526_v40  ;;  %19776 = vmatpush3.bf16.msra.mxu1 %v21801_v53  ;;  %v23683_v40 = vsub.s32 %v4339_v41, %v4341_v19  ;;  %v23708_v52 = vcombine.low %v6682_v24, %v6683_v57  ;;  %v23716_v53 = vsel %vm1317_vm4, %v6381_v13, %v6383_v30  ;;  %v23761_v24 = vld [vmem:[%s22885_s20 + $0x30] sm:$0xff]  }
 0x2ed   : > { %19777 = vmatprep.subr.bf16.mxu1 %v21802_v0 }
 0x2ee   : > { %26788 = vst [vmem:[#allocation29_spill] sm:$0xff] %v23683_v40 }
 0x2f0   : > { %19778 = vmatpush3.bf16.msra.mxu1 %v21802_v0  ;;  %v23722_v0 = vsel %vm1317_vm4, %v6385_v38, %v6387_v46 }
 0x2f1   : > { %19779 = vmatprep.subr.bf16.mxu1 %v21803_v33 }
 0x2f3   : > { %19744 = vmatmul.mubr.bf16.gmra.mrb[44].mxu1 %v23529_v18  ;;  %v6368_v18 = vsel %vm1317_vm4, %v6366_v27, %v6367_v21  ;;  %v6399_v27 = vrot.slane %v23601_v29, 1 }
 0x2f4   : > { %19747 = vmatprep.mubr.bf16.mxu1 %v23538_v49  ;;  %19780 = vmatpush3.bf16.msra.mxu1 %v21803_v33  ;;  %v6389_v49 = vrot.slane %v23574_v17, 1  ;;  %v21820_v33 = vld [vmem:[%s22885_s20 + $0x20] sm:$0xff]  }
 0x2f5   : > { %19781 = vmatprep.subr.bf16.mxu1 %v21804_v58  ;;  %v6834_v13 = vrot.slane %v21820_v33, 1 }
 0x2f6   : > { %v23731_v51 = vsel %vm1317_vm4, %v6387_v46, %v6389_v49  ;;  %v23758_v46 = vsel %vm1317_vm4, %v6395_v26, %v6397_v35 }
 0x2f8   : > { %19782 = vmatpush3.bf16.msra.mxu1 %v21804_v58  ;;  %v23726_v58 = vld [vmem:[%s22885_s20 + $0x28] sm:$0xff]  }
 0x2f9   : > { %19783 = vmatprep.subr.bf16.mxu1 %v21805_v2 }
 0x2fb   : > { %19748 = vmatmul.mubr.bf16.gmra.mrb[48].mxu1 %v23541_v8  ;;  %v6391_v8 = vrot.slane %v23577_v15, 1 }
 0x2fc   : > { %19751 = vmatprep.mubr.bf16.mxu1 %v23550_v12  ;;  %19784 = vmatpush3.bf16.msra.mxu1 %v21805_v2  ;;  %v23690_v12 = vsel %vm1317_vm4, %v6367_v21, %v6369_v3  ;;  %v6401_v21 = vrot.slane %v23610_v44, 1 }
 0x2fd   : > { %19785 = vmatprep.subr.bf16.mxu1 %v21806_v25  ;;  %v23734_v9 = vsel %vm1317_vm4, %v6389_v49, %v6391_v8  ;;  %v23766_v49 = vsel %vm1317_vm4, %v6397_v35, %v6399_v27 }
 0x2fe   : > { %v23628_v48 = vpop.f32.mrb[0].mxu1 }
 0x2ff   : > { %v23630_v32 = vpop.f32.mrb[1].mxu1 }
 0x300   : > { %v23632_v34 = vpop.f32.mrb[2].mxu1  ;;  %19786 = vmatpush3.bf16.msra.mxu1 %v21806_v25  ;;  %v23728_v25 = vld [vmem:[#allocation17] ss:$0 sm:$0xff] }
 0x301   : > { %v23634_v4 = vpop.f32.mrb[3].mxu1  ;;  %19823 = vmatprep.subr.bf16.mxu1 %v23626_v45 }
 0x303   : > { %19752 = vmatmul.mubr.bf16.gmra.mrb[52].mxu1 %v23553_v20  ;;  %v23693_v20 = vsel %vm1317_vm4, %v6369_v3, %v6371_v42  ;;  %v23744_v3 = vld [vmem:[#allocation18] ss:$0 sm:$0xff] }
 0x304   : > { %19755 = vmatprep.mubr.bf16.mxu1 %v23562_v60  ;;  %v23696_v60 = vsel %vm1317_vm4, %v6371_v42, %v6373_v54 }
 0x306   : > { %v23639_v47 = vpop.f32.mrb[4].mxu1 }
 0x307   : > { %v23641_v23 = vpop.f32.mrb[5].mxu1 }
 0x308   : > { %v23643_v5 = vpop.f32.mrb[6].mxu1 }
 0x309   : > { %v23645_v7 = vpop.f32.mrb[7].mxu1 }
 0x30b   : > { %19756 = vmatmul.mubr.bf16.gmra.mrb[56].mxu1 %v23565_v6  ;;  %v6393_v6 = vrot.slane %v23586_v62, 1 }
 0x30c   : > { %19759 = vmatprep.mubr.bf16.mxu1 %v23574_v17  ;;  %v23703_v17 = vsel %vm1317_vm4, %v6375_v36, %v6377_v28  ;;  %v6830_v36 = vrot.slane %v21817_v37, 1 }
 0x30d   : > { %v23740_v19 = vsel %vm1317_vm4, %v6391_v8, %v6393_v6 }
 0x30e   : > { %v23649_v55 = vpop.f32.mrb[8].mxu1 }
 0x30f   : > { %v23651_v1 = vpop.f32.mrb[9].mxu1 }
 0x310   : > { %v23653_v11 = vpop.f32.mrb[10].mxu1 }
 0x311   : > { %v23656_v16 = vpop.f32.mrb[11].mxu1 }
 0x313   : > { %19760 = vmatmul.mubr.bf16.gmra.mrb[60].mxu1 %v23577_v15  ;;  %v23706_v15 = vsel %vm1317_vm4, %v6377_v28, %v6379_v43 }
 0x314   : > { %19763 = vmatprep.mubr.bf16.mxu1 %v23586_v62  ;;  %v23719_v62 = vsel %vm1317_vm4, %v6383_v30, %v6385_v38  ;;  %v26750_v30 = vrot.slane %v23726_v58, 1 }
 0x316   : > { %v23661_v22 = vpop.f32.mrb[12].mxu1 }
 0x317   : > { %v23663_v14 = vpop.f32.mrb[13].mxu1 }
 0x318   : > { %v23666_v31 = vpop.f32.mrb[14].mxu1 }
 0x319   : > { %v23672_v39 = vpop.f32.mrb[15].mxu1 }
 0x31b   : > { %19764 = vmatmul.mubr.bf16.gmra.mrb[64].mxu1 %v23589_v10  ;;  %v6829_v10 = vrot.slane %v23708_v52, 1 }
 0x31c   : > { %19767 = vmatprep.mubr.bf16.mxu1 %v23598_v63  ;;  %v6832_v63 = vrot.slane %v21818_v50, 1 }
 0x31d   : > { %v23777_v37 = vsel %vm1317_vm4, %v6829_v10, %v6830_v36 }
 0x31e   : > { %v23780_v50 = vsel %vm1317_vm4, %v6830_v36, %v6832_v63 }
 0x31f   : > { %v19633_v2 = vpop.f32.mrb[0].mxu0 }
 0x320   : > { %v20619_v56 = vadd.f32 %v19633_v2, %v23628_v48  ;;  %v3999_v41 = vpop.f32.mrb[1].mxu0  ;;  %v23784_v2 = vsel %vm1317_vm4, %v6832_v63, %v6834_v13 }
 0x321   : > { %v20620_v42 = vadd.f32 %v3999_v41, %v23630_v32  ;;  %v19634_v54 = vpop.f32.mrb[2].mxu0  ;;  %v23755_v32 = vsel %vm1317_vm4, %v6393_v6, %v6395_v26  ;;  %v23789_v26 = vsel %vm1317_vm4, %v6834_v13, %v26750_v30  ;;  %v21810_v30 = vld [vmem:[#allocation6 + $0xd0] sm:$0xff]  }
 0x322   : > { %v4187_v48 = vmul.f32 %v20619_v56, %v23728_v25  ;;  %v20621_v28 = vadd.f32 %v19634_v54, %v23632_v34  ;;  %v4002_v43 = vpop.f32.mrb[3].mxu0 }
 0x323   : > { %v4185_v44 = vmul.f32 %v20620_v42, %v23728_v25  ;;  %v20622_v38 = vadd.f32 %v4002_v43, %v23634_v4  ;;  %19768 = vmatmul.mubr.bf16.gmra.mrb[68].mxu1 %v23601_v29  ;;  %v23769_v4 = vsel %vm1317_vm4, %v6399_v27, %v6401_v21  ;;  %v23772_v29 = vld [vmem:[%s22885_s20 + $0x38] sm:$0xff]  }
 0x324   : > { %v4230_v34 = vadd.f32 %v23744_v3, %v4187_v48  ;;  %v4188_v57 = vmul.f32 %v20621_v28, %v23728_v25  ;;  %19787 = vmatprep.mubr.bf16.mxu1 %v6368_v18  ;;  %v21809_v21 = vld [vmem:[#allocation6 + $0xc8] sm:$0xff]  }
 0x325   : > { %v4228_v8 = vadd.f32 %v23744_v3, %v4185_v44  ;;  %v4186_v6 = vmul.f32 %v20622_v38, %v23728_v25 }
 0x326   : > { %v4266_v33 = vmax.f32 %v4230_v34, 0.0  ;;  %v4231_v18 = vadd.f32 %v23744_v3, %v4188_v57 }
 0x327   : > { %v4264_v35 = vmax.f32 %v4228_v8, 0.0  ;;  %v4229_v56 = vadd.f32 %v23744_v3, %v4186_v6  ;;  %v19637_v41 = vpop.f32.mrb[4].mxu0 }
 0x328   : > { %v4370_v42 = vcombine.high %v4266_v33, %v4266_v33  ;;  %v4377_v54 = vrot.slane %v4266_v33, %v23683_v40  ;;  %v4267_v10 = vmax.f32 %v4231_v18, 0.0  ;;  %v20623_v36 = vadd.f32 %v19637_v41, %v23639_v47  ;;  %v4015_v63 = vpop.f32.mrb[5].mxu0 }
 0x329   : > { %v4336_v48 = vcombine.high %v4264_v35, %v4264_v35  ;;  %v4343_v28 = vrot.slane %v4264_v35, %v23683_v40  ;;  %v4265_v43 = vmax.f32 %v4229_v56, 0.0  ;;  %v20624_v13 = vadd.f32 %v4015_v63, %v23641_v23  ;;  %v19638_v44 = vpop.f32.mrb[6].mxu0 }
 0x32a   : > { %v4384_v38 = vrot.slane %v4370_v42, %v23683_v40  ;;  %v4385_v34 = vcombine.high %v4377_v54, %v4377_v54  ;;  %v4387_v57 = vcombine.high %v4267_v10, %v4267_v10  ;;  %v4394_v8 = vrot.slane %v4267_v10, %v23683_v40  ;;  %v4018_v6 = vpop.f32.mrb[7].mxu0 }
 0x32b   : > { %v4350_v33 = vrot.slane %v4336_v48, %v23683_v40  ;;  %v4351_v18 = vcombine.high %v4343_v28, %v4343_v28  ;;  %v4353_v47 = vcombine.high %v4265_v43, %v4265_v43  ;;  %v4360_v41 = vrot.slane %v4265_v43, %v23683_v40  ;;  %19788 = vmatmul.mubr.bf16.vlgmr.msra.gmra.mrb[36].mxu1 %v23690_v12 }
 0x32c   : > { %v4974_v35 = vcombine.low %v4385_v34, %v4384_v38  ;;  %v4386_v23 = vcombine.high %v4384_v38, %v4384_v38  ;;  %v23804_v56 = vrot.slane %v4387_v57, %v23683_v40  ;;  %v4402_v42 = vcombine.high %v4394_v8, %v4394_v8  ;;  %19824 = vmatpush3.bf16.msra.mxu1 %v23626_v45 }
 0x32d   : > { %v4352_v54 = vcombine.high %v4350_v33, %v4350_v33  ;;  %v4940_v10 = vcombine.low %v4343_v28, %v4351_v18  ;;  %v4367_v63 = vrot.slane %v4353_v47, %v23683_v40  ;;  %v4368_v48 = vcombine.high %v4360_v41, %v4360_v41  ;;  %19791 = vmatprep.mubr.bf16.mxu1 %v23693_v20 }
 0x32e   : > { %v4982_v43 = vrot.slane %v4974_v35, %v23683_v40  ;;  %v4975_v12 = vcombine.low %v4386_v23, %v4394_v8  ;;  %v23812_v38 = vcombine.low %v4402_v42, %v23804_v56  ;;  %v4191_v34 = vmul.f32 %v20623_v36, %v23728_v25  ;;  %19825 = vmatprep.subr.bf16.mxu1 %v21809_v21 }
 0x32f   : > { %v4941_v57 = vcombine.low %v4350_v33, %v4352_v54  ;;  %v4948_v45 = vrot.slane %v4940_v10, %v23683_v40  ;;  %v4369_v28 = vcombine.high %v4367_v63, %v4367_v63  ;;  %v4957_v18 = vcombine.low %v4360_v41, %v4368_v48  ;;  %v19641_v47 = vpop.f32.mrb[8].mxu0  ;;  %v21811_v10 = vld [vmem:[#allocation6 + $0xd8] sm:$0xff]  }
 0x330   : > { %v4989_v27 = vrot.slane %v4975_v12, %v23683_v40  ;;  %v4234_v35 = vadd.f32 %v23744_v3, %v4191_v34  ;;  %v4189_v8 = vmul.f32 %v20624_v13, %v23728_v25  ;;  %v4031_v23 = vpop.f32.mrb[9].mxu0  ;;  %19826 = vmatpush3.bf16.msra.mxu1 %v21809_v21  ;;  %v4403_v41 = vcombine.high %v23804_v56, %v23804_v56 }
 0x331   : > { %v4955_v36 = vrot.slane %v4941_v57, %v23683_v40  ;;  %v4958_v42 = vcombine.low %v4367_v63, %v4369_v28  ;;  %v4965_v33 = vrot.slane %v4957_v18, %v23683_v40  ;;  %v19642_v54 = vpop.f32.mrb[10].mxu0  ;;  %19827 = vmatprep.subr.bf16.mxu1 %v21810_v30  ;;  %v20625_v13 = vadd.f32 %v19638_v44, %v23643_v5 }
 0x332   : > { %v4990_v48 = vcombine.low %v4982_v43, %v4989_v27  ;;  %v4270_v12 = vmax.f32 %v4234_v35, 0.0  ;;  %v4232_v34 = vadd.f32 %v23744_v3, %v4189_v8  ;;  %v23827_v20 = vpop.f32.mrb[11].mxu0  ;;  %v20626_v57 = vadd.f32 %v4018_v6, %v23645_v7  ;;  %v21812_v43 = vld [vmem:[#allocation6 + $0xe0] sm:$0xff]  }
 0x333   : > { %v4956_v21 = vcombine.low %v4948_v45, %v4955_v36  ;;  %v4972_v63 = vrot.slane %v4958_v42, %v23683_v40  ;;  %v20627_v28 = vadd.f32 %v19641_v47, %v23649_v55  ;;  %19792 = vmatmul.mubr.bf16.gmra.mrb[40].mxu1 %v23696_v60  ;;  %v4192_v56 = vmul.f32 %v20625_v13, %v23728_v25 }
 0x334   : > { %5518 = vst [vmem:[%s23835_s25 + $0x10] sm:$0xff] %v4990_v48  ;;  %v4437_v27 = vcombine.high %v4270_v12, %v4270_v12  ;;  %v4444_v5 = vrot.slane %v4270_v12, %v23683_v40  ;;  %v4268_v44 = vmax.f32 %v4232_v34, 0.0  ;;  %19795 = vmatprep.mubr.bf16.mxu1 %v23700_v61  ;;  %19828 = vmatpush3.bf16.msra.mxu1 %v21810_v30 }
 0x335   : > { %5516 = vst [vmem:[%s23835_s25] sm:$0xff] %v4956_v21  ;;  %v4973_v7 = vcombine.low %v4965_v33, %v4972_v63  ;;  %v4190_v55 = vmul.f32 %v20626_v57, %v23728_v25  ;;  %v4195_v60 = vmul.f32 %v20627_v28, %v23728_v25  ;;  %v20628_v6 = vadd.f32 %v4031_v23, %v23651_v1 }
 0x336   : > { %19829 = vmatprep.subr.bf16.mxu1 %v21811_v10  ;;  %v4451_v45 = vrot.slane %v4437_v27, %v23683_v40  ;;  %v4452_v18 = vcombine.high %v4444_v5, %v4444_v5  ;;  %v4404_v47 = vcombine.high %v4268_v44, %v4268_v44  ;;  %v4411_v35 = vrot.slane %v4268_v44, %v23683_v40 }
 0x337   : > { %5517 = vst [vmem:[%s23835_s25 + $0x8] sm:$0xff] %v4973_v7  ;;  %v4235_v61 = vadd.f32 %v23744_v3, %v4192_v56  ;;  %v4233_v30 = vadd.f32 %v23744_v3, %v4190_v55  ;;  %v4238_v8 = vadd.f32 %v23744_v3, %v4195_v60  ;;  %v4193_v36 = vmul.f32 %v20628_v6, %v23728_v25  ;;  %v23852_v42 = vpop.f32.mrb[12].mxu0  ;;  %v21813_v56 = vld [vmem:[#allocation6 + $0xe8] sm:$0xff]  }
 0x338   : > { %v4453_v1 = vcombine.high %v4451_v45, %v4451_v45  ;;  %v23854_v23 = vcombine.low %v4444_v5, %v4452_v18  ;;  %v4418_v33 = vrot.slane %v4404_v47, %v23683_v40  ;;  %v4992_v48 = vcombine.low %v4403_v41, %v4411_v35  ;;  %v23857_v12 = vpop.f32.mrb[13].mxu0  ;;  %19830 = vmatpush3.bf16.msra.mxu1 %v21811_v10 }
 0x339   : > { %v4271_v34 = vmax.f32 %v4235_v61, 0.0  ;;  %v4269_v13 = vmax.f32 %v4233_v30, 0.0  ;;  %v4274_v21 = vmax.f32 %v4238_v8, 0.0  ;;  %v4236_v63 = vadd.f32 %v23744_v3, %v4193_v36  ;;  %v23860_v57 = vpop.f32.mrb[14].mxu0  ;;  %19831 = vmatprep.subr.bf16.mxu1 %v21812_v43 }
 0x33a   : > { %v5040_v28 = vrot.slane %v23854_v23, %v23683_v40  ;;  %v4419_v27 = vcombine.high %v4418_v33, %v4418_v33  ;;  %v5006_v5 = vrot.slane %v4992_v48, %v23683_v40  ;;  %v20629_v44 = vadd.f32 %v19642_v54, %v23653_v11  ;;  %v23866_v41 = vpop.f32.mrb[15].mxu0  ;;  %v21814_v23 = vld [vmem:[#allocation6 + $0xf0] sm:$0xff]  }
 0x33b   : > { %v4454_v10 = vcombine.high %v4271_v34, %v4271_v34  ;;  %v4461_v7 = vrot.slane %v4271_v34, %v23683_v40  ;;  %v4420_v55 = vcombine.high %v4269_v13, %v4269_v13  ;;  %v4427_v60 = vrot.slane %v4269_v13, %v23683_v40  ;;  %19796 = vmatmul.mubr.bf16.gmra.mrb[44].mxu1 %v23703_v17 }
 0x33c   : > { %v26789_v6 = vrot.slane %v23812_v38, %v23683_v40  ;;  %v5008_v18 = vcombine.low %v4418_v33, %v4419_v27  ;;  %v4504_v47 = vcombine.high %v4274_v21, %v4274_v21  ;;  %v4511_v11 = vrot.slane %v4274_v21, %v23683_v40  ;;  %19799 = vmatprep.mubr.bf16.mxu1 %v23706_v15 }
 0x33d   : > { %v4468_v54 = vrot.slane %v4454_v10, %v23683_v40  ;;  %v4469_v35 = vcombine.high %v4461_v7, %v4461_v7  ;;  %v5042_v61 = vcombine.low %v4453_v1, %v4461_v7  ;;  %v4434_v30 = vrot.slane %v4420_v55, %v23683_v40  ;;  %19832 = vmatpush3.bf16.msra.mxu1 %v21812_v43 }
 0x33e   : > { %v5007_v45 = vcombine.low %v26789_v6, %v5006_v5  ;;  %v5016_v8 = vrot.slane %v5008_v18, %v23683_v40  ;;  %v4435_v17 = vcombine.high %v4427_v60, %v4427_v60  ;;  %v4518_v38 = vrot.slane %v4504_v47, %v23683_v40  ;;  %19833 = vmatprep.subr.bf16.mxu1 %v21813_v56 }
 0x33f   : > { %v4519_v36 = vcombine.high %v4511_v11, %v4511_v11  ;;  %v5043_v33 = vcombine.low %v4469_v35, %v4468_v54  ;;  %v5050_v48 = vrot.slane %v5042_v61, %v23683_v40  ;;  %v4436_v15 = vcombine.high %v4434_v30, %v4434_v30  ;;  %v23882_v13 = vpop.f32.mrb[16].mxu0 }
 0x340   : > { %5519 = vst [vmem:[%s23835_s25 + $0x18] sm:$0xff] %v5007_v45  ;;  %v4272_v34 = vmax.f32 %v4236_v63, 0.0  ;;  %v5009_v1 = vcombine.low %v4427_v60, %v4435_v17  ;;  %v4520_v21 = vcombine.high %v4518_v38, %v4518_v38  ;;  %v4470_v43 = vcombine.high %v4468_v54, %v4468_v54  ;;  %v23884_v5 = vpop.f32.mrb[17].mxu0  ;;  %v21815_v54 = vld [vmem:[#allocation6 + $0xf8] sm:$0xff]  }
 0x341   : > { %v5093_v27 = vcombine.low %v4511_v11, %v4519_v36  ;;  %v5057_v10 = vrot.slane %v5043_v33, %v23683_v40  ;;  %v5025_v7 = vcombine.low %v4434_v30, %v4436_v15  ;;  %v23888_v45 = vpop.f32.mrb[18].mxu0  ;;  %19834 = vmatpush3.bf16.msra.mxu1 %v21813_v56  ;;  %v4196_v47 = vmul.f32 %v20629_v44, %v23728_v25 }
 0x342   : > { %v4471_v55 = vcombine.high %v4272_v34, %v4272_v34  ;;  %v4478_v6 = vrot.slane %v4272_v34, %v23683_v40  ;;  %v5023_v18 = vrot.slane %v5009_v1, %v23683_v40  ;;  %v5094_v63 = vcombine.low %v4518_v38, %v4520_v21  ;;  %v23893_v11 = vpop.f32.mrb[19].mxu0  ;;  %19835 = vmatprep.subr.bf16.mxu1 %v21814_v23 }
 0x343   : > { %v5101_v60 = vrot.slane %v5093_v27, %v23683_v40  ;;  %v5058_v35 = vcombine.low %v5050_v48, %v5057_v10  ;;  %v5033_v61 = vrot.slane %v5025_v7, %v23683_v40  ;;  %19800 = vmatmul.mubr.bf16.gmra.mrb[48].mxu1 %v23713_v59  ;;  %v4239_v33 = vadd.f32 %v23744_v3, %v4196_v47 }
 0x344   : > { %v4485_v30 = vrot.slane %v4471_v55, %v23683_v40  ;;  %v4486_v17 = vcombine.high %v4478_v6, %v4478_v6  ;;  %v5024_v56 = vcombine.low %v5016_v8, %v5023_v18  ;;  %v5108_v38 = vrot.slane %v5094_v63, %v23683_v40  ;;  %19803 = vmatprep.mubr.bf16.mxu1 %v23716_v53 }
 0x345   : > { %v5059_v36 = vcombine.low %v4470_v43, %v4478_v6  ;;  %5522 = vst [vmem:[%s23835_s25 + $0x30] sm:$0xff] %v5058_v35  ;;  %v5041_v44 = vcombine.low %v5033_v61, %v5040_v28  ;;  %v20630_v15 = vadd.f32 %v23827_v20, %v23656_v16  ;;  %v20631_v34 = vadd.f32 %v23852_v42, %v23661_v22  ;;  %v23910_v28 = vld [vmem:[#allocation6 + $0x100] sm:$0xff]  }
 0x346   : > { %v5060_v48 = vcombine.low %v4486_v17, %v4485_v30  ;;  %19836 = vmatpush3.bf16.msra.mxu1 %v21814_v23  ;;  %5520 = vst [vmem:[%s23835_s25 + $0x20] sm:$0xff] %v5024_v56  ;;  %v5109_v59 = vcombine.low %v5101_v60, %v5108_v38  ;;  %v4275_v1 = vmax.f32 %v4239_v33, 0.0  ;;  %v20632_v21 = vadd.f32 %v23857_v12, %v23663_v14  ;;  %v19441_v53 = vpop.f32.mrb[16].mxu1 }
 0x347   : > { %v5067_v8 = vrot.slane %v5059_v36, %v23683_v40  ;;  %19837 = vmatprep.subr.bf16.mxu1 %v21815_v54  ;;  %5521 = vst [vmem:[%s23835_s25 + $0x28] sm:$0xff] %v5041_v44  ;;  %v4194_v20 = vmul.f32 %v20630_v15, %v23728_v25  ;;  %v4199_v22 = vmul.f32 %v20631_v34, %v23728_v25  ;;  %v23918_v23 = vpop.f32.mrb[17].mxu1 }
 0x348   : > { %v5074_v16 = vrot.slane %v5060_v48, %v23683_v40  ;;  %v20633_v42 = vadd.f32 %v23860_v57, %v23666_v31  ;;  %5525 = vst [vmem:[%s23835_s25 + $0x48] sm:$0xff] %v5109_v59  ;;  %v4521_v27 = vcombine.high %v4275_v1, %v4275_v1  ;;  %v4528_v14 = vrot.slane %v4275_v1, %v23683_v40  ;;  %v23925_v10 = vpop.f32.mrb[18].mxu1  ;;  %v23927_v7 = vpop.f32.mrb[20].mxu0 }
 0x349   : > { %v4197_v12 = vmul.f32 %v20632_v21, %v23728_v25  ;;  %v20634_v43 = vadd.f32 %v23866_v41, %v23672_v39  ;;  %v4237_v6 = vadd.f32 %v23744_v3, %v4194_v20  ;;  %v4242_v31 = vadd.f32 %v23744_v3, %v4199_v22  ;;  %v23932_v18 = vpop.f32.mrb[19].mxu1  ;;  %v23934_v63 = vpop.f32.mrb[21].mxu0 }
 0x34a   : > { %v5075_v55 = vcombine.low %v5067_v8, %v5074_v16  ;;  %v4200_v57 = vmul.f32 %v20633_v42, %v23728_v25  ;;  %19838 = vmatpush3.bf16.msra.mxu1 %v21815_v54  ;;  %v4535_v60 = vrot.slane %v4521_v27, %v23683_v40  ;;  %v4536_v39 = vcombine.high %v4528_v14, %v4528_v14  ;;  %v23939_v35 = vpop.f32.mrb[22].mxu0 }
 0x34b   : > { %v4240_v41 = vadd.f32 %v23744_v3, %v4197_v12  ;;  %v4198_v47 = vmul.f32 %v20634_v43, %v23728_v25  ;;  %19875 = vmatprep.subr.bf16.mxu1 %v23910_v28  ;;  %v4273_v61 = vmax.f32 %v4237_v6, 0.0  ;;  %v4278_v30 = vmax.f32 %v4242_v31, 0.0  ;;  %19804 = vmatmul.mubr.bf16.gmra.mrb[52].mxu1 %v23719_v62  ;;  %v23946_v54 = vpop.f32.mrb[23].mxu0 }
 0x34c   : > { %5523 = vst [vmem:[%s23835_s25 + $0x38] sm:$0xff] %v5075_v55  ;;  %v4243_v17 = vadd.f32 %v23744_v3, %v4200_v57  ;;  %v20635_v56 = vadd.f32 %v23882_v13, %v19441_v53  ;;  %v5110_v38 = vcombine.low %v4536_v39, %v4535_v60  ;;  %v4537_v33 = vcombine.high %v4535_v60, %v4535_v60 }
 0x34d   : > { %v4276_v36 = vmax.f32 %v4240_v41, 0.0  ;;  %v4241_v44 = vadd.f32 %v23744_v3, %v4198_v47  ;;  %19807 = vmatprep.mubr.bf16.mxu1 %v23722_v0  ;;  %v4487_v48 = vcombine.high %v4273_v61, %v4273_v61  ;;  %v4494_v15 = vrot.slane %v4273_v61, %v23683_v40 }
 0x34e   : > { %v4571_v34 = vcombine.high %v4278_v30, %v4278_v30  ;;  %v4578_v59 = vrot.slane %v4278_v30, %v23683_v40  ;;  %v5118_v8 = vrot.slane %v5110_v38, %v23683_v40  ;;  %v4279_v1 = vmax.f32 %v4243_v17, 0.0  ;;  %v19445_v21 = vpop.f32.mrb[20].mxu1 }
 0x34f   : > { %v4538_v13 = vcombine.high %v4276_v36, %v4276_v36  ;;  %v4545_v62 = vrot.slane %v4276_v36, %v23683_v40  ;;  %v4501_v53 = vrot.slane %v4487_v48, %v23683_v40  ;;  %v4502_v16 = vcombine.high %v4494_v15, %v4494_v15  ;;  %v23956_v0 = vpop.f32.mrb[21].mxu1 }
 0x350   : > { %v4585_v20 = vrot.slane %v4571_v34, %v23683_v40  ;;  %v4586_v22 = vcombine.high %v4578_v59, %v4578_v59  ;;  %v4588_v12 = vcombine.high %v4279_v1, %v4279_v1  ;;  %v23959_v43 = vpop.f32.mrb[22].mxu1  ;;  %v23961_v55 = vpop.f32.mrb[24].mxu0  ;;  %v4595_v30 = vrot.slane %v4279_v1, %v23683_v40 }
 0x351   : > { %v4552_v42 = vrot.slane %v4538_v13, %v23683_v40  ;;  %v4553_v27 = vcombine.high %v4545_v62, %v4545_v62  ;;  %v5111_v14 = vcombine.low %v4537_v33, %v4545_v62  ;;  %v4503_v6 = vcombine.high %v4501_v53, %v4501_v53  ;;  %v23965_v39 = vpop.f32.mrb[23].mxu1  ;;  %v23967_v41 = vpop.f32.mrb[25].mxu0 }
 0x352   : > { %v5076_v31 = vcombine.low %v4494_v15, %v4502_v16  ;;  %v4587_v57 = vcombine.high %v4585_v20, %v4585_v20  ;;  %v23963_v60 = vcombine.low %v4578_v59, %v4586_v22  ;;  %v23972_v17 = vrot.slane %v4588_v12, %v23683_v40  ;;  %v23974_v38 = vpop.f32.mrb[26].mxu0 }
 0x353   : > { %v5125_v47 = vrot.slane %v5111_v14, %v23683_v40  ;;  %v5127_v61 = vcombine.low %v4553_v27, %v4552_v42  ;;  %v5077_v36 = vcombine.low %v4501_v53, %v4503_v6  ;;  %19808 = vmatmul.mubr.bf16.gmra.mrb[56].mxu1 %v23731_v51  ;;  %v23980_v34 = vpop.f32.mrb[27].mxu0  ;;  %v4603_v62 = vcombine.high %v4595_v30, %v4595_v30 }
 0x354   : > { %v5084_v33 = vrot.slane %v5076_v31, %v23683_v40  ;;  %v5159_v48 = vrot.slane %v23963_v60, %v23683_v40  ;;  %v5161_v15 = vcombine.low %v4585_v20, %v4587_v57  ;;  %v4604_v1 = vcombine.high %v23972_v17, %v23972_v17  ;;  %19811 = vmatprep.mubr.bf16.mxu1 %v23734_v9 }
 0x355   : > { %v5126_v59 = vcombine.low %v5118_v8, %v5125_v47  ;;  %v5135_v13 = vrot.slane %v5127_v61, %v23683_v40  ;;  %v5091_v53 = vrot.slane %v5077_v36, %v23683_v40  ;;  %v4277_v22 = vmax.f32 %v4241_v44, 0.0 }
 0x356   : > { %v5169_v16 = vrot.slane %v5161_v15, %v23683_v40  ;;  %v4554_v27 = vcombine.high %v4552_v42, %v4552_v42  ;;  %v5162_v20 = vcombine.low %v4595_v30, %v4603_v62  ;;  %v4203_v51 = vmul.f32 %v20635_v56, %v23728_v25  ;;  %v23994_v12 = vpop.f32.mrb[24].mxu1 }
 0x357   : > { %5526 = vst [vmem:[%s23835_s25 + $0x50] sm:$0xff] %v5126_v59  ;;  %v20636_v8 = vadd.f32 %v23884_v5, %v23918_v23  ;;  %v20637_v14 = vadd.f32 %v23888_v45, %v23925_v10  ;;  %v5092_v9 = vcombine.low %v5084_v33, %v5091_v53  ;;  %v4555_v6 = vcombine.high %v4277_v22, %v4277_v22  ;;  %v23999_v42 = vpop.f32.mrb[25].mxu1 }
 0x358   : > { %v4562_v31 = vrot.slane %v4277_v22, %v23683_v40  ;;  %v20638_v44 = vadd.f32 %v23893_v11, %v23932_v18  ;;  %v5176_v57 = vrot.slane %v5162_v20, %v23683_v40  ;;  %v4246_v56 = vadd.f32 %v23744_v3, %v4203_v51  ;;  %v24005_v45 = vpop.f32.mrb[26].mxu1  ;;  %v24007_v10 = vpop.f32.mrb[28].mxu0 }
 0x359   : > { %v4201_v5 = vmul.f32 %v20636_v8, %v23728_v25  ;;  %v4204_v23 = vmul.f32 %v20637_v14, %v23728_v25  ;;  %5524 = vst [vmem:[%s23835_s25 + $0x40] sm:$0xff] %v5092_v9  ;;  %v4569_v47 = vrot.slane %v4555_v6, %v23683_v40  ;;  %v20639_v18 = vadd.f32 %v23927_v7, %v19445_v21  ;;  %v24013_v30 = vpop.f32.mrb[27].mxu1  ;;  %v24015_v36 = vpop.f32.mrb[29].mxu0 }
 0x35a   : > { %v5128_v61 = vcombine.low %v4554_v27, %v4562_v31  ;;  %v4202_v11 = vmul.f32 %v20638_v44, %v23728_v25  ;;  %v5177_v33 = vcombine.low %v5169_v16, %v5176_v57  ;;  %v4282_v15 = vmax.f32 %v4246_v56, 0.0  ;;  %v24019_v53 = vpop.f32.mrb[30].mxu0 }
 0x35b   : > { %v4244_v59 = vadd.f32 %v23744_v3, %v4201_v5  ;;  %v4247_v62 = vadd.f32 %v23744_v3, %v4204_v23  ;;  %v4570_v22 = vcombine.high %v4569_v47, %v4569_v47  ;;  %v4207_v51 = vmul.f32 %v20639_v18, %v23728_v25  ;;  %19812 = vmatmul.mubr.bf16.gmra.mrb[60].mxu1 %v23740_v19  ;;  %v24025_v7 = vpop.f32.mrb[31].mxu0 }
 0x35c   : > { %v5142_v27 = vrot.slane %v5128_v61, %v23683_v40  ;;  %v4245_v20 = vadd.f32 %v23744_v3, %v4202_v11  ;;  %5529 = vst [vmem:[%s23835_s25 + $0x68] sm:$0xff] %v5177_v33  ;;  %v4638_v21 = vcombine.high %v4282_v15, %v4282_v15  ;;  %v4645_v16 = vrot.slane %v4282_v15, %v23683_v40 }
 0x35d   : > { %v4280_v8 = vmax.f32 %v4244_v59, 0.0  ;;  %v4283_v14 = vmax.f32 %v4247_v62, 0.0  ;;  %19815 = vmatprep.mubr.bf16.mxu1 %v23755_v32  ;;  %v5144_v6 = vcombine.low %v4569_v47, %v4570_v22  ;;  %v4250_v44 = vadd.f32 %v23744_v3, %v4207_v51 }
 0x35e   : > { %v5143_v9 = vcombine.low %v5135_v13, %v5142_v27  ;;  %v4281_v31 = vmax.f32 %v4245_v20, 0.0  ;;  %v4652_v57 = vrot.slane %v4638_v21, %v23683_v40  ;;  %v4653_v56 = vcombine.high %v4645_v16, %v4645_v16  ;;  %v24033_v23 = vpop.f32.mrb[28].mxu1 }
 0x35f   : > { %v4605_v19 = vcombine.high %v4280_v8, %v4280_v8  ;;  %v4612_v5 = vrot.slane %v4280_v8, %v23683_v40  ;;  %v5152_v61 = vrot.slane %v5144_v6, %v23683_v40  ;;  %v4655_v11 = vcombine.high %v4283_v14, %v4283_v14  ;;  %v24038_v13 = vpop.f32.mrb[29].mxu1 }
 0x360   : > { %5527 = vst [vmem:[%s23835_s25 + $0x58] sm:$0xff] %v5143_v9  ;;  %v4662_v18 = vrot.slane %v4283_v14, %v23683_v40  ;;  %v4622_v32 = vcombine.high %v4281_v31, %v4281_v31  ;;  %v4654_v47 = vcombine.high %v4652_v57, %v4652_v57  ;;  %v5212_v33 = vcombine.low %v4645_v16, %v4653_v56  ;;  %v24041_v62 = vpop.f32.mrb[30].mxu1  ;;  %v24043_v22 = vpop.f32.mrb[32].mxu0 }
 0x361   : > { %v4619_v15 = vrot.slane %v4605_v19, %v23683_v40  ;;  %v4620_v59 = vcombine.high %v4612_v5, %v4612_v5  ;;  %v5160_v27 = vcombine.low %v5152_v61, %v5159_v48  ;;  %v5178_v20 = vcombine.low %v4604_v1, %v4612_v5  ;;  %v24052_v16 = vpop.f32.mrb[31].mxu1  ;;  %v24054_v8 = vpop.f32.mrb[33].mxu0 }
 0x362   : > { %v4669_v51 = vrot.slane %v4655_v11, %v23683_v40  ;;  %v4670_v21 = vcombine.high %v4662_v18, %v4662_v18  ;;  %v5213_v14 = vcombine.low %v4652_v57, %v4654_v47  ;;  %v5220_v9 = vrot.slane %v5212_v33, %v23683_v40  ;;  %v24057_v19 = vpop.f32.mrb[34].mxu0 }
 0x363   : > { %v5179_v6 = vcombine.low %v4620_v59, %v4619_v15  ;;  %v4621_v56 = vcombine.high %v4619_v15, %v4619_v15  ;;  %5528 = vst [vmem:[%s23835_s25 + $0x60] sm:$0xff] %v5160_v27  ;;  %v5186_v60 = vrot.slane %v5178_v20, %v23683_v40  ;;  %v4629_v1 = vrot.slane %v4281_v31, %v23683_v40  ;;  %v24063_v5 = vpop.f32.mrb[35].mxu0 }
 0x364   : > { %v4671_v48 = vcombine.high %v4669_v51, %v4669_v51  ;;  %v5229_v17 = vcombine.low %v4662_v18, %v4670_v21  ;;  %19816 = vmatmul.mubr.bf16.gmra.mrb[64].mxu1 %v23758_v46  ;;  %v5227_v61 = vrot.slane %v5213_v14, %v23683_v40  ;;  %v4636_v11 = vrot.slane %v4622_v32, %v23683_v40 }
 0x365   : > { %v5193_v57 = vrot.slane %v5179_v6, %v23683_v40  ;;  %v24068_v47 = vmax.f32 %v4250_v44, 0.0  ;;  %19819 = vmatprep.mubr.bf16.mxu1 %v23766_v49  ;;  %v4637_v31 = vcombine.high %v4629_v1, %v4629_v1  ;;  %v5195_v15 = vcombine.low %v4621_v56, %v4629_v1 }
 0x366   : > { %v5230_v33 = vcombine.low %v4669_v51, %v4671_v48  ;;  %v5237_v18 = vrot.slane %v5229_v17, %v23683_v40  ;;  %v5228_v46 = vcombine.low %v5220_v9, %v5227_v61  ;;  %v24076_v32 = vpop.f32.mrb[32].mxu1  ;;  %v20640_v51 = vadd.f32 %v23934_v63, %v23956_v0 }
 0x367   : > { %v5194_v59 = vcombine.low %v5186_v60, %v5193_v57  ;;  %v4706_v27 = vcombine.high %v24068_v47, %v24068_v47  ;;  %v4713_v20 = vrot.slane %v24068_v47, %v23683_v40  ;;  %v5196_v21 = vcombine.low %v4637_v31, %v4636_v11  ;;  %v24082_v14 = vpop.f32.mrb[33].mxu1 }
 0x368   : > { %v5244_v44 = vrot.slane %v5230_v33, %v23683_v40  ;;  %v5203_v49 = vrot.slane %v5195_v15, %v23683_v40  ;;  %5532 = vst [vmem:[%s23835_s25 + $0x80] sm:$0xff] %v5228_v46  ;;  %v20641_v6 = vadd.f32 %v23939_v35, %v23959_v43  ;;  %v20642_v56 = vadd.f32 %v23946_v54, %v23965_v39  ;;  %v24093_v48 = vpop.f32.mrb[34].mxu1 }
 0x369   : > { %5530 = vst [vmem:[%s23835_s25 + $0x70] sm:$0xff] %v5194_v59  ;;  %v4720_v9 = vrot.slane %v4706_v27, %v23683_v40  ;;  %v20643_v60 = vadd.f32 %v23961_v55, %v23994_v12  ;;  %v5210_v63 = vrot.slane %v5196_v21, %v23683_v40  ;;  %v4205_v0 = vmul.f32 %v20640_v51, %v23728_v25  ;;  %v24099_v61 = vpop.f32.mrb[35].mxu1 }
 0x36a   : > { %v5245_v17 = vcombine.low %v5237_v18, %v5244_v44  ;;  %v20644_v1 = vadd.f32 %v23967_v41, %v23999_v42  ;;  %v4208_v43 = vmul.f32 %v20641_v6, %v23728_v25  ;;  %v4206_v54 = vmul.f32 %v20642_v56, %v23728_v25 }
 0x36b   : > { %v4721_v35 = vcombine.high %v4720_v9, %v4720_v9  ;;  %v4211_v55 = vmul.f32 %v20643_v60, %v23728_v25  ;;  %v5211_v39 = vcombine.low %v5203_v49, %v5210_v63  ;;  %v4248_v12 = vadd.f32 %v23744_v3, %v4205_v0 }
 0x36c   : > { %5533 = vst [vmem:[%s23835_s25 + $0x88] sm:$0xff] %v5245_v17  ;;  %v4209_v57 = vmul.f32 %v20644_v1, %v23728_v25  ;;  %v20645_v11 = vadd.f32 %v23974_v38, %v24005_v45  ;;  %19820 = vmatmul.mubr.bf16.gmra.mrb[68].mxu1 %v23769_v4  ;;  %v4251_v42 = vadd.f32 %v23744_v3, %v4208_v43  ;;  %v21822_v43 = vld [vmem:[#allocation6 + $0x108] sm:$0xff]  }
 0x36d   : > { %v5280_v41 = vcombine.low %v4720_v9, %v4721_v35  ;;  %v4249_v33 = vadd.f32 %v23744_v3, %v4206_v54  ;;  %v4254_v18 = vadd.f32 %v23744_v3, %v4211_v55  ;;  %19839 = vmatprep.mubr.bf16.mxu1 %v23777_v37  ;;  %5531 = vst [vmem:[%s23835_s25 + $0x78] sm:$0xff] %v5211_v39  ;;  %v4284_v31 = vmax.f32 %v4248_v12, 0.0 }
 0x36e   : > { %v4252_v15 = vadd.f32 %v23744_v3, %v4209_v57  ;;  %v4212_v46 = vmul.f32 %v20645_v11, %v23728_v25  ;;  %v20646_v38 = vadd.f32 %v23980_v34, %v24013_v30  ;;  %v4287_v45 = vmax.f32 %v4251_v42, 0.0 }
 0x36f   : > { %v5288_v4 = vrot.slane %v5280_v41, %v23683_v40  ;;  %v4285_v59 = vmax.f32 %v4249_v33, 0.0  ;;  %v4290_v27 = vmax.f32 %v4254_v18, 0.0  ;;  %v4672_v44 = vcombine.high %v4284_v31, %v4284_v31 }
 0x370   : > { %v4679_v21 = vrot.slane %v4284_v31, %v23683_v40  ;;  %v4288_v49 = vmax.f32 %v4252_v15, 0.0  ;;  %v4255_v37 = vadd.f32 %v23744_v3, %v4212_v46  ;;  %v4722_v51 = vcombine.high %v4287_v45, %v4287_v45 }
 0x371   : > { %v4729_v9 = vrot.slane %v4287_v45, %v23683_v40  ;;  %v4689_v6 = vcombine.high %v4285_v59, %v4285_v59  ;;  %v4696_v56 = vrot.slane %v4285_v59, %v23683_v40  ;;  %v4686_v60 = vrot.slane %v4672_v44, %v23683_v40  ;;  %v21825_v59 = vld [vmem:[#allocation6 + $0x110] sm:$0xff]  }
 0x372   : > { %v4687_v34 = vcombine.high %v4679_v21, %v4679_v21  ;;  %v4773_v30 = vcombine.high %v4290_v27, %v4290_v27  ;;  %v24126_v17 = vrot.slane %v4290_v27, %v23683_v40  ;;  %v4736_v63 = vrot.slane %v4722_v51, %v23683_v40 }
 0x373   : > { %v4737_v0 = vcombine.high %v4729_v9, %v4729_v9  ;;  %v4703_v1 = vrot.slane %v4689_v6, %v23683_v40  ;;  %v4704_v35 = vcombine.high %v4696_v56, %v4696_v56  ;;  %v4688_v55 = vcombine.high %v4686_v60, %v4686_v60 }
 0x374   : > { %v5246_v54 = vcombine.low %v4687_v34, %v4686_v60  ;;  %v4787_v39 = vrot.slane %v4773_v30, %v23683_v40  ;;  %v4788_v12 = vcombine.high %v24126_v17, %v24126_v17  ;;  %19840 = vmatmul.mubr.bf16.vlgmr.msra.gmra.mrb[36].mxu1 %v23780_v50  ;;  %v4738_v57 = vcombine.high %v4736_v63, %v4736_v63 }
 0x375   : > { %v5281_v11 = vcombine.low %v4729_v9, %v4737_v0  ;;  %v4705_v41 = vcombine.high %v4703_v1, %v4703_v1  ;;  %v5263_v42 = vcombine.low %v4704_v35, %v4703_v1  ;;  %19876 = vmatpush3.bf16.msra.mxu1 %v23910_v28  ;;  %v5247_v18 = vcombine.low %v4688_v55, %v4696_v56  ;;  %v21828_v1 = vld [vmem:[#allocation6 + $0x118] sm:$0xff]  }
 0x376   : > { %v5254_v33 = vrot.slane %v5246_v54, %v23683_v40  ;;  %v4739_v31 = vcombine.high %v4288_v49, %v4288_v49  ;;  %19843 = vmatprep.mubr.bf16.mxu1 %v23784_v2  ;;  %v26790_v15 = vrot.slane %v23761_v24, 1  ;;  %v26791_v46 = vrot.slane %v23726_v58, 1  ;;  %19877 = vmatprep.subr.bf16.mxu1 %v21822_v43 }
 0x377   : > { %v5295_v50 = vrot.slane %v5281_v11, %v23683_v40  ;;  %v5297_v27 = vcombine.low %v4736_v63, %v4738_v57  ;;  %v5264_v28 = vcombine.low %v4705_v41, %v4713_v20  ;;  %v24146_v44 = vcombine.low %v4788_v12, %v4787_v39  ;;  %v24172_v57 = vld [vmem:[#allocation17] ss:$0 sm:$0xff] }
 0x378   : > { %v6839_v45 = vsel %vm1317_vm4, %v26791_v46, %v26790_v15  ;;  %v5261_v2 = vrot.slane %v5247_v18, %v23683_v40  ;;  %v5271_v21 = vrot.slane %v5263_v42, %v23683_v40  ;;  %v4746_v58 = vrot.slane %v4288_v49, %v23683_v40  ;;  %v24179_v42 = vld [vmem:[#allocation18] ss:$0 sm:$0xff] }
 0x379   : > { %v4753_v51 = vrot.slane %v4739_v31, %v23683_v40  ;;  %v5296_v9 = vcombine.low %v5288_v4, %v5295_v50  ;;  %v5305_v6 = vrot.slane %v5297_v27, %v23683_v40  ;;  %v5278_v56 = vrot.slane %v5264_v28, %v23683_v40  ;;  %19878 = vmatpush3.bf16.msra.mxu1 %v21822_v43 }
 0x37a   : > { %v4291_v47 = vmax.f32 %v4255_v37, 0.0  ;;  %v5262_v20 = vcombine.low %v5254_v33, %v5261_v2  ;;  %v4754_v60 = vcombine.high %v4746_v58, %v4746_v58  ;;  %v4210_v30 = vmul.f32 %v20646_v38, %v23728_v25  ;;  %19879 = vmatprep.subr.bf16.mxu1 %v21825_v59 }
 0x37b   : > { %v4755_v34 = vcombine.high %v4753_v51, %v4753_v51  ;;  %5536 = vst [vmem:[%s23835_s25 + $0xa0] sm:$0xff] %v5296_v9  ;;  %v5279_v63 = vcombine.low %v5271_v21, %v5278_v56  ;;  %v20647_v4 = vadd.f32 %v24007_v10, %v24033_v23  ;;  %v20648_v43 = vadd.f32 %v24015_v36, %v24038_v13 }
 0x37c   : > { %v4789_v49 = vcombine.high %v4291_v47, %v4291_v47  ;;  %v4796_v0 = vrot.slane %v4291_v47, %v23683_v40  ;;  %5534 = vst [vmem:[%s23835_s25 + $0x90] sm:$0xff] %v5262_v20  ;;  %v5298_v35 = vcombine.low %v4746_v58, %v4754_v60  ;;  %v4253_v37 = vadd.f32 %v23744_v3, %v4210_v30  ;;  %v21834_v58 = vld [vmem:[#allocation6 + $0x128] sm:$0xff]  }
 0x37d   : > { %v20649_v38 = vadd.f32 %v24019_v53, %v24041_v62  ;;  %19844 = vmatmul.mubr.bf16.gmra.mrb[40].mxu1 %v23789_v26  ;;  %5535 = vst [vmem:[%s23835_s25 + $0x98] sm:$0xff] %v5279_v63  ;;  %v4215_v39 = vmul.f32 %v20647_v4, %v23728_v25  ;;  %v20650_v10 = vadd.f32 %v24025_v7, %v24052_v16  ;;  %v21831_v7 = vld [vmem:[#allocation6 + $0x120] sm:$0xff]   ;;  %v24196_v30 = vld [vmem:[%s22885_s20 + $0x40] sm:$0xff]  }
 0x37e   : > { %v4803_v54 = vrot.slane %v4789_v49, %v23683_v40  ;;  %v4804_v55 = vcombine.high %v4796_v0, %v4796_v0  ;;  %19847 = vmatprep.mubr.bf16.mxu1 %v6839_v45  ;;  %v5312_v23 = vrot.slane %v5298_v35, %v23683_v40  ;;  %v4289_v12 = vmax.f32 %v4253_v37, 0.0  ;;  %19880 = vmatpush3.bf16.msra.mxu1 %v21825_v59 }
 0x37f   : > { %v4213_v36 = vmul.f32 %v24172_v57, %v20648_v43  ;;  %v4216_v53 = vmul.f32 %v24172_v57, %v20649_v38  ;;  %v4258_v62 = vadd.f32 %v23744_v3, %v4215_v39  ;;  %v4214_v25 = vmul.f32 %v24172_v57, %v20650_v10  ;;  %19881 = vmatprep.subr.bf16.mxu1 %v21828_v1  ;;  %v21837_v38 = vld [vmem:[#allocation6 + $0x130] sm:$0xff]  }
 0x380   : > { %v4805_v26 = vcombine.high %v4803_v54, %v4803_v54  ;;  %v5348_v13 = vcombine.low %v4796_v0, %v4804_v55  ;;  %v5313_v16 = vcombine.low %v5305_v6, %v5312_v23  ;;  %v4756_v11 = vcombine.high %v4289_v12, %v4289_v12 }
 0x381   : > { %v4763_v41 = vrot.slane %v4289_v12, %v23683_v40  ;;  %v4256_v33 = vadd.f32 %v24179_v42, %v4213_v36  ;;  %v4294_v15 = vmax.f32 %v4258_v62, 0.0  ;;  %v4259_v46 = vadd.f32 %v24179_v42, %v4216_v53 }
 0x382   : > { %v5349_v18 = vcombine.low %v4803_v54, %v4805_v26  ;;  %v5356_v31 = vrot.slane %v5348_v13, %v23683_v40  ;;  %5537 = vst [vmem:[%s23835_s25 + $0xa8] sm:$0xff] %v5313_v16  ;;  %v4770_v3 = vrot.slane %v4756_v11, %v23683_v40  ;;  %19882 = vmatpush3.bf16.msra.mxu1 %v21828_v1  ;;  %v6842_v36 = vrot.slane %v24196_v30, 1 }
 0x383   : > { %v4771_v45 = vcombine.high %v4763_v41, %v4763_v41  ;;  %v5314_v59 = vcombine.low %v4755_v34, %v4763_v41  ;;  %v4292_v50 = vmax.f32 %v4256_v33, 0.0  ;;  %v4840_v28 = vcombine.high %v4294_v15, %v4294_v15  ;;  %19883 = vmatprep.subr.bf16.mxu1 %v21831_v7 }
 0x384   : > { %v5363_v27 = vrot.slane %v5349_v18, %v23683_v40  ;;  %v24188_v2 = vrot.slane %v4294_v15, %v23683_v40  ;;  %v4295_v21 = vmax.f32 %v4259_v46, 0.0  ;;  %v4772_v51 = vcombine.high %v4770_v3, %v4770_v3 }
 0x385   : > { %v5315_v9 = vcombine.low %v4771_v45, %v4770_v3  ;;  %v5322_v6 = vrot.slane %v5314_v59, %v23683_v40  ;;  %v4806_v56 = vcombine.high %v4292_v50, %v4292_v50  ;;  %v4854_v20 = vrot.slane %v4840_v28, %v23683_v40  ;;  %v24234_v28 = vld [vmem:[#allocation6 + $0x140] sm:$0xff]  }
 0x386   : > { %v5364_v47 = vcombine.low %v5356_v31, %v5363_v27  ;;  %v4855_v60 = vcombine.high %v24188_v2, %v24188_v2  ;;  %v4813_v34 = vrot.slane %v4292_v50, %v23683_v40  ;;  %v5331_v49 = vcombine.low %v4772_v51, %v24126_v17  ;;  %19884 = vmatpush3.bf16.msra.mxu1 %v21831_v7  ;;  %v24232_v27 = vld [vmem:[%s22885_s20 + $0x48] sm:$0xff]  }
 0x387   : > { %v5329_v63 = vrot.slane %v5315_v9, %v23683_v40  ;;  %v4820_v0 = vrot.slane %v4806_v56, %v23683_v40  ;;  %v4857_v4 = vcombine.high %v4295_v21, %v4295_v21  ;;  %v4856_v37 = vcombine.high %v4854_v20, %v4854_v20  ;;  %19885 = vmatprep.subr.bf16.mxu1 %v21834_v58 }
 0x388   : > { %5540 = vst [vmem:[%s23835_s25 + $0xc0] sm:$0xff] %v5364_v47  ;;  %v5399_v1 = vcombine.low %v4855_v60, %v4854_v20  ;;  %v4821_v35 = vcombine.high %v4813_v34, %v4813_v34  ;;  %v4864_v43 = vrot.slane %v4295_v21, %v23683_v40  ;;  %v5346_v54 = vrot.slane %v24146_v44, %v23683_v40 }
 0x389   : > { %v5330_v55 = vcombine.low %v5322_v6, %v5329_v63  ;;  %v5339_v39 = vrot.slane %v5331_v49, %v23683_v40  ;;  %v4822_v17 = vcombine.high %v4820_v0, %v4820_v0  ;;  %v4257_v12 = vadd.f32 %v24179_v42, %v4214_v25  ;;  %v21841_v25 = vld [vmem:[#allocation6 + $0x138] sm:$0xff]  }
 0x38a   : > { %v5365_v10 = vcombine.low %v4813_v34, %v4821_v35  ;;  %v5400_v23 = vcombine.low %v4856_v37, %v4864_v43  ;;  %v4871_v13 = vrot.slane %v4857_v4, %v23683_v40  ;;  %v20651_v62 = vadd.f32 %v24043_v22, %v24076_v32  ;;  %19886 = vmatpush3.bf16.msra.mxu1 %v21834_v58 }
 0x38b   : > { %v5347_v53 = vcombine.low %v5339_v39, %v5346_v54  ;;  %5538 = vst [vmem:[%s23835_s25 + $0xb0] sm:$0xff] %v5330_v55  ;;  %v5366_v26 = vcombine.low %v4820_v0, %v4822_v17  ;;  %v5407_v44 = vrot.slane %v5399_v1, %v23683_v40  ;;  %v4293_v16 = vmax.f32 %v4257_v12, 0.0  ;;  %19887 = vmatprep.subr.bf16.mxu1 %v21837_v38  ;;  %v24263_v12 = vld [vmem:[%s22885_s20 + $0x50] sm:$0xff]  }
 0x38c   : > { %v5414_v7 = vrot.slane %v5400_v23, %v23683_v40  ;;  %v20652_v11 = vadd.f32 %v24054_v8, %v24082_v14  ;;  %v5373_v41 = vrot.slane %v5365_v10, %v23683_v40  ;;  %v4219_v18 = vmul.f32 %v24172_v57, %v20651_v62 }
 0x38d   : > { %5539 = vst [vmem:[%s23835_s25 + $0xb8] sm:$0xff] %v5347_v53  ;;  %v5380_v33 = vrot.slane %v5366_v26, %v23683_v40  ;;  %v20653_v22 = vadd.f32 %v24057_v19, %v24093_v48  ;;  %v4823_v31 = vcombine.high %v4293_v16, %v4293_v16  ;;  %v4830_v15 = vrot.slane %v4293_v16, %v23683_v40  ;;  %v24266_v53 = vld [vmem:[%s22885_s20 + $0x58] sm:$0xff]  }
 0x38e   : > { %v5415_v32 = vcombine.low %v5407_v44, %v5414_v7  ;;  %v4217_v8 = vmul.f32 %v24172_v57, %v20652_v11  ;;  %v4872_v46 = vcombine.high %v4871_v13, %v4871_v13  ;;  %v4262_v3 = vadd.f32 %v24179_v42, %v4219_v18  ;;  %19888 = vmatpush3.bf16.msra.mxu1 %v21837_v38 }
 0x38f   : > { %v5381_v14 = vcombine.low %v5373_v41, %v5380_v33  ;;  %v4220_v45 = vmul.f32 %v24172_v57, %v20653_v22  ;;  %v4837_v59 = vrot.slane %v4823_v31, %v23683_v40  ;;  %v4838_v50 = vcombine.high %v4830_v15, %v4830_v15  ;;  %19889 = vmatprep.subr.bf16.mxu1 %v21841_v25 }
 0x390   : > { %5543 = vst [vmem:[%s23835_s25 + $0xd8] sm:$0xff] %v5415_v32  ;;  %v4260_v19 = vadd.f32 %v24179_v42, %v4217_v8  ;;  %v20654_v48 = vadd.f32 %v24063_v5, %v24099_v61  ;;  %v4298_v21 = vmax.f32 %v4262_v3, 0.0  ;;  %v26792_v51 = vrot.slane %v23772_v29, 1 }
 0x391   : > { %5541 = vst [vmem:[%s23835_s25 + $0xc8] sm:$0xff] %v5381_v14  ;;  %v4263_v58 = vadd.f32 %v24179_v42, %v4220_v45  ;;  %v26793_v9 = vrot.slane %v23761_v24, 1  ;;  %v4839_v61 = vcombine.high %v4837_v59, %v4837_v59  ;;  %v5382_v47 = vcombine.low %v4838_v50, %v4837_v59 }
 0x392   : > { %v26794_v56 = vmov %v26792_v51  ;;  %v4296_v20 = vmax.f32 %v4260_v19, 0.0  ;;  %v4218_v60 = vmul.f32 %v24172_v57, %v20654_v48  ;;  %v5416_v34 = vcombine.low %v4871_v13, %v4872_v46  ;;  %19890 = vmatpush3.bf16.msra.mxu1 %v21841_v25  ;;  %v24272_v25 = vld [vmem:[%s22885_s20 + $0x60] sm:$0xff]  }
 0x393   : > { %v6841_v6 = vsel %vm1317_vm4, %v26793_v9, %v26792_v51  ;;  %v6843_v5 = vsel %vm1317_vm4, %v26794_v56, %v6842_v36  ;;  %v4907_v63 = vcombine.high %v4298_v21, %v4298_v21  ;;  %v4914_v49 = vrot.slane %v4298_v21, %v23683_v40  ;;  %19927 = vmatprep.subr.bf16.mxu1 %v24234_v28  ;;  %v24289_v51 = vld [vmem:[%s22885_s20 + $0x68] sm:$0xff]  }
 0x394   : > { %19848 = vmatmul.mubr.bf16.gmra.mrb[44].mxu1 %v6841_v6  ;;  %v4299_v0 = vmax.f32 %v4263_v58, 0.0  ;;  %v5383_v24 = vcombine.low %v4839_v61, %v24188_v2  ;;  %v4873_v4 = vcombine.high %v4296_v20, %v4296_v20  ;;  %v4880_v29 = vrot.slane %v4296_v20, %v23683_v40 }
 0x395   : > { %19851 = vmatprep.mubr.bf16.mxu1 %v6843_v5  ;;  %v6844_v1 = vrot.slane %v24232_v27, 1  ;;  %v5390_v57 = vrot.slane %v5382_v47, %v23683_v40  ;;  %v4921_v35 = vrot.slane %v4907_v63, %v23683_v40  ;;  %v4261_v55 = vadd.f32 %v24179_v42, %v4218_v60  ;;  %v24294_v5 = vld [vmem:[%s22885_s20 + $0x70] sm:$0xff]  }
 0x396   : > { %v4924_v37 = vcombine.high %v4299_v0, %v4299_v0  ;;  %v4931_v43 = vrot.slane %v4299_v0, %v23683_v40  ;;  %v5397_v38 = vrot.slane %v5383_v24, %v23683_v40  ;;  %v4887_v2 = vrot.slane %v4873_v4, %v23683_v40  ;;  %v24305_v0 = vld [vmem:[%s22885_s20 + $0x80] sm:$0xff]   ;;  %v24308_v24 = vld [vmem:[%s22885_s20 + $0x88] sm:$0xff]   ;;  %v24311_v4 = vld [vmem:[%s22885_s20 + $0x90] sm:$0xff]  }
 0x397   : > { %v4888_v54 = vcombine.high %v4880_v29, %v4880_v29  ;;  %v5424_v39 = vrot.slane %v5416_v34, %v23683_v40  ;;  %v4923_v17 = vcombine.high %v4921_v35, %v4921_v35  ;;  %v4297_v44 = vmax.f32 %v4261_v55, 0.0  ;;  %v24326_v55 = vld [vmem:[%s22885_s20 + $0x10] sm:$0xff]  }
 0x398   : > { %v4938_v10 = vrot.slane %v4924_v37, %v23683_v40  ;;  %v4939_v23 = vcombine.high %v4931_v43, %v4931_v43  ;;  %v5398_v26 = vcombine.low %v5390_v57, %v5397_v38  ;;  %v4889_v13 = vcombine.high %v4887_v2, %v4887_v2 }
 0x399   : > { %v5417_v62 = vcombine.low %v4880_v29, %v4888_v54  ;;  %v4922_v7 = vcombine.high %v4914_v49, %v4914_v49  ;;  %v5467_v16 = vcombine.low %v4923_v17, %v4931_v43  ;;  %v6845_v42 = vsel %vm1317_vm4, %v6842_v36, %v6844_v1  ;;  %v24320_v43 = vld [vmem:[%s22885_s20 + $0x98] ss:$0 sps:$4 sm:$0x11]  }
 0x39a   : > { %v5468_v11 = vcombine.low %v4939_v23, %v4938_v10  ;;  %5542 = vst [vmem:[%s23835_s25 + $0xd0] sm:$0xff] %v5398_v26  ;;  %v5433_v33 = vcombine.low %v4887_v2, %v4889_v13  ;;  %v4890_v18 = vcombine.high %v4297_v44, %v4297_v44  ;;  %v4897_v22 = vrot.slane %v4297_v44, %v23683_v40  ;;  %v24340_v44 = vld [vmem:[%s22885_s20 + $0x18] sm:$0xff]  }
 0x39b   : > { %v5431_v41 = vrot.slane %v5417_v62, %v23683_v40  ;;  %v5475_v32 = vrot.slane %v5467_v16, %v23683_v40  ;;  %v6846_v15 = vrot.slane %v24263_v12, 1  ;;  %v6848_v36 = vrot.slane %v24266_v53, 1 }
 0x39c   : > { %19852 = vmatmul.mubr.bf16.gmra.mrb[48].mxu1 %v6845_v42  ;;  %v5482_v31 = vrot.slane %v5468_v11, %v23683_v40  ;;  %v4904_v14 = vrot.slane %v4890_v18, %v23683_v40  ;;  %v4905_v46 = vcombine.high %v4897_v22, %v4897_v22  ;;  %v6850_v59 = vrot.slane %v24272_v25, 1 }
 0x39d   : > { %v5432_v8 = vcombine.low %v5424_v39, %v5431_v41  ;;  %v6847_v45 = vsel %vm1317_vm4, %v6844_v1, %v6846_v15  ;;  %v5451_v50 = vcombine.low %v4922_v7, %v4921_v35  ;;  %v5441_v19 = vrot.slane %v5433_v33, %v23683_v40 }
 0x39e   : > { %v5483_v3 = vcombine.low %v5475_v32, %v5482_v31  ;;  %v4906_v48 = vcombine.high %v4904_v14, %v4904_v14  ;;  %v5434_v21 = vcombine.low %v4897_v22, %v4905_v46  ;;  %19855 = vmatprep.mubr.bf16.mxu1 %v6847_v45  ;;  %v6849_v58 = vsel %vm1317_vm4, %v6846_v15, %v6848_v36 }
 0x39f   : > { %5544 = vst [vmem:[%s23835_s25 + $0xe0] sm:$0xff] %v5432_v8  ;;  %v6851_v56 = vsel %vm1317_vm4, %v6848_v36, %v6850_v59  ;;  %v5465_v61 = vrot.slane %v5451_v50, %v23683_v40  ;;  %v6852_v60 = vrot.slane %v24289_v51, 1  ;;  %v6854_v63 = vrot.slane %v24294_v5, 1  ;;  %v24352_v36 = vld [vmem:[%s22885_s20 + $0x20] sm:$0xff]  }
 0x3a0   : > { %5547 = vst [vmem:[%s23835_s25 + $0xf8] sm:$0xff] %v5483_v3  ;;  %v5448_v9 = vrot.slane %v5434_v21, %v23683_v40  ;;  %v5450_v6 = vcombine.low %v4906_v48, %v4914_v49  ;;  %v24302_v49 = vld [vmem:[%s22885_s20 + $0x78] sm:$0xff]   ;;  %v6858_v35 = vrot.slane %v24305_v0, 1  ;;  %v6860_v37 = vrot.slane %v24308_v24, 1 }
 0x3a1   : > { %v6853_v29 = vsel %vm1317_vm4, %v6850_v59, %v6852_v60  ;;  %v6855_v1 = vsel %vm1317_vm4, %v6852_v60, %v6854_v63  ;;  %v6856_v57 = vrot.slane %v24302_v49, 1  ;;  %v6862_v38 = vrot.slane %v24311_v4, 1 }
 0x3a2   : > { %v5449_v47 = vcombine.low %v5441_v19, %v5448_v9  ;;  %v5458_v20 = vrot.slane %v5450_v6, %v23683_v40  ;;  %v7167_v2 = vshrl.u32 %v23708_v52, 16  ;;  %v7170_v54 = vshll.u32 %v23708_v52, 16 }
 0x3a3   : > { %v7175_v39 = vshrl.u32 %v24326_v55, 16  ;;  %v7178_v17 = vshll.u32 %v24326_v55, 16  ;;  %v6857_v10 = vsel %vm1317_vm4, %v6854_v63, %v6856_v57  ;;  %v6859_v23 = vsel %vm1317_vm4, %v6856_v57, %v6858_v35 }
 0x3a4   : > { %19856 = vmatmul.mubr.bf16.gmra.mrb[52].mxu1 %v6849_v58  ;;  %v5466_v34 = vcombine.low %v5458_v20, %v5465_v61  ;;  %5545 = vst [vmem:[%s23835_s25 + $0xe8] sm:$0xff] %v5449_v47  ;;  %v6861_v26 = vsel %vm1317_vm4, %v6858_v35, %v6860_v37  ;;  %v6864_v13 = vrot.slane %v24320_v43, 1  ;;  %v6863_v52 = vsel %vm1317_vm4, %v6860_v37, %v6862_v38 }
 0x3a5   : > { %19859 = vmatprep.mubr.bf16.mxu1 %v6851_v56  ;;  %v24337_v62 = vrot.slane %v7167_v2, 1  ;;  %v7184_v7 = vshrl.u32 %v24340_v44, 16  ;;  %v7238_v16 = vshrl.u32 %v24232_v27, 16  ;;  %v24344_v11 = vrot.slane %v7170_v54, 2 }
 0x3a6   : > { %5546 = vst [vmem:[%s23835_s25 + $0xf0] sm:$0xff] %v5466_v34  ;;  %v7177_v42 = vrot.slane %v7175_v39, 1  ;;  %v7241_v41 = vshll.u32 %v24232_v27, 16  ;;  %v7247_v33 = vshrl.u32 %v24263_v12, 16  ;;  %v7180_v18 = vrot.slane %v7178_v17, 2 }
 0x3a7   : > { %v7240_v22 = vrot.slane %v7238_v16, 1  ;;  %v7250_v32 = vshll.u32 %v24263_v12, 16  ;;  %v7256_v31 = vshrl.u32 %v24266_v53, 16  ;;  %v7187_v15 = vshll.u32 %v24340_v44, 16 }
 0x3a8   : > { %v7193_v8 = vshrl.u32 %v24352_v36, 16  ;;  %v7243_v14 = vrot.slane %v7241_v41, 2  ;;  %v7249_v46 = vrot.slane %v7247_v33, 1  ;;  %v7259_v59 = vshll.u32 %v24266_v53, 16 }
 0x3a9   : > { %v7252_v3 = vrot.slane %v7250_v32, 2  ;;  %v7258_v45 = vrot.slane %v7256_v31, 1  ;;  %v7265_v50 = vshrl.u32 %v24272_v25, 16  ;;  %v7196_v19 = vshll.u32 %v24352_v36, 16 }
 0x3aa   : > { %v24358_v48 = vor.u32 %v7243_v14, %v7240_v22  ;;  %v7268_v21 = vshll.u32 %v24272_v25, 16  ;;  %v7274_v58 = vshrl.u32 %v24289_v51, 16  ;;  %v7261_v6 = vrot.slane %v7259_v59, 2 }
 0x3ab   : > { %v7253_v9 = vor.u32 %v7252_v3, %v7249_v46  ;;  %v7267_v56 = vrot.slane %v7265_v50, 1  ;;  %v7277_v61 = vshll.u32 %v24289_v51, 16  ;;  %v7173_v47 = vor.u32 %v24344_v11, %v24337_v62 }
 0x3ac   : > { %19860 = vmatmul.mubr.bf16.gmra.mrb[56].mxu1 %v6853_v29  ;;  %v7270_v20 = vrot.slane %v7268_v21, 2  ;;  %v7276_v60 = vrot.slane %v7274_v58, 1  ;;  %v7283_v34 = vshrl.u32 %v24294_v5, 16  ;;  %v7262_v29 = vor.u32 %v7261_v6, %v7258_v45 }
 0x3ad   : > { %19863 = vmatprep.mubr.bf16.mxu1 %v6855_v1  ;;  %v24368_v63 = vsel %vm2118_vm1, %v24358_v48, %v7253_v9  ;;  %v7279_v1 = vrot.slane %v7277_v61, 2  ;;  %v7286_v57 = vshll.u32 %v24294_v5, 16  ;;  %v7292_v2 = vshrl.u32 %v24302_v49, 16 }
 0x3ae   : > { %v7271_v35 = vor.u32 %v7270_v20, %v7267_v56  ;;  %v7285_v37 = vrot.slane %v7283_v34, 1  ;;  %v7295_v54 = vshll.u32 %v24302_v49, 16  ;;  %v24374_v39 = vsel %vm2118_vm1, %v7253_v9, %v7262_v29  ;;  %v24395_v20 = vld [vmem:[%s22885_s20 + $0x28] sm:$0xff]  }
 0x3af   : > { %v7280_v17 = vor.u32 %v7279_v1, %v7276_v60  ;;  %v7294_v16 = vrot.slane %v7292_v2, 1  ;;  %v7304_v41 = vshll.u32 %v24305_v0, 16  ;;  %v7310_v31 = vshrl.u32 %v24308_v24, 16 }
 0x3b0   : > { %v24378_v62 = vsel %vm2118_vm1, %v7262_v29, %v7271_v35  ;;  %v7297_v11 = vrot.slane %v7295_v54, 2  ;;  %v7313_v3 = vshll.u32 %v24308_v24, 16  ;;  %v7319_v45 = vshrl.u32 %v24311_v4, 16 }
 0x3b1   : > { %v24382_v33 = vsel %vm2118_vm1, %v7271_v35, %v7280_v17  ;;  %v7306_v46 = vrot.slane %v7304_v41, 2  ;;  %v7181_v59 = vor.u32 %v7180_v18, %v7177_v42  ;;  %v7312_v21 = vrot.slane %v7310_v31, 1 }
 0x3b2   : > { %v7298_v14 = vor.u32 %v7297_v11, %v7294_v16  ;;  %v7322_v58 = vshll.u32 %v24311_v4, 16  ;;  %v7315_v56 = vrot.slane %v7313_v3, 2  ;;  %v7202_v60 = vshrl.u32 %v24395_v20, 16 }
 0x3b3   : > { %v6865_v18 = vsel %vm1317_vm4, %v6862_v38, %v6864_v13  ;;  %v7186_v34 = vrot.slane %v7184_v7, 1  ;;  %v7189_v29 = vrot.slane %v7187_v15, 2  ;;  %v7195_v35 = vrot.slane %v7193_v8, 1  ;;  %v24424_v7 = vld [vmem:[%s22885_s20 + $0x30] sm:$0xff]  }
 0x3b4   : > { %19864 = vmatmul.mubr.bf16.gmra.mrb[60].mxu1 %v6857_v10  ;;  %v7288_v10 = vrot.slane %v7286_v57, 2  ;;  %v7324_v61 = vrot.slane %v7322_v58, 2  ;;  %v7316_v42 = vor.u32 %v7315_v56, %v7312_v21  ;;  %v7182_v57 = vsel %vm2118_vm1, %v7173_v47, %v7181_v59  ;;  %v24471_v56 = vld [vmem:[%s22885_s20 + $0x38] sm:$0xff]  }
 0x3b5   : > { %19867 = vmatprep.mubr.bf16.mxu1 %v6859_v23  ;;  %v7301_v23 = vshrl.u32 %v24305_v0, 16  ;;  %v7205_v2 = vshll.u32 %v24395_v20, 16  ;;  %v7204_v13 = vrot.slane %v7202_v60, 1  ;;  %v7211_v15 = vshrl.u32 %v24424_v7, 16 }
 0x3b6   : > { %v7289_v22 = vor.u32 %v7288_v10, %v7285_v37  ;;  %v7198_v37 = vrot.slane %v7196_v19, 2  ;;  %v7190_v47 = vor.u32 %v7189_v29, %v7186_v34  ;;  %v7651_v8 = vrot.slane %v24232_v27, 2  ;;  %v7952_v27 = vld [vmem:[%s22885_s20 + $0x10] sm:$0xc] }
 0x3b7   : > { %v7303_v32 = vrot.slane %v7301_v23, 1  ;;  %v7653_v19 = vrot.slane %v24263_v12, 2  ;;  %v7655_v54 = vrot.slane %v24266_v53, 2  ;;  %v7214_v10 = vshll.u32 %v24424_v7, 16 }
 0x3b8   : > { %v24388_v50 = vsel %vm2118_vm1, %v7280_v17, %v7289_v22  ;;  %v24392_v9 = vsel %vm2118_vm1, %v7289_v22, %v7298_v14  ;;  %v7199_v17 = vor.u32 %v7198_v37, %v7195_v35  ;;  %v7657_v23 = vrot.slane %v24272_v25, 2 }
 0x3b9   : > { %v7307_v6 = vor.u32 %v7306_v46, %v7303_v32  ;;  %v7659_v16 = vrot.slane %v24289_v51, 2  ;;  %v7207_v11 = vrot.slane %v7205_v2, 2  ;;  %v24436_v41 = vsel %vm2589_vm2, %v7651_v8, %v7653_v19 }
 0x3ba   : > { %v24439_v22 = vsel %vm2589_vm2, %v7653_v19, %v7655_v54  ;;  %v7661_v12 = vrot.slane %v24294_v5, 2  ;;  %v24443_v53 = vsel %vm2589_vm2, %v7655_v54, %v7657_v23  ;;  %v7663_v25 = vrot.slane %v24302_v49, 2 }
 0x3bb   : > { %v24416_v43 = vsel %vm2118_vm1, %v7307_v6, %v7316_v42  ;;  %v24446_v32 = vsel %vm2589_vm2, %v7657_v23, %v7659_v16  ;;  %v7665_v51 = vrot.slane %v24305_v0, 2  ;;  %v7191_v31 = vsel %vm2118_vm1, %v7181_v59, %v7190_v47  ;;  %v24463_v0 = vld [vmem:[%s22885_s20 + $0x98] ss:$0 sps:$4 sm:$0x33]  }
 0x3bc   : > { %19868 = vmatmul.mubr.bf16.gmra.mrb[64].mxu1 %v6861_v26  ;;  %v7321_v26 = vrot.slane %v7319_v45, 1  ;;  %v24452_v46 = vsel %vm2589_vm2, %v7659_v16, %v7661_v12  ;;  %v7667_v3 = vrot.slane %v24308_v24, 2  ;;  %v7200_v5 = vsel %vm2118_vm1, %v7190_v47, %v7199_v17  ;;  %v21844_v45 = vld [vmem:[#allocation6 + $0x148] sm:$0xff]   ;;  %v21846_v47 = vld [vmem:[#allocation6 + $0x158] sm:$0xff]  }
 0x3bd   : > { %19871 = vmatprep.mubr.bf16.mxu1 %v6863_v52  ;;  %v24399_v52 = vsel %vm2118_vm1, %v7298_v14, %v7307_v6  ;;  %v7213_v14 = vrot.slane %v7211_v15, 1  ;;  %v7216_v21 = vrot.slane %v7214_v10, 2  ;;  %v24457_v58 = vsel %vm2589_vm2, %v7661_v12, %v7663_v25  ;;  %v21847_v10 = vld [vmem:[#allocation6 + $0x160] sm:$0xff]   ;;  %v21848_v16 = vld [vmem:[#allocation6 + $0x168] sm:$0xff]  }
 0x3be   : > { %v24410_v1 = vor.u32 %v7324_v61, %v7321_v26  ;;  %v24460_v49 = vsel %vm2589_vm2, %v7663_v25, %v7665_v51  ;;  %v24466_v59 = vsel %vm2589_vm2, %v7665_v51, %v7667_v3  ;;  %v7669_v6 = vrot.slane %v24311_v4, 2  ;;  %v21850_v25 = vld [vmem:[#allocation6 + $0x178] sm:$0xff]   ;;  %v21853_v51 = vld [vmem:[#allocation6 + $0x180] sm:$0xff]  }
 0x3bf   : > { %v7208_v24 = vor.u32 %v7207_v11, %v7204_v13  ;;  %v7220_v26 = vshrl.u32 %v24471_v56, 16  ;;  %v7223_v61 = vshll.u32 %v24471_v56, 16  ;;  %v7671_v60 = vrot.slane %v24463_v0, 2  ;;  %v21849_v11 = vld [vmem:[#allocation6 + $0x170] sm:$0xff]  }
 0x3c0   : > { %v24421_v38 = vsel %vm2118_vm1, %v7316_v42, %v24410_v1  ;;  %v7217_v42 = vor.u32 %v7216_v21, %v7213_v14  ;;  %v7229_v34 = vshrl.u32 %v24196_v30, 16  ;;  %v7232_v29 = vshll.u32 %v24196_v30, 16 }
 0x3c1   : > { %v24479_v4 = vsel %vm2589_vm2, %v7667_v3, %v7669_v6  ;;  %v7222_v35 = vrot.slane %v7220_v26, 1  ;;  %v7225_v37 = vrot.slane %v7223_v61, 2  ;;  %v7641_v21 = vrot.slane %v24352_v36, 2  ;;  %v21856_v36 = vld [vmem:[#allocation6 + $0x198] sm:$0xff]  }
 0x3c2   : > { %v7218_v2 = vsel %vm2118_vm1, %v7208_v24, %v7217_v42  ;;  %v7231_v13 = vrot.slane %v7229_v34, 1  ;;  %v7234_v15 = vrot.slane %v7232_v29, 2  ;;  %v7647_v26 = vrot.slane %v24471_v56, 2  ;;  %v21864_v34 = vld [vmem:[#allocation6 + $0x1c0] sm:$0xff]  }
 0x3c3   : > { %v7226_v19 = vor.u32 %v7225_v37, %v7222_v35  ;;  %v7649_v61 = vrot.slane %v24196_v30, 2  ;;  %v21860_v30 = vld [vmem:[#allocation6 + $0x1b8] sm:$0xff]   ;;  %v24537_v29 = vld [vmem:[%s22885_s20 + $0x18] sm:$0xff]  }
 0x3c4   : > { %19872 = vmatmul.mubr.bf16.gmra.mrb[68].mxu1 %v6865_v18  ;;  %v21845_v18 = vld [vmem:[#allocation6 + $0x150] sm:$0xff]   ;;  %v7235_v54 = vor.u32 %v7234_v15, %v7231_v13  ;;  %v21867_v37 = vld [vmem:[#allocation6 + $0x1c8] sm:$0xff]  }
 0x3c5   : > { %19891 = vmatprep.mubr.bf16.mxu1 %v7182_v57  ;;  %v7209_v57 = vsel %vm2118_vm1, %v7199_v17, %v7208_v24  ;;  %v7227_v23 = vsel %vm2118_vm1, %v7217_v42, %v7226_v19  ;;  %v21858_v42 = vld [vmem:[#allocation6 + $0x1a8] sm:$0xff]   ;;  %v7652_v56 = vsel %vm2589_vm2, %v7649_v61, %v7651_v8  ;;  %v21870_v15 = vld [vmem:[#allocation6 + $0x1d0] sm:$0xff]  }
 0x3c6   : > { %v7236_v17 = vsel %vm2118_vm1, %v7226_v19, %v7235_v54  ;;  %v7245_v12 = vsel %vm2118_vm1, %v7235_v54, %v24358_v48  ;;  %v7328_v48 = vshrl.u32 %v24463_v0, 16  ;;  %v24531_v8 = vld [vmem:[%s22885_s20 + $0x14] sm:$0xf]  ;;  %v24565_v19 = vld [vmem:[%s22885_s20 + $0x40] sm:$0xff]  }
 0x3c8   : > { %v7330_v14 = vrot.slane %v7328_v48, 1  ;;  %v24579_v48 = vld [vmem:[%s22885_s20 + $0x58] sm:$0xff]  }
 0x3cc   : > { %19892 = vmatmul.mubr.bf16.vlgmr.msra.gmra.mrb[36].mxu1 %v7191_v31  ;;  %v7615_v31 = vld [vmem:[%s22885_s20 + $0x8] sm:$0xc] }
 0x3cd   : > { %19928 = vmatpush3.bf16.msra.mxu1 %v24234_v28  ;;  %19895 = vmatprep.mubr.bf16.mxu1 %v7200_v5  ;;  %v24482_v28 = vsel %vm2589_vm2, %v7669_v6, %v7671_v60  ;;  %v22100_v5 = vld [vmem:[%s22885_s20 + $0xc] sm:$0xf] }
 0x3ce   : > { %19929 = vmatprep.subr.bf16.mxu1 %v21844_v45  ;;  %v21855_v6 = vld [vmem:[#allocation6 + $0x190] sm:$0xff]  }
 0x3d1   : > { %19930 = vmatpush3.bf16.msra.mxu1 %v21844_v45  ;;  %v18195_v45 = vcombine.low %v7615_v31, %v22100_v5 }
 0x3d2   : > { %19931 = vmatprep.subr.bf16.mxu1 %v21845_v18 }
 0x3d4   : > { %19896 = vmatmul.mubr.bf16.gmra.mrb[40].mxu1 %v7209_v57  ;;  %v24555_v57 = vld [vmem:[%s22885_s20 + $0x30] sm:$0xff]  }
 0x3d5   : > { %19899 = vmatprep.mubr.bf16.mxu1 %v7218_v2  ;;  %19932 = vmatpush3.bf16.msra.mxu1 %v21845_v18  ;;  %v21859_v18 = vld [vmem:[#allocation6 + $0x1b0] sm:$0xff]  }
 0x3d6   : > { %19933 = vmatprep.subr.bf16.mxu1 %v21846_v47  ;;  %v24559_v2 = vld [vmem:[%s22885_s20 + $0x38] sm:$0xff]  }
 0x3d7   : > { %v8108_v13 = vrot.slane %v24559_v2, 2 }
 0x3d9   : > { %19934 = vmatpush3.bf16.msra.mxu1 %v21846_v47 }
 0x3da   : > { %19935 = vmatprep.subr.bf16.mxu1 %v21847_v10 }
 0x3dc   : > { %19900 = vmatmul.mubr.bf16.gmra.mrb[44].mxu1 %v7227_v23  ;;  %v21873_v23 = vld [vmem:[#allocation6 + $0x1d8] sm:$0xff]  }
 0x3dd   : > { %19903 = vmatprep.mubr.bf16.mxu1 %v7236_v17  ;;  %19936 = vmatpush3.bf16.msra.mxu1 %v21847_v10  ;;  %v24569_v10 = vld [vmem:[%s22885_s20 + $0x48] sm:$0xff]   ;;  %v8110_v17 = vrot.slane %v24565_v19, 2 }
 0x3de   : > { %19937 = vmatprep.subr.bf16.mxu1 %v21848_v16 }
 0x3e1   : > { %19938 = vmatpush3.bf16.msra.mxu1 %v21848_v16  ;;  %v8112_v16 = vrot.slane %v24569_v10, 2 }
 0x3e2   : > { %19939 = vmatprep.subr.bf16.mxu1 %v21849_v11 }
 0x3e4   : > { %19904 = vmatmul.mubr.bf16.gmra.mrb[48].mxu1 %v7245_v12  ;;  %v8111_v12 = vsel %vm2589_vm2, %v8108_v13, %v8110_v17 }
 0x3e5   : > { %19907 = vmatprep.mubr.bf16.mxu1 %v24368_v63  ;;  %19940 = vmatpush3.bf16.msra.mxu1 %v21849_v11  ;;  %v7331_v63 = vshll.u32 %v24463_v0, 16  ;;  %v21876_v11 = vld [vmem:[#allocation6 + $0x1e0] sm:$0xff]  }
 0x3e6   : > { %19941 = vmatprep.subr.bf16.mxu1 %v21850_v25 }
 0x3e7   : > { %v7333_v3 = vrot.slane %v7331_v63, 2  ;;  %v21879_v63 = vld [vmem:[#allocation6 + $0x1e8] sm:$0xff]  }
 0x3e9   : > { %19942 = vmatpush3.bf16.msra.mxu1 %v21850_v25  ;;  %v24575_v25 = vld [vmem:[%s22885_s20 + $0x50] sm:$0xff]  }
 0x3ea   : > { %19979 = vmatprep.subr.bf16.mxu1 %v21853_v51  ;;  %v8114_v31 = vrot.slane %v24575_v25, 2 }
 0x3ec   : > { %19908 = vmatmul.mubr.bf16.gmra.mrb[52].mxu1 %v24374_v39  ;;  %v7334_v39 = vor.u32 %v7333_v3, %v7330_v14  ;;  %v8116_v14 = vrot.slane %v24579_v48, 2  ;;  %v21882_v3 = vld [vmem:[#allocation6 + $0x1f0] sm:$0xff]   ;;  %v8115_v5 = vsel %vm2589_vm2, %v8112_v16, %v8114_v31 }
 0x3ed   : > { %19911 = vmatprep.mubr.bf16.mxu1 %v24378_v62  ;;  %v7636_v62 = vrot.slane %v18195_v45, 2  ;;  %v24585_v45 = vld [vmem:[%s22885_s20 + $0x60] sm:$0xff]  }
 0x3f4   : > { %19912 = vmatmul.mubr.bf16.gmra.mrb[56].mxu1 %v24382_v33  ;;  %v7637_v33 = vrot.slane %v24326_v55, 2  ;;  %v7643_v55 = vrot.slane %v24395_v20, 2  ;;  %v21857_v20 = vld [vmem:[#allocation6 + $0x1a0] sm:$0xff]  }
 0x3f5   : > { %19915 = vmatprep.mubr.bf16.mxu1 %v24388_v50  ;;  %v7335_v50 = vsel %vm2118_vm1, %v24410_v1, %v7334_v39  ;;  %v7645_v1 = vrot.slane %v24424_v7, 2  ;;  %v7650_v7 = vsel %vm2589_vm2, %v7647_v26, %v7649_v61  ;;  %v8117_v39 = vsel %vm2589_vm2, %v8114_v31, %v8116_v14 }
 0x3f6   : > { %v7644_v24 = vsel %vm2589_vm2, %v7641_v21, %v7643_v55 }
 0x3f7   : > { %v7648_v60 = vsel %vm2589_vm2, %v7645_v1, %v7647_v26 }
 0x3fc   : > { %19916 = vmatmul.mubr.bf16.gmra.mrb[60].mxu1 %v24392_v9  ;;  %v7638_v9 = vsel %vm2589_vm2, %v7636_v62, %v7637_v33  ;;  %v24589_v62 = vld [vmem:[%s22885_s20 + $0x68] sm:$0xff]  }
 0x3fd   : > { %19919 = vmatprep.mubr.bf16.mxu1 %v24399_v52  ;;  %v7639_v52 = vrot.slane %v24340_v44, 2  ;;  %v7646_v44 = vsel %vm2589_vm2, %v7643_v55, %v7645_v1 }
 0x3ff   : > { %v7640_v0 = vsel %vm2589_vm2, %v7637_v33, %v7639_v52  ;;  %v21886_v33 = vld [vmem:[#allocation6 + $0x1f8] sm:$0xff]  }
 0x404   : > { %19920 = vmatmul.mubr.bf16.gmra.mrb[64].mxu1 %v24416_v43  ;;  %v7642_v43 = vsel %vm2589_vm2, %v7639_v52, %v7641_v21  ;;  %v24593_v52 = vld [vmem:[#allocation6 + $0x200] sm:$0xff]  }
 0x405   : > { %19923 = vmatprep.mubr.bf16.mxu1 %v24421_v38  ;;  %v21854_v38 = vld [vmem:[#allocation6 + $0x188] sm:$0xff]  }
 0x40c   : > { %19924 = vmatmul.mubr.bf16.gmra.mrb[68].mxu1 %v7335_v50  ;;  %v8118_v50 = vrot.slane %v24585_v45, 2 }
 0x40d   : > { %19943 = vmatprep.mubr.bf16.mxu1 %v7638_v9  ;;  %v8120_v9 = vrot.slane %v24589_v62, 2 }
 0x40e   : > { %v8119_v21 = vsel %vm2589_vm2, %v8116_v14, %v8118_v50  ;;  %v8472_v14 = vshrl.u32 %v24555_v57, 16 }
 0x414   : > { %19944 = vmatmul.mubr.bf16.vlgmr.msra.gmra.mrb[36].mxu1 %v7640_v0  ;;  %v24597_v0 = vld [vmem:[%s22885_s20 + $0x70] sm:$0xff]  }
 0x415   : > { %19980 = vmatpush3.bf16.msra.mxu1 %v21853_v51  ;;  %19947 = vmatprep.mubr.bf16.mxu1 %v7642_v43  ;;  %v8113_v51 = vsel %vm2589_vm2, %v8110_v17, %v8112_v16  ;;  %v8121_v43 = vsel %vm2589_vm2, %v8118_v50, %v8120_v9  ;;  %v8122_v55 = vrot.slane %v24597_v0, 2 }
 0x416   : > { %19981 = vmatprep.subr.bf16.mxu1 %v21854_v38 }
 0x419   : > { %19982 = vmatpush3.bf16.msra.mxu1 %v21854_v38  ;;  %v24601_v38 = vld [vmem:[%s22885_s20 + $0x78] sm:$0xff]  }
 0x41a   : > { %19983 = vmatprep.subr.bf16.mxu1 %v21855_v6  ;;  %v8124_v1 = vrot.slane %v24601_v38, 2 }
 0x41c   : > { %19948 = vmatmul.mubr.bf16.gmra.mrb[40].mxu1 %v7644_v24  ;;  %v24608_v24 = vld [vmem:[%s22885_s20 + $0x80] sm:$0xff]  }
 0x41d   : > { %19951 = vmatprep.mubr.bf16.mxu1 %v7646_v44  ;;  %19984 = vmatpush3.bf16.msra.mxu1 %v21855_v6  ;;  %v8123_v6 = vsel %vm2589_vm2, %v8120_v9, %v8122_v55  ;;  %v8125_v44 = vsel %vm2589_vm2, %v8122_v55, %v8124_v1  ;;  %v8126_v26 = vrot.slane %v24608_v24, 2  ;;  %v8474_v9 = vrot.slane %v8472_v14, 2  ;;  %v21889_v55 = vld [vmem:[#allocation6 + $0x208] sm:$0xff]  }
 0x41e   : > { %19985 = vmatprep.subr.bf16.mxu1 %v21856_v36 }
 0x421   : > { %19986 = vmatpush3.bf16.msra.mxu1 %v21856_v36  ;;  %v24612_v36 = vld [vmem:[%s22885_s20 + $0x88] sm:$0xff]  }
 0x422   : > { %19987 = vmatprep.subr.bf16.mxu1 %v21857_v20  ;;  %v8128_v61 = vrot.slane %v24612_v36, 2 }
 0x424   : > { %19952 = vmatmul.mubr.bf16.gmra.mrb[44].mxu1 %v7648_v60  ;;  %v24618_v60 = vld [vmem:[%s22885_s20 + $0x90] sm:$0xff]  }
 0x425   : > { %19955 = vmatprep.mubr.bf16.mxu1 %v7650_v7  ;;  %19988 = vmatpush3.bf16.msra.mxu1 %v21857_v20  ;;  %v8127_v20 = vsel %vm2589_vm2, %v8124_v1, %v8126_v26  ;;  %v24621_v7 = vld [vmem:[%s22885_s20 + $0x98] sm:$0xff]  }
 0x426   : > { %19989 = vmatprep.subr.bf16.mxu1 %v21858_v42 }
 0x429   : > { %19990 = vmatpush3.bf16.msra.mxu1 %v21858_v42  ;;  %v8129_v42 = vsel %vm2589_vm2, %v8126_v26, %v8128_v61  ;;  %v8490_v26 = vshrl.u32 %v24565_v19, 16 }
 0x42a   : > { %19991 = vmatprep.subr.bf16.mxu1 %v21859_v18 }
 0x42c   : > { %19956 = vmatmul.mubr.bf16.gmra.mrb[48].mxu1 %v7652_v56  ;;  %v8132_v56 = vrot.slane %v24621_v7, 2 }
 0x42d   : > { %19959 = vmatprep.mubr.bf16.mxu1 %v24436_v41  ;;  %19992 = vmatpush3.bf16.msra.mxu1 %v21859_v18  ;;  %v24534_v41 = vcombine.low %v7952_v27, %v24531_v8  ;;  %v8130_v18 = vrot.slane %v24618_v60, 2  ;;  %v8445_v27 = vshrl.u32 %v24537_v29, 16 }
 0x42e   : > { %19993 = vmatprep.subr.bf16.mxu1 %v21860_v30 }
 0x431   : > { %19994 = vmatpush3.bf16.msra.mxu1 %v21860_v30  ;;  %v8437_v30 = vshrl.u32 %v24534_v41, 16 }
 0x432   : > { %20031 = vmatprep.subr.bf16.mxu1 %v21864_v34 }
 0x434   : > { %19960 = vmatmul.mubr.bf16.gmra.mrb[52].mxu1 %v24439_v22  ;;  %v8099_v22 = vrot.slane %v24534_v41, 2 }
 0x435   : > { %19963 = vmatprep.mubr.bf16.mxu1 %v24443_v53  ;;  %v8100_v53 = vrot.slane %v24537_v29, 2 }
 0x43c   : > { %19964 = vmatmul.mubr.bf16.gmra.mrb[56].mxu1 %v24446_v32  ;;  %v24544_v32 = vld [vmem:[%s22885_s20 + $0x20] sm:$0xff]  }
 0x43d   : > { %19967 = vmatprep.mubr.bf16.mxu1 %v24452_v46  ;;  %v8101_v46 = vsel %vm2589_vm2, %v8099_v22, %v8100_v53  ;;  %v8448_v22 = vshll.u32 %v24537_v29, 16 }
 0x444   : > { %19968 = vmatmul.mubr.bf16.gmra.mrb[60].mxu1 %v24457_v58  ;;  %v24548_v58 = vld [vmem:[%s22885_s20 + $0x28] sm:$0xff]  }
 0x445   : > { %19971 = vmatprep.mubr.bf16.mxu1 %v24460_v49  ;;  %v8102_v49 = vrot.slane %v24544_v32, 2 }
 0x44c   : > { %19972 = vmatmul.mubr.bf16.gmra.mrb[64].mxu1 %v24466_v59  ;;  %v8104_v59 = vrot.slane %v24548_v58, 2 }
 0x44d   : > { %19975 = vmatprep.mubr.bf16.mxu1 %v24479_v4  ;;  %v8103_v4 = vsel %vm2589_vm2, %v8100_v53, %v8102_v49  ;;  %v8131_v53 = vsel %vm2589_vm2, %v8128_v61, %v8130_v18  ;;  %v8493_v61 = vshll.u32 %v24565_v19, 16 }
 0x44e   : > { %v8105_v35 = vsel %vm2589_vm2, %v8102_v49, %v8104_v59  ;;  %v21887_v49 = vld [vmem:[%s22885_s20 + $0xa0] ss:$0 sps:$4 sm:$0x33]  }
 0x454   : > { %19976 = vmatmul.mubr.bf16.gmra.mrb[68].mxu1 %v24482_v28  ;;  %v8106_v28 = vrot.slane %v24555_v57, 2 }
 0x455   : > { %19995 = vmatprep.mubr.bf16.mxu1 %v8101_v46  ;;  %v8133_v46 = vsel %vm2589_vm2, %v8130_v18, %v8132_v56  ;;  %v8499_v18 = vshrl.u32 %v24569_v10, 16 }
 0x456   : > { %v8107_v47 = vsel %vm2589_vm2, %v8104_v59, %v8106_v28  ;;  %v8109_v54 = vsel %vm2589_vm2, %v8106_v28, %v8108_v13  ;;  %v8439_v59 = vrot.slane %v8437_v30, 2  ;;  %v8134_v28 = vrot.slane %v21887_v49, 2  ;;  %v21898_v49 = vld [vmem:[#allocation8 + $0x40] sm:$0xff]  }
 0x457   : > { %v8454_v13 = vshrl.u32 %v24544_v32, 16  ;;  %20135 = vmatprep.subr.bf16.mxu0 %v21898_v49 }
 0x458   : > { %v8135_v17 = vsel %vm2589_vm2, %v8132_v56, %v8134_v28  ;;  %v8502_v56 = vshll.u32 %v24569_v10, 16  ;;  %20136 = vmatpush3.bf16.msra.mxu0 %v21898_v49 }
 0x459   : > { %v8456_v16 = vrot.slane %v8454_v13, 2  ;;  %v8517_v13 = vshrl.u32 %v24579_v48, 16 }
 0x45c   : > { %19996 = vmatmul.mubr.bf16.vlgmr.msra.gmra.mrb[36].mxu1 %v8103_v4 }
 0x45d   : > { %20032 = vmatpush3.bf16.msra.mxu1 %v21864_v34  ;;  %19999 = vmatprep.mubr.bf16.mxu1 %v8105_v35  ;;  %v8440_v34 = vshll.u32 %v24534_v41, 16  ;;  %v8447_v35 = vrot.slane %v8445_v27, 2  ;;  %v8457_v41 = vshll.u32 %v24544_v32, 16  ;;  %v8495_v27 = vrot.slane %v8493_v61, 3 }
 0x45e   : > { %20033 = vmatprep.subr.bf16.mxu1 %v21867_v37 }
 0x45f   : > { %v8442_v4 = vrot.slane %v8440_v34, 3  ;;  %v8492_v34 = vrot.slane %v8490_v26, 2  ;;  %v8547_v26 = vshll.u32 %v24597_v0, 16 }
 0x461   : > { %20034 = vmatpush3.bf16.msra.mxu1 %v21867_v37  ;;  %v8450_v37 = vrot.slane %v8448_v22, 3  ;;  %v8501_v22 = vrot.slane %v8499_v18, 2 }
 0x462   : > { %20035 = vmatprep.subr.bf16.mxu1 %v21870_v15 }
 0x464   : > { %20000 = vmatmul.mubr.bf16.gmra.mrb[40].mxu1 %v8107_v47  ;;  %v8451_v47 = vor.u32 %v8450_v37, %v8447_v35  ;;  %v8508_v35 = vshrl.u32 %v24575_v25, 16  ;;  %v8511_v37 = vshll.u32 %v24575_v25, 16 }
 0x465   : > { %20003 = vmatprep.mubr.bf16.mxu1 %v8109_v54  ;;  %20036 = vmatpush3.bf16.msra.mxu1 %v21870_v15  ;;  %v8443_v15 = vor.u32 %v8442_v4, %v8439_v59  ;;  %v8463_v54 = vshrl.u32 %v24548_v58, 16  ;;  %v21899_v59 = vld [vmem:[#allocation8 + $0x48] sm:$0xff]   ;;  %v8496_v4 = vor.u32 %v8495_v27, %v8492_v34 }
 0x466   : > { %20037 = vmatprep.subr.bf16.mxu1 %v21873_v23  ;;  %20137 = vmatprep.subr.bf16.mxu0 %v21899_v59 }
 0x467   : > { %20138 = vmatpush3.bf16.msra.mxu0 %v21899_v59  ;;  %v8571_v59 = vshrl.u32 %v24612_v36, 16 }
 0x469   : > { %20038 = vmatpush3.bf16.msra.mxu1 %v21873_v23  ;;  %v8466_v23 = vshll.u32 %v24548_v58, 16 }
 0x46a   : > { %20039 = vmatprep.subr.bf16.mxu1 %v21876_v11 }
 0x46c   : > { %20004 = vmatmul.mubr.bf16.gmra.mrb[44].mxu1 %v8111_v12  ;;  %v8452_v12 = vsel %vm3390_vm3, %v8443_v15, %v8451_v47  ;;  %v21892_v15 = vld [vmem:[#allocation6 + $0x220] sm:$0xff]  }
 0x46d   : > { %20007 = vmatprep.mubr.bf16.mxu1 %v8113_v51  ;;  %20040 = vmatpush3.bf16.msra.mxu1 %v21876_v11  ;;  %v8459_v11 = vrot.slane %v8457_v41, 3  ;;  %v8465_v51 = vrot.slane %v8463_v54, 2  ;;  %v8520_v41 = vshll.u32 %v24579_v48, 16  ;;  %v8510_v54 = vrot.slane %v8508_v35, 2 }
 0x46e   : > { %20041 = vmatprep.subr.bf16.mxu1 %v21879_v63 }
 0x46f   : > { %v8460_v31 = vor.u32 %v8459_v11, %v8456_v16  ;;  %v8519_v16 = vrot.slane %v8517_v13, 2  ;;  %v8522_v11 = vrot.slane %v8520_v41, 3  ;;  %v8573_v41 = vrot.slane %v8571_v59, 2 }
 0x471   : > { %20042 = vmatpush3.bf16.msra.mxu1 %v21879_v63  ;;  %v8468_v63 = vrot.slane %v8466_v23, 3  ;;  %v8461_v50 = vsel %vm3390_vm3, %v8451_v47, %v8460_v31  ;;  %v8513_v23 = vrot.slane %v8511_v37, 3  ;;  %v8523_v14 = vor.u32 %v8522_v11, %v8519_v16 }
 0x472   : > { %20043 = vmatprep.subr.bf16.mxu1 %v21882_v3  ;;  %v8589_v16 = vshrl.u32 %v24621_v7, 16  ;;  %v8592_v11 = vshll.u32 %v24621_v7, 16 }
 0x474   : > { %20008 = vmatmul.mubr.bf16.gmra.mrb[48].mxu1 %v8115_v5  ;;  %v8469_v5 = vor.u32 %v8468_v63, %v8465_v51  ;;  %v8514_v51 = vor.u32 %v8513_v23, %v8510_v54  ;;  %v8526_v63 = vshrl.u32 %v24585_v45, 16  ;;  %v8580_v54 = vshrl.u32 %v24618_v60, 16 }
 0x475   : > { %20011 = vmatprep.mubr.bf16.mxu1 %v8117_v39  ;;  %20044 = vmatpush3.bf16.msra.mxu1 %v21882_v3  ;;  %v8475_v3 = vshll.u32 %v24555_v57, 16  ;;  %v8481_v39 = vshrl.u32 %v24559_v2, 16  ;;  %v8583_v23 = vshll.u32 %v24618_v60, 16 }
 0x476   : > { %20045 = vmatprep.subr.bf16.mxu1 %v21886_v33 }
 0x477   : > { %v8483_v1 = vrot.slane %v8481_v39, 2  ;;  %v21894_v39 = vld [vmem:[#allocation6 + $0x230] sm:$0xff]  }
 0x479   : > { %20046 = vmatpush3.bf16.msra.mxu1 %v21886_v33  ;;  %v8484_v33 = vshll.u32 %v24559_v2, 16 }
 0x47a   : > { %20083 = vmatprep.subr.bf16.mxu1 %v24593_v52 }
 0x47c   : > { %20012 = vmatmul.mubr.bf16.gmra.mrb[52].mxu1 %v8119_v21  ;;  %v8477_v21 = vrot.slane %v8475_v3, 3  ;;  %v8535_v3 = vshrl.u32 %v24589_v62, 16 }
 0x47d   : > { %20015 = vmatprep.mubr.bf16.mxu1 %v8121_v43  ;;  %v8470_v43 = vsel %vm3390_vm3, %v8460_v31, %v8469_v5  ;;  %v8529_v31 = vshll.u32 %v24585_v45, 16 }
 0x484   : > { %20016 = vmatmul.mubr.bf16.gmra.mrb[56].mxu1 %v8123_v6  ;;  %v8486_v6 = vrot.slane %v8484_v33, 3 }
 0x485   : > { %20019 = vmatprep.mubr.bf16.mxu1 %v8125_v44  ;;  %v8478_v44 = vor.u32 %v8477_v21, %v8474_v9  ;;  %v8531_v9 = vrot.slane %v8529_v31, 3  ;;  %v8524_v21 = vsel %vm3390_vm3, %v8514_v51, %v8523_v14  ;;  %v24682_v31 = vld [vmem:[%s22885_s20 + $0xa0] ss:$0 sps:$4 sm:$0x77]  }
 0x487   : > { %v8479_v30 = vsel %vm3390_vm3, %v8469_v5, %v8478_v44  ;;  %v8538_v5 = vshll.u32 %v24589_v62, 16 }
 0x48c   : > { %20020 = vmatmul.mubr.bf16.gmra.mrb[60].mxu1 %v8127_v20  ;;  %v8487_v20 = vor.u32 %v8486_v6, %v8483_v1  ;;  %v21895_v1 = vld [vmem:[#allocation6 + $0x238] sm:$0xff]  }
 0x48d   : > { %20023 = vmatprep.mubr.bf16.mxu1 %v8129_v42  ;;  %v21890_v42 = vld [vmem:[#allocation6 + $0x210] sm:$0xff]  }
 0x48e   : > { %v8497_v47 = vsel %vm3390_vm3, %v8487_v20, %v8496_v4 }
 0x494   : > { %20024 = vmatmul.mubr.bf16.gmra.mrb[64].mxu1 %v8131_v53  ;;  %v8504_v53 = vrot.slane %v8502_v56, 3 }
 0x495   : > { %20027 = vmatprep.mubr.bf16.mxu1 %v8133_v46  ;;  %v21891_v46 = vld [vmem:[#allocation6 + $0x218] sm:$0xff]  }
 0x496   : > { %v8505_v28 = vor.u32 %v8504_v53, %v8501_v22  ;;  %v8562_v53 = vshrl.u32 %v24608_v24, 16 }
 0x498   : > { %v8515_v33 = vsel %vm3390_vm3, %v8505_v28, %v8514_v51  ;;  %v8564_v37 = vrot.slane %v8562_v53, 2  ;;  %v8582_v51 = vrot.slane %v8580_v54, 2  ;;  %v11466_v54 = vld [vmem:[#allocation2 + $0x8] sm:$0x3] }
 0x49c   : > { %20028 = vmatmul.mubr.bf16.gmra.mrb[68].mxu1 %v8135_v17  ;;  %v8506_v17 = vsel %vm3390_vm3, %v8496_v4, %v8505_v28  ;;  %v8574_v4 = vshll.u32 %v24612_v36, 16 }
 0x49d   : > { %20047 = vmatprep.mubr.bf16.mxu1 %v8452_v12  ;;  %v21893_v12 = vld [vmem:[#allocation6 + $0x228] sm:$0xff]  }
 0x4a4   : > { %20048 = vmatmul.mubr.bf16.vlgmr.msra.gmra.mrb[36].mxu1 %v8461_v50  ;;  %v8528_v50 = vrot.slane %v8526_v63, 2  ;;  %v8585_v63 = vrot.slane %v8583_v23, 3  ;;  %v11467_v23 = vsel %vm24729_vm9, 0, %v11466_v54 }
 0x4a5   : > { %20084 = vmatpush3.bf16.msra.mxu1 %v24593_v52  ;;  %20051 = vmatprep.mubr.bf16.mxu1 %v8470_v43  ;;  %v8488_v52 = vsel %vm3390_vm3, %v8478_v44, %v8487_v20  ;;  %v8537_v43 = vrot.slane %v8535_v3, 2  ;;  %v8544_v44 = vshrl.u32 %v24597_v0, 16  ;;  %v8553_v20 = vshrl.u32 %v24601_v38, 16  ;;  %11468 = vst [vmem:[#allocation2 + $0x8] sm:$0x3] %v11467_v23 }
 0x4a6   : > { %20085 = vmatprep.subr.bf16.mxu1 %v21889_v55  ;;  %v8532_v6 = vor.u32 %v8531_v9, %v8528_v50  ;;  %v8591_v3 = vrot.slane %v8589_v16, 2  ;;  %v8601_v50 = vshll.u32 %v24682_v31, 16 }
 0x4a7   : > { %v8546_v56 = vrot.slane %v8544_v44, 2  ;;  %v8555_v27 = vrot.slane %v8553_v20, 2  ;;  %v8907_v20 = vrot.slane %v24537_v29, 3  ;;  %v8915_v29 = vrot.slane %v24559_v2, 3 }
 0x4a8   : > { %v8533_v18 = vsel %vm3390_vm3, %v8523_v14, %v8532_v6  ;;  %v8923_v2 = vrot.slane %v24579_v48, 3  ;;  %v8931_v48 = vrot.slane %v24601_v38, 3 }
 0x4a9   : > { %20086 = vmatpush3.bf16.msra.mxu1 %v21889_v55  ;;  %v8540_v55 = vrot.slane %v8538_v5, 3  ;;  %v8594_v5 = vrot.slane %v8592_v11, 3  ;;  %v21900_v11 = vld [vmem:[#allocation8 + $0x50] sm:$0xff]  }
 0x4aa   : > { %20087 = vmatprep.subr.bf16.mxu1 %v21890_v42  ;;  %20139 = vmatprep.subr.bf16.mxu0 %v21900_v11 }
 0x4ab   : > { %v8541_v61 = vor.u32 %v8540_v55, %v8537_v43  ;;  %v8595_v9 = vor.u32 %v8594_v5, %v8591_v3  ;;  %20140 = vmatpush3.bf16.msra.mxu0 %v21900_v11  ;;  %v24743_v3 = vld [vmem:[#allocation12] ss:$0 sm:$0xff] }
 0x4ac   : > { %20052 = vmatmul.mubr.bf16.gmra.mrb[40].mxu1 %v8479_v30  ;;  %v8549_v30 = vrot.slane %v8547_v26, 3 }
 0x4ad   : > { %20055 = vmatprep.mubr.bf16.mxu1 %v8488_v52  ;;  %20088 = vmatpush3.bf16.msra.mxu1 %v21890_v42  ;;  %v8556_v42 = vshll.u32 %v24601_v38, 16  ;;  %v8542_v34 = vsel %vm3390_vm3, %v8532_v6, %v8541_v61  ;;  %v8939_v38 = vrot.slane %v24621_v7, 3  ;;  %v11472_v7 = vld [vmem:[#allocation2 + $0x98] sm:$0xe] }
 0x4ae   : > { %20089 = vmatprep.subr.bf16.mxu1 %v21891_v46  ;;  %v8550_v22 = vor.u32 %v8549_v30, %v8546_v56  ;;  %v8909_v56 = vrot.slane %v24544_v32, 3  ;;  %v8911_v30 = vrot.slane %v24548_v58, 3  ;;  %v8917_v32 = vrot.slane %v24565_v19, 3 }
 0x4af   : > { %v8558_v52 = vrot.slane %v8556_v42, 3  ;;  %v8919_v58 = vrot.slane %v24569_v10, 3  ;;  %v8925_v19 = vrot.slane %v24585_v45, 3  ;;  %v8927_v10 = vrot.slane %v24589_v62, 3 }
 0x4b0   : > { %v8551_v35 = vsel %vm3390_vm3, %v8541_v61, %v8550_v22  ;;  %v8918_v53 = vsel %vm3861_vm5, %v8915_v29, %v8917_v32  ;;  %v8933_v45 = vrot.slane %v24608_v24, 3  ;;  %v8935_v62 = vrot.slane %v24612_v36, 3 }
 0x4b1   : > { %20090 = vmatpush3.bf16.msra.mxu1 %v21891_v46  ;;  %v8565_v46 = vshll.u32 %v24608_v24, 16  ;;  %v8559_v49 = vor.u32 %v8558_v52, %v8555_v27  ;;  %v8913_v27 = vrot.slane %v24555_v57, 3  ;;  %v8921_v57 = vrot.slane %v24575_v25, 3 }
 0x4b2   : > { %20091 = vmatprep.subr.bf16.mxu1 %v21892_v15  ;;  %v8929_v25 = vrot.slane %v24597_v0, 3  ;;  %v8937_v0 = vrot.slane %v24618_v60, 3  ;;  %v8941_v24 = vrot.slane %v24682_v31, 3  ;;  %v11473_v16 = vsel %vm24735_vm11, 0, %v11472_v7 }
 0x4b3   : > { %v8567_v28 = vrot.slane %v8565_v46, 3  ;;  %v8560_v13 = vsel %vm3390_vm3, %v8550_v22, %v8559_v49  ;;  %v8914_v52 = vsel %vm3861_vm5, %v8911_v30, %v8913_v27  ;;  %v8916_v22 = vsel %vm3861_vm5, %v8913_v27, %v8915_v29  ;;  %11474 = vst [vmem:[#allocation2 + $0x98] sm:$0xe] %v11473_v16 }
 0x4b4   : > { %20056 = vmatmul.mubr.bf16.gmra.mrb[44].mxu1 %v8497_v47  ;;  %v8920_v46 = vsel %vm3861_vm5, %v8917_v32, %v8919_v58  ;;  %v8924_v59 = vsel %vm3861_vm5, %v8921_v57, %v8923_v2  ;;  %v8942_v36 = vsel %vm3861_vm5, %v8939_v38, %v8941_v24 }
 0x4b5   : > { %20059 = vmatprep.mubr.bf16.mxu1 %v8506_v17  ;;  %20092 = vmatpush3.bf16.msra.mxu1 %v21892_v15  ;;  %v8576_v15 = vrot.slane %v8574_v4, 3  ;;  %v8568_v47 = vor.u32 %v8567_v28, %v8564_v37  ;;  %v8926_v4 = vsel %vm3861_vm5, %v8923_v2, %v8925_v19  ;;  %v8930_v37 = vsel %vm3861_vm5, %v8927_v10, %v8929_v25 }
 0x4b6   : > { %20093 = vmatprep.subr.bf16.mxu1 %v21893_v12  ;;  %v8932_v28 = vsel %vm3861_vm5, %v8929_v25, %v8931_v48 }
 0x4b7   : > { %v8577_v17 = vor.u32 %v8576_v15, %v8573_v41  ;;  %v8936_v41 = vsel %vm3861_vm5, %v8933_v45, %v8935_v62  ;;  %v8938_v15 = vsel %vm3861_vm5, %v8935_v62, %v8937_v0  ;;  %v22505_v62 = vmov 0.0  }
 0x4b9   : > { %20094 = vmatpush3.bf16.msra.mxu1 %v21893_v12  ;;  %v8569_v12 = vsel %vm3390_vm3, %v8559_v49, %v8568_v47  ;;  %v8578_v14 = vsel %vm3390_vm3, %v8568_v47, %v8577_v17  ;;  %v8922_v49 = vsel %vm3861_vm5, %v8919_v58, %v8921_v57  ;;  %v8940_v47 = vsel %vm3861_vm5, %v8937_v0, %v8939_v38 }
 0x4ba   : > { %20095 = vmatprep.subr.bf16.mxu1 %v21894_v39 }
 0x4bc   : > { %20060 = vmatmul.mubr.bf16.gmra.mrb[48].mxu1 %v8515_v33  ;;  %v8598_v33 = vshrl.u32 %v24682_v31, 16  ;;  %v24741_v31 = vld [vmem:[#allocation11] ss:$0 sm:$0xff] }
 0x4bd   : > { %20063 = vmatprep.mubr.bf16.mxu1 %v8524_v21  ;;  %20096 = vmatpush3.bf16.msra.mxu1 %v21894_v39  ;;  %v8586_v39 = vor.u32 %v8585_v63, %v8582_v51  ;;  %v8885_v21 = vld [vmem:[%s22885_s20 + $0x10] sm:$0x8]  ;;  %v21903_v63 = vld [vmem:[#allocation8 + $0x68] sm:$0xff]  }
 0x4be   : > { %20097 = vmatprep.subr.bf16.mxu1 %v21895_v1  ;;  %v8600_v55 = vrot.slane %v8598_v33, 2  ;;  %v18240_v44 = vcombine.low %v8885_v21, %v24531_v8  ;;  %v8912_v8 = vsel %vm3861_vm5, %v8909_v56, %v8911_v30  ;;  %v21902_v51 = vld [vmem:[#allocation8 + $0x60] sm:$0xff]  }
 0x4bf   : > { %v8587_v43 = vsel %vm3390_vm3, %v8577_v17, %v8586_v39  ;;  %v8596_v6 = vsel %vm3390_vm3, %v8586_v39, %v8595_v9 }
 0x4c0   : > { %v8906_v61 = vrot.slane %v18240_v44, 3 }
 0x4c1   : > { %20098 = vmatpush3.bf16.msra.mxu1 %v21895_v1  ;;  %v8603_v1 = vrot.slane %v8601_v50, 3 }
 0x4c3   : > { %v8604_v26 = vor.u32 %v8603_v1, %v8600_v55 }
 0x4c4   : > { %20064 = vmatmul.mubr.bf16.gmra.mrb[52].mxu1 %v8533_v18  ;;  %v8908_v18 = vsel %vm3861_vm5, %v8906_v61, %v8907_v20 }
 0x4c5   : > { %20067 = vmatprep.mubr.bf16.mxu1 %v8542_v34  ;;  %v8605_v42 = vsel %vm3390_vm3, %v8595_v9, %v8604_v26  ;;  %v8910_v34 = vsel %vm3861_vm5, %v8907_v20, %v8909_v56 }
 0x4cc   : > { %20068 = vmatmul.mubr.bf16.gmra.mrb[56].mxu1 %v8551_v35  ;;  %v8928_v35 = vsel %vm3861_vm5, %v8925_v19, %v8927_v10 }
 0x4cd   : > { %20071 = vmatprep.mubr.bf16.mxu1 %v8560_v13  ;;  %v8934_v13 = vsel %vm3861_vm5, %v8931_v48, %v8933_v45 }
 0x4d4   : > { %20072 = vmatmul.mubr.bf16.gmra.mrb[60].mxu1 %v8569_v12  ;;  %v21901_v12 = vld [vmem:[#allocation8 + $0x58] sm:$0xff]  }
 0x4d5   : > { %20075 = vmatprep.mubr.bf16.mxu1 %v8578_v14  ;;  %20141 = vmatprep.subr.bf16.mxu0 %v21901_v12 }
 0x4d6   : > { %20142 = vmatpush3.bf16.msra.mxu0 %v21901_v12 }
 0x4d7   : > { %20143 = vmatprep.subr.bf16.mxu0 %v21902_v51 }
 0x4da   : > { %20144 = vmatpush3.bf16.msra.mxu0 %v21902_v51 }
 0x4db   : > { %20145 = vmatprep.subr.bf16.mxu0 %v21903_v63 }
 0x4dc   : > { %20076 = vmatmul.mubr.bf16.gmra.mrb[64].mxu1 %v8587_v43 }
 0x4dd   : > { %20079 = vmatprep.mubr.bf16.mxu1 %v8596_v6 }
 0x4de   : > { %20146 = vmatpush3.bf16.msra.mxu0 %v21903_v63 }
 0x4e4   : > { %20080 = vmatmul.mubr.bf16.gmra.mrb[68].mxu1 %v8605_v42 }
 0x4e5   : > { %20099 = vmatprep.mubr.bf16.mxu1 %v8908_v18 }
 0x4ec   : > { %20100 = vmatmul.mubr.bf16.vlgmr.msra.gmra.mrb[36].mxu1 %v8910_v34 }
 0x4ed   : > { %20103 = vmatprep.mubr.bf16.mxu1 %v8912_v8 }
 0x4f4   : > { %20104 = vmatmul.mubr.bf16.gmra.mrb[40].mxu1 %v8914_v52 }
 0x4f5   : > { %20107 = vmatprep.mubr.bf16.mxu1 %v8916_v22 }
 0x4fc   : > { %20108 = vmatmul.mubr.bf16.gmra.mrb[44].mxu1 %v8918_v53 }
 0x4fd   : > { %20111 = vmatprep.mubr.bf16.mxu1 %v8920_v46 }
 0x504   : > { %20112 = vmatmul.mubr.bf16.gmra.mrb[48].mxu1 %v8922_v49 }
 0x505   : > { %20115 = vmatprep.mubr.bf16.mxu1 %v8924_v59 }
 0x50c   : > { %20116 = vmatmul.mubr.bf16.gmra.mrb[52].mxu1 %v8926_v4 }
 0x50d   : > { %20119 = vmatprep.mubr.bf16.mxu1 %v8928_v35 }
 0x514   : > { %20120 = vmatmul.mubr.bf16.gmra.mrb[56].mxu1 %v8930_v37 }
 0x515   : > { %20123 = vmatprep.mubr.bf16.mxu1 %v8932_v28 }
 0x51c   : > { %20124 = vmatmul.mubr.bf16.gmra.mrb[60].mxu1 %v8934_v13  ;;  %v24769_v13 = vrot.slane %v22505_v62, %v23683_v40 }
 0x51d   : > { %20127 = vmatprep.mubr.bf16.mxu1 %v8936_v41 }
 0x524   : > { %20128 = vmatmul.mubr.bf16.gmra.mrb[64].mxu1 %v8938_v15 }
 0x525   : > { %20131 = vmatprep.mubr.bf16.mxu1 %v8940_v47 }
 0x52c   : > { %20132 = vmatmul.mubr.bf16.gmra.mrb[68].mxu1 %v8942_v36 }
 0x5bf   : > { %v20101_v14 = vpop.f32.mrb[36].mxu1 }
 0x5c0   : > { %v9231_v5 = vmul.f32 %v20101_v14, %v24741_v31  ;;  %v9043_v39 = vpop.f32.mrb[37].mxu1 }
 0x5c1   : > { %v9229_v33 = vmul.f32 %v24741_v31, %v9043_v39  ;;  %v20102_v50 = vpop.f32.mrb[38].mxu1 }
 0x5c2   : > { %v9274_v9 = vadd.f32 %v24743_v3, %v9231_v5  ;;  %v9232_v21 = vmul.f32 %v20102_v50, %v24741_v31  ;;  %v9046_v43 = vpop.f32.mrb[39].mxu1 }
 0x5c3   : > { %v9272_v55 = vadd.f32 %v24743_v3, %v9229_v33  ;;  %v9230_v1 = vmul.f32 %v24741_v31, %v9046_v43 }
 0x5c4   : > { %v9310_v6 = vmax.f32 %v9274_v9, 0.0  ;;  %v9275_v44 = vadd.f32 %v24743_v3, %v9232_v21 }
 0x5c5   : > { %v9308_v26 = vmax.f32 %v9272_v55, 0.0  ;;  %v9273_v61 = vadd.f32 %v24743_v3, %v9230_v1 }
 0x5c6   : > { %v9421_v20 = vcombine.high %v9310_v6, %v9310_v6  ;;  %v9428_v42 = vrot.slane %v9310_v6, %v23683_v40  ;;  %v9311_v18 = vmax.f32 %v9275_v44, 0.0 }
 0x5c7   : > { %v9387_v56 = vcombine.high %v9308_v26, %v9308_v26  ;;  %v9394_v30 = vrot.slane %v9308_v26, %v23683_v40  ;;  %v9309_v34 = vmax.f32 %v9273_v61, 0.0  ;;  %v20105_v8 = vpop.f32.mrb[40].mxu1 }
 0x5c8   : > { %v9435_v27 = vrot.slane %v9421_v20, %v23683_v40  ;;  %v9436_v29 = vcombine.high %v9428_v42, %v9428_v42  ;;  %v9438_v52 = vcombine.high %v9311_v18, %v9311_v18  ;;  %v9445_v22 = vrot.slane %v9311_v18, %v23683_v40  ;;  %v9059_v32 = vpop.f32.mrb[41].mxu1 }
 0x5c9   : > { %v9401_v58 = vrot.slane %v9387_v56, %v23683_v40  ;;  %v9402_v53 = vcombine.high %v9394_v30, %v9394_v30  ;;  %v9404_v46 = vcombine.high %v9309_v34, %v9309_v34  ;;  %v9411_v57 = vrot.slane %v9309_v34, %v23683_v40  ;;  %v20106_v2 = vpop.f32.mrb[42].mxu1 }
 0x5ca   : > { %v10046_v49 = vcombine.low %v9436_v29, %v9435_v27  ;;  %v9437_v59 = vcombine.high %v9435_v27, %v9435_v27  ;;  %v24760_v19 = vrot.slane %v9438_v52, %v23683_v40  ;;  %v9453_v10 = vcombine.high %v9445_v22, %v9445_v22  ;;  %v24762_v4 = vpop.f32.mrb[43].mxu1 }
 0x5cb   : > { %v9403_v35 = vcombine.high %v9401_v58, %v9401_v58  ;;  %v10005_v25 = vcombine.low %v9394_v30, %v9402_v53  ;;  %v9418_v48 = vrot.slane %v9404_v46, %v23683_v40  ;;  %v9419_v37 = vcombine.high %v9411_v57, %v9411_v57 }
 0x5cc   : > { %v10047_v28 = vcombine.low %v9437_v59, %v9445_v22  ;;  %v24766_v45 = vcombine.low %v9453_v10, %v24760_v19  ;;  %v9235_v41 = vmul.f32 %v20105_v8, %v24741_v31  ;;  %v10054_v0 = vrot.slane %v10046_v49, %v23683_v40 }
 0x5cd   : > { %v10006_v38 = vcombine.low %v9401_v58, %v9403_v35  ;;  %v9420_v15 = vcombine.high %v9418_v48, %v9418_v48  ;;  %v10022_v47 = vcombine.low %v9411_v57, %v9419_v37  ;;  %v10013_v24 = vrot.slane %v10005_v25, %v23683_v40 }
 0x5ce   : > { %v10061_v36 = vrot.slane %v10047_v28, %v23683_v40  ;;  %v9278_v54 = vadd.f32 %v24743_v3, %v9235_v41  ;;  %v9233_v7 = vmul.f32 %v24741_v31, %v9059_v32  ;;  %v10071_v16 = vrot.slane %v24766_v45, %v23683_v40 }
 0x5cf   : > { %v10020_v23 = vrot.slane %v10006_v38, %v23683_v40  ;;  %v10023_v11 = vcombine.low %v9418_v48, %v9420_v15  ;;  %v10030_v12 = vrot.slane %v10022_v47, %v23683_v40  ;;  %v24781_v51 = vpop.f32.mrb[44].mxu1  ;;  %v9454_v39 = vcombine.high %v24760_v19, %v24760_v19  ;;  %v21904_v47 = vld [vmem:[#allocation8 + $0x70] sm:$0xff]  }
 0x5d0   : > { %v10062_v63 = vcombine.low %v10054_v0, %v10061_v36  ;;  %v18253_v14 = vcombine.low %v10061_v36, %v10061_v36  ;;  %v9314_v5 = vmax.f32 %v9278_v54, 0.0  ;;  %v24785_v33 = vpop.f32.mrb[45].mxu1  ;;  %v9276_v43 = vadd.f32 %v24743_v3, %v9233_v7  ;;  %20147 = vmatprep.subr.bf16.mxu0 %v21904_v47 }
 0x5d1   : > { %v10021_v50 = vcombine.low %v10013_v24, %v10020_v23  ;;  %v18251_v9 = vcombine.low %v10020_v23, %v10020_v23  ;;  %v10037_v21 = vrot.slane %v10023_v11, %v23683_v40  ;;  %v24789_v55 = vpop.f32.mrb[46].mxu1  ;;  %v9236_v27 = vmul.f32 %v20106_v2, %v24741_v31  ;;  %20148 = vmatpush3.bf16.msra.mxu0 %v21904_v47 }
 0x5d2   : > { %v10853_v1 = vrot.slane %v10062_v63, %v23683_v40  ;;  %v24793_v6 = vrot.slane %v18253_v14, %v23683_v40  ;;  %v9489_v44 = vcombine.high %v9314_v5, %v9314_v5  ;;  %v9496_v26 = vrot.slane %v9314_v5, %v23683_v40  ;;  %v24796_v61 = vpop.f32.mrb[47].mxu1 }
 0x5d3   : > { %v10812_v20 = vrot.slane %v10021_v50, %v23683_v40  ;;  %v10819_v42 = vrot.slane %v18251_v9, %v23683_v40  ;;  %v10038_v18 = vcombine.low %v10030_v12, %v10037_v21  ;;  %v18252_v56 = vcombine.low %v10037_v21, %v10037_v21 }
 0x5d4   : > { %v10861_v30 = vcombine.high %v10853_v1, %v10853_v1  ;;  %v10862_v34 = vcombine.high %v24793_v6, %v24793_v6  ;;  %v11513_v8 = vcombine.low %v24769_v13, %v10853_v1  ;;  %v24809_v46 = vrot.slane %v9489_v44, %v23683_v40 }
 0x5d5   : > { %v10820_v29 = vcombine.high %v10812_v20, %v10812_v20  ;;  %v10821_v52 = vcombine.high %v10819_v42, %v10819_v42  ;;  %v10829_v22 = vrot.slane %v10038_v18, %v23683_v40  ;;  %v10836_v32 = vrot.slane %v18252_v56, %v23683_v40 }
 0x5d6   : > { %v11514_v58 = vcombine.low %v10861_v30, %v24793_v6  ;;  %v11521_v53 = vrot.slane %v11513_v8, %v23683_v40  ;;  %v9504_v57 = vcombine.high %v9496_v26, %v9496_v26  ;;  %v9312_v48 = vmax.f32 %v9276_v43, 0.0 }
 0x5d7   : > { %v11479_v49 = vcombine.low %v10812_v20, %v10820_v29  ;;  %v11480_v59 = vcombine.low %v10819_v42, %v10821_v52  ;;  %v10837_v19 = vcombine.high %v10829_v22, %v10829_v22  ;;  %v10838_v10 = vcombine.high %v10836_v32, %v10836_v32  ;;  %v24811_v35 = vpop.f32.mrb[48].mxu1 }
 0x5d8   : > { %v11528_v2 = vrot.slane %v11514_v58, %v23683_v40  ;;  %v10105_v25 = vcombine.low %v9496_v26, %v9504_v57  ;;  %v9279_v37 = vadd.f32 %v24743_v3, %v9236_v27  ;;  %v24815_v28 = vpop.f32.mrb[49].mxu1  ;;  %v9455_v54 = vcombine.high %v9312_v48, %v9312_v48 }
 0x5d9   : > { %v11487_v62 = vrot.slane %v11479_v49, %v23683_v40  ;;  %v11494_v41 = vrot.slane %v11480_v59, %v23683_v40  ;;  %v11496_v0 = vcombine.low %v10829_v22, %v10837_v19  ;;  %v11497_v38 = vcombine.low %v10836_v32, %v10838_v10  ;;  %v24819_v15 = vpop.f32.mrb[50].mxu1  ;;  %v12633_v10 = vld [vmem:[#allocation2 + $0x8] sm:$0xe] }
 0x5da   : > { %v11529_v24 = vcombine.low %v11521_v53, %v11528_v2  ;;  %v24822_v36 = vrot.slane %v10105_v25, %v23683_v40  ;;  %v9462_v7 = vrot.slane %v9312_v48, %v23683_v40  ;;  %v24825_v23 = vpop.f32.mrb[51].mxu1  ;;  %v9315_v14 = vmax.f32 %v9279_v37, 0.0 }
 0x5db   : > { %v11495_v11 = vcombine.low %v11487_v62, %v11494_v41  ;;  %v11504_v12 = vrot.slane %v11496_v0, %v23683_v40  ;;  %v11511_v63 = vrot.slane %v11497_v38, %v23683_v40  ;;  %v9469_v9 = vrot.slane %v9455_v54, %v23683_v40 }
 0x5dc   : > { %v18462_v5 = vpack.c.bf16 %v11529_v24, %v11529_v24  ;;  %v18256_v50 = vcombine.low %v24822_v36, %v24822_v36  ;;  %v10064_v21 = vcombine.low %v9454_v39, %v9462_v7  ;;  %v9505_v44 = vcombine.high %v24809_v46, %v24809_v46 }
 0x5dd   : > { %v18460_v43 = vpack.c.bf16 %v11495_v11, %v11495_v11  ;;  %v11512_v1 = vcombine.low %v11504_v12, %v11511_v63  ;;  %v9506_v26 = vcombine.high %v9315_v14, %v9315_v14  ;;  %v9471_v56 = vcombine.high %v9469_v9, %v9469_v9 }
 0x5de   : > { %v12257_v20 = vshrl.u32 %v18462_v5, 16  ;;  %v12260_v42 = vshll.u32 %v18462_v5, 16  ;;  %v10918_v18 = vrot.slane %v18256_v50, %v23683_v40  ;;  %v10078_v29 = vrot.slane %v10064_v21, %v23683_v40 }
 0x5df   : > { %v12238_v30 = vshrl.u32 %v18460_v43, 16  ;;  %v12241_v8 = vshll.u32 %v18460_v43, 16  ;;  %v18461_v27 = vpack.c.bf16 %v11512_v1, %v11512_v1  ;;  %v24836_v52 = vpop.f32.mrb[52].mxu1  ;;  %v24838_v58 = vcombine.low %v9469_v9, %v9471_v56 }
 0x5e0   : > { %v12259_v39 = vrot.slane %v12257_v20, 6  ;;  %v12262_v22 = vrot.slane %v12260_v42, 7  ;;  %v10920_v32 = vcombine.high %v10918_v18, %v10918_v18  ;;  %v24840_v53 = vpop.f32.mrb[53].mxu1  ;;  %v10079_v48 = vcombine.low %v10071_v16, %v10078_v29 }
 0x5e1   : > { %v12240_v46 = vrot.slane %v12238_v30, 6  ;;  %v12243_v57 = vrot.slane %v12241_v8, 7  ;;  %v12247_v49 = vshrl.u32 %v18461_v27, 16  ;;  %v12250_v59 = vshll.u32 %v18461_v27, 16  ;;  %v24842_v19 = vpop.f32.mrb[54].mxu1 }
 0x5e2   : > { %v24844_v2 = vor.u32 %v12262_v22, %v12259_v39  ;;  %v24846_v25 = vcombine.low %v10918_v18, %v10920_v32  ;;  %v9513_v37 = vrot.slane %v9315_v14, %v23683_v40  ;;  %v24852_v62 = vpop.f32.mrb[55].mxu1  ;;  %v18254_v47 = vcombine.low %v10078_v29, %v10078_v29 }
 0x5e3   : > { %v12244_v41 = vor.u32 %v12243_v57, %v12240_v46  ;;  %v12249_v0 = vrot.slane %v12247_v49, 6  ;;  %v12252_v38 = vrot.slane %v12250_v59, 7  ;;  %v10095_v45 = vrot.slane %v24838_v58, %v23683_v40 }
 0x5e4   : > { %v12265_v54 = vrot.slane %v24844_v2, 4  ;;  %v10870_v16 = vrot.slane %v10079_v48, %v23683_v40  ;;  %v24865_v7 = vrot.slane %v9506_v26, %v23683_v40  ;;  %v10877_v14 = vrot.slane %v18254_v47, %v23683_v40 }
 0x5e5   : > { %v12245_v11 = vrot.slane %v12244_v41, 4  ;;  %v12634_v12 = vsel %vm24735_vm11, %v12244_v41, %v12633_v10  ;;  %v12253_v63 = vor.u32 %v12252_v38, %v12249_v0  ;;  %v9521_v9 = vcombine.high %v9513_v37, %v9513_v37 }
 0x5e6   : > { %12635 = vst [vmem:[#allocation2 + $0x8] sm:$0xe] %v12634_v12  ;;  %v10878_v5 = vcombine.high %v10870_v16, %v10870_v16  ;;  %v11530_v50 = vcombine.low %v10862_v34, %v10870_v16  ;;  %v10128_v21 = vcombine.low %v9505_v44, %v9513_v37  ;;  %v10879_v26 = vcombine.high %v10877_v14, %v10877_v14 }
 0x5e7   : > { %v12254_v43 = vsel %vm24856_vm13, %v12245_v11, %v12253_v63  ;;  %v12255_v1 = vrot.slane %v12253_v63, 4  ;;  %v9234_v17 = vmul.f32 %v24741_v31, %v24762_v4  ;;  %v24877_v20 = vpop.f32.mrb[56].mxu1  ;;  %v11589_v42 = vrot.slane %v24846_v25, %v23683_v40 }
 0x5e8   : > { %12636 = vst [vmem:[#allocation2 + $0xc] sm:$0xf] %v12254_v43  ;;  %v11531_v18 = vcombine.low %v10878_v5, %v10877_v14  ;;  %v10129_v6 = vcombine.low %v9521_v9, %v24865_v7  ;;  %v10136_v34 = vrot.slane %v10128_v21, %v23683_v40  ;;  %v24883_v44 = vpop.f32.mrb[57].mxu1  ;;  %v24889_v30 = vcombine.low %v10879_v26, %v24769_v13 }
 0x5e9   : > { %v12264_v56 = vsel %vm24856_vm13, %v12255_v1, %v24844_v2  ;;  %v9277_v4 = vadd.f32 %v24743_v3, %v9234_v17  ;;  %v9239_v8 = vmul.f32 %v24781_v51, %v24741_v31  ;;  %v24894_v27 = vpop.f32.mrb[58].mxu1  ;;  %v11538_v29 = vrot.slane %v11530_v50, %v23683_v40 }
 0x5ea   : > { %12637 = vst [vmem:[#allocation2 + $0x10] sm:$0xf] %v12264_v56  ;;  %v11545_v39 = vrot.slane %v11531_v18, %v23683_v40  ;;  %v10143_v22 = vrot.slane %v10129_v6, %v23683_v40  ;;  %v9237_v32 = vmul.f32 %v24741_v31, %v24785_v33  ;;  %v24901_v46 = vpop.f32.mrb[59].mxu1  ;;  %v11555_v57 = vrot.slane %v24889_v30, %v23683_v40 }
 0x5eb   : > { %v9313_v49 = vmax.f32 %v9277_v4, 0.0  ;;  %v9282_v51 = vadd.f32 %v24743_v3, %v9239_v8  ;;  %v9522_v59 = vcombine.high %v24865_v7, %v24865_v7  ;;  %v9240_v38 = vmul.f32 %v24789_v55, %v24741_v31 }
 0x5ec   : > { %v11546_v10 = vcombine.low %v11538_v29, %v11545_v39  ;;  %v10144_v25 = vcombine.low %v10136_v34, %v10143_v22  ;;  %v18257_v48 = vcombine.low %v10143_v22, %v10143_v22  ;;  %v9280_v37 = vadd.f32 %v24743_v3, %v9237_v32 }
 0x5ed   : > { %v9472_v41 = vcombine.high %v9313_v49, %v9313_v49  ;;  %v9479_v0 = vrot.slane %v9313_v49, %v23683_v40  ;;  %v9318_v33 = vmax.f32 %v9282_v51, 0.0 }
 0x5ee   : > { %v18463_v47 = vpack.c.bf16 %v11546_v10, %v11546_v10  ;;  %v10935_v16 = vrot.slane %v10144_v25, %v23683_v40  ;;  %v24914_v11 = vrot.slane %v18257_v48, %v23683_v40  ;;  %v9316_v12 = vmax.f32 %v9280_v37, 0.0 }
 0x5ef   : > { %v9486_v63 = vrot.slane %v9472_v41, %v23683_v40  ;;  %v9487_v14 = vcombine.high %v9479_v0, %v9479_v0  ;;  %v9557_v5 = vcombine.high %v9318_v33, %v9318_v33  ;;  %v9564_v50 = vrot.slane %v9318_v33, %v23683_v40  ;;  %v24918_v9 = vpop.f32.mrb[60].mxu1 }
 0x5f0   : > { %v12267_v21 = vshrl.u32 %v18463_v47, 16  ;;  %v12270_v43 = vshll.u32 %v18463_v47, 16  ;;  %v10943_v1 = vcombine.high %v10935_v16, %v10935_v16  ;;  %v11582_v55 = vcombine.low %v24769_v13, %v10935_v16  ;;  %v24921_v26 = vpop.f32.mrb[61].mxu1 }
 0x5f1   : > { %v9488_v17 = vcombine.high %v9486_v63, %v9486_v63  ;;  %v10088_v18 = vcombine.low %v9479_v0, %v9487_v14  ;;  %v9571_v6 = vrot.slane %v9557_v5, %v23683_v40  ;;  %v9572_v34 = vcombine.high %v9564_v50, %v9564_v50  ;;  %v24924_v56 = vpop.f32.mrb[62].mxu1 }
 0x5f2   : > { %v12269_v4 = vrot.slane %v12267_v21, 6  ;;  %v12272_v8 = vrot.slane %v12270_v43, 7  ;;  %v11596_v29 = vrot.slane %v11582_v55, %v23683_v40  ;;  %v24928_v39 = vcombine.low %v10943_v1, %v24914_v11  ;;  %v24930_v22 = vpop.f32.mrb[63].mxu1  ;;  %v21905_v1 = vld [vmem:[#allocation8 + $0x78] sm:$0xff]  }
 0x5f3   : > { %v10102_v32 = vrot.slane %v10088_v18, %v23683_v40  ;;  %v10104_v49 = vcombine.low %v9486_v63, %v9488_v17  ;;  %v9573_v51 = vcombine.high %v9571_v6, %v9571_v6  ;;  %v10186_v10 = vcombine.low %v9564_v50, %v9572_v34  ;;  %20149 = vmatprep.subr.bf16.mxu0 %v21905_v1 }
 0x5f4   : > { %v24933_v25 = vor.u32 %v12272_v8, %v12269_v4  ;;  %v11597_v48 = vcombine.low %v11589_v42, %v11596_v29  ;;  %v9523_v37 = vcombine.high %v9316_v12, %v9316_v12  ;;  %v9283_v41 = vadd.f32 %v24743_v3, %v9240_v38  ;;  %20150 = vmatpush3.bf16.msra.mxu0 %v21905_v1 }
 0x5f5   : > { %v10103_v0 = vcombine.low %v10095_v45, %v10102_v32  ;;  %v10112_v33 = vrot.slane %v10104_v49, %v23683_v40  ;;  %v18255_v47 = vcombine.low %v10102_v32, %v10102_v32  ;;  %v10187_v16 = vcombine.low %v9571_v6, %v9573_v51 }
 0x5f6   : > { %v12274_v63 = vsel %vm24856_vm13, %v12265_v54, %v24933_v25  ;;  %v11606_v42 = vrot.slane %v24928_v39, %v23683_v40  ;;  %v18466_v14 = vpack.c.bf16 %v11597_v48, %v11597_v48  ;;  %v10194_v38 = vrot.slane %v10186_v10, %v23683_v40 }
 0x5f7   : > { %12638 = vst [vmem:[#allocation2 + $0x14] sm:$0xf] %v12274_v63  ;;  %v10120_v58 = vcombine.low %v10112_v33, %v24822_v36  ;;  %v10894_v45 = vrot.slane %v10103_v0, %v23683_v40  ;;  %v10901_v5 = vrot.slane %v18255_v47, %v23683_v40  ;;  %v10201_v50 = vrot.slane %v10187_v16, %v23683_v40  ;;  %v24964_v63 = vpop.f32.mrb[64].mxu1 }
 0x5f8   : > { %v12297_v21 = vshrl.u32 %v18466_v14, 16  ;;  %v12300_v2 = vshll.u32 %v18466_v14, 16  ;;  %v9530_v43 = vrot.slane %v9316_v12, %v23683_v40  ;;  %v9537_v54 = vrot.slane %v9523_v37, %v23683_v40 }
 0x5f9   : > { %v10902_v55 = vcombine.high %v10894_v45, %v10894_v45  ;;  %v10903_v17 = vcombine.high %v10901_v5, %v10901_v5  ;;  %v10911_v18 = vrot.slane %v10120_v58, %v23683_v40  ;;  %v10202_v6 = vcombine.low %v10194_v38, %v10201_v50 }
 0x5fa   : > { %v12299_v34 = vrot.slane %v12297_v21, 6  ;;  %v12302_v36 = vrot.slane %v12300_v2, 7  ;;  %v18260_v4 = vcombine.low %v10201_v50, %v10201_v50  ;;  %v9538_v8 = vcombine.high %v9530_v43, %v9530_v43 }
 0x5fb   : > { %v10919_v29 = vcombine.high %v10911_v18, %v10911_v18  ;;  %v11548_v32 = vcombine.low %v10894_v45, %v10902_v55  ;;  %v11564_v49 = vcombine.low %v10901_v5, %v10903_v17  ;;  %v10993_v51 = vrot.slane %v10202_v6, %v23683_v40 }
 0x5fc   : > { %v12275_v12 = vrot.slane %v24933_v25, 4  ;;  %v11000_v10 = vrot.slane %v18260_v4, %v23683_v40  ;;  %v10145_v48 = vcombine.low %v9522_v59, %v9530_v43  ;;  %v10146_v37 = vcombine.low %v9538_v8, %v9537_v54 }
 0x5fd   : > { %v24961_v0 = vor.u32 %v12302_v36, %v12299_v34  ;;  %v11562_v33 = vrot.slane %v11548_v32, %v23683_v40  ;;  %v11565_v47 = vcombine.low %v10911_v18, %v10919_v29  ;;  %v11001_v16 = vcombine.high %v10993_v51, %v10993_v51 }
 0x5fe   : > { %v11572_v14 = vrot.slane %v11564_v49, %v23683_v40  ;;  %v11002_v38 = vcombine.high %v11000_v10, %v11000_v10  ;;  %v10153_v25 = vrot.slane %v10145_v48, %v23683_v40  ;;  %v10160_v58 = vrot.slane %v10146_v37, %v23683_v40 }
 0x5ff   : > { %v11563_v7 = vcombine.low %v11555_v57, %v11562_v33  ;;  %v11579_v59 = vrot.slane %v11565_v47, %v23683_v40  ;;  %v11649_v45 = vcombine.low %v10993_v51, %v11001_v16  ;;  %v10944_v5 = vcombine.high %v24914_v11, %v24914_v11 }
 0x600   : > { %v11650_v50 = vcombine.low %v11000_v10, %v11002_v38  ;;  %v10161_v21 = vcombine.low %v10153_v25, %v10160_v58  ;;  %v18258_v2 = vcombine.low %v10160_v58, %v10160_v58  ;;  %v9319_v43 = vmax.f32 %v9283_v41, 0.0 }
 0x601   : > { %v11580_v54 = vcombine.low %v11572_v14, %v11579_v59  ;;  %v18464_v1 = vpack.c.bf16 %v11563_v7, %v11563_v7  ;;  %v11657_v55 = vrot.slane %v11649_v45, %v23683_v40  ;;  %v9238_v17 = vmul.f32 %v24741_v31, %v24796_v61 }
 0x602   : > { %v11664_v30 = vrot.slane %v11650_v50, %v23683_v40  ;;  %v10952_v57 = vrot.slane %v10161_v21, %v23683_v40  ;;  %v10959_v18 = vrot.slane %v18258_v2, %v23683_v40  ;;  %v9574_v6 = vcombine.high %v9319_v43, %v9319_v43 }
 0x603   : > { %v18465_v34 = vpack.c.bf16 %v11580_v54, %v11580_v54  ;;  %v12277_v11 = vshrl.u32 %v18464_v1, 16  ;;  %v12280_v36 = vshll.u32 %v18464_v1, 16  ;;  %v9581_v4 = vrot.slane %v9319_v43, %v23683_v40 }
 0x604   : > { %v11665_v41 = vcombine.low %v11657_v55, %v11664_v30  ;;  %v10960_v8 = vcombine.high %v10952_v57, %v10952_v57  ;;  %v10961_v29 = vcombine.high %v10959_v18, %v10959_v18  ;;  %v11599_v32 = vcombine.low %v10944_v5, %v10952_v57 }
 0x605   : > { %v12279_v49 = vrot.slane %v12277_v11, 6  ;;  %v12282_v51 = vrot.slane %v12280_v36, 7  ;;  %v12287_v10 = vshrl.u32 %v18465_v34, 16  ;;  %v12290_v61 = vshll.u32 %v18465_v34, 16 }
 0x606   : > { %v18470_v48 = vpack.c.bf16 %v11665_v41, %v11665_v41  ;;  %v11613_v37 = vrot.slane %v11599_v32, %v23683_v40  ;;  %v11615_v33 = vcombine.low %v10960_v8, %v10959_v18  ;;  %v11616_v47 = vcombine.low %v10961_v29, %v24769_v13 }
 0x607   : > { %v12283_v16 = vor.u32 %v12282_v51, %v12279_v49  ;;  %v12289_v14 = vrot.slane %v12287_v10, 6  ;;  %v12292_v38 = vrot.slane %v12290_v61, 7  ;;  %v24985_v25 = vrot.slane %v9574_v6, %v23683_v40 }
 0x608   : > { %v12337_v58 = vshrl.u32 %v18470_v48, 16  ;;  %v12340_v7 = vshll.u32 %v18470_v48, 16  ;;  %v11614_v59 = vcombine.low %v11606_v42, %v11613_v37  ;;  %v11623_v45 = vrot.slane %v11615_v33, %v23683_v40 }
 0x609   : > { %v12284_v5 = vsel %vm24856_vm13, %v12275_v12, %v12283_v16  ;;  %v12285_v50 = vrot.slane %v12283_v16, 4  ;;  %v12293_v21 = vor.u32 %v12292_v38, %v12289_v14  ;;  %v11630_v2 = vrot.slane %v11616_v47, %v23683_v40 }
 0x60a   : > { %12639 = vst [vmem:[#allocation2 + $0x18] sm:$0xf] %v12284_v5  ;;  %v12339_v43 = vrot.slane %v12337_v58, 6  ;;  %v12342_v54 = vrot.slane %v12340_v7, 7  ;;  %v18467_v1 = vpack.c.bf16 %v11614_v59, %v11614_v59  ;;  %v9589_v55 = vcombine.high %v9581_v4, %v9581_v4 }
 0x60b   : > { %v12294_v30 = vsel %vm24856_vm13, %v12285_v50, %v12293_v21  ;;  %v12295_v57 = vrot.slane %v12293_v21, 4  ;;  %v11631_v39 = vcombine.low %v11623_v45, %v11630_v2  ;;  %v9281_v42 = vadd.f32 %v24743_v3, %v9238_v17 }
 0x60c   : > { %12640 = vst [vmem:[#allocation2 + $0x1c] sm:$0xf] %v12294_v30  ;;  %v24997_v18 = vor.u32 %v12342_v54, %v12339_v43  ;;  %v12307_v12 = vshrl.u32 %v18467_v1, 16  ;;  %v12310_v6 = vshll.u32 %v18467_v1, 16  ;;  %v25000_v34 = vcombine.low %v9589_v55, %v24985_v25 }
 0x60d   : > { %v12304_v11 = vsel %vm24856_vm13, %v12295_v57, %v24961_v0  ;;  %v18468_v36 = vpack.c.bf16 %v11631_v39, %v11631_v39  ;;  %v9317_v4 = vmax.f32 %v9281_v42, 0.0  ;;  %v9243_v41 = vmul.f32 %v24811_v35, %v24741_v31 }
 0x60e   : > { %v12305_v8 = vrot.slane %v24961_v0, 4  ;;  %12641 = vst [vmem:[#allocation2 + $0x20] sm:$0xf] %v12304_v11  ;;  %v12345_v17 = vrot.slane %v24997_v18, 4  ;;  %v12309_v29 = vrot.slane %v12307_v12, 6  ;;  %v12312_v32 = vrot.slane %v12310_v6, 7 }
 0x60f   : > { %v12317_v49 = vshrl.u32 %v18468_v36, 16  ;;  %v12320_v51 = vshll.u32 %v18468_v36, 16  ;;  %v9540_v10 = vcombine.high %v9317_v4, %v9317_v4  ;;  %v9547_v61 = vrot.slane %v9317_v4, %v23683_v40 }
 0x610   : > { %v12313_v48 = vor.u32 %v12312_v32, %v12309_v29  ;;  %v10218_v37 = vrot.slane %v25000_v34, %v23683_v40  ;;  %v9286_v33 = vadd.f32 %v24743_v3, %v9243_v41  ;;  %v9241_v35 = vmul.f32 %v24741_v31, %v24815_v28 }
 0x611   : > { %v12319_v0 = vrot.slane %v12317_v49, 6  ;;  %v12322_v47 = vrot.slane %v12320_v51, 7  ;;  %v9554_v16 = vrot.slane %v9540_v10, %v23683_v40  ;;  %v9555_v14 = vcombine.high %v9547_v61, %v9547_v61 }
 0x612   : > { %v12314_v38 = vsel %vm24856_vm13, %v12305_v8, %v12313_v48  ;;  %v12315_v58 = vrot.slane %v12313_v48, 4  ;;  %v9322_v7 = vmax.f32 %v9286_v33, 0.0  ;;  %v9284_v59 = vadd.f32 %v24743_v3, %v9241_v35  ;;  %v25046_v33 = vpop.f32.mrb[65].mxu1 }
 0x613   : > { %v25019_v45 = vor.u32 %v12322_v47, %v12319_v0  ;;  %12642 = vst [vmem:[#allocation2 + $0x24] sm:$0xf] %v12314_v38  ;;  %v9556_v5 = vcombine.high %v9554_v16, %v9554_v16  ;;  %v10169_v50 = vcombine.low %v9547_v61, %v9555_v14  ;;  %v9244_v28 = vmul.f32 %v24819_v15, %v24741_v31  ;;  %v25051_v14 = vpop.f32.mrb[66].mxu1 }
 0x614   : > { %v9625_v21 = vcombine.high %v9322_v7, %v9322_v7  ;;  %v9632_v2 = vrot.slane %v9322_v7, %v23683_v40  ;;  %v9320_v43 = vmax.f32 %v9284_v59, 0.0  ;;  %v9242_v54 = vmul.f32 %v24741_v31, %v24825_v23 }
 0x615   : > { %v12324_v1 = vsel %vm24856_vm13, %v12315_v58, %v25019_v45  ;;  %v12325_v55 = vrot.slane %v25019_v45, 4  ;;  %v10170_v30 = vcombine.low %v9554_v16, %v9556_v5  ;;  %v9590_v57 = vcombine.high %v24985_v25, %v24985_v25 }
 0x616   : > { %12643 = vst [vmem:[#allocation2 + $0x28] sm:$0xf] %v12324_v1  ;;  %v9639_v15 = vrot.slane %v9625_v21, %v23683_v40  ;;  %v9640_v39 = vcombine.high %v9632_v2, %v9632_v2  ;;  %v9591_v42 = vcombine.high %v9320_v43, %v9320_v43  ;;  %v9598_v12 = vrot.slane %v9320_v43, %v23683_v40 }
 0x617   : > { %v10177_v6 = vrot.slane %v10169_v50, %v23683_v40  ;;  %v10184_v23 = vrot.slane %v10170_v30, %v23683_v40  ;;  %v9287_v34 = vadd.f32 %v24743_v3, %v9244_v28  ;;  %v9285_v11 = vadd.f32 %v24743_v3, %v9242_v54 }
 0x618   : > { %v9641_v36 = vcombine.high %v9639_v15, %v9639_v15  ;;  %v10252_v4 = vcombine.low %v9632_v2, %v9640_v39  ;;  %v9605_v41 = vrot.slane %v9591_v42, %v23683_v40  ;;  %v9606_v25 = vcombine.high %v9598_v12, %v9598_v12 }
 0x619   : > { %v10185_v8 = vcombine.low %v10177_v6, %v10184_v23  ;;  %v18259_v29 = vcombine.low %v10184_v23, %v10184_v23  ;;  %v10211_v32 = vcombine.low %v9590_v57, %v9598_v12  ;;  %v9323_v49 = vmax.f32 %v9287_v34, 0.0 }
 0x61a   : > { %v25040_v51 = vrot.slane %v10252_v4, %v23683_v40  ;;  %v10268_v10 = vcombine.low %v9639_v15, %v9641_v36  ;;  %v25042_v61 = vcombine.low %v9606_v25, %v9605_v41  ;;  %v9247_v48 = vmul.f32 %v24836_v52, %v24741_v31  ;;  %v25071_v36 = vpop.f32.mrb[67].mxu1 }
 0x61b   : > { %v10976_v35 = vrot.slane %v10185_v8, %v23683_v40  ;;  %v10983_v0 = vrot.slane %v18259_v29, %v23683_v40  ;;  %v10225_v47 = vrot.slane %v10211_v32, %v23683_v40  ;;  %v9642_v16 = vcombine.high %v9323_v49, %v9323_v49 }
 0x61c   : > { %v10276_v38 = vrot.slane %v10268_v10, %v23683_v40  ;;  %v18263_v58 = vcombine.low %v25040_v51, %v25040_v51  ;;  %v9649_v7 = vrot.slane %v9323_v49, %v23683_v40  ;;  %v9321_v59 = vmax.f32 %v9285_v11, 0.0 }
 0x61d   : > { %v10984_v52 = vcombine.high %v10976_v35, %v10976_v35  ;;  %v10985_v5 = vcombine.high %v10983_v0, %v10983_v0  ;;  %v10226_v50 = vcombine.low %v10218_v37, %v10225_v47  ;;  %v18261_v28 = vcombine.low %v10225_v47, %v10225_v47 }
 0x61e   : > { %v11065_v21 = vrot.slane %v18263_v58, %v23683_v40  ;;  %v10235_v2 = vrot.slane %v25042_v61, %v23683_v40  ;;  %v25061_v43 = vrot.slane %v9642_v16, %v23683_v40  ;;  %v9657_v54 = vcombine.high %v9649_v7, %v9649_v7 }
 0x61f   : > { %v11632_v1 = vcombine.low %v10976_v35, %v10984_v52  ;;  %v11633_v30 = vcombine.low %v10983_v0, %v10985_v5  ;;  %v11017_v57 = vrot.slane %v10226_v50, %v23683_v40  ;;  %v9607_v15 = vcombine.high %v9605_v41, %v9605_v41 }
 0x620   : > { %v11067_v39 = vcombine.high %v11065_v21, %v11065_v21  ;;  %v25065_v42 = vrot.slane %v18261_v28, %v23683_v40  ;;  %v10269_v37 = vcombine.low %v9649_v7, %v9657_v54  ;;  %v9608_v12 = vcombine.high %v9321_v59, %v9321_v59 }
 0x621   : > { %v11640_v6 = vrot.slane %v11632_v1, %v23683_v40  ;;  %v11647_v23 = vrot.slane %v11633_v30, %v23683_v40  ;;  %v11025_v34 = vcombine.high %v11017_v57, %v11017_v57  ;;  %v9658_v11 = vcombine.high %v25061_v43, %v25061_v43 }
 0x622   : > { %v11717_v4 = vcombine.low %v11065_v21, %v11067_v39  ;;  %v11666_v25 = vcombine.low %v24769_v13, %v11017_v57  ;;  %v10283_v41 = vrot.slane %v10269_v37, %v23683_v40  ;;  %v9615_v8 = vrot.slane %v9321_v59, %v23683_v40 }
 0x623   : > { %v11648_v29 = vcombine.low %v11640_v6, %v11647_v23  ;;  %v11667_v32 = vcombine.low %v11025_v34, %v25065_v42  ;;  %v9622_v49 = vrot.slane %v9608_v12, %v23683_v40  ;;  %v9290_v10 = vadd.f32 %v24743_v3, %v9247_v48  ;;  %v25086_v3 = vpop.f32.mrb[68].mxu1 }
 0x624   : > { %v11026_v61 = vcombine.high %v25065_v42, %v25065_v42  ;;  %v11674_v35 = vrot.slane %v11666_v25, %v23683_v40  ;;  %v10284_v0 = vcombine.low %v10276_v38, %v10283_v41  ;;  %v18264_v47 = vcombine.low %v10283_v41, %v10283_v41 }
 0x625   : > { %v18469_v16 = vpack.c.bf16 %v11648_v29, %v11648_v29  ;;  %v11681_v58 = vrot.slane %v11667_v32, %v23683_v40  ;;  %v9624_v7 = vcombine.high %v9622_v49, %v9622_v49  ;;  %v10228_v52 = vcombine.low %v9607_v15, %v9615_v8 }
 0x626   : > { %v11725_v59 = vrot.slane %v11717_v4, %v23683_v40  ;;  %v11075_v5 = vrot.slane %v10284_v0, %v23683_v40  ;;  %v11082_v50 = vrot.slane %v18264_v47, %v23683_v40  ;;  %v9326_v28 = vmax.f32 %v9290_v10, 0.0 }
 0x627   : > { %v12327_v48 = vshrl.u32 %v18469_v16, 16  ;;  %v12330_v21 = vshll.u32 %v18469_v16, 16  ;;  %v11682_v54 = vcombine.low %v11674_v35, %v11681_v58  ;;  %v10242_v38 = vrot.slane %v10228_v52, %v23683_v40 }
 0x628   : > { %v11083_v1 = vcombine.high %v11075_v5, %v11075_v5  ;;  %v11084_v30 = vcombine.high %v11082_v50, %v11082_v50  ;;  %v10251_v57 = vcombine.low %v9622_v49, %v9624_v7  ;;  %v9245_v15 = vmul.f32 %v24741_v31, %v24840_v53 }
 0x629   : > { %v12329_v39 = vrot.slane %v12327_v48, 6  ;;  %v12332_v42 = vrot.slane %v12330_v21, 7  ;;  %v18471_v37 = vpack.c.bf16 %v11682_v54, %v11682_v54  ;;  %v10243_v12 = vcombine.low %v10235_v2, %v10242_v38 }
 0x62a   : > { %v11718_v6 = vcombine.low %v11075_v5, %v11083_v1  ;;  %v10259_v23 = vrot.slane %v10251_v57, %v23683_v40  ;;  %v18262_v34 = vcombine.low %v10242_v38, %v10242_v38  ;;  %v9693_v4 = vcombine.high %v9326_v28, %v9326_v28 }
 0x62b   : > { %v12333_v25 = vor.u32 %v12332_v42, %v12329_v39  ;;  %v12347_v41 = vshrl.u32 %v18471_v37, 16  ;;  %v12350_v8 = vshll.u32 %v18471_v37, 16  ;;  %v11034_v29 = vrot.slane %v10243_v12, %v23683_v40  ;;  %v25120_v39 = vpop.f32.mrb[69].mxu1 }
 0x62c   : > { %v11732_v32 = vrot.slane %v11718_v6, %v23683_v40  ;;  %v25094_v49 = vcombine.low %v11082_v50, %v11084_v30  ;;  %v10267_v31 = vcombine.low %v10259_v23, %v25040_v51  ;;  %v11041_v53 = vrot.slane %v18262_v34, %v23683_v40  ;;  %v25126_v6 = vpop.f32.mrb[70].mxu1 }
 0x62d   : > { %v12334_v2 = vsel %vm24856_vm13, %v12325_v55, %v12333_v25  ;;  %v12335_v10 = vrot.slane %v12333_v25, 4  ;;  %v12349_v35 = vrot.slane %v12347_v41, 6  ;;  %v12352_v0 = vrot.slane %v12350_v8, 7 }
 0x62e   : > { %12644 = vst [vmem:[#allocation2 + $0x2c] sm:$0xf] %v12334_v2  ;;  %v11733_v47 = vcombine.low %v11725_v59, %v11732_v32  ;;  %v11042_v16 = vcombine.high %v11034_v29, %v11034_v29  ;;  %v11043_v58 = vcombine.high %v11041_v53, %v11041_v53  ;;  %v11058_v7 = vrot.slane %v10267_v31, %v23683_v40 }
 0x62f   : > { %v12344_v51 = vsel %vm24856_vm13, %v12335_v10, %v24997_v18  ;;  %v25106_v52 = vor.u32 %v12352_v0, %v12349_v35  ;;  %v11683_v5 = vcombine.low %v11026_v61, %v11034_v29  ;;  %v9700_v45 = vrot.slane %v9326_v28, %v23683_v40  ;;  %v25132_v10 = vld [vmem:[#allocation11] ss:$0 sm:$0xff] }
 0x630   : > { %12645 = vst [vmem:[#allocation2 + $0x30] sm:$0xf] %v12344_v51  ;;  %v18474_v55 = vpack.c.bf16 %v11733_v47, %v11733_v47  ;;  %v11066_v50 = vcombine.high %v11058_v7, %v11058_v7  ;;  %v11684_v48 = vcombine.low %v11042_v16, %v11041_v53  ;;  %v11700_v21 = vcombine.low %v11043_v58, %v24769_v13 }
 0x631   : > { %v12354_v59 = vsel %vm24856_vm13, %v12345_v17, %v25106_v52  ;;  %v11742_v54 = vrot.slane %v25094_v49, %v23683_v40  ;;  %v11691_v38 = vrot.slane %v11683_v5, %v23683_v40  ;;  %v9707_v61 = vrot.slane %v9693_v4, %v23683_v40  ;;  %v25123_v17 = vld [vmem:[#allocation12] ss:$0 sm:$0xff] }
 0x632   : > { %12646 = vst [vmem:[#allocation2 + $0x34] sm:$0xf] %v12354_v59  ;;  %v12377_v28 = vshrl.u32 %v18474_v55, 16  ;;  %v12380_v1 = vshll.u32 %v18474_v55, 16  ;;  %v11698_v30 = vrot.slane %v11684_v48, %v23683_v40  ;;  %v11701_v57 = vcombine.low %v11058_v7, %v11066_v50 }
 0x633   : > { %v11708_v18 = vrot.slane %v11700_v21, %v23683_v40  ;;  %v9708_v42 = vcombine.high %v9700_v45, %v9700_v45  ;;  %v9709_v37 = vcombine.high %v9707_v61, %v9707_v61  ;;  %v9288_v12 = vadd.f32 %v25123_v17, %v9245_v15 }
 0x634   : > { %v12379_v23 = vrot.slane %v12377_v28, 6  ;;  %v12382_v34 = vrot.slane %v12380_v1, 7  ;;  %v11699_v4 = vcombine.low %v11691_v38, %v11698_v30  ;;  %v11715_v25 = vrot.slane %v11701_v57, %v23683_v40 }
 0x635   : > { %v12355_v41 = vrot.slane %v25106_v52, 4  ;;  %v10333_v8 = vcombine.low %v9700_v45, %v9708_v42  ;;  %v10334_v29 = vcombine.low %v9707_v61, %v9709_v37  ;;  %v9324_v32 = vmax.f32 %v9288_v12, 0.0 }
 0x636   : > { %v25130_v31 = vor.u32 %v12382_v34, %v12379_v23  ;;  %v11716_v53 = vcombine.low %v11708_v18, %v11715_v25  ;;  %v18472_v2 = vpack.c.bf16 %v11699_v4, %v11699_v4  ;;  %v9248_v15 = vmul.f32 %v25132_v10, %v24842_v19 }
 0x637   : > { %v10341_v35 = vrot.slane %v10333_v8, %v23683_v40  ;;  %v10348_v0 = vrot.slane %v10334_v29, %v23683_v40  ;;  %v9659_v47 = vcombine.high %v9324_v32, %v9324_v32  ;;  %v9666_v16 = vrot.slane %v9324_v32, %v23683_v40 }
 0x638   : > { %v18473_v58 = vpack.c.bf16 %v11716_v53, %v11716_v53  ;;  %v12357_v7 = vshrl.u32 %v18472_v2, 16  ;;  %v12360_v51 = vshll.u32 %v18472_v2, 16  ;;  %v9246_v52 = vmul.f32 %v25132_v10, %v24852_v62 }
 0x639   : > { %v10349_v5 = vcombine.low %v10341_v35, %v10348_v0  ;;  %v18267_v45 = vcombine.low %v10348_v0, %v10348_v0  ;;  %v25142_v55 = vrot.slane %v9659_v47, %v23683_v40  ;;  %v9674_v50 = vcombine.high %v9666_v16, %v9666_v16 }
 0x63a   : > { %v12359_v19 = vrot.slane %v12357_v7, 6  ;;  %v12362_v48 = vrot.slane %v12360_v51, 7  ;;  %v12367_v21 = vshrl.u32 %v18473_v58, 16  ;;  %v12370_v59 = vshll.u32 %v18473_v58, 16 }
 0x63b   : > { %v11140_v38 = vrot.slane %v10349_v5, %v23683_v40  ;;  %v11147_v61 = vrot.slane %v18267_v45, %v23683_v40  ;;  %v10292_v28 = vcombine.low %v9658_v11, %v9666_v16  ;;  %v10293_v62 = vcombine.low %v9674_v50, %v25142_v55  ;;  %v25167_v45 = vld [vmem:[#allocation8] sm:$0xff]   ;;  %v25169_v50 = vpop.f32.mrb[71].mxu1 }
 0x63c   : > { %v12363_v1 = vor.u32 %v12362_v48, %v12359_v19  ;;  %v12369_v30 = vrot.slane %v12367_v21, 6  ;;  %v12372_v57 = vrot.slane %v12370_v59, 7  ;;  %v9291_v18 = vadd.f32 %v25123_v17, %v9248_v15  ;;  %20187 = vmatprep.subr.bf16.mxu0 %v25167_v45 }
 0x63d   : > { %v11148_v42 = vcombine.high %v11140_v38, %v11140_v38  ;;  %v11149_v37 = vcombine.high %v11147_v61, %v11147_v61  ;;  %v10300_v12 = vrot.slane %v10292_v28, %v23683_v40  ;;  %v10307_v23 = vrot.slane %v10293_v62, %v23683_v40 }
 0x63e   : > { %v12364_v34 = vsel %vm24856_vm13, %v12355_v41, %v12363_v1  ;;  %v12365_v4 = vrot.slane %v12363_v1, 4  ;;  %v12373_v25 = vor.u32 %v12372_v57, %v12369_v30  ;;  %v9327_v43 = vmax.f32 %v9291_v18, 0.0 }
 0x63f   : > { %12647 = vst [vmem:[#allocation2 + $0x38] sm:$0xf] %v12364_v34  ;;  %v11785_v11 = vcombine.low %v11140_v38, %v11148_v42  ;;  %v11786_v8 = vcombine.low %v11147_v61, %v11149_v37  ;;  %v10308_v29 = vcombine.low %v10300_v12, %v10307_v23  ;;  %v18265_v32 = vcombine.low %v10307_v23, %v10307_v23 }
 0x640   : > { %v12374_v53 = vsel %vm24856_vm13, %v12365_v4, %v12373_v25  ;;  %v12375_v2 = vrot.slane %v12373_v25, 4  ;;  %v9710_v15 = vcombine.high %v9327_v43, %v9327_v43  ;;  %v9717_v35 = vrot.slane %v9327_v43, %v23683_v40 }
 0x641   : > { %v12385_v0 = vrot.slane %v25130_v31, 4  ;;  %12648 = vst [vmem:[#allocation2 + $0x3c] sm:$0xf] %v12374_v53  ;;  %v11793_v41 = vrot.slane %v11785_v11, %v23683_v40  ;;  %v11800_v47 = vrot.slane %v11786_v8, %v23683_v40  ;;  %v11099_v16 = vrot.slane %v10308_v29, %v23683_v40 }
 0x642   : > { %v12384_v58 = vsel %vm24856_vm13, %v12375_v2, %v25130_v31  ;;  %v9724_v7 = vrot.slane %v9710_v15, %v23683_v40  ;;  %v9725_v51 = vcombine.high %v9717_v35, %v9717_v35  ;;  %v9289_v5 = vadd.f32 %v25123_v17, %v9246_v52 }
 0x643   : > { %12649 = vst [vmem:[#allocation2 + $0x40] sm:$0xf] %v12384_v58  ;;  %v11801_v19 = vcombine.low %v11793_v41, %v11800_v47  ;;  %v25172_v48 = vrot.slane %v18265_v32, %v23683_v40  ;;  %v11107_v21 = vcombine.high %v11099_v16, %v11099_v16  ;;  %v11735_v59 = vcombine.low %v24769_v13, %v11099_v16 }
 0x644   : > { %v9726_v38 = vcombine.high %v9724_v7, %v9724_v7  ;;  %v10350_v61 = vcombine.low %v9717_v35, %v9725_v51  ;;  %v9325_v28 = vmax.f32 %v9289_v5, 0.0  ;;  %v9675_v62 = vcombine.high %v25142_v55, %v25142_v55 }
 0x645   : > { %v18478_v52 = vpack.c.bf16 %v11801_v19, %v11801_v19  ;;  %v11749_v1 = vrot.slane %v11735_v59, %v23683_v40  ;;  %v25180_v30 = vcombine.low %v11107_v21, %v25172_v48  ;;  %v9251_v57 = vmul.f32 %v25132_v10, %v24877_v20 }
 0x646   : > { %v10351_v18 = vcombine.low %v9724_v7, %v9726_v38  ;;  %v9676_v42 = vcombine.high %v9325_v28, %v9325_v28  ;;  %v9683_v37 = vrot.slane %v9325_v28, %v23683_v40  ;;  %v10358_v34 = vrot.slane %v10350_v61, %v23683_v40 }
 0x647   : > { %v12417_v12 = vshrl.u32 %v18478_v52, 16  ;;  %v12420_v23 = vshll.u32 %v18478_v52, 16  ;;  %v11750_v55 = vcombine.low %v11742_v54, %v11749_v1  ;;  %v9294_v32 = vadd.f32 %v25123_v17, %v9251_v57 }
 0x648   : > { %v10365_v4 = vrot.slane %v10351_v18, %v23683_v40  ;;  %v9690_v25 = vrot.slane %v9676_v42, %v23683_v40  ;;  %v9691_v43 = vcombine.high %v9683_v37, %v9683_v37  ;;  %v10309_v11 = vcombine.low %v9675_v62, %v9683_v37 }
 0x649   : > { %v12419_v8 = vrot.slane %v12417_v12, 6  ;;  %v12422_v20 = vrot.slane %v12420_v23, 7  ;;  %v18475_v29 = vpack.c.bf16 %v11750_v55, %v11750_v55  ;;  %v11108_v41 = vcombine.high %v25172_v48, %v25172_v48 }
 0x64a   : > { %v10366_v53 = vcombine.low %v10358_v34, %v10365_v4  ;;  %v18268_v2 = vcombine.low %v10365_v4, %v10365_v4  ;;  %v10310_v15 = vcombine.low %v9691_v43, %v9690_v25  ;;  %v10317_v35 = vrot.slane %v10309_v11, %v23683_v40 }
 0x64b   : > { %v12387_v49 = vshrl.u32 %v18475_v29, 16  ;;  %v12390_v54 = vshll.u32 %v18475_v29, 16  ;;  %v25195_v47 = vmax.f32 %v9294_v32, 0.0  ;;  %v9249_v51 = vmul.f32 %v25132_v10, %v24883_v44 }
 0x64c   : > { %v11157_v16 = vrot.slane %v10366_v53, %v23683_v40  ;;  %v11164_v58 = vrot.slane %v18268_v2, %v23683_v40  ;;  %v10324_v7 = vrot.slane %v10310_v15, %v23683_v40  ;;  %v25202_v5 = vor.u32 %v12422_v20, %v12419_v8 }
 0x64d   : > { %v12389_v19 = vrot.slane %v12387_v49, 6  ;;  %v12392_v21 = vrot.slane %v12390_v54, 7  ;;  %v9761_v59 = vcombine.high %v25195_v47, %v25195_v47  ;;  %v11759_v62 = vrot.slane %v25180_v30, %v23683_v40 }
 0x64e   : > { %v11165_v38 = vcombine.high %v11157_v16, %v11157_v16  ;;  %v11166_v48 = vcombine.high %v11164_v58, %v11164_v58  ;;  %v10325_v61 = vcombine.low %v10317_v35, %v10324_v7  ;;  %v18266_v28 = vcombine.low %v10324_v7, %v10324_v7 }
 0x64f   : > { %v25208_v52 = vor.u32 %v12392_v21, %v12389_v19  ;;  %v9775_v1 = vrot.slane %v9761_v59, %v23683_v40  ;;  %v9292_v44 = vadd.f32 %v25123_v17, %v9249_v51  ;;  %v12425_v12 = vrot.slane %v25202_v5, 4 }
 0x650   : > { %v11802_v57 = vcombine.low %v11157_v16, %v11165_v38  ;;  %v11803_v18 = vcombine.low %v11164_v58, %v11166_v48  ;;  %v11116_v42 = vrot.slane %v10325_v61, %v23683_v40  ;;  %v11123_v37 = vrot.slane %v18266_v28, %v23683_v40 }
 0x651   : > { %v12394_v30 = vsel %vm24856_vm13, %v12385_v0, %v25208_v52  ;;  %v9777_v23 = vcombine.high %v9775_v1, %v9775_v1  ;;  %v9328_v55 = vmax.f32 %v9292_v44, 0.0  ;;  %v9252_v0 = vmul.f32 %v25132_v10, %v24894_v27 }
 0x652   : > { %12650 = vst [vmem:[#allocation2 + $0x44] sm:$0xf] %v12394_v30  ;;  %v11810_v34 = vrot.slane %v11802_v57, %v23683_v40  ;;  %v11817_v4 = vrot.slane %v11803_v18, %v23683_v40  ;;  %v11124_v25 = vcombine.high %v11116_v42, %v11116_v42  ;;  %v11125_v43 = vcombine.high %v11123_v37, %v11123_v37 }
 0x653   : > { %v11752_v11 = vcombine.low %v11108_v41, %v11116_v42  ;;  %v25222_v8 = vcombine.low %v9775_v1, %v9777_v23  ;;  %v9727_v20 = vcombine.high %v9328_v55, %v9328_v55  ;;  %v9734_v29 = vrot.slane %v9328_v55, %v23683_v40 }
 0x654   : > { %v11818_v32 = vcombine.low %v11810_v34, %v11817_v4  ;;  %v11768_v31 = vcombine.low %v11124_v25, %v11123_v37  ;;  %v11769_v53 = vcombine.low %v11125_v43, %v24769_v13  ;;  %v9768_v15 = vrot.slane %v25195_v47, %v23683_v40 }
 0x655   : > { %v11766_v2 = vrot.slane %v11752_v11, %v23683_v40  ;;  %v9741_v35 = vrot.slane %v9727_v20, %v23683_v40  ;;  %v9742_v49 = vcombine.high %v9734_v29, %v9734_v29  ;;  %v9295_v58 = vadd.f32 %v25123_v17, %v9252_v0 }
 0x656   : > { %v18479_v54 = vpack.c.bf16 %v11818_v32, %v11818_v32  ;;  %v11776_v41 = vrot.slane %v11768_v31, %v23683_v40  ;;  %v11783_v16 = vrot.slane %v11769_v53, %v23683_v40  ;;  %v12395_v7 = vrot.slane %v25208_v52, 4 }
 0x657   : > { %v11767_v51 = vcombine.low %v11759_v62, %v11766_v2  ;;  %v10423_v27 = vrot.slane %v25222_v8, %v23683_v40  ;;  %v9250_v19 = vmul.f32 %v25132_v10, %v24901_v46  ;;  %v9331_v48 = vmax.f32 %v9295_v58, 0.0 }
 0x658   : > { %v12427_v21 = vshrl.u32 %v18479_v54, 16  ;;  %v12430_v59 = vshll.u32 %v18479_v54, 16  ;;  %v11784_v38 = vcombine.low %v11776_v41, %v11783_v16  ;;  %v10374_v28 = vcombine.low %v9742_v49, %v9741_v35 }
 0x659   : > { %v18476_v61 = vpack.c.bf16 %v11767_v51, %v11767_v51  ;;  %v9293_v1 = vadd.f32 %v25123_v17, %v9250_v19  ;;  %v9255_v44 = vmul.f32 %v25132_v10, %v24918_v9  ;;  %v9778_v18 = vcombine.high %v9331_v48, %v9331_v48 }
 0x65a   : > { %v12429_v57 = vrot.slane %v12427_v21, 6  ;;  %v12432_v52 = vrot.slane %v12430_v59, 7  ;;  %v18477_v62 = vpack.c.bf16 %v11784_v38, %v11784_v38  ;;  %v9785_v30 = vrot.slane %v9331_v48, %v23683_v40 }
 0x65b   : > { %v12397_v42 = vshrl.u32 %v18476_v61, 16  ;;  %v12400_v37 = vshll.u32 %v18476_v61, 16  ;;  %v9329_v46 = vmax.f32 %v9293_v1, 0.0  ;;  %v9792_v4 = vrot.slane %v9778_v18, %v23683_v40 }
 0x65c   : > { %v25244_v23 = vor.u32 %v12432_v52, %v12429_v57  ;;  %v12407_v55 = vshrl.u32 %v18477_v62, 16  ;;  %v12410_v34 = vshll.u32 %v18477_v62, 16  ;;  %v9793_v11 = vcombine.high %v9785_v30, %v9785_v30 }
 0x65d   : > { %v12399_v25 = vrot.slane %v12397_v42, 6  ;;  %v12402_v43 = vrot.slane %v12400_v37, 7  ;;  %v9744_v8 = vcombine.high %v9329_v46, %v9329_v46  ;;  %v9743_v32 = vcombine.high %v9741_v35, %v9741_v35 }
 0x65e   : > { %v12434_v9 = vsel %vm24856_vm13, %v12425_v12, %v25244_v23  ;;  %v12409_v20 = vrot.slane %v12407_v55, 6  ;;  %v12412_v29 = vrot.slane %v12410_v34, 7  ;;  %v9794_v53 = vcombine.high %v9792_v4, %v9792_v4 }
 0x65f   : > { %12654 = vst [vmem:[#allocation2 + $0x54] sm:$0xf] %v12434_v9  ;;  %v12403_v31 = vor.u32 %v12402_v43, %v12399_v25  ;;  %v10416_v0 = vcombine.low %v9785_v30, %v9793_v11  ;;  %v9751_v2 = vrot.slane %v9329_v46, %v23683_v40  ;;  %v10382_v54 = vrot.slane %v10374_v28, %v23683_v40 }
 0x660   : > { %v12413_v49 = vor.u32 %v12412_v29, %v12409_v20  ;;  %v9758_v41 = vrot.slane %v9744_v8, %v23683_v40  ;;  %v9298_v16 = vadd.f32 %v25123_v17, %v9255_v44  ;;  %v25257_v35 = vcombine.low %v9792_v4, %v9794_v53 }
 0x661   : > { %v12404_v58 = vsel %vm24856_vm13, %v12395_v7, %v12403_v31  ;;  %v12405_v12 = vrot.slane %v12403_v31, 4  ;;  %v10430_v51 = vrot.slane %v10416_v0, %v23683_v40  ;;  %v9759_v21 = vcombine.high %v9751_v2, %v9751_v2 }
 0x662   : > { %v12415_v19 = vrot.slane %v12413_v49, 4  ;;  %12651 = vst [vmem:[#allocation2 + $0x48] sm:$0xf] %v12404_v58  ;;  %v9760_v59 = vcombine.high %v9758_v41, %v9758_v41  ;;  %v10375_v38 = vcombine.low %v9743_v32, %v9751_v2  ;;  %v12435_v48 = vrot.slane %v25244_v23, 4 }
 0x663   : > { %v12414_v61 = vsel %vm24856_vm13, %v12405_v12, %v12413_v49  ;;  %v10431_v28 = vcombine.low %v10423_v27, %v10430_v51  ;;  %v18271_v1 = vcombine.low %v10430_v51, %v10430_v51  ;;  %v10391_v57 = vcombine.low %v9759_v21, %v9758_v41 }
 0x664   : > { %v12424_v7 = vsel %vm24856_vm13, %v12415_v19, %v25202_v5  ;;  %12652 = vst [vmem:[#allocation2 + $0x4c] sm:$0xf] %v12414_v61  ;;  %v10389_v44 = vrot.slane %v10375_v38, %v23683_v40  ;;  %v10392_v52 = vcombine.low %v9760_v59, %v9768_v15  ;;  %v10440_v62 = vrot.slane %v25257_v35, %v23683_v40 }
 0x665   : > { %12653 = vst [vmem:[#allocation2 + $0x50] sm:$0xf] %v12424_v7  ;;  %v11222_v18 = vrot.slane %v10431_v28, %v23683_v40  ;;  %v9334_v27 = vmax.f32 %v9298_v16, 0.0  ;;  %v9253_v42 = vmul.f32 %v25132_v10, %v24921_v26  ;;  %v10399_v5 = vrot.slane %v10391_v57, %v23683_v40 }
 0x666   : > { %v10390_v37 = vcombine.low %v10382_v54, %v10389_v44  ;;  %v10406_v30 = vrot.slane %v10392_v52, %v23683_v40  ;;  %v18269_v46 = vcombine.low %v10389_v44, %v10389_v44  ;;  %v11229_v55 = vrot.slane %v18271_v1, %v23683_v40 }
 0x667   : > { %v11230_v47 = vcombine.high %v11222_v18, %v11222_v18  ;;  %v9829_v15 = vcombine.high %v9334_v27, %v9334_v27  ;;  %v25278_v34 = vrot.slane %v9334_v27, %v23683_v40  ;;  %v9296_v20 = vadd.f32 %v25123_v17, %v9253_v42 }
 0x668   : > { %v10407_v4 = vcombine.low %v10399_v5, %v10406_v30  ;;  %v11181_v25 = vrot.slane %v10390_v37, %v23683_v40  ;;  %v11188_v43 = vrot.slane %v18269_v46, %v23683_v40  ;;  %v18270_v11 = vcombine.low %v10406_v30, %v10406_v30 }
 0x669   : > { %v11854_v26 = vcombine.low %v11222_v18, %v11230_v47  ;;  %v9843_v8 = vrot.slane %v9829_v15, %v23683_v40  ;;  %v9844_v9 = vcombine.high %v25278_v34, %v25278_v34  ;;  %v11231_v0 = vcombine.high %v11229_v55, %v11229_v55 }
 0x66a   : > { %v11189_v29 = vcombine.high %v11181_v25, %v11181_v25  ;;  %v11190_v32 = vcombine.high %v11188_v43, %v11188_v43  ;;  %v11198_v31 = vrot.slane %v10407_v4, %v23683_v40  ;;  %v11205_v53 = vrot.slane %v18270_v11, %v23683_v40 }
 0x66b   : > { %v11868_v2 = vrot.slane %v11854_v26, %v23683_v40  ;;  %v11819_v49 = vcombine.low %v24769_v13, %v11181_v25  ;;  %v10474_v54 = vcombine.low %v9844_v9, %v9843_v8  ;;  %v9332_v21 = vmax.f32 %v9296_v20, 0.0 }
 0x66c   : > { %v11206_v41 = vcombine.high %v11198_v31, %v11198_v31  ;;  %v11207_v16 = vcombine.high %v11205_v53, %v11205_v53  ;;  %v11820_v58 = vcombine.low %v11189_v29, %v11188_v43  ;;  %v11836_v12 = vcombine.low %v11190_v32, %v11198_v31 }
 0x66d   : > { %v11827_v51 = vrot.slane %v11819_v49, %v23683_v40  ;;  %v25292_v19 = vrot.slane %v10474_v54, %v23683_v40  ;;  %v9256_v59 = vmul.f32 %v25132_v10, %v24924_v56  ;;  %v9795_v44 = vcombine.high %v9332_v21, %v9332_v21 }
 0x66e   : > { %v11834_v38 = vrot.slane %v11820_v58, %v23683_v40  ;;  %v11837_v61 = vcombine.low %v11206_v41, %v11205_v53  ;;  %v11844_v28 = vrot.slane %v11836_v12, %v23683_v40  ;;  %v11853_v1 = vcombine.low %v11207_v16, %v24769_v13 }
 0x66f   : > { %v18274_v7 = vcombine.low %v25292_v19, %v25292_v19  ;;  %v9802_v57 = vrot.slane %v9332_v21, %v23683_v40  ;;  %v9299_v52 = vadd.f32 %v25123_v17, %v9256_v59  ;;  %v9254_v42 = vmul.f32 %v25132_v10, %v24930_v22 }
 0x670   : > { %v11835_v18 = vcombine.low %v11827_v51, %v11834_v38  ;;  %v11851_v27 = vrot.slane %v11837_v61, %v23683_v40  ;;  %v11861_v56 = vrot.slane %v11853_v1, %v23683_v40  ;;  %v25311_v5 = vrot.slane %v9795_v44, %v23683_v40 }
 0x671   : > { %v25308_v37 = vrot.slane %v18274_v7, %v23683_v40  ;;  %v9810_v30 = vcombine.high %v9802_v57, %v9802_v57  ;;  %v9335_v46 = vmax.f32 %v9299_v52, 0.0  ;;  %v25313_v47 = vcombine.low %v11229_v55, %v11231_v0 }
 0x672   : > { %v11852_v15 = vcombine.low %v11844_v28, %v11851_v27  ;;  %v11869_v4 = vcombine.low %v11861_v56, %v11868_v2  ;;  %v18480_v25 = vpack.c.bf16 %v11835_v18, %v11835_v18  ;;  %v9297_v22 = vadd.f32 %v25123_v17, %v9254_v42 }
 0x673   : > { %v11289_v43 = vcombine.high %v25308_v37, %v25308_v37  ;;  %v10433_v11 = vcombine.low %v9802_v57, %v9810_v30  ;;  %v9846_v26 = vcombine.high %v9335_v46, %v9335_v46  ;;  %v9811_v55 = vcombine.high %v25311_v5, %v25311_v5 }
 0x674   : > { %v18481_v8 = vpack.c.bf16 %v11852_v15, %v11852_v15  ;;  %v18482_v9 = vpack.c.bf16 %v11869_v4, %v11869_v4  ;;  %v12437_v20 = vshrl.u32 %v18480_v25, 16  ;;  %v12440_v29 = vshll.u32 %v18480_v25, 16 }
 0x675   : > { %v25319_v32 = vcombine.low %v11289_v43, %v24769_v13  ;;  %v10447_v31 = vrot.slane %v10433_v11, %v23683_v40  ;;  %v9853_v53 = vrot.slane %v9335_v46, %v23683_v40  ;;  %v9860_v12 = vrot.slane %v9846_v26, %v23683_v40 }
 0x676   : > { %v12439_v0 = vrot.slane %v12437_v20, 6  ;;  %v12442_v2 = vrot.slane %v12440_v29, 7  ;;  %v12447_v49 = vshrl.u32 %v18481_v8, 16  ;;  %v12450_v54 = vshll.u32 %v18481_v8, 16 }
 0x677   : > { %v12457_v41 = vshrl.u32 %v18482_v9, 16  ;;  %v12460_v16 = vshll.u32 %v18482_v9, 16  ;;  %v10448_v58 = vcombine.low %v10440_v62, %v10447_v31  ;;  %v18272_v38 = vcombine.low %v10447_v31, %v10447_v31 }
 0x678   : > { %v12443_v51 = vor.u32 %v12442_v2, %v12439_v0  ;;  %v12449_v21 = vrot.slane %v12447_v49, 6  ;;  %v12452_v59 = vrot.slane %v12450_v54, 7  ;;  %v9861_v7 = vcombine.high %v9853_v53, %v9853_v53  ;;  %v25355_v0 = vld [vmem:[#allocation2 + $0x8] sm:$0xff]  }
 0x679   : > { %v12459_v61 = vrot.slane %v12457_v41, 6  ;;  %v12462_v28 = vrot.slane %v12460_v16, 7  ;;  %v11239_v1 = vrot.slane %v10448_v58, %v23683_v40  ;;  %v11246_v35 = vrot.slane %v18272_v38, %v23683_v40 }
 0x67a   : > { %v12444_v44 = vsel %vm24856_vm13, %v12435_v48, %v12443_v51  ;;  %v12445_v57 = vrot.slane %v12443_v51, 4  ;;  %v12453_v52 = vor.u32 %v12452_v59, %v12449_v21  ;;  %v9862_v27 = vcombine.high %v9860_v12, %v9860_v12 }
 0x67b   : > { %v25335_v62 = vor.u32 %v12462_v28, %v12459_v61  ;;  %12655 = vst [vmem:[#allocation2 + $0x58] sm:$0xf] %v12444_v44  ;;  %v11247_v18 = vcombine.high %v11239_v1, %v11239_v1  ;;  %v10497_v56 = vcombine.low %v9853_v53, %v9861_v7  ;;  %v11248_v30 = vcombine.high %v11246_v35, %v11246_v35 }
 0x67c   : > { %v12454_v42 = vsel %vm24856_vm13, %v12445_v57, %v12453_v52  ;;  %v12455_v5 = vrot.slane %v12453_v52, 4  ;;  %v9333_v46 = vmax.f32 %v9297_v22, 0.0  ;;  %v11878_v23 = vrot.slane %v25313_v47, %v23683_v40 }
 0x67d   : > { %12656 = vst [vmem:[#allocation2 + $0x5c] sm:$0xf] %v12454_v42  ;;  %v11936_v48 = vrot.slane %v25319_v32, %v23683_v40  ;;  %v11871_v15 = vcombine.low %v11239_v1, %v11247_v18  ;;  %v10498_v4 = vcombine.low %v9860_v12, %v9862_v27  ;;  %v10505_v43 = vrot.slane %v10497_v56, %v23683_v40 }
 0x67e   : > { %v12464_v25 = vsel %vm24856_vm13, %v12455_v5, %v25335_v62  ;;  %v9812_v11 = vcombine.high %v9333_v46, %v9333_v46  ;;  %v9819_v26 = vrot.slane %v9333_v46, %v23683_v40  ;;  %v9259_v8 = vmul.f32 %v25132_v10, %v24964_v63 }
 0x67f   : > { %12657 = vst [vmem:[#allocation2 + $0x60] sm:$0xf] %v12464_v25  ;;  %v11885_v22 = vrot.slane %v11871_v15, %v23683_v40  ;;  %v10512_v47 = vrot.slane %v10498_v4, %v23683_v40  ;;  %v25352_v9 = vcombine.low %v11246_v35, %v11248_v30  ;;  %v22506_v53 = vmov 0  }
 0x680   : > { %v9826_v20 = vrot.slane %v9812_v11, %v23683_v40  ;;  %v9827_v29 = vcombine.high %v9819_v26, %v9819_v26  ;;  %v10456_v31 = vcombine.low %v9811_v55, %v9819_v26  ;;  %11461 = vst [vmem:[#allocation2] sm:$0xf] %v22506_v53  ;;  %11462 = vst [vmem:[#allocation2 + $0x4] sm:$0xf] %v22506_v53  ;;  %v12465_v63 = vrot.slane %v25335_v62, 4 }
 0x681   : > { %11475 = vst [vmem:[#allocation2 + $0x9c] sm:$0xf] %v22506_v53  ;;  %11476 = vst [vmem:[#allocation2 + $0xa0] sm:$0xf] %v22506_v53  ;;  %v11886_v2 = vcombine.low %v11878_v23, %v11885_v22  ;;  %v10513_v49 = vcombine.low %v10505_v43, %v10512_v47  ;;  %v18275_v54 = vcombine.low %v10512_v47, %v10512_v47  ;;  %v12845_v1 = vshll.u32 %v25355_v0, 16 }
 0x682   : > { %v9302_v41 = vadd.f32 %v25123_v17, %v9259_v8  ;;  %v9828_v16 = vcombine.high %v9826_v20, %v9826_v20  ;;  %v10457_v58 = vcombine.low %v9827_v29, %v9826_v20  ;;  %v10464_v12 = vrot.slane %v10456_v31, %v23683_v40 }
 0x683   : > { %v18483_v51 = vpack.c.bf16 %v11886_v2, %v11886_v2  ;;  %v11304_v55 = vrot.slane %v10513_v49, %v23683_v40  ;;  %v11311_v21 = vrot.slane %v18275_v54, %v23683_v40  ;;  %v11895_v38 = vrot.slane %v25352_v9, %v23683_v40 }
 0x684   : > { %v9338_v59 = vmax.f32 %v9302_v41, 0.0  ;;  %v10471_v61 = vrot.slane %v10457_v58, %v23683_v40  ;;  %v10473_v28 = vcombine.low %v9828_v16, %v25278_v34  ;;  %v12847_v11 = vrot.slane %v12845_v1, 1 }
 0x685   : > { %v12467_v7 = vshrl.u32 %v18483_v51, 16  ;;  %v12470_v44 = vshll.u32 %v18483_v51, 16  ;;  %v11312_v57 = vcombine.high %v11304_v55, %v11304_v55  ;;  %v11313_v52 = vcombine.high %v11311_v21, %v11311_v21 }
 0x686   : > { %v10472_v35 = vcombine.low %v10464_v12, %v10471_v61  ;;  %v10481_v62 = vrot.slane %v10473_v28, %v23683_v40  ;;  %v18273_v18 = vcombine.low %v10471_v61, %v10471_v61  ;;  %v9897_v27 = vcombine.high %v9338_v59, %v9338_v59 }
 0x687   : > { %v12469_v56 = vrot.slane %v12467_v7, 6  ;;  %v12472_v42 = vrot.slane %v12470_v44, 7  ;;  %v11938_v5 = vcombine.low %v11304_v55, %v11312_v57  ;;  %v11939_v30 = vcombine.low %v11311_v21, %v11313_v52  ;;  %v12674_v8 = vld [vmem:[#allocation2] sm:$0xf]  ;;  %v12675_v9 = vld [vmem:[#allocation2 + $0x4] sm:$0xf] }
 0x688   : > { %v10489_v46 = vcombine.low %v10481_v62, %v25292_v19  ;;  %v11263_v23 = vrot.slane %v10472_v35, %v23683_v40  ;;  %v11270_v34 = vrot.slane %v18273_v18, %v23683_v40  ;;  %v25372_v15 = vrot.slane %v9338_v59, %v23683_v40 }
 0x689   : > { %v25374_v4 = vor.u32 %v12472_v42, %v12469_v56  ;;  %v11946_v25 = vrot.slane %v11938_v5, %v23683_v40  ;;  %v11953_v43 = vrot.slane %v11939_v30, %v23683_v40  ;;  %v25384_v31 = vrot.slane %v9897_v27, %v23683_v40 }
 0x68a   : > { %v11271_v26 = vcombine.high %v11263_v23, %v11263_v23  ;;  %v11272_v22 = vcombine.high %v11270_v34, %v11270_v34  ;;  %v11280_v47 = vrot.slane %v10489_v46, %v23683_v40  ;;  %v11888_v19 = vcombine.low %v24769_v13, %v11263_v23 }
 0x68b   : > { %v12474_v20 = vsel %vm24856_vm13, %v12465_v63, %v25374_v4  ;;  %v11954_v29 = vcombine.low %v11946_v25, %v11953_v43  ;;  %v9912_v53 = vcombine.high %v25372_v15, %v25372_v15  ;;  %v12475_v16 = vrot.slane %v25374_v4, 4 }
 0x68c   : > { %12658 = vst [vmem:[#allocation2 + $0x64] sm:$0xf] %v12474_v20  ;;  %v11288_v2 = vcombine.high %v11280_v47, %v11280_v47  ;;  %v11902_v49 = vrot.slane %v11888_v19, %v23683_v40  ;;  %v11904_v54 = vcombine.low %v11271_v26, %v11270_v34  ;;  %v11905_v41 = vcombine.low %v11272_v22, %v11280_v47 }
 0x68d   : > { %v18487_v58 = vpack.c.bf16 %v11954_v29, %v11954_v29  ;;  %v25390_v12 = vcombine.low %v12674_v8, %v12675_v9  ;;  %v12849_v63 = vshrl.u32 %v25355_v0, 16  ;;  %v25397_v1 = vcombine.low %v9912_v53, %v25384_v31  ;;  %v25413_v8 = vld [vmem:[#allocation2 + $0x10] sm:$0xff]  }
 0x68e   : > { %v11903_v51 = vcombine.low %v11895_v38, %v11902_v49  ;;  %v11912_v55 = vrot.slane %v11904_v54, %v23683_v40  ;;  %v11919_v21 = vrot.slane %v11905_v41, %v23683_v40  ;;  %v11921_v59 = vcombine.low %v11288_v2, %v25308_v37 }
 0x68f   : > { %v12507_v61 = vshrl.u32 %v18487_v58, 16  ;;  %v12510_v28 = vshll.u32 %v18487_v58, 16  ;;  %v12838_v7 = vshrl.u32 %v25390_v12, 16  ;;  %v12840_v0 = vshll.u32 %v25390_v12, 16 }
 0x690   : > { %v11920_v44 = vcombine.low %v11912_v55, %v11919_v21  ;;  %v11929_v57 = vrot.slane %v11921_v59, %v23683_v40  ;;  %v18484_v52 = vpack.c.bf16 %v11903_v51, %v11903_v51  ;;  %v9257_v62 = vmul.f32 %v25132_v10, %v25046_v33 }
 0x691   : > { %v12509_v38 = vrot.slane %v12507_v61, 6  ;;  %v12512_v35 = vrot.slane %v12510_v28, 7  ;;  %v9260_v37 = vmul.f32 %v25132_v10, %v25051_v14  ;;  %v12842_v30 = vrot.slane %v12840_v0, 1 }
 0x692   : > { %v11937_v18 = vcombine.low %v11929_v57, %v11936_v48  ;;  %v18485_v27 = vpack.c.bf16 %v11920_v44, %v11920_v44  ;;  %v12477_v56 = vshrl.u32 %v18484_v52, 16  ;;  %v12480_v42 = vshll.u32 %v18484_v52, 16 }
 0x693   : > { %v25409_v5 = vor.u32 %v12512_v35, %v12509_v38  ;;  %v12851_v46 = vor.u32 %v12849_v63, %v12847_v11  ;;  %v9300_v23 = vadd.f32 %v25123_v17, %v9257_v62  ;;  %v12843_v26 = vor.u32 %v12842_v30, %v12838_v7  ;;  %v25441_v30 = vld [vmem:[#allocation2 + $0x18] sm:$0xff]  }
 0x694   : > { %v18486_v34 = vpack.c.bf16 %v11937_v18, %v11937_v18  ;;  %v12479_v4 = vrot.slane %v12477_v56, 6  ;;  %v12482_v25 = vrot.slane %v12480_v42, 7  ;;  %v12487_v33 = vshrl.u32 %v18485_v27, 16 }
 0x695   : > { %v12490_v43 = vshll.u32 %v18485_v27, 16  ;;  %v9336_v14 = vmax.f32 %v9300_v23, 0.0  ;;  %v9303_v22 = vadd.f32 %v25123_v17, %v9260_v37  ;;  %v12848_v20 = vsel %vm661_vm0, %v12843_v26, %v12847_v11  ;;  %v21912_v37 = vld [vmem:[#allocation8 + $0x8] sm:$0xff]  }
 0x696   : > { %v12483_v32 = vor.u32 %v12482_v25, %v12479_v4  ;;  %v12489_v48 = vrot.slane %v12487_v33, 6  ;;  %v12497_v47 = vshrl.u32 %v18486_v34, 16  ;;  %v12500_v19 = vshll.u32 %v18486_v34, 16  ;;  %20151 = vmatprep.mubr.bf16.mxu0 %v12848_v20 }
 0x697   : > { %v12492_v9 = vrot.slane %v12490_v43, 7  ;;  %v9863_v29 = vcombine.high %v9336_v14, %v9336_v14  ;;  %v9870_v53 = vrot.slane %v9336_v14, %v23683_v40  ;;  %v9339_v55 = vmax.f32 %v9303_v22, 0.0 }
 0x698   : > { %v12484_v2 = vsel %vm24856_vm13, %v12475_v16, %v12483_v32  ;;  %v12485_v49 = vrot.slane %v12483_v32, 4  ;;  %v12499_v54 = vrot.slane %v12497_v47, 6  ;;  %v12502_v41 = vrot.slane %v12500_v19, 7  ;;  %v21915_v32 = vld [vmem:[#allocation8 + $0x10] sm:$0xff]   ;;  %v25452_v19 = vld [vmem:[#allocation12] ss:$0 sm:$0xff] }
 0x699   : > { %v12493_v58 = vor.u32 %v12492_v9, %v12489_v48  ;;  %12659 = vst [vmem:[#allocation2 + $0x68] sm:$0xf] %v12484_v2  ;;  %v9877_v63 = vrot.slane %v9863_v29, %v23683_v40  ;;  %v9878_v51 = vcombine.high %v9870_v53, %v9870_v53  ;;  %v9913_v11 = vcombine.high %v25384_v31, %v25384_v31 }
 0x69a   : > { %v12503_v21 = vor.u32 %v12502_v41, %v12499_v54  ;;  %v12853_v59 = vshll.u32 %v25413_v8, 16  ;;  %v9258_v61 = vmul.f32 %v25132_v10, %v25071_v36  ;;  %v9914_v52 = vcombine.high %v9339_v55, %v9339_v55 }
 0x69b   : > { %v12494_v16 = vsel %vm24856_vm13, %v12485_v49, %v12493_v58  ;;  %v12495_v28 = vrot.slane %v12493_v58, 4  ;;  %v9879_v7 = vcombine.high %v9877_v63, %v9877_v63  ;;  %v10514_v44 = vcombine.low %v9870_v53, %v9878_v51 }
 0x69c   : > { %v12505_v57 = vrot.slane %v12503_v21, 4  ;;  %12660 = vst [vmem:[#allocation2 + $0x6c] sm:$0xf] %v12494_v16  ;;  %v9921_v0 = vrot.slane %v9339_v55, %v23683_v40  ;;  %v25428_v38 = vrot.slane %v12853_v59, 1  ;;  %v10563_v35 = vrot.slane %v25397_v1, %v23683_v40  ;;  %v21919_v55 = vld [vmem:[#allocation8 + $0x18] sm:$0xff]  }
 0x69d   : > { %v12504_v31 = vsel %vm24856_vm13, %v12495_v28, %v12503_v21  ;;  %v10515_v36 = vcombine.low %v9877_v63, %v9879_v7  ;;  %v9301_v62 = vadd.f32 %v25123_v17, %v9258_v61  ;;  %v9928_v27 = vrot.slane %v9914_v52, %v23683_v40 }
 0x69e   : > { %v12514_v18 = vsel %vm24856_vm13, %v12505_v57, %v25409_v5  ;;  %12661 = vst [vmem:[#allocation2 + $0x70] sm:$0xf] %v12504_v31  ;;  %v10556_v56 = vcombine.low %v9913_v11, %v9921_v0  ;;  %v12856_v42 = vsel %vm661_vm0, %v12851_v46, %v25428_v38  ;;  %v10522_v1 = vrot.slane %v10514_v44, %v23683_v40  ;;  %v25471_v44 = vld [vmem:[#allocation11] ss:$0 sm:$0xff] }
 0x69f   : > { %12662 = vst [vmem:[#allocation2 + $0x74] sm:$0xf] %v12514_v18  ;;  %v10529_v23 = vrot.slane %v10515_v36, %v23683_v40  ;;  %20152 = vmatmul.mubr.bf16.vlgmr.msra.gmra.mrb[36].mxu0 %v12856_v42  ;;  %v9337_v17 = vmax.f32 %v9301_v62, 0.0  ;;  %v9263_v34 = vmul.f32 %v25132_v10, %v25086_v3  ;;  %v12515_v4 = vrot.slane %v25409_v5, 4 }
 0x6a0   : > { %v9930_v25 = vcombine.high %v9928_v27, %v9928_v27  ;;  %v10570_v33 = vrot.slane %v10556_v56, %v23683_v40  ;;  %20188 = vmatpush3.bf16.msra.mxu0 %v25167_v45  ;;  %v12857_v46 = vshrl.u32 %v25413_v8, 16  ;;  %v12861_v10 = vshll.u32 %v25441_v30, 16 }
 0x6a1   : > { %v10530_v43 = vcombine.low %v10522_v1, %v10529_v23  ;;  %v18276_v26 = vcombine.low %v10529_v23, %v10529_v23  ;;  %v9880_v14 = vcombine.high %v9337_v17, %v9337_v17  ;;  %v9887_v22 = vrot.slane %v9337_v17, %v23683_v40  ;;  %20189 = vmatprep.subr.bf16.mxu0 %v21912_v37 }
 0x6a2   : > { %v10571_v48 = vcombine.low %v10563_v35, %v10570_v33  ;;  %v18278_v47 = vcombine.low %v10570_v33, %v10570_v33  ;;  %v9306_v3 = vadd.f32 %v25452_v19, %v9263_v34  ;;  %v25459_v53 = vcombine.low %v9928_v27, %v9930_v25 }
 0x6a3   : > { %v11321_v9 = vrot.slane %v10530_v43, %v23683_v40  ;;  %v11328_v45 = vrot.slane %v18276_v26, %v23683_v40  ;;  %v9894_v20 = vrot.slane %v9880_v14, %v23683_v40  ;;  %v9895_v29 = vcombine.high %v9887_v22, %v9887_v22 }
 0x6a4   : > { %v25462_v2 = vrot.slane %v10571_v48, %v23683_v40  ;;  %v11369_v49 = vrot.slane %v18278_v47, %v23683_v40  ;;  %v9342_v54 = vmax.f32 %v9306_v3, 0.0  ;;  %20190 = vmatpush3.bf16.msra.mxu0 %v21912_v37  ;;  %v9261_v57 = vmul.f32 %v25471_v44, %v25120_v39  ;;  %v21922_v37 = vld [vmem:[#allocation8 + $0x20] sm:$0xff]  }
 0x6a5   : > { %v11329_v41 = vcombine.high %v11321_v9, %v11321_v9  ;;  %v11330_v58 = vcombine.high %v11328_v45, %v11328_v45  ;;  %v9896_v63 = vcombine.high %v9894_v20, %v9894_v20  ;;  %v10538_v51 = vcombine.low %v9895_v29, %v9894_v20  ;;  %20191 = vmatprep.subr.bf16.mxu0 %v21915_v32 }
 0x6a6   : > { %v11370_v21 = vcombine.high %v25462_v2, %v25462_v2  ;;  %v11371_v11 = vcombine.high %v11369_v49, %v11369_v49  ;;  %v9965_v59 = vcombine.high %v9342_v54, %v9342_v54  ;;  %v25468_v61 = vrot.slane %v9342_v54, %v23683_v40 }
 0x6a7   : > { %v11955_v16 = vcombine.low %v11321_v9, %v11329_v41  ;;  %v11956_v28 = vcombine.low %v11328_v45, %v11330_v58  ;;  %v10539_v7 = vcombine.low %v9896_v63, %v25372_v15  ;;  %v10587_v52 = vrot.slane %v25459_v53, %v23683_v40 }
 0x6a8   : > { %v25477_v0 = vcombine.low %v11370_v21, %v11369_v49  ;;  %v25480_v31 = vrot.slane %v9965_v59, %v23683_v40  ;;  %v9980_v35 = vcombine.high %v25468_v61, %v25468_v61  ;;  %20192 = vmatpush3.bf16.msra.mxu0 %v21915_v32  ;;  %v10546_v62 = vrot.slane %v10538_v51, %v23683_v40  ;;  %v21925_v32 = vld [vmem:[#allocation8 + $0x28] sm:$0xff]  }
 0x6a9   : > { %v11963_v36 = vrot.slane %v11955_v16, %v23683_v40  ;;  %v11970_v15 = vrot.slane %v11956_v28, %v23683_v40  ;;  %v10553_v39 = vrot.slane %v10539_v7, %v23683_v40  ;;  %20193 = vmatprep.subr.bf16.mxu0 %v21919_v55  ;;  %v25489_v18 = vcombine.low %v11371_v11, %v24769_v13  ;;  %v21928_v11 = vld [vmem:[#allocation8 + $0x30] sm:$0xff]  }
 0x6aa   : > { %v10621_v27 = vcombine.low %v9980_v35, %v25480_v31  ;;  %v12859_v56 = vor.u32 %v12857_v46, %v25428_v38  ;;  %v25493_v42 = vrot.slane %v12861_v10, 1  ;;  %v9304_v34 = vadd.f32 %v25452_v19, %v9261_v57  ;;  %v25514_v10 = vld [vmem:[#allocation2 + $0x20] sm:$0xff]  }
 0x6ab   : > { %v11971_v1 = vcombine.low %v11963_v36, %v11970_v15  ;;  %v10554_v23 = vcombine.low %v10546_v62, %v10553_v39  ;;  %v18277_v17 = vcombine.low %v10553_v39, %v10553_v39  ;;  %v12004_v25 = vrot.slane %v25477_v0, %v23683_v40 }
 0x6ac   : > { %v25499_v33 = vrot.slane %v10621_v27, %v23683_v40  ;;  %v12864_v43 = vsel %vm661_vm0, %v12859_v56, %v25493_v42  ;;  %v9264_v26 = vmul.f32 %v25471_v44, %v25126_v6  ;;  %20194 = vmatpush3.bf16.msra.mxu0 %v21919_v55  ;;  %v9340_v22 = vmax.f32 %v9304_v34, 0.0 }
 0x6ad   : > { %v18488_v38 = vpack.c.bf16 %v11971_v1, %v11971_v1  ;;  %v11345_v46 = vrot.slane %v10554_v23, %v23683_v40  ;;  %v11352_v14 = vrot.slane %v18277_v17, %v23683_v40  ;;  %20155 = vmatprep.mubr.bf16.mxu0 %v12864_v43  ;;  %20195 = vmatprep.subr.bf16.mxu0 %v21922_v37  ;;  %v12865_v58 = vshrl.u32 %v25441_v30, 16  ;;  %v21931_v1 = vld [vmem:[#allocation8 + $0x38] sm:$0xff]  }
 0x6ae   : > { %v12014_v48 = vrot.slane %v25489_v18, %v23683_v40  ;;  %v18281_v47 = vcombine.low %v25499_v33, %v25499_v33  ;;  %v9307_v3 = vadd.f32 %v25452_v19, %v9264_v26  ;;  %v9981_v6 = vcombine.high %v25480_v31, %v25480_v31  ;;  %v25585_v18 = vld [vmem:[#allocation2 + $0x38] sm:$0xff]  }
 0x6af   : > { %v12517_v9 = vshrl.u32 %v18488_v38, 16  ;;  %v12520_v45 = vshll.u32 %v18488_v38, 16  ;;  %v11353_v20 = vcombine.high %v11345_v46, %v11345_v46  ;;  %v11354_v29 = vcombine.high %v11352_v14, %v11352_v14 }
 0x6b0   : > { %v11972_v49 = vcombine.low %v24769_v13, %v11345_v46  ;;  %v9931_v54 = vcombine.high %v9340_v22, %v9340_v22  ;;  %v9938_v41 = vrot.slane %v9340_v22, %v23683_v40  ;;  %20196 = vmatpush3.bf16.msra.mxu0 %v21922_v37  ;;  %v9343_v28 = vmax.f32 %v9307_v3, 0.0 }
 0x6b1   : > { %v12519_v63 = vrot.slane %v12517_v9, 6  ;;  %v12522_v51 = vrot.slane %v12520_v45, 7  ;;  %v11973_v55 = vcombine.low %v11353_v20, %v11352_v14  ;;  %v11989_v21 = vcombine.low %v11354_v29, %v25462_v2  ;;  %20197 = vmatprep.subr.bf16.mxu0 %v21925_v32  ;;  %v25541_v45 = vld [vmem:[#allocation8 + $0x80] sm:$0xff]  }
 0x6b2   : > { %v9945_v59 = vrot.slane %v9931_v54, %v23683_v40  ;;  %v9946_v16 = vcombine.high %v9938_v41, %v9938_v41  ;;  %v12869_v7 = vshll.u32 %v25514_v10, 16  ;;  %v11980_v0 = vrot.slane %v11972_v49, %v23683_v40 }
 0x6b3   : > { %v12523_v57 = vor.u32 %v12522_v51, %v12519_v63  ;;  %v11987_v31 = vrot.slane %v11973_v55, %v23683_v40  ;;  %v11997_v35 = vrot.slane %v11989_v21, %v23683_v40  ;;  %v9982_v62 = vcombine.high %v9343_v28, %v9343_v28 }
 0x6b4   : > { %v9947_v36 = vcombine.high %v9945_v59, %v9945_v59  ;;  %v10580_v15 = vcombine.low %v9938_v41, %v9946_v16  ;;  %v9989_v2 = vrot.slane %v9343_v28, %v23683_v40  ;;  %20198 = vmatpush3.bf16.msra.mxu0 %v21925_v32  ;;  %v25531_v56 = vrot.slane %v18281_v47, %v23683_v40 }
 0x6b5   : > { %v12524_v39 = vsel %vm24856_vm13, %v12515_v4, %v12523_v57  ;;  %v11988_v37 = vcombine.low %v11980_v0, %v11987_v31  ;;  %v12005_v27 = vcombine.low %v11997_v35, %v12004_v25  ;;  %20199 = vmatprep.subr.bf16.mxu0 %v21928_v11  ;;  %v12525_v23 = vrot.slane %v12523_v57, 4  ;;  %v25556_v31 = vld [vmem:[#allocation2 + $0x28] sm:$0xff]  }
 0x6b6   : > { %12663 = vst [vmem:[#allocation2 + $0x78] sm:$0xf] %v12524_v39  ;;  %v10594_v17 = vrot.slane %v10580_v15, %v23683_v40  ;;  %v9996_v34 = vrot.slane %v9982_v62, %v23683_v40  ;;  %v9997_v43 = vcombine.high %v9989_v2, %v9989_v2  ;;  %v25535_v5 = vcombine.low %v9945_v59, %v9947_v36 }
 0x6b7   : > { %v18489_v26 = vpack.c.bf16 %v11988_v37, %v11988_v37  ;;  %v18490_v38 = vpack.c.bf16 %v12005_v27, %v12005_v27  ;;  %v10637_v46 = vcombine.low %v9981_v6, %v9989_v2  ;;  %v12867_v22 = vor.u32 %v12865_v58, %v25493_v42 }
 0x6b8   : > { %v10595_v4 = vcombine.low %v10587_v52, %v10594_v17  ;;  %v18279_v25 = vcombine.low %v10594_v17, %v10594_v17  ;;  %v10638_v14 = vcombine.low %v9997_v43, %v9996_v34  ;;  %20200 = vmatpush3.bf16.msra.mxu0 %v21928_v11  ;;  %v11436_v21 = vcombine.high %v25531_v56, %v25531_v56 }
 0x6b9   : > { %v12527_v32 = vshrl.u32 %v18489_v26, 16  ;;  %v12530_v47 = vshll.u32 %v18489_v26, 16  ;;  %v12537_v3 = vshrl.u32 %v18490_v38, 16  ;;  %v12540_v9 = vshll.u32 %v18490_v38, 16  ;;  %20201 = vmatprep.subr.bf16.mxu0 %v21931_v1 }
 0x6ba   : > { %v11386_v20 = vrot.slane %v10595_v4, %v23683_v40  ;;  %v11393_v6 = vrot.slane %v18279_v25, %v23683_v40  ;;  %v10645_v29 = vrot.slane %v10637_v46, %v23683_v40  ;;  %v10652_v53 = vrot.slane %v10638_v14, %v23683_v40 }
 0x6bb   : > { %v12529_v52 = vrot.slane %v12527_v32, 6  ;;  %v12532_v49 = vrot.slane %v12530_v47, 7  ;;  %v12539_v54 = vrot.slane %v12537_v3, 6  ;;  %v12542_v42 = vrot.slane %v12540_v9, 7 }
 0x6bc   : > { %v11394_v41 = vcombine.high %v11386_v20, %v11386_v20  ;;  %v11395_v58 = vcombine.high %v11393_v6, %v11393_v6  ;;  %v10653_v63 = vcombine.low %v10645_v29, %v10652_v53  ;;  %v18282_v51 = vcombine.low %v10652_v53, %v10652_v53  ;;  %20202 = vmatpush3.bf16.msra.mxu0 %v21931_v1 }
 0x6bd   : > { %v12533_v55 = vor.u32 %v12532_v49, %v12529_v52  ;;  %v12871_v11 = vrot.slane %v12869_v7, 1  ;;  %v9262_v59 = vmul.f32 %v25471_v44, %v25169_v50  ;;  %20239 = vmatprep.subr.bf16.mxu0 %v25541_v45  ;;  %v25552_v16 = vor.u32 %v12542_v42, %v12539_v54  ;;  %v25592_v42 = vld [vmem:[#allocation2 + $0x40] sm:$0xff]  }
 0x6be   : > { %v12007_v28 = vcombine.low %v11386_v20, %v11394_v41  ;;  %v11444_v57 = vrot.slane %v10653_v63, %v23683_v40  ;;  %v11451_v0 = vrot.slane %v18282_v51, %v23683_v40  ;;  %v25560_v15 = vcombine.low %v11393_v6, %v11395_v58 }
 0x6bf   : > { %v12534_v35 = vsel %vm24856_vm13, %v12525_v23, %v12533_v55  ;;  %v12535_v36 = vrot.slane %v12533_v55, 4  ;;  %v12872_v7 = vsel %vm661_vm0, %v12867_v22, %v12871_v11  ;;  %v10604_v50 = vrot.slane %v25535_v5, %v23683_v40  ;;  %v25573_v23 = vld [vmem:[#allocation2 + $0x30] sm:$0xff]  }
 0x6c0   : > { %12664 = vst [vmem:[#allocation2 + $0x7c] sm:$0xf] %v12534_v35  ;;  %v12021_v44 = vrot.slane %v12007_v28, %v23683_v40  ;;  %v11452_v62 = vcombine.high %v11444_v57, %v11444_v57  ;;  %v11453_v2 = vcombine.high %v11451_v0, %v11451_v0  ;;  %20156 = vmatmul.mubr.bf16.gmra.mrb[40].mxu0 %v12872_v7  ;;  %v12873_v1 = vshrl.u32 %v25514_v10, 16 }
 0x6c1   : > { %v12544_v39 = vsel %vm24856_vm13, %v12535_v36, %v25552_v16  ;;  %v25569_v37 = vcombine.low %v11436_v21, %v11444_v57  ;;  %v9305_v27 = vadd.f32 %v25452_v19, %v9262_v59  ;;  %v12877_v26 = vshll.u32 %v25556_v31, 16 }
 0x6c2   : > { %12665 = vst [vmem:[#allocation2 + $0x80] sm:$0xf] %v12544_v39  ;;  %v12022_v17 = vcombine.low %v12014_v48, %v12021_v44  ;;  %v12074_v34 = vcombine.low %v11452_v62, %v11451_v0  ;;  %v12075_v43 = vcombine.low %v11453_v2, %v24769_v13  ;;  %v12545_v38 = vrot.slane %v25552_v16, 4  ;;  %v25602_v62 = vld [vmem:[#allocation2 + $0x48] sm:$0xff]  }
 0x6c3   : > { %v12031_v5 = vrot.slane %v25560_v15, %v23683_v40  ;;  %v9341_v19 = vmax.f32 %v9305_v27, 0.0  ;;  %v12875_v46 = vor.u32 %v12873_v1, %v12871_v11  ;;  %v12879_v22 = vrot.slane %v12877_v26, 1 }
 0x6c4   : > { %v18491_v4 = vpack.c.bf16 %v12022_v17, %v12022_v17  ;;  %v12082_v25 = vrot.slane %v12074_v34, %v23683_v40  ;;  %v12089_v14 = vrot.slane %v12075_v43, %v23683_v40  ;;  %v12881_v47 = vshrl.u32 %v25556_v31, 16 }
 0x6c5   : > { %v9948_v48 = vcombine.high %v9341_v19, %v9341_v19  ;;  %v9955_v32 = vrot.slane %v9341_v19, %v23683_v40  ;;  %v12885_v3 = vshll.u32 %v25573_v23, 16  ;;  %v12880_v29 = vsel %vm661_vm0, %v12875_v46, %v12879_v22 }
 0x6c6   : > { %v12547_v9 = vshrl.u32 %v18491_v4, 16  ;;  %v12550_v20 = vshll.u32 %v18491_v4, 16  ;;  %v12090_v6 = vcombine.low %v12082_v25, %v12089_v14  ;;  %20159 = vmatprep.mubr.bf16.mxu0 %v12880_v29  ;;  %v12883_v49 = vor.u32 %v12881_v47, %v12879_v22  ;;  %v25613_v25 = vld [vmem:[#allocation2 + $0x50] sm:$0xff]   ;;  %v12671_v14 = vld [vmem:[#allocation2 + $0x98] sm:$0x3] }
 0x6c7   : > { %v9962_v53 = vrot.slane %v9948_v48, %v23683_v40  ;;  %v9963_v52 = vcombine.high %v9955_v32, %v9955_v32  ;;  %v12887_v54 = vrot.slane %v12885_v3, 1  ;;  %v12893_v51 = vshll.u32 %v25585_v18, 16 }
 0x6c8   : > { %v12549_v41 = vrot.slane %v12547_v9, 6  ;;  %v12552_v58 = vrot.slane %v12550_v20, 7  ;;  %v18495_v63 = vpack.c.bf16 %v12090_v6, %v12090_v6  ;;  %v12889_v59 = vshrl.u32 %v25573_v23, 16 }
 0x6c9   : > { %v9964_v55 = vcombine.high %v9962_v53, %v9962_v53  ;;  %v10597_v21 = vcombine.low %v9955_v32, %v9963_v52  ;;  %v12888_v11 = vsel %vm661_vm0, %v12883_v49, %v12887_v54  ;;  %v12895_v0 = vrot.slane %v12893_v51, 1 }
 0x6ca   : > { %v25597_v16 = vor.u32 %v12552_v58, %v12549_v41  ;;  %v12587_v28 = vshrl.u32 %v18495_v63, 16  ;;  %v12590_v57 = vshll.u32 %v18495_v63, 16  ;;  %20160 = vmatmul.mubr.bf16.gmra.mrb[44].mxu0 %v12888_v11  ;;  %v12891_v7 = vor.u32 %v12889_v59, %v12887_v54  ;;  %v25630_v58 = vld [vmem:[#allocation2 + $0x60] sm:$0xff]  }
 0x6cb   : > { %v10611_v35 = vrot.slane %v10597_v21, %v23683_v40  ;;  %v10620_v36 = vcombine.low %v9964_v55, %v25468_v61  ;;  %v12901_v44 = vshll.u32 %v25592_v42, 16  ;;  %v12897_v1 = vshrl.u32 %v25585_v18, 16 }
 0x6cc   : > { %v12554_v2 = vsel %vm24856_vm13, %v12545_v38, %v25597_v16  ;;  %v12589_v39 = vrot.slane %v12587_v28, 6  ;;  %v12592_v27 = vrot.slane %v12590_v57, 7  ;;  %v12896_v61 = vsel %vm661_vm0, %v12891_v7, %v12895_v0  ;;  %v25615_v38 = vld [vmem:[#allocation2 + $0x58] sm:$0xff]   ;;  %v25634_v57 = vld [vmem:[#allocation2 + $0x68] sm:$0xff]  }
 0x6cd   : > { %12666 = vst [vmem:[#allocation2 + $0x84] sm:$0xf] %v12554_v2  ;;  %v10612_v17 = vcombine.low %v10604_v50, %v10611_v35  ;;  %v10628_v34 = vrot.slane %v10620_v36, %v23683_v40  ;;  %v18280_v43 = vcombine.low %v10611_v35, %v10611_v35  ;;  %20163 = vmatprep.mubr.bf16.mxu0 %v12896_v61  ;;  %v12903_v46 = vrot.slane %v12901_v44, 1 }
 0x6ce   : > { %v25610_v26 = vor.u32 %v12592_v27, %v12589_v39  ;;  %v12899_v19 = vor.u32 %v12897_v1, %v12895_v0  ;;  %v12905_v4 = vshrl.u32 %v25592_v42, 16  ;;  %v12909_v32 = vshll.u32 %v25602_v62, 16 }
 0x6cf   : > { %v10636_v22 = vcombine.low %v10628_v34, %v25499_v33  ;;  %v11403_v50 = vrot.slane %v10612_v17, %v23683_v40  ;;  %v11410_v48 = vrot.slane %v18280_v43, %v23683_v40  ;;  %v12913_v20 = vshrl.u32 %v25602_v62, 16 }
 0x6d0   : > { %v12595_v47 = vrot.slane %v25610_v26, 4  ;;  %v12904_v3 = vsel %vm661_vm0, %v12899_v19, %v12903_v46  ;;  %v12907_v9 = vor.u32 %v12905_v4, %v12903_v46  ;;  %v12911_v52 = vrot.slane %v12909_v32, 1 }
 0x6d1   : > { %v11411_v6 = vcombine.high %v11403_v50, %v11403_v50  ;;  %v11412_v29 = vcombine.high %v11410_v48, %v11410_v48  ;;  %v11427_v53 = vrot.slane %v10636_v22, %v23683_v40  ;;  %v12917_v49 = vshll.u32 %v25613_v25, 16 }
 0x6d2   : > { %v12672_v33 = vsel %vm24729_vm9, %v12595_v47, %v12671_v14  ;;  %20164 = vmatmul.mubr.bf16.gmra.mrb[48].mxu0 %v12904_v3  ;;  %v12921_v54 = vshrl.u32 %v25613_v25, 16  ;;  %v12925_v41 = vshll.u32 %v25615_v38, 16  ;;  %v12912_v11 = vsel %vm661_vm0, %v12907_v9, %v12911_v52  ;;  %v25655_v9 = vld [vmem:[#allocation2 + $0x78] sm:$0xff]  }
 0x6d3   : > { %12673 = vst [vmem:[#allocation2 + $0x98] sm:$0x3] %v12672_v33  ;;  %v11435_v63 = vcombine.high %v11427_v53, %v11427_v53  ;;  %v12024_v51 = vcombine.low %v11403_v50, %v11411_v6  ;;  %v12040_v55 = vcombine.low %v11410_v48, %v11412_v29  ;;  %v12041_v21 = vcombine.low %v24769_v13, %v11427_v53 }
 0x6d4   : > { %v12915_v59 = vor.u32 %v12913_v20, %v12911_v52  ;;  %v12919_v60 = vrot.slane %v12917_v49, 1  ;;  %v12927_v28 = vrot.slane %v12925_v41, 1  ;;  %20167 = vmatprep.mubr.bf16.mxu0 %v12912_v11  ;;  %v12933_v2 = vshll.u32 %v25630_v58, 16 }
 0x6d5   : > { %v12038_v0 = vrot.slane %v12024_v51, %v23683_v40  ;;  %v12048_v35 = vrot.slane %v12040_v55, %v23683_v40  ;;  %v12055_v36 = vrot.slane %v12041_v21, %v23683_v40  ;;  %v12057_v7 = vcombine.low %v11435_v63, %v25531_v56 }
 0x6d6   : > { %v12923_v44 = vor.u32 %v12921_v54, %v12919_v60  ;;  %v12072_v13 = vrot.slane %v25569_v37, %v23683_v40  ;;  %v12555_v17 = vrot.slane %v25597_v16, 4  ;;  %v12935_v43 = vrot.slane %v12933_v2, 1  ;;  %v25651_v37 = vld [vmem:[#allocation2 + $0x70] sm:$0xff]  }
 0x6d7   : > { %v12039_v39 = vcombine.low %v12031_v5, %v12038_v0  ;;  %v12056_v27 = vcombine.low %v12048_v35, %v12055_v36  ;;  %v12065_v1 = vrot.slane %v12057_v7, %v23683_v40  ;;  %v12941_v56 = vshll.u32 %v25634_v57, 16  ;;  %v25665_v7 = vld [vmem:[#allocation2 + $0x80] sm:$0xff]  }
 0x6d8   : > { %v12928_v34 = vsel %vm661_vm0, %v12923_v44, %v12927_v28  ;;  %v12920_v4 = vsel %vm661_vm0, %v12915_v59, %v12919_v60  ;;  %v12929_v15 = vshrl.u32 %v25615_v38, 16  ;;  %v12937_v5 = vshrl.u32 %v25630_v58, 16 }
 0x6d9   : > { %v12073_v61 = vcombine.low %v12065_v1, %v12072_v13  ;;  %v18492_v19 = vpack.c.bf16 %v12039_v39, %v12039_v39  ;;  %v18493_v46 = vpack.c.bf16 %v12056_v27, %v12056_v27  ;;  %v12943_v3 = vrot.slane %v12941_v56, 1 }
 0x6da   : > { %20168 = vmatmul.mubr.bf16.gmra.mrb[52].mxu0 %v12920_v4  ;;  %v12931_v32 = vor.u32 %v12929_v15, %v12927_v28  ;;  %v12939_v47 = vor.u32 %v12937_v5, %v12935_v43  ;;  %v12949_v49 = vshll.u32 %v25651_v37, 16  ;;  %v12957_v11 = vshll.u32 %v25655_v9, 16 }
 0x6db   : > { %v18494_v14 = vpack.c.bf16 %v12073_v61, %v12073_v61  ;;  %v12557_v22 = vshrl.u32 %v18492_v19, 16  ;;  %v12560_v16 = vshll.u32 %v18492_v19, 16  ;;  %v12567_v50 = vshrl.u32 %v18493_v46, 16  ;;  %20171 = vmatprep.mubr.bf16.mxu0 %v12928_v34 }
 0x6dc   : > { %v12570_v48 = vshll.u32 %v18493_v46, 16  ;;  %v12936_v63 = vsel %vm661_vm0, %v12931_v32, %v12935_v43  ;;  %v12944_v21 = vsel %vm661_vm0, %v12939_v47, %v12943_v3  ;;  %v12951_v35 = vrot.slane %v12949_v49, 1  ;;  %v25699_v49 = vld [vmem:[#allocation2 + $0x28] sm:$0xff]  }
 0x6dd   : > { %v12559_v20 = vrot.slane %v12557_v22, 6  ;;  %v12562_v6 = vrot.slane %v12560_v16, 7  ;;  %v12569_v29 = vrot.slane %v12567_v50, 6  ;;  %v12577_v53 = vshrl.u32 %v18494_v14, 16 }
 0x6de   : > { %v12572_v52 = vrot.slane %v12570_v48, 7  ;;  %v12580_v33 = vshll.u32 %v18494_v14, 16  ;;  %v12953_v13 = vshrl.u32 %v25651_v37, 16  ;;  %v12959_v39 = vrot.slane %v12957_v11, 1  ;;  %v25686_v48 = vld [vmem:[#allocation2 + $0xc] sm:$0xf] }
 0x6df   : > { %v12563_v54 = vor.u32 %v12562_v6, %v12559_v20  ;;  %v12579_v41 = vrot.slane %v12577_v53, 6  ;;  %v12945_v27 = vshrl.u32 %v25634_v57, 16  ;;  %v12965_v43 = vshll.u32 %v25665_v7, 16  ;;  %v25707_v11 = vld [vmem:[#allocation2 + $0x30] sm:$0xff]  }
 0x6e0   : > { %v12573_v51 = vor.u32 %v12572_v52, %v12569_v29  ;;  %v12582_v55 = vrot.slane %v12580_v33, 7  ;;  %v12961_v19 = vshrl.u32 %v25655_v9, 16  ;;  %v12969_v24 = vshrl.u32 %v25665_v7, 16  ;;  %v25693_v29 = vld [vmem:[#allocation2 + $0x10] sm:$0xff]   ;;  %v25695_v52 = vld [vmem:[#allocation2 + $0x18] sm:$0xff]   ;;  %v25697_v33 = vld [vmem:[#allocation2 + $0x20] sm:$0xff]  }
 0x6e1   : > { %v12564_v59 = vsel %vm24856_vm13, %v12555_v17, %v12563_v54  ;;  %v12565_v60 = vrot.slane %v12563_v54, 4  ;;  %v12955_v17 = vor.u32 %v12953_v13, %v12951_v35  ;;  %v12947_v34 = vor.u32 %v12945_v27, %v12943_v3  ;;  %v13808_v3 = vld [vmem:[#allocation2 + $0x8] sm:$0xe] }
 0x6e2   : > { %v12575_v28 = vrot.slane %v12573_v51, 4  ;;  %v12583_v0 = vor.u32 %v12582_v55, %v12579_v41  ;;  %12667 = vst [vmem:[#allocation2 + $0x88] sm:$0xf] %v12564_v59  ;;  %20172 = vmatmul.mubr.bf16.gmra.mrb[56].mxu0 %v12936_v63  ;;  %v12967_v46 = vrot.slane %v12965_v43, 1  ;;  %v12963_v15 = vor.u32 %v12961_v19, %v12959_v39  ;;  %v25709_v59 = vld [vmem:[#allocation2 + $0x38] sm:$0xff]   ;;  %v25719_v19 = vld [vmem:[#allocation2 + $0x48] sm:$0xff]  }
 0x6e3   : > { %v12574_v36 = vsel %vm24856_vm13, %v12565_v60, %v12573_v51  ;;  %20175 = vmatprep.mubr.bf16.mxu0 %v12944_v21  ;;  %v12960_v56 = vsel %vm661_vm0, %v12955_v17, %v12959_v39  ;;  %v12952_v61 = vsel %vm661_vm0, %v12947_v34, %v12951_v35  ;;  %v25691_v20 = vcombine.low %v13808_v3, %v25686_v48  ;;  %v25716_v17 = vld [vmem:[#allocation2 + $0x40] sm:$0xff]  }
 0x6e4   : > { %v12584_v44 = vsel %vm24856_vm13, %v12575_v28, %v12583_v0  ;;  %v12585_v2 = vrot.slane %v12583_v0, 4  ;;  %12668 = vst [vmem:[#allocation2 + $0x8c] sm:$0xf] %v12574_v36  ;;  %v12968_v5 = vsel %vm661_vm0, %v12963_v15, %v12967_v46  ;;  %v12971_v14 = vor.u32 %v12969_v24, %v12967_v46 }
 0x6e5   : > { %12669 = vst [vmem:[#allocation2 + $0x90] sm:$0xf] %v12584_v44  ;;  %v14293_v54 = vshrl.u32 %v25691_v20, 16  ;;  %v14296_v63 = vshll.u32 %v25691_v20, 16  ;;  %v14301_v55 = vshrl.u32 %v25693_v29, 16  ;;  %v14304_v21 = vshll.u32 %v25693_v29, 16 }
 0x6e6   : > { %v12594_v1 = vsel %vm24856_vm13, %v12585_v2, %v25610_v26  ;;  %v14310_v28 = vshrl.u32 %v25695_v52, 16  ;;  %v14313_v0 = vshll.u32 %v25695_v52, 16  ;;  %v14319_v35 = vshrl.u32 %v25697_v33, 16 }
 0x6e7   : > { %12670 = vst [vmem:[#allocation2 + $0x94] sm:$0xf] %v12594_v1  ;;  %v14295_v51 = vrot.slane %v14293_v54, 1  ;;  %v14298_v60 = vrot.slane %v14296_v63, 2  ;;  %v14303_v36 = vrot.slane %v14301_v55, 1  ;;  %v14306_v44 = vrot.slane %v14304_v21, 2 }
 0x6e8   : > { %v14322_v2 = vshll.u32 %v25697_v33, 16  ;;  %v14328_v13 = vshrl.u32 %v25699_v49, 16  ;;  %v14312_v27 = vrot.slane %v14310_v28, 1  ;;  %v14321_v1 = vrot.slane %v14319_v35, 1  ;;  %v25736_v63 = vld [vmem:[#allocation2 + $0x58] sm:$0xff]   ;;  %v25744_v28 = vld [vmem:[#allocation2 + $0x60] sm:$0xff]  }
 0x6e9   : > { %v14299_v39 = vor.u32 %v14298_v60, %v14295_v51  ;;  %v14307_v34 = vor.u32 %v14306_v44, %v14303_v36  ;;  %v14337_v15 = vshrl.u32 %v25707_v11, 16  ;;  %v14340_v24 = vshll.u32 %v25707_v11, 16 }
 0x6ea   : > { %20176 = vmatmul.mubr.bf16.gmra.mrb[60].mxu0 %v12952_v61  ;;  %v14324_v43 = vrot.slane %v14322_v2, 2  ;;  %v14331_v61 = vshll.u32 %v25699_v49, 16  ;;  %v14355_v60 = vshrl.u32 %v25716_v17, 16  ;;  %v14358_v35 = vshll.u32 %v25716_v17, 16  ;;  %v21935_v2 = vld [vmem:[#allocation8 + $0x90] sm:$0xff]  }
 0x6eb   : > { %20179 = vmatprep.mubr.bf16.mxu0 %v12960_v56  ;;  %v25678_v4 = vld [vmem:[#allocation2 + $0x88] sm:$0xff]   ;;  %v14330_v56 = vrot.slane %v14328_v13, 1  ;;  %v14364_v36 = vshrl.u32 %v25719_v19, 16  ;;  %v14367_v44 = vshll.u32 %v25719_v19, 16 }
 0x6ec   : > { %v12973_v26 = vshll.u32 %v25678_v4, 16  ;;  %v25683_v16 = vld [vmem:[#allocation2 + $0x90] ss:$0 sps:$4 sm:$0x11]   ;;  %v12977_v32 = vshrl.u32 %v25678_v4, 16  ;;  %v25749_v13 = vld [vmem:[#allocation2 + $0x68] sm:$0xff]  }
 0x6ed   : > { %v12981_v47 = vshll.u32 %v25683_v16, 16 }
 0x6ee   : > { %v12975_v22 = vrot.slane %v12973_v26, 1  ;;  %v14346_v26 = vshrl.u32 %v25709_v59, 16 }
 0x6ef   : > { %v12983_v53 = vrot.slane %v12981_v47, 1  ;;  %v14349_v47 = vshll.u32 %v25709_v59, 16 }
 0x6f0   : > { %v12976_v50 = vsel %vm661_vm0, %v12971_v14, %v12975_v22  ;;  %v12979_v6 = vor.u32 %v12977_v32, %v12975_v22  ;;  %v25724_v14 = vld [vmem:[#allocation2 + $0x50] sm:$0xff]   ;;  %v25727_v22 = vsel %vm2118_vm1, %v14299_v39, %v14307_v34  ;;  %v14333_v32 = vrot.slane %v14331_v61, 2 }
 0x6f1   : > { %26801 = vst [vmem:[#allocation30_spill] sm:$0xff] %v25727_v22  ;;  %v14348_v54 = vrot.slane %v14346_v26, 1  ;;  %v14351_v21 = vrot.slane %v14349_v47, 2  ;;  %v25765_v26 = vld [vmem:[#allocation2 + $0x78] sm:$0xff]   ;;  %v14385_v47 = vshll.u32 %v25736_v63, 16 }
 0x6f2   : > { %20180 = vmatmul.mubr.bf16.gmra.mrb[64].mxu0 %v12968_v5  ;;  %v12984_v41 = vsel %vm661_vm0, %v12979_v6, %v12983_v53  ;;  %v21934_v5 = vld [vmem:[#allocation8 + $0x88] sm:$0xff]   ;;  %v14339_v6 = vrot.slane %v14337_v15, 1  ;;  %v14342_v53 = vrot.slane %v14340_v24, 2  ;;  %v14334_v55 = vor.u32 %v14333_v32, %v14330_v56 }
 0x6f3   : > { %20183 = vmatprep.mubr.bf16.mxu0 %v12976_v50  ;;  %v14325_v50 = vor.u32 %v14324_v43, %v14321_v1  ;;  %v14360_v1 = vrot.slane %v14358_v35, 2  ;;  %v14369_v43 = vrot.slane %v14367_v44, 2  ;;  %v14382_v15 = vshrl.u32 %v25736_v63, 16  ;;  %v25763_v24 = vld [vmem:[#allocation2 + $0x70] sm:$0xff]   ;;  %v25778_v44 = vld [vmem:[#allocation2 + $0x80] sm:$0xff]  }
 0x6f4   : > { %v14387_v35 = vrot.slane %v14385_v47, 2  ;;  %v25787_v47 = vld [vmem:[#allocation2 + $0x90] sm:$0xff]  }
 0x6f5   : > { %v25752_v39 = vsel %vm2118_vm1, %v14325_v50, %v14334_v55  ;;  %26809 = vst [vmem:[#allocation38_spill] sm:$0xff] %v25787_v47 }
 0x6f6   : > { %26804 = vst [vmem:[#allocation33_spill] sm:$0xff] %v25752_v39 }
 0x6fa   : > { %20184 = vmatmul.mubr.bf16.gmra.mrb[68].mxu0 %v12984_v41  ;;  %v25733_v41 = vld [vmem:[#allocation2 + $0x8] sm:$0xff]  }
 0x6fb   : > { %20203 = vmatprep.mubr.bf16.mxu0 %v25390_v12  ;;  %v14315_v12 = vrot.slane %v14313_v0, 2  ;;  %v14343_v0 = vor.u32 %v14342_v53, %v14339_v6  ;;  %v14391_v6 = vshrl.u32 %v25744_v28, 16  ;;  %v21936_v53 = vld [vmem:[#allocation8 + $0x98] sm:$0xff]  }
 0x6fd   : > { %v14316_v46 = vor.u32 %v14315_v12, %v14312_v27  ;;  %v14352_v27 = vor.u32 %v14351_v21, %v14348_v54  ;;  %v25756_v12 = vsel %vm2118_vm1, %v14334_v55, %v14343_v0  ;;  %v14384_v55 = vrot.slane %v14382_v15, 1 }
 0x6fe   : > { %26805 = vst [vmem:[#allocation34_spill] sm:$0xff] %v25756_v12  ;;  %v14394_v21 = vshll.u32 %v25744_v28, 16  ;;  %v14412_v15 = vshll.u32 %v25763_v24, 16 }
 0x6ff   : > { %v25731_v3 = vsel %vm2118_vm1, %v14307_v34, %v14316_v46  ;;  %v25739_v51 = vsel %vm2118_vm1, %v14316_v46, %v14325_v50  ;;  %v14366_v34 = vrot.slane %v14364_v36, 1  ;;  %v25759_v56 = vsel %vm2118_vm1, %v14343_v0, %v14352_v27 }
 0x700   : > { %26802 = vst [vmem:[#allocation31_spill] sm:$0xff] %v25731_v3  ;;  %26803 = vst [vmem:[#allocation32_spill] sm:$0xff] %v25739_v51  ;;  %v14376_v46 = vshll.u32 %v25724_v14, 16  ;;  %v14393_v36 = vrot.slane %v14391_v6, 1 }
 0x701   : > { %26806 = vst [vmem:[#allocation35_spill] sm:$0xff] %v25759_v56  ;;  %v14370_v32 = vor.u32 %v14369_v43, %v14366_v34  ;;  %v14403_v34 = vshll.u32 %v25749_v13, 16  ;;  %v25782_v43 = vld [vmem:[#allocation2 + $0x88] sm:$0xff]  }
 0x702   : > { %20204 = vmatmul.mubr.bf16.vlgmr.msra.gmra.mrb[36].mxu0 %v25733_v41  ;;  %v14378_v54 = vrot.slane %v14376_v46, 2  ;;  %v14409_v46 = vshrl.u32 %v25763_v24, 16 }
 0x703   : > { %20207 = vmatprep.mubr.bf16.mxu0 %v25413_v8  ;;  %20240 = vmatpush3.bf16.msra.mxu0 %v25541_v45  ;;  %v14357_v8 = vrot.slane %v14355_v60, 1  ;;  %v14373_v45 = vshrl.u32 %v25724_v14, 16  ;;  %v14400_v60 = vshrl.u32 %v25749_v13, 16 }
 0x704   : > { %20241 = vmatprep.subr.bf16.mxu0 %v21934_v5 }
 0x705   : > { %v14375_v61 = vrot.slane %v14373_v45, 1  ;;  %v14361_v50 = vor.u32 %v14360_v1, %v14357_v8  ;;  %v14396_v45 = vrot.slane %v14394_v21, 2  ;;  %v14402_v1 = vrot.slane %v14400_v60, 1 }
 0x706   : > { %v14414_v21 = vrot.slane %v14412_v15, 2 }
 0x707   : > { %20242 = vmatpush3.bf16.msra.mxu0 %v21934_v5  ;;  %v25772_v5 = vsel %vm2118_vm1, %v14352_v27, %v14361_v50  ;;  %v25775_v0 = vsel %vm2118_vm1, %v14361_v50, %v14370_v32  ;;  %v14379_v8 = vor.u32 %v14378_v54, %v14375_v61  ;;  %v14388_v27 = vor.u32 %v14387_v35, %v14384_v55 }
 0x708   : > { %20243 = vmatprep.subr.bf16.mxu0 %v21935_v2  ;;  %26807 = vst [vmem:[#allocation36_spill] sm:$0xff] %v25772_v5  ;;  %26808 = vst [vmem:[#allocation37_spill] sm:$0xff] %v25775_v0  ;;  %v14418_v50 = vshrl.u32 %v25765_v26, 16  ;;  %v14397_v6 = vor.u32 %v14396_v45, %v14393_v36  ;;  %v14405_v54 = vrot.slane %v14403_v34, 2  ;;  %v14411_v55 = vrot.slane %v14409_v46, 1 }
 0x709   : > { %v25790_v61 = vsel %vm2118_vm1, %v14370_v32, %v14379_v8  ;;  %v14427_v5 = vshrl.u32 %v25778_v44, 16  ;;  %v14430_v36 = vshll.u32 %v25778_v44, 16  ;;  %v14436_v45 = vshrl.u32 %v25782_v43, 16 }
 0x70a   : > { %20208 = vmatmul.mubr.bf16.gmra.mrb[40].mxu0 %v25441_v30  ;;  %v21937_v30 = vld [vmem:[#allocation8 + $0xa0] sm:$0xff]   ;;  %26810 = vst [vmem:[#allocation39_spill] sm:$0xff] %v25790_v61  ;;  %v14420_v60 = vrot.slane %v14418_v50, 1  ;;  %v25797_v35 = vsel %vm2118_vm1, %v14388_v27, %v14397_v6  ;;  %v14406_v40 = vor.u32 %v14405_v54, %v14402_v1  ;;  %v14415_v32 = vor.u32 %v14414_v21, %v14411_v55 }
 0x70b   : > { %20211 = vmatprep.mubr.bf16.mxu0 %v25514_v10  ;;  %20244 = vmatpush3.bf16.msra.mxu0 %v21935_v2  ;;  %v14421_v10 = vshll.u32 %v25765_v26, 16  ;;  %v25794_v2 = vsel %vm2118_vm1, %v14379_v8, %v14388_v27  ;;  %26812 = vst [vmem:[#allocation41_spill] sm:$0xff] %v25797_v35  ;;  %v14439_v34 = vshll.u32 %v25782_v43, 16  ;;  %v21938_v8 = vld [vmem:[#allocation8 + $0xa8] sm:$0xff]   ;;  %v14429_v27 = vrot.slane %v14427_v5, 1 }
 0x70c   : > { %20245 = vmatprep.subr.bf16.mxu0 %v21936_v53  ;;  %26811 = vst [vmem:[#allocation40_spill] sm:$0xff] %v25794_v2  ;;  %v25804_v46 = vsel %vm2118_vm1, %v14397_v6, %v14406_v40  ;;  %v14445_v1 = vshrl.u32 %v25787_v47, 16  ;;  %v25808_v50 = vsel %vm2118_vm1, %v14406_v40, %v14415_v32  ;;  %v14438_v54 = vrot.slane %v14436_v45, 1  ;;  %v14741_v6 = vld [vmem:[#allocation2 + $0x8] sm:$0xc] }
 0x70d   : > { %v14423_v0 = vrot.slane %v14421_v10, 2  ;;  %26813 = vst [vmem:[#allocation42_spill] sm:$0xff] %v25804_v46  ;;  %26814 = vst [vmem:[#allocation43_spill] sm:$0xff] %v25808_v50  ;;  %v14441_v10 = vrot.slane %v14439_v34, 2  ;;  %v14448_v35 = vshll.u32 %v25787_v47, 16  ;;  %v18399_v40 = vcombine.low %v14741_v6, %v25686_v48 }
 0x70e   : > { %v14447_v21 = vrot.slane %v14445_v1, 1  ;;  %v14763_v45 = vrot.slane %v25693_v29, 2  ;;  %v14767_v48 = vrot.slane %v25697_v33, 2 }
 0x70f   : > { %20246 = vmatpush3.bf16.msra.mxu0 %v21936_v53  ;;  %v14424_v15 = vor.u32 %v14423_v0, %v14420_v60  ;;  %v14432_v53 = vrot.slane %v14430_v36, 2  ;;  %v14442_v0 = vor.u32 %v14441_v10, %v14438_v54  ;;  %v21939_v60 = vld [vmem:[#allocation8 + $0xb0] sm:$0xff]   ;;  %v14450_v36 = vrot.slane %v14448_v35, 2  ;;  %v21940_v54 = vld [vmem:[#allocation8 + $0xb8] sm:$0xff]  }
 0x710   : > { %20247 = vmatprep.subr.bf16.mxu0 %v21937_v30  ;;  %v14762_v1 = vrot.slane %v18399_v40, 2  ;;  %v14769_v35 = vrot.slane %v25699_v49, 2 }
 0x711   : > { %v25812_v55 = vsel %vm2118_vm1, %v14415_v32, %v14424_v15  ;;  %v14433_v5 = vor.u32 %v14432_v53, %v14429_v27  ;;  %v14773_v53 = vrot.slane %v25709_v59, 2 }
 0x712   : > { %20212 = vmatmul.mubr.bf16.gmra.mrb[44].mxu0 %v25556_v31  ;;  %26815 = vst [vmem:[#allocation44_spill] sm:$0xff] %v25812_v55  ;;  %v14765_v31 = vrot.slane %v25695_v52, 2  ;;  %v25833_v27 = vsel %vm2589_vm2, %v14762_v1, %v14763_v45  ;;  %v25845_v6 = vsel %vm2589_vm2, %v14767_v48, %v14769_v35  ;;  %v14781_v1 = vrot.slane %v25736_v63, 2  ;;  %v25944_v55 = vld [vmem:[#allocation2 + $0x50] sm:$0xff]  }
 0x713   : > { %20215 = vmatprep.mubr.bf16.mxu0 %v25573_v23  ;;  %20248 = vmatpush3.bf16.msra.mxu0 %v21937_v30  ;;  %v25820_v32 = vsel %vm2118_vm1, %v14424_v15, %v14433_v5  ;;  %v25823_v34 = vsel %vm2118_vm1, %v14433_v5, %v14442_v0  ;;  %v25825_v23 = vor.u32 %v14450_v36, %v14447_v21  ;;  %v14771_v15 = vrot.slane %v25707_v11, 2 }
 0x714   : > { %20249 = vmatprep.subr.bf16.mxu0 %v21938_v8  ;;  %26816 = vst [vmem:[#allocation45_spill] sm:$0xff] %v25820_v32  ;;  %26817 = vst [vmem:[#allocation46_spill] sm:$0xff] %v25823_v34  ;;  %v25828_v30 = vsel %vm2589_vm2, %v14763_v45, %v14765_v31  ;;  %v25842_v21 = vsel %vm2589_vm2, %v14765_v31, %v14767_v48  ;;  %v14777_v36 = vrot.slane %v25719_v19, 2  ;;  %v14779_v31 = vrot.slane %v25724_v14, 2 }
 0x715   : > { %26818 = vst [vmem:[#allocation47_spill] sm:$0xff] %v25825_v23  ;;  %26819 = vst [vmem:[#allocation48_spill] sm:$0xff] %v25828_v30  ;;  %v25839_v10 = vsel %vm2118_vm1, %v14442_v0, %v25825_v23  ;;  %v25849_v5 = vsel %vm2589_vm2, %v14769_v35, %v14771_v15  ;;  %v25852_v40 = vsel %vm2589_vm2, %v14771_v15, %v14773_v53  ;;  %v25856_v0 = vld [vmem:[#allocation2 + $0x98] ss:$0 sps:$4 sm:$0x33]   ;;  %v14783_v48 = vrot.slane %v25744_v28, 2 }
 0x716   : > { %26820 = vst [vmem:[#allocation49_spill] sm:$0xff] %v25833_v27  ;;  %26821 = vst [vmem:[#allocation50_spill] sm:$0xff] %v25839_v10  ;;  %v14785_v15 = vrot.slane %v25749_v13, 2 }
 0x717   : > { %20250 = vmatpush3.bf16.msra.mxu0 %v21938_v8  ;;  %26822 = vst [vmem:[#allocation51_spill] sm:$0xff] %v25842_v21  ;;  %26823 = vst [vmem:[#allocation52_spill] sm:$0xff] %v25845_v6  ;;  %v14775_v8 = vrot.slane %v25716_v17, 2 }
 0x718   : > { %20251 = vmatprep.subr.bf16.mxu0 %v21939_v60  ;;  %26824 = vst [vmem:[#allocation53_spill] sm:$0xff] %v25849_v5  ;;  %26825 = vst [vmem:[#allocation54_spill] sm:$0xff] %v25852_v40  ;;  %v14789_v40 = vrot.slane %v25765_v26, 2  ;;  %v25877_v5 = vsel %vm2589_vm2, %v14779_v31, %v14781_v1 }
 0x719   : > { %26826 = vst [vmem:[#allocation55_spill] sm:$0xff] %v25856_v0  ;;  %v25859_v45 = vsel %vm2589_vm2, %v14773_v53, %v14775_v8  ;;  %v25866_v35 = vsel %vm2589_vm2, %v14775_v8, %v14777_v36  ;;  %v25871_v53 = vld [vmem:[#allocation8 + $0xc0] sm:$0xff]   ;;  %26830 = vst [vmem:[#allocation59_spill] sm:$0xff] %v25877_v5  ;;  %v25884_v8 = vsel %vm2589_vm2, %v14783_v48, %v14785_v15 }
 0x71a   : > { %20216 = vmatmul.mubr.bf16.gmra.mrb[48].mxu0 %v25585_v18  ;;  %26827 = vst [vmem:[#allocation56_spill] sm:$0xff] %v25859_v45  ;;  %26828 = vst [vmem:[#allocation57_spill] sm:$0xff] %v25866_v35  ;;  %v14787_v18 = vrot.slane %v25763_v24, 2  ;;  %v25874_v45 = vsel %vm2589_vm2, %v14777_v36, %v14779_v31  ;;  %v14793_v36 = vrot.slane %v25782_v43, 2  ;;  %v14795_v31 = vrot.slane %v25787_v47, 2 }
 0x71b   : > { %20219 = vmatprep.mubr.bf16.mxu0 %v25592_v42  ;;  %20252 = vmatpush3.bf16.msra.mxu0 %v21939_v60  ;;  %26829 = vst [vmem:[#allocation58_spill] sm:$0xff] %v25874_v45  ;;  %v25880_v42 = vsel %vm2589_vm2, %v14781_v1, %v14783_v48  ;;  %v14791_v60 = vrot.slane %v25778_v44, 2  ;;  %26832 = vst [vmem:[#allocation61_spill] sm:$0xff] %v25884_v8  ;;  %v14797_v1 = vrot.slane %v25856_v0, 2 }
 0x71c   : > { %20253 = vmatprep.subr.bf16.mxu0 %v21940_v54  ;;  %26831 = vst [vmem:[#allocation60_spill] sm:$0xff] %v25880_v42  ;;  %v25887_v35 = vsel %vm2589_vm2, %v14785_v15, %v14787_v18  ;;  %v25890_v6 = vsel %vm2589_vm2, %v14787_v18, %v14789_v40  ;;  %v25903_v48 = vsel %vm2589_vm2, %v14793_v36, %v14795_v31  ;;  %v15078_v18 = vld [vmem:[#allocation2 + $0x10] sm:$0xc] }
 0x71d   : > { %26833 = vst [vmem:[#allocation62_spill] sm:$0xff] %v25887_v35  ;;  %26834 = vst [vmem:[#allocation63_spill] sm:$0xff] %v25890_v6  ;;  %v25894_v45 = vsel %vm2589_vm2, %v14789_v40, %v14791_v60  ;;  %v25899_v42 = vsel %vm2589_vm2, %v14791_v60, %v14793_v36  ;;  %v25906_v15 = vsel %vm2589_vm2, %v14795_v31, %v14797_v1  ;;  %v25908_v6 = vld [vmem:[#allocation2 + $0x14] sm:$0xf]  ;;  %v13471_v40 = vld [vmem:[#allocation2] sm:$0xe] }
 0x71e   : > { %26835 = vst [vmem:[#allocation64_spill] sm:$0xff] %v25894_v45  ;;  %26836 = vst [vmem:[#allocation65_spill] sm:$0xff] %v25899_v42  ;;  %v22106_v60 = vld [vmem:[#allocation2 + $0x4] sm:$0xf]  ;;  %v25915_v45 = vld [vmem:[#allocation2 + $0x18] sm:$0xff]  }
 0x71f   : > { %20254 = vmatpush3.bf16.msra.mxu0 %v21940_v54  ;;  %26837 = vst [vmem:[#allocation66_spill] sm:$0xff] %v25903_v48  ;;  %26838 = vst [vmem:[#allocation67_spill] sm:$0xff] %v25906_v15  ;;  %v25913_v54 = vcombine.low %v15078_v18, %v25908_v6  ;;  %v18354_v42 = vcombine.low %v13471_v40, %v22106_v60  ;;  %v25917_v36 = vld [vmem:[#allocation2 + $0x20] sm:$0xff]   ;;  %v25919_v48 = vld [vmem:[#allocation2 + $0x28] sm:$0xff]   ;;  %v15571_v18 = vshrl.u32 %v25915_v45, 16  ;;  %v15574_v40 = vshll.u32 %v25915_v45, 16 }
 0x720   : > { %20291 = vmatprep.subr.bf16.mxu0 %v25871_v53  ;;  %v25921_v31 = vld [vmem:[#allocation2 + $0x30] sm:$0xff]   ;;  %v25931_v60 = vld [vmem:[#allocation2 + $0x38] sm:$0xff]   ;;  %v15580_v5 = vshrl.u32 %v25917_v36, 16  ;;  %v15583_v21 = vshll.u32 %v25917_v36, 16  ;;  %v15589_v30 = vshrl.u32 %v25919_v48, 16  ;;  %v15592_v27 = vshll.u32 %v25919_v48, 16 }
 0x721   : > { %26839 = vst [vmem:[#allocation68_spill] sm:$0xff] %v25913_v54  ;;  %v15563_v1 = vshrl.u32 %v25913_v54, 16  ;;  %v25925_v15 = vrot.slane %v18354_v42, 1  ;;  %v25936_v42 = vld [vmem:[#allocation2 + $0x40] sm:$0xff]   ;;  %v15607_v50 = vshrl.u32 %v25931_v60, 16  ;;  %v15610_v46 = vshll.u32 %v25931_v60, 16 }
 0x722   : > { %20220 = vmatmul.mubr.bf16.gmra.mrb[52].mxu0 %v25602_v62  ;;  %v15566_v62 = vshll.u32 %v25913_v54, 16  ;;  %v15573_v54 = vrot.slane %v15571_v18, 2  ;;  %v15585_v10 = vrot.slane %v15583_v21, 3  ;;  %v15591_v0 = vrot.slane %v15589_v30, 2 }
 0x723   : > { %20223 = vmatprep.mubr.bf16.mxu0 %v25613_v25  ;;  %v15565_v35 = vrot.slane %v15563_v1, 2  ;;  %v15576_v25 = vrot.slane %v15574_v40, 3  ;;  %v15598_v1 = vshrl.u32 %v25921_v31, 16  ;;  %v15594_v32 = vrot.slane %v15592_v27, 3 }
 0x724   : > { %v15568_v8 = vrot.slane %v15566_v62, 3  ;;  %v25941_v62 = vld [vmem:[#allocation2 + $0x48] sm:$0xff]   ;;  %v15616_v30 = vshrl.u32 %v25936_v42, 16  ;;  %v16035_v47 = vrot.slane %v25917_v36, 3 }
 0x725   : > { %v15577_v34 = vor.u32 %v15576_v25, %v15573_v54  ;;  %v15600_v40 = vrot.slane %v15598_v1, 2  ;;  %v15609_v54 = vrot.slane %v15607_v50, 2  ;;  %v15612_v25 = vrot.slane %v15610_v46, 3 }
 0x726   : > { %v15569_v23 = vor.u32 %v15568_v8, %v15565_v35  ;;  %v25948_v35 = vld [vmem:[#allocation2 + $0x58] sm:$0xff]   ;;  %v15618_v61 = vrot.slane %v15616_v30, 2  ;;  %v15628_v50 = vshll.u32 %v25941_v62, 16  ;;  %v15634_v46 = vshrl.u32 %v25944_v55, 16  ;;  %v25975_v30 = vld [vmem:[#allocation2 + $0x70] sm:$0xff]  }
 0x728   : > { %v25951_v21 = vsel %vm3390_vm3, %v15569_v23, %v15577_v34  ;;  %v15625_v23 = vshrl.u32 %v25941_v62, 16 }
 0x729   : > { %26840 = vst [vmem:[#allocation69_spill] sm:$0xff] %v25951_v21 }
 0x72a   : > { %20224 = vmatmul.mubr.bf16.gmra.mrb[56].mxu0 %v25615_v38  ;;  %v15582_v38 = vrot.slane %v15580_v5, 2  ;;  %v15595_v5 = vor.u32 %v15594_v32, %v15591_v0  ;;  %v25965_v32 = vld [vmem:[#allocation2 + $0x68] sm:$0xff]   ;;  %v15613_v0 = vor.u32 %v15612_v25, %v15609_v54  ;;  %v15630_v25 = vrot.slane %v15628_v50, 3 }
 0x72b   : > { %20227 = vmatprep.mubr.bf16.mxu0 %v25630_v58  ;;  %v15601_v58 = vshll.u32 %v25921_v31, 16 }
 0x72c   : > { %v15586_v18 = vor.u32 %v15585_v10, %v15582_v38  ;;  %v15619_v10 = vshll.u32 %v25936_v42, 16  ;;  %v25958_v38 = vld [vmem:[#allocation2 + $0x60] sm:$0xff]  }
 0x72d   : > { %v15603_v8 = vrot.slane %v15601_v58, 3  ;;  %v15655_v56 = vshll.u32 %v25958_v38, 16 }
 0x72e   : > { %v25955_v27 = vsel %vm3390_vm3, %v15577_v34, %v15586_v18  ;;  %v25961_v1 = vsel %vm3390_vm3, %v15586_v18, %v15595_v5  ;;  %v15621_v34 = vrot.slane %v15619_v10, 3  ;;  %v15627_v18 = vrot.slane %v15625_v23, 2 }
 0x72f   : > { %26841 = vst [vmem:[#allocation70_spill] sm:$0xff] %v25955_v27  ;;  %26842 = vst [vmem:[#allocation71_spill] sm:$0xff] %v25961_v1  ;;  %v15604_v2 = vor.u32 %v15603_v8, %v15600_v40  ;;  %v15637_v40 = vshll.u32 %v25944_v55, 16  ;;  %v15643_v8 = vshrl.u32 %v25948_v35, 16  ;;  %v15636_v10 = vrot.slane %v15634_v46, 2 }
 0x730   : > { %v15622_v54 = vor.u32 %v15621_v34, %v15618_v61  ;;  %v15631_v21 = vor.u32 %v15630_v25, %v15627_v18  ;;  %v15664_v46 = vshll.u32 %v25965_v32, 16 }
 0x731   : > { %v25971_v58 = vsel %vm3390_vm3, %v15595_v5, %v15604_v2  ;;  %v15639_v1 = vrot.slane %v15637_v40, 3  ;;  %v15645_v27 = vrot.slane %v15643_v8, 2  ;;  %v15652_v5 = vshrl.u32 %v25958_v38, 16 }
 0x732   : > { %20228 = vmatmul.mubr.bf16.gmra.mrb[60].mxu0 %v25634_v57  ;;  %26843 = vst [vmem:[#allocation72_spill] sm:$0xff] %v25971_v58  ;;  %v25978_v57 = vsel %vm3390_vm3, %v15604_v2, %v15613_v0  ;;  %v25982_v58 = vld [vmem:[#allocation2 + $0x78] sm:$0xff]   ;;  %v25985_v23 = vsel %vm3390_vm3, %v15613_v0, %v15622_v54  ;;  %v15661_v2 = vshrl.u32 %v25965_v32, 16  ;;  %v25993_v40 = vsel %vm3390_vm3, %v15622_v54, %v15631_v21 }
 0x733   : > { %20231 = vmatprep.mubr.bf16.mxu0 %v25651_v37  ;;  %26844 = vst [vmem:[#allocation73_spill] sm:$0xff] %v25978_v57  ;;  %v15646_v37 = vshll.u32 %v25948_v35, 16  ;;  %26845 = vst [vmem:[#allocation74_spill] sm:$0xff] %v25985_v23  ;;  %v25989_v57 = vld [vmem:[#allocation2 + $0x80] sm:$0xff]   ;;  %v15640_v61 = vor.u32 %v15639_v1, %v15636_v10  ;;  %v15654_v50 = vrot.slane %v15652_v5, 2  ;;  %v15657_v8 = vrot.slane %v15655_v56, 3 }
 0x734   : > { %26846 = vst [vmem:[#allocation75_spill] sm:$0xff] %v25993_v40  ;;  %v15663_v12 = vrot.slane %v15661_v2, 2  ;;  %v15670_v0 = vshrl.u32 %v25975_v30, 16  ;;  %v25996_v23 = vld [vmem:[#allocation2 + $0x88] sm:$0xff]   ;;  %v15666_v39 = vrot.slane %v15664_v46, 3  ;;  %v15673_v1 = vshll.u32 %v25975_v30, 16 }
 0x735   : > { %v15648_v34 = vrot.slane %v15646_v37, 3  ;;  %v25999_v18 = vsel %vm3390_vm3, %v15631_v21, %v15640_v61  ;;  %v26003_v10 = vld [vmem:[#allocation2 + $0x90] sm:$0xff]   ;;  %v15658_v37 = vor.u32 %v15657_v8, %v15654_v50  ;;  %v15679_v56 = vshrl.u32 %v25982_v58, 16  ;;  %v26008_v2 = vld [vmem:[#allocation2 + $0x98] sm:$0xff]  }
 0x736   : > { %26847 = vst [vmem:[#allocation76_spill] sm:$0xff] %v25999_v18  ;;  %v15672_v54 = vrot.slane %v15670_v0, 2  ;;  %v15682_v5 = vshll.u32 %v25982_v58, 16  ;;  %v15688_v46 = vshrl.u32 %v25989_v57, 16  ;;  %v15691_v0 = vshll.u32 %v25989_v57, 16 }
 0x737   : > { %v15649_v25 = vor.u32 %v15648_v34, %v15645_v27  ;;  %v15667_v27 = vor.u32 %v15666_v39, %v15663_v12  ;;  %v15675_v34 = vrot.slane %v15673_v1, 3  ;;  %v15681_v50 = vrot.slane %v15679_v56, 2 }
 0x738   : > { %v15684_v8 = vrot.slane %v15682_v5, 3  ;;  %v15690_v51 = vrot.slane %v15688_v46, 2  ;;  %v15697_v3 = vshrl.u32 %v25996_v23, 16  ;;  %v15700_v39 = vshll.u32 %v25996_v23, 16 }
 0x739   : > { %v26011_v21 = vsel %vm3390_vm3, %v15640_v61, %v15649_v25  ;;  %v26019_v18 = vsel %vm3390_vm3, %v15658_v37, %v15667_v27  ;;  %v15676_v40 = vor.u32 %v15675_v34, %v15672_v54  ;;  %v15706_v12 = vshrl.u32 %v26003_v10, 16 }
 0x73a   : > { %20232 = vmatmul.mubr.bf16.gmra.mrb[64].mxu0 %v25655_v9  ;;  %26848 = vst [vmem:[#allocation77_spill] sm:$0xff] %v26011_v21  ;;  %v26015_v9 = vsel %vm3390_vm3, %v15649_v25, %v15658_v37  ;;  %26850 = vst [vmem:[#allocation79_spill] sm:$0xff] %v26019_v18  ;;  %v15685_v61 = vor.u32 %v15684_v8, %v15681_v50  ;;  %v15693_v21 = vrot.slane %v15691_v0, 3  ;;  %v15699_v1 = vrot.slane %v15697_v3, 2  ;;  %v16011_v37 = vld [vmem:[#allocation2 + $0x10] sm:$0x8] }
 0x73b   : > { %20235 = vmatprep.mubr.bf16.mxu0 %v25665_v7  ;;  %26849 = vst [vmem:[#allocation78_spill] sm:$0xff] %v26015_v9  ;;  %v26025_v25 = vsel %vm3390_vm3, %v15667_v27, %v15676_v40  ;;  %v15709_v56 = vshll.u32 %v26003_v10, 16  ;;  %v15715_v5 = vshrl.u32 %v26008_v2, 16  ;;  %v15702_v46 = vrot.slane %v15700_v39, 3  ;;  %v22107_v8 = vld [vmem:[#allocation2 + $0x10] sm:$0xff]  }
 0x73c   : > { %26851 = vst [vmem:[#allocation80_spill] sm:$0xff] %v26025_v25  ;;  %v26030_v54 = vsel %vm3390_vm3, %v15676_v40, %v15685_v61  ;;  %v15694_v34 = vor.u32 %v15693_v21, %v15690_v51  ;;  %v15708_v50 = vrot.slane %v15706_v12, 2  ;;  %v13495_v0 = vrot.slane %v22107_v8, 1 }
 0x73d   : > { %26852 = vst [vmem:[#allocation81_spill] sm:$0xff] %v26030_v54  ;;  %v15711_v18 = vrot.slane %v15709_v56, 3  ;;  %v15717_v9 = vrot.slane %v15715_v5, 2  ;;  %v15718_v22 = vshll.u32 %v26008_v2, 16  ;;  %v26853_v3 = vrot.slane %v25733_v41, 1  ;;  %v22108_v56 = vld [vmem:[#allocation2 + $0x18] sm:$0xff]  }
 0x73e   : > { %v26039_v25 = vsel %vm3390_vm3, %v15685_v61, %v15694_v34  ;;  %v15703_v40 = vor.u32 %v15702_v46, %v15699_v1  ;;  %v18444_v51 = vcombine.low %v16011_v37, %v25908_v6  ;;  %v16033_v12 = vrot.slane %v25915_v45, 3 }
 0x73f   : > { %v13494_v27 = vsel %vm1317_vm4, %v25925_v15, %v26853_v3  ;;  %v15712_v21 = vor.u32 %v15711_v18, %v15708_v50  ;;  %v15720_v39 = vrot.slane %v15718_v22, 3  ;;  %v13497_v5 = vrot.slane %v22108_v56, 1 }
 0x740   : > { %v26044_v8 = vsel %vm3390_vm3, %v15694_v34, %v15703_v40  ;;  %v16032_v54 = vrot.slane %v18444_v51, 3  ;;  %v16037_v6 = vrot.slane %v25919_v48, 3  ;;  %v16039_v18 = vrot.slane %v25921_v31, 3 }
 0x741   : > { %v26048_v15 = vsel %vm3390_vm3, %v15703_v40, %v15712_v21  ;;  %v26050_v61 = vor.u32 %v15720_v39, %v15717_v9  ;;  %v26854_v22 = vmov %v26853_v3  ;;  %v26061_v34 = vsel %vm3861_vm5, %v16033_v12, %v16035_v47 }
 0x742   : > { %20236 = vmatmul.mubr.bf16.gmra.mrb[68].mxu0 %v25678_v4  ;;  %v13496_v1 = vsel %vm1317_vm4, %v26854_v22, %v13495_v0  ;;  %v26058_v37 = vsel %vm3861_vm5, %v16032_v54, %v16033_v12  ;;  %v16041_v46 = vrot.slane %v25931_v60, 3  ;;  %v26069_v50 = vsel %vm3861_vm5, %v16035_v47, %v16037_v6 }
 0x743   : > { %20255 = vmatprep.mubr.bf16.mxu0 %v13494_v27  ;;  %v26066_v9 = vsel %vm3390_vm3, %v15712_v21, %v26050_v61  ;;  %v26072_v3 = vsel %vm3861_vm5, %v16037_v6, %v16039_v18  ;;  %v16043_v41 = vrot.slane %v25936_v42, 3  ;;  %v13498_v54 = vsel %vm1317_vm4, %v13495_v0, %v13497_v5  ;;  %v21943_v27 = vld [vmem:[#allocation8 + $0xc8] sm:$0xff]   ;;  %v26081_v21 = vld [vmem:[#allocation2 + $0xa0] ss:$0 sps:$4 sm:$0x77]  }
 0x744   : > { %26855 = vst [vmem:[#allocation82_spill] sm:$0xff] %v26072_v3  ;;  %v26077_v40 = vsel %vm3861_vm5, %v16039_v18, %v16041_v46  ;;  %v16045_v51 = vrot.slane %v25941_v62, 3  ;;  %v16047_v39 = vrot.slane %v25944_v55, 3  ;;  %v16049_v12 = vrot.slane %v25948_v35, 3 }
 0x745   : > { %26856 = vst [vmem:[#allocation83_spill] sm:$0xff] %v26077_v40  ;;  %v26084_v47 = vsel %vm3861_vm5, %v16041_v46, %v16043_v41  ;;  %v16051_v56 = vrot.slane %v25958_v38, 3  ;;  %v16053_v6 = vrot.slane %v25965_v32, 3  ;;  %v16055_v22 = vrot.slane %v25975_v30, 3 }
 0x746   : > { %26857 = vst [vmem:[#allocation84_spill] sm:$0xff] %v26084_v47  ;;  %v26090_v0 = vsel %vm3861_vm5, %v16043_v41, %v16045_v51  ;;  %v26093_v18 = vsel %vm3861_vm5, %v16045_v51, %v16047_v39  ;;  %v16057_v40 = vrot.slane %v25982_v58, 3  ;;  %v26099_v46 = vsel %vm3861_vm5, %v16047_v39, %v16049_v12  ;;  %v21944_v51 = vld [vmem:[#allocation8 + $0xd0] sm:$0xff]  }
 0x747   : > { %26858 = vst [vmem:[#allocation85_spill] sm:$0xff] %v26090_v0  ;;  %26859 = vst [vmem:[#allocation86_spill] sm:$0xff] %v26093_v18  ;;  %v26102_v47 = vsel %vm3861_vm5, %v16049_v12, %v16051_v56  ;;  %v16059_v41 = vrot.slane %v25989_v57, 3  ;;  %v26109_v18 = vsel %vm3861_vm5, %v16053_v6, %v16055_v22  ;;  %v16063_v39 = vrot.slane %v26003_v10, 3  ;;  %v22110_v0 = vld [vmem:[#allocation2 + $0x28] sm:$0xff]  }
 0x748   : > { %26860 = vst [vmem:[#allocation87_spill] sm:$0xff] %v26099_v46  ;;  %26861 = vst [vmem:[#allocation88_spill] sm:$0xff] %v26102_v47  ;;  %v22109_v46 = vld [vmem:[#allocation2 + $0x20] sm:$0xff]   ;;  %v13501_v3 = vrot.slane %v22110_v0, 1 }
 0x749   : > { %v13499_v12 = vrot.slane %v22109_v46, 1  ;;  %v26117_v47 = vsel %vm3861_vm5, %v16057_v40, %v16059_v41 }
 0x74a   : > { %20256 = vmatmul.mubr.bf16.vlgmr.msra.gmra.mrb[36].mxu0 %v13496_v1  ;;  %v26105_v1 = vsel %vm3861_vm5, %v16051_v56, %v16053_v6  ;;  %26864 = vst [vmem:[#allocation91_spill] sm:$0xff] %v26117_v47  ;;  %v16065_v56 = vrot.slane %v26008_v2, 3 }
 0x74b   : > { %20259 = vmatprep.mubr.bf16.mxu0 %v13498_v54  ;;  %20292 = vmatpush3.bf16.msra.mxu0 %v25871_v53  ;;  %26862 = vst [vmem:[#allocation89_spill] sm:$0xff] %v26105_v1  ;;  %v26112_v54 = vsel %vm3861_vm5, %v16055_v22, %v16057_v40  ;;  %v16061_v53 = vrot.slane %v25996_v23, 3  ;;  %v16067_v1 = vrot.slane %v26081_v21, 3  ;;  %v21945_v40 = vld [vmem:[#allocation8 + $0xd8] sm:$0xff]   ;;  %v13500_v47 = vsel %vm1317_vm4, %v13497_v5, %v13499_v12  ;;  %v21948_v5 = vld [vmem:[#allocation8 + $0xf0] sm:$0xff]  }
 0x74c   : > { %20293 = vmatprep.subr.bf16.mxu0 %v21943_v27  ;;  %26863 = vst [vmem:[#allocation90_spill] sm:$0xff] %v26112_v54  ;;  %v26128_v54 = vsel %vm3861_vm5, %v16063_v39, %v16065_v56  ;;  %v13502_v0 = vsel %vm1317_vm4, %v13499_v12, %v13501_v3  ;;  %v22114_v12 = vld [vmem:[#allocation2 + $0x48] sm:$0xff]  }
 0x74d   : > { %v26122_v6 = vsel %vm3861_vm5, %v16059_v41, %v16061_v53  ;;  %v26125_v22 = vsel %vm3861_vm5, %v16061_v53, %v16063_v39  ;;  %v26131_v46 = vsel %vm3861_vm5, %v16065_v56, %v16067_v1  ;;  %v21946_v41 = vld [vmem:[#allocation8 + $0xe0] sm:$0xff]   ;;  %v22111_v53 = vld [vmem:[#allocation2 + $0x30] sm:$0xff]  }
 0x74e   : > { %26865 = vst [vmem:[#allocation92_spill] sm:$0xff] %v26122_v6  ;;  %26866 = vst [vmem:[#allocation93_spill] sm:$0xff] %v26125_v22  ;;  %v13503_v22 = vrot.slane %v22111_v53, 1  ;;  %v21947_v39 = vld [vmem:[#allocation8 + $0xe8] sm:$0xff]   ;;  %v21949_v53 = vld [vmem:[#allocation8 + $0xf8] sm:$0xff]  }
 0x74f   : > { %20294 = vmatpush3.bf16.msra.mxu0 %v21943_v27  ;;  %26867 = vst [vmem:[#allocation94_spill] sm:$0xff] %v26131_v46  ;;  %v22112_v27 = vld [vmem:[#allocation2 + $0x38] sm:$0xff]  }
 0x750   : > { %20295 = vmatprep.subr.bf16.mxu0 %v21944_v51  ;;  %v13505_v6 = vrot.slane %v22112_v27, 1  ;;  %v13504_v1 = vsel %vm1317_vm4, %v13501_v3, %v13503_v22  ;;  %v21953_v3 = vld [vmem:[#allocation8 + $0x100] sm:$0xff]  }
 0x752   : > { %20260 = vmatmul.mubr.bf16.gmra.mrb[40].mxu0 %v13500_v47  ;;  %v13506_v56 = vsel %vm1317_vm4, %v13503_v22, %v13505_v6  ;;  %v22113_v47 = vld [vmem:[#allocation2 + $0x40] sm:$0xff]   ;;  %v22115_v22 = vld [vmem:[#allocation2 + $0x50] sm:$0xff]  }
 0x753   : > { %20263 = vmatprep.mubr.bf16.mxu0 %v13502_v0  ;;  %20296 = vmatpush3.bf16.msra.mxu0 %v21944_v51  ;;  %v13507_v51 = vrot.slane %v22113_v47, 1  ;;  %v13509_v0 = vrot.slane %v22114_v12, 1 }
 0x754   : > { %20297 = vmatprep.subr.bf16.mxu0 %v21945_v40 }
 0x755   : > { %v13510_v27 = vsel %vm1317_vm4, %v13507_v51, %v13509_v0 }
 0x757   : > { %20298 = vmatpush3.bf16.msra.mxu0 %v21945_v40  ;;  %v13508_v40 = vsel %vm1317_vm4, %v13505_v6, %v13507_v51  ;;  %v22117_v6 = vld [vmem:[#allocation2 + $0x60] sm:$0xff]  }
 0x758   : > { %20299 = vmatprep.subr.bf16.mxu0 %v21946_v41  ;;  %v13515_v12 = vrot.slane %v22117_v6, 1 }
 0x75a   : > { %20264 = vmatmul.mubr.bf16.gmra.mrb[44].mxu0 %v13504_v1  ;;  %v22116_v1 = vld [vmem:[#allocation2 + $0x58] sm:$0xff]  }
 0x75b   : > { %20267 = vmatprep.mubr.bf16.mxu0 %v13506_v56  ;;  %20300 = vmatpush3.bf16.msra.mxu0 %v21946_v41  ;;  %v13511_v41 = vrot.slane %v22115_v22, 1  ;;  %v13513_v56 = vrot.slane %v22116_v1, 1  ;;  %v22119_v22 = vld [vmem:[#allocation2 + $0x70] sm:$0xff]  }
 0x75c   : > { %20301 = vmatprep.subr.bf16.mxu0 %v21947_v39  ;;  %v13519_v1 = vrot.slane %v22119_v22, 1 }
 0x75d   : > { %v13512_v47 = vsel %vm1317_vm4, %v13509_v0, %v13511_v41 }
 0x75f   : > { %20302 = vmatpush3.bf16.msra.mxu0 %v21947_v39  ;;  %v13514_v39 = vsel %vm1317_vm4, %v13511_v41, %v13513_v56 }
 0x760   : > { %20303 = vmatprep.subr.bf16.mxu0 %v21948_v5 }
 0x762   : > { %20268 = vmatmul.mubr.bf16.gmra.mrb[48].mxu0 %v13508_v40  ;;  %v22118_v40 = vld [vmem:[#allocation2 + $0x68] sm:$0xff]  }
 0x763   : > { %20271 = vmatprep.mubr.bf16.mxu0 %v13510_v27  ;;  %20304 = vmatpush3.bf16.msra.mxu0 %v21948_v5  ;;  %v13517_v51 = vrot.slane %v22118_v40, 1  ;;  %v13516_v5 = vsel %vm1317_vm4, %v13513_v56, %v13515_v12  ;;  %v13955_v40 = vrot.slane %v25691_v20, 1  ;;  %v21960_v20 = vld [vmem:[#allocation8 + $0x110] sm:$0xff]  }
 0x764   : > { %20305 = vmatprep.subr.bf16.mxu0 %v21949_v53 }
 0x765   : > { %v13518_v27 = vsel %vm1317_vm4, %v13515_v12, %v13517_v51  ;;  %v13520_v0 = vsel %vm1317_vm4, %v13517_v51, %v13519_v1  ;;  %v13527_v12 = vrot.slane %v25683_v16, 1  ;;  %v13956_v51 = vrot.slane %v25693_v29, 1 }
 0x766   : > { %v13962_v29 = vrot.slane %v25699_v49, 1  ;;  %v21969_v49 = vld [vmem:[#allocation8 + $0x128] sm:$0xff]  }
 0x767   : > { %20306 = vmatpush3.bf16.msra.mxu0 %v21949_v53  ;;  %v22120_v53 = vld [vmem:[#allocation2 + $0x78] sm:$0xff]  }
 0x768   : > { %20343 = vmatprep.subr.bf16.mxu0 %v21953_v3  ;;  %v13521_v46 = vrot.slane %v22120_v53, 1  ;;  %v21963_v53 = vld [vmem:[#allocation8 + $0x118] sm:$0xff]  }
 0x76a   : > { %20272 = vmatmul.mubr.bf16.gmra.mrb[52].mxu0 %v13512_v47  ;;  %v13522_v41 = vsel %vm1317_vm4, %v13519_v1, %v13521_v46  ;;  %v13523_v47 = vrot.slane %v25665_v7, 1  ;;  %v13958_v7 = vrot.slane %v25695_v52, 1  ;;  %v13964_v1 = vrot.slane %v25707_v11, 1 }
 0x76b   : > { %20275 = vmatprep.mubr.bf16.mxu0 %v13514_v39  ;;  %v13525_v39 = vrot.slane %v25678_v4, 1  ;;  %v13960_v4 = vrot.slane %v25697_v33, 1 }
 0x76c   : > { %v13524_v56 = vsel %vm1317_vm4, %v13521_v46, %v13523_v47  ;;  %v21957_v46 = vld [vmem:[#allocation8 + $0x108] sm:$0xff]   ;;  %v13959_v22 = vsel %vm1317_vm4, %v13956_v51, %v13958_v7  ;;  %v13965_v33 = vsel %vm1317_vm4, %v13962_v29, %v13964_v1 }
 0x76d   : > { %v13526_v6 = vsel %vm1317_vm4, %v13523_v47, %v13525_v39  ;;  %v13961_v16 = vsel %vm1317_vm4, %v13958_v7, %v13960_v4  ;;  %v13963_v52 = vsel %vm1317_vm4, %v13960_v4, %v13962_v29  ;;  %v13980_v7 = vrot.slane %v25763_v24, 1 }
 0x772   : > { %20276 = vmatmul.mubr.bf16.gmra.mrb[56].mxu0 %v13516_v5  ;;  %v13528_v5 = vsel %vm1317_vm4, %v13525_v39, %v13527_v12  ;;  %v21972_v39 = vld [vmem:[#allocation8 + $0x130] sm:$0xff]  }
 0x773   : > { %20279 = vmatprep.mubr.bf16.mxu0 %v13518_v27  ;;  %v13957_v27 = vsel %vm1317_vm4, %v13955_v40, %v13956_v51  ;;  %v21977_v40 = vld [vmem:[#allocation8 + $0x140] sm:$0xff]   ;;  %v13974_v51 = vrot.slane %v25736_v63, 1  ;;  %v13982_v63 = vrot.slane %v25765_v26, 1 }
 0x77a   : > { %20280 = vmatmul.mubr.bf16.gmra.mrb[60].mxu0 %v13520_v0  ;;  %v21966_v0 = vld [vmem:[#allocation8 + $0x120] sm:$0xff]  }
 0x77b   : > { %20283 = vmatprep.mubr.bf16.mxu0 %v13522_v41  ;;  %v13968_v41 = vrot.slane %v25716_v17, 1 }
 0x782   : > { %20284 = vmatmul.mubr.bf16.gmra.mrb[64].mxu0 %v13524_v56  ;;  %v13970_v56 = vrot.slane %v25719_v19, 1 }
 0x783   : > { %20287 = vmatprep.mubr.bf16.mxu0 %v13526_v6  ;;  %v13972_v6 = vrot.slane %v25724_v14, 1 }
 0x784   : > { %v13971_v17 = vsel %vm1317_vm4, %v13968_v41, %v13970_v56 }
 0x785   : > { %v13973_v12 = vsel %vm1317_vm4, %v13970_v56, %v13972_v6  ;;  %v13975_v19 = vsel %vm1317_vm4, %v13972_v6, %v13974_v51  ;;  %v26874_v56 = vld [vmem:[#allocation35_spill] sm:$0xff]  ;;  %v26875_v6 = vld [vmem:[#allocation36_spill] sm:$0xff] }
 0x78a   : > { %20288 = vmatmul.mubr.bf16.gmra.mrb[68].mxu0 %v13528_v5  ;;  %v13976_v5 = vrot.slane %v25744_v28, 1  ;;  %v13984_v28 = vrot.slane %v25778_v44, 1 }
 0x78b   : > { %20307 = vmatprep.mubr.bf16.mxu0 %v13957_v27  ;;  %v13978_v27 = vrot.slane %v25749_v13, 1  ;;  %v13986_v13 = vrot.slane %v25782_v43, 1  ;;  %v21979_v43 = vld [vmem:[#allocation8 + $0x150] sm:$0xff]  }
 0x78c   : > { %v13977_v14 = vsel %vm1317_vm4, %v13974_v51, %v13976_v5  ;;  %v21987_v51 = vld [vmem:[#allocation8 + $0x180] sm:$0xff]  }
 0x78d   : > { %v13979_v4 = vsel %vm1317_vm4, %v13976_v5, %v13978_v27  ;;  %v13987_v29 = vsel %vm1317_vm4, %v13984_v28, %v13986_v13  ;;  %v26878_v5 = vld [vmem:[#allocation40_spill] sm:$0xff] }
 0x792   : > { %20308 = vmatmul.mubr.bf16.vlgmr.msra.gmra.mrb[36].mxu0 %v13959_v22  ;;  %v13983_v22 = vsel %vm1317_vm4, %v13980_v7, %v13982_v63 }
 0x793   : > { %20311 = vmatprep.mubr.bf16.mxu0 %v13961_v16  ;;  %20344 = vmatpush3.bf16.msra.mxu0 %v21953_v3  ;;  %v13966_v3 = vrot.slane %v25709_v59, 1  ;;  %v21975_v59 = vld [vmem:[#allocation8 + $0x138] sm:$0xff]   ;;  %v13985_v16 = vsel %vm1317_vm4, %v13982_v63, %v13984_v28 }
 0x794   : > { %20345 = vmatprep.subr.bf16.mxu0 %v21957_v46 }
 0x795   : > { %v13967_v11 = vsel %vm1317_vm4, %v13964_v1, %v13966_v3  ;;  %v13969_v47 = vsel %vm1317_vm4, %v13966_v3, %v13968_v41  ;;  %v26871_v3 = vld [vmem:[#allocation32_spill] sm:$0xff]  ;;  %v21980_v41 = vld [vmem:[#allocation8 + $0x158] sm:$0xff]  }
 0x797   : > { %20346 = vmatpush3.bf16.msra.mxu0 %v21957_v46  ;;  %v13981_v46 = vsel %vm1317_vm4, %v13978_v27, %v13980_v7  ;;  %v26881_v27 = vld [vmem:[#allocation43_spill] sm:$0xff]  ;;  %v26882_v7 = vld [vmem:[#allocation44_spill] sm:$0xff] }
 0x798   : > { %20347 = vmatprep.subr.bf16.mxu0 %v21960_v20 }
 0x79a   : > { %20312 = vmatmul.mubr.bf16.gmra.mrb[40].mxu0 %v13963_v52  ;;  %v26869_v52 = vld [vmem:[#allocation30_spill] sm:$0xff] }
 0x79b   : > { %20315 = vmatprep.mubr.bf16.mxu0 %v13965_v33  ;;  %20348 = vmatpush3.bf16.msra.mxu0 %v21960_v20  ;;  %v26868_v20 = vld [vmem:[#allocation38_spill] sm:$0xff]  ;;  %v21978_v33 = vld [vmem:[#allocation8 + $0x148] sm:$0xff]  }
 0x79c   : > { %20349 = vmatprep.subr.bf16.mxu0 %v21963_v53  ;;  %v13988_v24 = vrot.slane %v26868_v20, 1 }
 0x79e   : > { %v13989_v1 = vsel %vm1317_vm4, %v13986_v13, %v13988_v24 }
 0x79f   : > { %20350 = vmatpush3.bf16.msra.mxu0 %v21963_v53  ;;  %v21976_v53 = vld [vmem:[#allocation2 + $0x98] ss:$0 sps:$4 sm:$0x11]  }
 0x7a0   : > { %20351 = vmatprep.subr.bf16.mxu0 %v21966_v0  ;;  %v13990_v26 = vrot.slane %v21976_v53, 1  ;;  %v26888_v53 = vld [vmem:[#allocation49_spill] sm:$0xff] }
 0x7a2   : > { %20316 = vmatmul.mubr.bf16.gmra.mrb[44].mxu0 %v13967_v11  ;;  %v13991_v44 = vsel %vm1317_vm4, %v13988_v24, %v13990_v26  ;;  %v26873_v11 = vld [vmem:[#allocation34_spill] sm:$0xff]  ;;  %v21988_v26 = vld [vmem:[#allocation8 + $0x188] sm:$0xff]  }
 0x7a3   : > { %20319 = vmatprep.mubr.bf16.mxu0 %v13969_v47  ;;  %20352 = vmatpush3.bf16.msra.mxu0 %v21966_v0  ;;  %v26870_v0 = vld [vmem:[#allocation31_spill] sm:$0xff] }
 0x7a4   : > { %20353 = vmatprep.subr.bf16.mxu0 %v21969_v49  ;;  %v21981_v47 = vld [vmem:[#allocation8 + $0x160] sm:$0xff]  }
 0x7a7   : > { %20354 = vmatpush3.bf16.msra.mxu0 %v21969_v49  ;;  %v26872_v49 = vld [vmem:[#allocation33_spill] sm:$0xff] }
 0x7a8   : > { %20355 = vmatprep.subr.bf16.mxu0 %v21972_v39 }
 0x7aa   : > { %20320 = vmatmul.mubr.bf16.gmra.mrb[48].mxu0 %v13971_v17  ;;  %v21984_v17 = vld [vmem:[#allocation8 + $0x178] sm:$0xff]  }
 0x7ab   : > { %20323 = vmatprep.mubr.bf16.mxu0 %v13973_v12  ;;  %20356 = vmatpush3.bf16.msra.mxu0 %v21972_v39  ;;  %v21982_v39 = vld [vmem:[#allocation8 + $0x168] sm:$0xff]  }
 0x7ac   : > { %20357 = vmatprep.subr.bf16.mxu0 %v21975_v59  ;;  %v26876_v12 = vld [vmem:[#allocation37_spill] sm:$0xff] }
 0x7af   : > { %20358 = vmatpush3.bf16.msra.mxu0 %v21975_v59  ;;  %v21983_v59 = vld [vmem:[#allocation8 + $0x170] sm:$0xff]  }
 0x7b0   : > { %20395 = vmatprep.subr.bf16.mxu0 %v21977_v40 }
 0x7b2   : > { %20324 = vmatmul.mubr.bf16.gmra.mrb[52].mxu0 %v13975_v19  ;;  %v26879_v19 = vld [vmem:[#allocation41_spill] sm:$0xff] }
 0x7b3   : > { %20327 = vmatprep.mubr.bf16.mxu0 %v13977_v14  ;;  %v26880_v14 = vld [vmem:[#allocation42_spill] sm:$0xff] }
 0x7ba   : > { %20328 = vmatmul.mubr.bf16.gmra.mrb[56].mxu0 %v13979_v4  ;;  %v26883_v4 = vld [vmem:[#allocation45_spill] sm:$0xff] }
 0x7bb   : > { %20331 = vmatprep.mubr.bf16.mxu0 %v13981_v46  ;;  %v26884_v46 = vld [vmem:[#allocation55_spill] sm:$0xff] }
 0x7bc   : > { %v14454_v63 = vshrl.u32 %v26884_v46, 16  ;;  %v14457_v28 = vshll.u32 %v26884_v46, 16  ;;  %v26905_v46 = vld [vmem:[#allocation68_spill] sm:$0xff] }
 0x7be   : > { %v14456_v13 = vrot.slane %v14454_v63, 1  ;;  %v14459_v20 = vrot.slane %v14457_v28, 2  ;;  %v15225_v63 = vrot.slane %v26905_v46, 2  ;;  %v26906_v28 = vld [vmem:[#allocation67_spill] sm:$0xff]  ;;  %v26910_v46 = vld [vmem:[#allocation72_spill] sm:$0xff] }
 0x7c0   : > { %v14460_v24 = vor.u32 %v14459_v20, %v14456_v13  ;;  %v15230_v13 = vrot.slane %v25919_v48, 2  ;;  %v22002_v20 = vld [vmem:[#allocation8 + $0x1c8] sm:$0xff]  }
 0x7c2   : > { %20332 = vmatmul.mubr.bf16.gmra.mrb[60].mxu0 %v13983_v22  ;;  %v26885_v22 = vld [vmem:[#allocation46_spill] sm:$0xff] }
 0x7c3   : > { %20335 = vmatprep.mubr.bf16.mxu0 %v13985_v16  ;;  %v26886_v16 = vld [vmem:[#allocation50_spill] sm:$0xff] }
 0x7ca   : > { %20336 = vmatmul.mubr.bf16.gmra.mrb[64].mxu0 %v13987_v29  ;;  %v26887_v29 = vld [vmem:[#allocation47_spill] sm:$0xff] }
 0x7cb   : > { %20339 = vmatprep.mubr.bf16.mxu0 %v13989_v1  ;;  %v14461_v1 = vsel %vm2118_vm1, %v26887_v29, %v14460_v24 }
 0x7d2   : > { %20340 = vmatmul.mubr.bf16.gmra.mrb[68].mxu0 %v13991_v44  ;;  %v26889_v44 = vld [vmem:[#allocation48_spill] sm:$0xff] }
 0x7d3   : > { %20359 = vmatprep.mubr.bf16.mxu0 %v26869_v52  ;;  %v26890_v52 = vld [vmem:[#allocation51_spill] sm:$0xff] }
 0x7da   : > { %20360 = vmatmul.mubr.bf16.vlgmr.msra.gmra.mrb[36].mxu0 %v26870_v0  ;;  %v21990_v0 = vld [vmem:[#allocation8 + $0x198] sm:$0xff]  }
 0x7db   : > { %20363 = vmatprep.mubr.bf16.mxu0 %v26871_v3  ;;  %20396 = vmatpush3.bf16.msra.mxu0 %v21977_v40  ;;  %v26877_v40 = vld [vmem:[#allocation39_spill] sm:$0xff]  ;;  %v26891_v3 = vld [vmem:[#allocation52_spill] sm:$0xff] }
 0x7dc   : > { %20397 = vmatprep.subr.bf16.mxu0 %v21978_v33 }
 0x7df   : > { %20398 = vmatpush3.bf16.msra.mxu0 %v21978_v33  ;;  %v21989_v33 = vld [vmem:[#allocation8 + $0x190] sm:$0xff]  }
 0x7e0   : > { %20399 = vmatprep.subr.bf16.mxu0 %v21979_v43 }
 0x7e2   : > { %20364 = vmatmul.mubr.bf16.gmra.mrb[40].mxu0 %v26872_v49  ;;  %v21992_v49 = vld [vmem:[#allocation8 + $0x1a8] sm:$0xff]  }
 0x7e3   : > { %20367 = vmatprep.mubr.bf16.mxu0 %v26873_v11  ;;  %20400 = vmatpush3.bf16.msra.mxu0 %v21979_v43  ;;  %v26892_v43 = vld [vmem:[#allocation53_spill] sm:$0xff]  ;;  %v26893_v11 = vld [vmem:[#allocation54_spill] sm:$0xff] }
 0x7e4   : > { %20401 = vmatprep.subr.bf16.mxu0 %v21980_v41 }
 0x7e7   : > { %20402 = vmatpush3.bf16.msra.mxu0 %v21980_v41  ;;  %v21991_v41 = vld [vmem:[#allocation8 + $0x1a0] sm:$0xff]  }
 0x7e8   : > { %20403 = vmatprep.subr.bf16.mxu0 %v21981_v47 }
 0x7ea   : > { %20368 = vmatmul.mubr.bf16.gmra.mrb[44].mxu0 %v26874_v56  ;;  %v21994_v56 = vld [vmem:[#allocation8 + $0x1b8] sm:$0xff]  }
 0x7eb   : > { %20371 = vmatprep.mubr.bf16.mxu0 %v26875_v6  ;;  %20404 = vmatpush3.bf16.msra.mxu0 %v21981_v47  ;;  %v26894_v47 = vld [vmem:[#allocation56_spill] sm:$0xff]  ;;  %v26895_v6 = vld [vmem:[#allocation57_spill] sm:$0xff] }
 0x7ec   : > { %20405 = vmatprep.subr.bf16.mxu0 %v21982_v39 }
 0x7ef   : > { %20406 = vmatpush3.bf16.msra.mxu0 %v21982_v39  ;;  %v21993_v39 = vld [vmem:[#allocation8 + $0x1b0] sm:$0xff]  }
 0x7f0   : > { %20407 = vmatprep.subr.bf16.mxu0 %v21983_v59 }
 0x7f2   : > { %20372 = vmatmul.mubr.bf16.gmra.mrb[48].mxu0 %v26876_v12  ;;  %v26897_v12 = vld [vmem:[#allocation59_spill] sm:$0xff] }
 0x7f3   : > { %20375 = vmatprep.mubr.bf16.mxu0 %v26877_v40  ;;  %20408 = vmatpush3.bf16.msra.mxu0 %v21983_v59  ;;  %v26896_v59 = vld [vmem:[#allocation58_spill] sm:$0xff]  ;;  %v26898_v40 = vld [vmem:[#allocation60_spill] sm:$0xff] }
 0x7f4   : > { %20409 = vmatprep.subr.bf16.mxu0 %v21984_v17 }
 0x7f7   : > { %20410 = vmatpush3.bf16.msra.mxu0 %v21984_v17  ;;  %v21998_v17 = vld [vmem:[#allocation8 + $0x1c0] sm:$0xff]  }
 0x7f8   : > { %20447 = vmatprep.subr.bf16.mxu0 %v21987_v51 }
 0x7fa   : > { %20376 = vmatmul.mubr.bf16.gmra.mrb[52].mxu0 %v26878_v5  ;;  %v26900_v5 = vld [vmem:[#allocation62_spill] sm:$0xff] }
 0x7fb   : > { %20379 = vmatprep.mubr.bf16.mxu0 %v26879_v19  ;;  %v26901_v19 = vld [vmem:[#allocation63_spill] sm:$0xff] }
 0x802   : > { %20380 = vmatmul.mubr.bf16.gmra.mrb[56].mxu0 %v26880_v14  ;;  %v26902_v14 = vld [vmem:[#allocation64_spill] sm:$0xff] }
 0x803   : > { %20383 = vmatprep.mubr.bf16.mxu0 %v26881_v27  ;;  %v26903_v27 = vld [vmem:[#allocation65_spill] sm:$0xff] }
 0x80a   : > { %20384 = vmatmul.mubr.bf16.gmra.mrb[60].mxu0 %v26882_v7  ;;  %v26904_v7 = vld [vmem:[#allocation66_spill] sm:$0xff] }
 0x80b   : > { %20387 = vmatprep.mubr.bf16.mxu0 %v26883_v4  ;;  %v15226_v4 = vrot.slane %v25915_v45, 2  ;;  %v22005_v45 = vld [vmem:[#allocation8 + $0x1d0] sm:$0xff]  }
 0x812   : > { %20388 = vmatmul.mubr.bf16.gmra.mrb[64].mxu0 %v26885_v22  ;;  %v15227_v22 = vsel %vm2589_vm2, %v15225_v63, %v15226_v4  ;;  %v26911_v63 = vld [vmem:[#allocation73_spill] sm:$0xff] }
 0x813   : > { %20391 = vmatprep.mubr.bf16.mxu0 %v26886_v16  ;;  %v15228_v16 = vrot.slane %v25917_v36, 2 }
 0x815   : > { %v15229_v24 = vsel %vm2589_vm2, %v15226_v4, %v15228_v16  ;;  %v15231_v29 = vsel %vm2589_vm2, %v15228_v16, %v15230_v13  ;;  %v26909_v4 = vld [vmem:[#allocation71_spill] sm:$0xff]  ;;  %v26912_v16 = vld [vmem:[#allocation74_spill] sm:$0xff] }
 0x81a   : > { %20392 = vmatmul.mubr.bf16.gmra.mrb[68].mxu0 %v14461_v1  ;;  %v15232_v1 = vrot.slane %v25921_v31, 2  ;;  %v22014_v31 = vld [vmem:[#allocation8 + $0x1e8] sm:$0xff]  }
 0x81b   : > { %20411 = vmatprep.mubr.bf16.mxu0 %v26888_v53  ;;  %v15234_v53 = vrot.slane %v25931_v60, 2 }
 0x81c   : > { %v15233_v36 = vsel %vm2589_vm2, %v15230_v13, %v15232_v1  ;;  %v26913_v13 = vld [vmem:[#allocation75_spill] sm:$0xff] }
 0x81d   : > { %v15235_v48 = vsel %vm2589_vm2, %v15232_v1, %v15234_v53  ;;  %v26916_v1 = vld [vmem:[#allocation78_spill] sm:$0xff] }
 0x822   : > { %20412 = vmatmul.mubr.bf16.vlgmr.msra.gmra.mrb[36].mxu0 %v26889_v44  ;;  %v22011_v44 = vld [vmem:[#allocation8 + $0x1e0] sm:$0xff]  }
 0x823   : > { %20415 = vmatprep.mubr.bf16.mxu0 %v26890_v52  ;;  %20448 = vmatpush3.bf16.msra.mxu0 %v21987_v51  ;;  %v26899_v51 = vld [vmem:[#allocation61_spill] sm:$0xff]  ;;  %v15236_v52 = vrot.slane %v25936_v42, 2  ;;  %v22020_v42 = vld [vmem:[#allocation8 + $0x1f8] sm:$0xff]  }
 0x824   : > { %20449 = vmatprep.subr.bf16.mxu0 %v21988_v26 }
 0x825   : > { %v15237_v60 = vsel %vm2589_vm2, %v15234_v53, %v15236_v52  ;;  %v26917_v53 = vld [vmem:[#allocation79_spill] sm:$0xff] }
 0x827   : > { %20450 = vmatpush3.bf16.msra.mxu0 %v21988_v26  ;;  %v22008_v26 = vld [vmem:[#allocation8 + $0x1d8] sm:$0xff]  }
 0x828   : > { %20451 = vmatprep.subr.bf16.mxu0 %v21989_v33 }
 0x82a   : > { %20416 = vmatmul.mubr.bf16.gmra.mrb[40].mxu0 %v26891_v3  ;;  %v22017_v3 = vld [vmem:[#allocation8 + $0x1f0] sm:$0xff]  }
 0x82b   : > { %20419 = vmatprep.mubr.bf16.mxu0 %v26892_v43  ;;  %20452 = vmatpush3.bf16.msra.mxu0 %v21989_v33  ;;  %v15238_v33 = vrot.slane %v25941_v62, 2  ;;  %v15240_v43 = vrot.slane %v25944_v55, 2 }
 0x82c   : > { %20453 = vmatprep.subr.bf16.mxu0 %v21990_v0 }
 0x82d   : > { %v15241_v62 = vsel %vm2589_vm2, %v15238_v33, %v15240_v43 }
 0x82f   : > { %20454 = vmatpush3.bf16.msra.mxu0 %v21990_v0  ;;  %v15239_v0 = vsel %vm2589_vm2, %v15236_v52, %v15238_v33 }
 0x830   : > { %20455 = vmatprep.subr.bf16.mxu0 %v21991_v41 }
 0x832   : > { %20420 = vmatmul.mubr.bf16.gmra.mrb[44].mxu0 %v26893_v11  ;;  %v22022_v11 = vld [vmem:[#allocation8 + $0x200] sm:$0xff]  }
 0x833   : > { %20423 = vmatprep.mubr.bf16.mxu0 %v26894_v47  ;;  %20456 = vmatpush3.bf16.msra.mxu0 %v21991_v41  ;;  %v15242_v41 = vrot.slane %v25948_v35, 2  ;;  %v15244_v47 = vrot.slane %v25958_v38, 2  ;;  %v15252_v38 = vrot.slane %v25989_v57, 2 }
 0x834   : > { %20457 = vmatprep.subr.bf16.mxu0 %v21992_v49 }
 0x835   : > { %v15245_v55 = vsel %vm2589_vm2, %v15242_v41, %v15244_v47 }
 0x837   : > { %20458 = vmatpush3.bf16.msra.mxu0 %v21992_v49  ;;  %v15243_v49 = vsel %vm2589_vm2, %v15240_v43, %v15242_v41  ;;  %v26931_v43 = vld [vmem:[#allocation93_spill] sm:$0xff]  ;;  %v26932_v41 = vld [vmem:[#allocation94_spill] sm:$0xff] }
 0x838   : > { %20459 = vmatprep.subr.bf16.mxu0 %v21993_v39 }
 0x83a   : > { %20424 = vmatmul.mubr.bf16.gmra.mrb[48].mxu0 %v26895_v6  ;;  %v15250_v6 = vrot.slane %v25982_v58, 2  ;;  %v15258_v58 = vrot.slane %v26008_v2, 2  ;;  %v22025_v2 = vld [vmem:[#allocation8 + $0x218] sm:$0xff]  }
 0x83b   : > { %20427 = vmatprep.mubr.bf16.mxu0 %v26896_v59  ;;  %20460 = vmatpush3.bf16.msra.mxu0 %v21993_v39  ;;  %v15246_v39 = vrot.slane %v25965_v32, 2  ;;  %v15254_v32 = vrot.slane %v25996_v23, 2 }
 0x83c   : > { %20461 = vmatprep.subr.bf16.mxu0 %v21994_v56 }
 0x83d   : > { %v15247_v35 = vsel %vm2589_vm2, %v15244_v47, %v15246_v39 }
 0x83f   : > { %20462 = vmatpush3.bf16.msra.mxu0 %v21994_v56  ;;  %v15248_v56 = vrot.slane %v25975_v30, 2  ;;  %v15256_v30 = vrot.slane %v26003_v10, 2  ;;  %v22024_v10 = vld [vmem:[#allocation8 + $0x210] sm:$0xff]  }
 0x840   : > { %20499 = vmatprep.subr.bf16.mxu0 %v21998_v17 }
 0x841   : > { %v15249_v59 = vsel %vm2589_vm2, %v15246_v39, %v15248_v56 }
 0x842   : > { %20428 = vmatmul.mubr.bf16.gmra.mrb[52].mxu0 %v26897_v12  ;;  %v15253_v12 = vsel %vm2589_vm2, %v15250_v6, %v15252_v38 }
 0x843   : > { %20431 = vmatprep.mubr.bf16.mxu0 %v26898_v40  ;;  %v15255_v40 = vsel %vm2589_vm2, %v15252_v38, %v15254_v32 }
 0x84a   : > { %20432 = vmatmul.mubr.bf16.gmra.mrb[56].mxu0 %v26899_v51  ;;  %v15257_v51 = vsel %vm2589_vm2, %v15254_v32, %v15256_v30 }
 0x84b   : > { %20435 = vmatprep.mubr.bf16.mxu0 %v26900_v5  ;;  %v22021_v5 = vld [vmem:[#allocation2 + $0xa0] ss:$0 sps:$4 sm:$0x33]  }
 0x84c   : > { %v15260_v57 = vrot.slane %v22021_v5, 2 }
 0x84e   : > { %v15261_v23 = vsel %vm2589_vm2, %v15258_v58, %v15260_v57 }
 0x852   : > { %20436 = vmatmul.mubr.bf16.gmra.mrb[60].mxu0 %v26901_v19  ;;  %v15259_v19 = vsel %vm2589_vm2, %v15256_v30, %v15258_v58 }
 0x853   : > { %20439 = vmatprep.mubr.bf16.mxu0 %v26902_v14  ;;  %v26907_v14 = vld [vmem:[#allocation69_spill] sm:$0xff] }
 0x85a   : > { %20440 = vmatmul.mubr.bf16.gmra.mrb[64].mxu0 %v26903_v27  ;;  %v22023_v27 = vld [vmem:[#allocation8 + $0x208] sm:$0xff]  }
 0x85b   : > { %20443 = vmatprep.mubr.bf16.mxu0 %v26904_v7  ;;  %v26908_v7 = vld [vmem:[#allocation70_spill] sm:$0xff] }
 0x862   : > { %20444 = vmatmul.mubr.bf16.gmra.mrb[68].mxu0 %v26906_v28  ;;  %v22026_v28 = vld [vmem:[#allocation8 + $0x220] sm:$0xff]  }
 0x863   : > { %20463 = vmatprep.mubr.bf16.mxu0 %v15227_v22  ;;  %v22027_v22 = vld [vmem:[#allocation8 + $0x228] sm:$0xff]  }
 0x86a   : > { %20464 = vmatmul.mubr.bf16.vlgmr.msra.gmra.mrb[36].mxu0 %v15229_v24  ;;  %v22029_v24 = vld [vmem:[#allocation8 + $0x238] sm:$0xff]  }
 0x86b   : > { %20467 = vmatprep.mubr.bf16.mxu0 %v15231_v29  ;;  %20500 = vmatpush3.bf16.msra.mxu0 %v21998_v17  ;;  %v15251_v17 = vsel %vm2589_vm2, %v15248_v56, %v15250_v6  ;;  %v26914_v29 = vld [vmem:[#allocation76_spill] sm:$0xff] }
 0x86c   : > { %20501 = vmatprep.subr.bf16.mxu0 %v22002_v20 }
 0x86f   : > { %20502 = vmatpush3.bf16.msra.mxu0 %v22002_v20  ;;  %v22028_v20 = vld [vmem:[#allocation8 + $0x230] sm:$0xff]  }
 0x870   : > { %20503 = vmatprep.subr.bf16.mxu0 %v22005_v45 }
 0x872   : > { %20468 = vmatmul.mubr.bf16.gmra.mrb[40].mxu0 %v15233_v36  ;;  %v26919_v36 = vld [vmem:[#allocation81_spill] sm:$0xff] }
 0x873   : > { %20471 = vmatprep.mubr.bf16.mxu0 %v15235_v48  ;;  %20504 = vmatpush3.bf16.msra.mxu0 %v22005_v45  ;;  %v26915_v45 = vld [vmem:[#allocation77_spill] sm:$0xff]  ;;  %v15724_v48 = vshrl.u32 %v26081_v21, 16 }
 0x874   : > { %20505 = vmatprep.subr.bf16.mxu0 %v22008_v26 }
 0x875   : > { %v15726_v52 = vrot.slane %v15724_v48, 2 }
 0x877   : > { %20506 = vmatpush3.bf16.msra.mxu0 %v22008_v26  ;;  %v26918_v26 = vld [vmem:[#allocation80_spill] sm:$0xff] }
 0x878   : > { %20507 = vmatprep.subr.bf16.mxu0 %v22011_v44 }
 0x87a   : > { %20472 = vmatmul.mubr.bf16.gmra.mrb[44].mxu0 %v15237_v60 }
 0x87b   : > { %20475 = vmatprep.mubr.bf16.mxu0 %v15239_v0  ;;  %20508 = vmatpush3.bf16.msra.mxu0 %v22011_v44  ;;  %v15727_v44 = vshll.u32 %v26081_v21, 16  ;;  %v26922_v21 = vld [vmem:[#allocation84_spill] sm:$0xff]  ;;  %v26925_v0 = vld [vmem:[#allocation87_spill] sm:$0xff] }
 0x87c   : > { %20509 = vmatprep.subr.bf16.mxu0 %v22014_v31 }
 0x87d   : > { %v15729_v33 = vrot.slane %v15727_v44, 3 }
 0x87f   : > { %20510 = vmatpush3.bf16.msra.mxu0 %v22014_v31  ;;  %v15730_v31 = vor.u32 %v15729_v33, %v15726_v52 }
 0x880   : > { %20511 = vmatprep.subr.bf16.mxu0 %v22017_v3 }
 0x881   : > { %v15731_v60 = vsel %vm3390_vm3, %v26050_v61, %v15730_v31  ;;  %v26926_v61 = vld [vmem:[#allocation88_spill] sm:$0xff] }
 0x882   : > { %20476 = vmatmul.mubr.bf16.gmra.mrb[48].mxu0 %v15241_v62 }
 0x883   : > { %20479 = vmatprep.mubr.bf16.mxu0 %v15243_v49  ;;  %20512 = vmatpush3.bf16.msra.mxu0 %v22017_v3  ;;  %v26927_v3 = vld [vmem:[#allocation89_spill] sm:$0xff]  ;;  %v26303_v49 = vld [vmem:[#allocation15] ss:$0 sm:$0xff] }
 0x884   : > { %20513 = vmatprep.subr.bf16.mxu0 %v22020_v42 }
 0x887   : > { %20514 = vmatpush3.bf16.msra.mxu0 %v22020_v42  ;;  %v26301_v42 = vld [vmem:[#allocation14] ss:$0 sm:$0xff] }
 0x888   : > { %20551 = vmatprep.subr.bf16.mxu0 %v22022_v11 }
 0x88a   : > { %20480 = vmatmul.mubr.bf16.gmra.mrb[52].mxu0 %v15245_v55 }
 0x88b   : > { %20483 = vmatprep.mubr.bf16.mxu0 %v15247_v35 }
 0x892   : > { %20484 = vmatmul.mubr.bf16.gmra.mrb[56].mxu0 %v15249_v59 }
 0x893   : > { %20487 = vmatprep.mubr.bf16.mxu0 %v15251_v17 }
 0x89a   : > { %20488 = vmatmul.mubr.bf16.gmra.mrb[60].mxu0 %v15253_v12 }
 0x89b   : > { %20491 = vmatprep.mubr.bf16.mxu0 %v15255_v40  ;;  %v26933_v40 = vld [vmem:[#allocation29_spill] sm:$0xff] }
 0x8a2   : > { %20492 = vmatmul.mubr.bf16.gmra.mrb[64].mxu0 %v15257_v51 }
 0x8a3   : > { %20495 = vmatprep.mubr.bf16.mxu0 %v15259_v19 }
 0x8aa   : > { %20496 = vmatmul.mubr.bf16.gmra.mrb[68].mxu0 %v15261_v23 }
 0x8ab   : > { %20515 = vmatprep.mubr.bf16.mxu0 %v26907_v14 }
 0x8b2   : > { %20516 = vmatmul.mubr.bf16.vlgmr.msra.gmra.mrb[36].mxu0 %v26908_v7 }
 0x8b3   : > { %20519 = vmatprep.mubr.bf16.mxu0 %v26909_v4  ;;  %20552 = vmatpush3.bf16.msra.mxu0 %v22022_v11 }
 0x8b4   : > { %20553 = vmatprep.subr.bf16.mxu0 %v22023_v27 }
 0x8b7   : > { %20554 = vmatpush3.bf16.msra.mxu0 %v22023_v27 }
 0x8b8   : > { %20555 = vmatprep.subr.bf16.mxu0 %v22024_v10 }
 0x8ba   : > { %20520 = vmatmul.mubr.bf16.gmra.mrb[40].mxu0 %v26910_v46 }
 0x8bb   : > { %20523 = vmatprep.mubr.bf16.mxu0 %v26911_v63  ;;  %20556 = vmatpush3.bf16.msra.mxu0 %v22024_v10 }
 0x8bc   : > { %20557 = vmatprep.subr.bf16.mxu0 %v22025_v2 }
 0x8bf   : > { %20558 = vmatpush3.bf16.msra.mxu0 %v22025_v2 }
 0x8c0   : > { %20559 = vmatprep.subr.bf16.mxu0 %v22026_v28 }
 0x8c2   : > { %20524 = vmatmul.mubr.bf16.gmra.mrb[44].mxu0 %v26912_v16 }
 0x8c3   : > { %20527 = vmatprep.mubr.bf16.mxu0 %v26913_v13  ;;  %20560 = vmatpush3.bf16.msra.mxu0 %v22026_v28 }
 0x8c4   : > { %20561 = vmatprep.subr.bf16.mxu0 %v22027_v22 }
 0x8c7   : > { %20562 = vmatpush3.bf16.msra.mxu0 %v22027_v22 }
 0x8c8   : > { %20563 = vmatprep.subr.bf16.mxu0 %v22028_v20 }
 0x8ca   : > { %20528 = vmatmul.mubr.bf16.gmra.mrb[48].mxu0 %v26914_v29 }
 0x8cb   : > { %20531 = vmatprep.mubr.bf16.mxu0 %v26915_v45  ;;  %20564 = vmatpush3.bf16.msra.mxu0 %v22028_v20 }
 0x8cc   : > { %20565 = vmatprep.subr.bf16.mxu0 %v22029_v24 }
 0x8cf   : > { %20566 = vmatpush3.bf16.msra.mxu0 %v22029_v24 }
 0x8d2   : > { %20532 = vmatmul.mubr.bf16.gmra.mrb[52].mxu0 %v26916_v1 }
 0x8d3   : > { %20535 = vmatprep.mubr.bf16.mxu0 %v26917_v53 }
 0x8da   : > { %20536 = vmatmul.mubr.bf16.gmra.mrb[56].mxu0 %v26918_v26 }
 0x8db   : > { %20539 = vmatprep.mubr.bf16.mxu0 %v26919_v36 }
 0x8e2   : > { %20540 = vmatmul.mubr.bf16.gmra.mrb[60].mxu0 %v26039_v25  ;;  %v26920_v25 = vld [vmem:[#allocation82_spill] sm:$0xff] }
 0x8e3   : > { %20543 = vmatprep.mubr.bf16.mxu0 %v26044_v8  ;;  %v26921_v8 = vld [vmem:[#allocation83_spill] sm:$0xff] }
 0x8ea   : > { %20544 = vmatmul.mubr.bf16.gmra.mrb[64].mxu0 %v26048_v15  ;;  %v26923_v15 = vld [vmem:[#allocation85_spill] sm:$0xff] }
 0x8eb   : > { %20547 = vmatprep.mubr.bf16.mxu0 %v26066_v9  ;;  %v26924_v9 = vld [vmem:[#allocation86_spill] sm:$0xff] }
 0x8f2   : > { %20548 = vmatmul.mubr.bf16.gmra.mrb[68].mxu0 %v15731_v60 }
 0x8f3   : > { %20567 = vmatprep.mubr.bf16.mxu0 %v26058_v37  ;;  %v26928_v37 = vld [vmem:[#allocation90_spill] sm:$0xff] }
 0x8fa   : > { %20568 = vmatmul.mubr.bf16.vlgmr.msra.gmra.mrb[36].mxu0 %v26061_v34  ;;  %v26929_v34 = vld [vmem:[#allocation91_spill] sm:$0xff] }
 0x8fb   : > { %20571 = vmatprep.mubr.bf16.mxu0 %v26069_v50  ;;  %v26930_v50 = vld [vmem:[#allocation92_spill] sm:$0xff] }
 0x902   : > { %20572 = vmatmul.mubr.bf16.gmra.mrb[40].mxu0 %v26920_v25 }
 0x903   : > { %20575 = vmatprep.mubr.bf16.mxu0 %v26921_v8 }
 0x90a   : > { %20576 = vmatmul.mubr.bf16.gmra.mrb[44].mxu0 %v26922_v21 }
 0x90b   : > { %20579 = vmatprep.mubr.bf16.mxu0 %v26923_v15 }
 0x912   : > { %20580 = vmatmul.mubr.bf16.gmra.mrb[48].mxu0 %v26924_v9 }
 0x913   : > { %20583 = vmatprep.mubr.bf16.mxu0 %v26925_v0 }
 0x91a   : > { %20584 = vmatmul.mubr.bf16.gmra.mrb[52].mxu0 %v26926_v61 }
 0x91b   : > { %20587 = vmatprep.mubr.bf16.mxu0 %v26927_v3 }
 0x922   : > { %20588 = vmatmul.mubr.bf16.gmra.mrb[56].mxu0 %v26109_v18 }
 0x923   : > { %20591 = vmatprep.mubr.bf16.mxu0 %v26928_v37 }
 0x92a   : > { %20592 = vmatmul.mubr.bf16.gmra.mrb[60].mxu0 %v26929_v34 }
 0x92b   : > { %20595 = vmatprep.mubr.bf16.mxu0 %v26930_v50 }
 0x932   : > { %20596 = vmatmul.mubr.bf16.gmra.mrb[64].mxu0 %v26931_v43 }
 0x933   : > { %20599 = vmatprep.mubr.bf16.mxu0 %v26128_v54 }
 0x93a   : > { %20600 = vmatmul.mubr.bf16.gmra.mrb[68].mxu0 %v26932_v41 }
 0x9cd   : > { %v20569_v62 = vpop.f32.mrb[36].mxu0 }
 0x9ce   : > { %v16357_v11 = vmul.f32 %v20569_v62, %v26301_v42  ;;  %v16169_v18 = vpop.f32.mrb[37].mxu0 }
 0x9cf   : > { %v16355_v47 = vmul.f32 %v26301_v42, %v16169_v18  ;;  %v20570_v39 = vpop.f32.mrb[38].mxu0  ;;  %v16472_v18 = vld [vmem:[%s23835_s25 + $0x10] sm:$0xff] }
 0x9d0   : > { %v16400_v55 = vadd.f32 %v26303_v49, %v16357_v11  ;;  %v16358_v35 = vmul.f32 %v20570_v39, %v26301_v42  ;;  %v16172_v56 = vpop.f32.mrb[39].mxu0 }
 0x9d1   : > { %v16398_v54 = vadd.f32 %v26303_v49, %v16355_v47  ;;  %v16356_v6 = vmul.f32 %v26301_v42, %v16172_v56  ;;  %v16470_v56 = vld [vmem:[%s23835_s25] sm:$0xff] }
 0x9d2   : > { %v16436_v59 = vmax.f32 %v16400_v55, 0.0  ;;  %v16401_v17 = vadd.f32 %v26303_v49, %v16358_v35 }
 0x9d3   : > { %v16434_v38 = vmax.f32 %v16398_v54, 0.0  ;;  %v16399_v32 = vadd.f32 %v26303_v49, %v16356_v6 }
 0x9d4   : > { %v16572_v12 = vcombine.high %v16436_v59, %v16436_v59  ;;  %v16579_v30 = vrot.slane %v16436_v59, %v26933_v40  ;;  %v16437_v58 = vmax.f32 %v16401_v17, 0.0 }
 0x9d5   : > { %v16538_v51 = vcombine.high %v16434_v38, %v16434_v38  ;;  %v16545_v5 = vrot.slane %v16434_v38, %v26933_v40  ;;  %v16435_v19 = vmax.f32 %v16399_v32, 0.0  ;;  %v20573_v57 = vpop.f32.mrb[40].mxu0 }
 0x9d6   : > { %v16586_v23 = vrot.slane %v16572_v12, %v26933_v40  ;;  %v16587_v14 = vcombine.high %v16579_v30, %v16579_v30  ;;  %v16589_v27 = vcombine.high %v16437_v58, %v16437_v58  ;;  %v16596_v7 = vrot.slane %v16437_v58, %v26933_v40  ;;  %v16185_v4 = vpop.f32.mrb[41].mxu0 }
 0x9d7   : > { %v16552_v10 = vrot.slane %v16538_v51, %v26933_v40  ;;  %v16553_v2 = vcombine.high %v16545_v5, %v16545_v5  ;;  %v16555_v46 = vcombine.high %v16435_v19, %v16435_v19  ;;  %v16562_v63 = vrot.slane %v16435_v19, %v26933_v40  ;;  %v20574_v28 = vpop.f32.mrb[42].mxu0  ;;  %v16471_v51 = vld [vmem:[%s23835_s25 + $0x8] sm:$0xff] }
 0x9d8   : > { %v17176_v22 = vcombine.low %v16587_v14, %v16586_v23  ;;  %v16588_v16 = vcombine.high %v16586_v23, %v16586_v23  ;;  %v16603_v13 = vrot.slane %v16589_v27, %v26933_v40  ;;  %v16604_v20 = vcombine.high %v16596_v7, %v16596_v7  ;;  %v16188_v24 = vpop.f32.mrb[43].mxu0 }
 0x9d9   : > { %v16554_v29 = vcombine.high %v16552_v10, %v16552_v10  ;;  %v17142_v45 = vcombine.low %v16545_v5, %v16553_v2  ;;  %v16569_v1 = vrot.slane %v16555_v46, %v26933_v40  ;;  %v16570_v53 = vcombine.high %v16562_v63, %v16562_v63 }
 0x9da   : > { %v17184_v26 = vrot.slane %v17176_v22, %v26933_v40  ;;  %v17177_v36 = vcombine.low %v16588_v16, %v16596_v7  ;;  %v26322_v48 = vcombine.low %v16604_v20, %v16603_v13  ;;  %v16361_v44 = vmul.f32 %v20573_v57, %v26301_v42 }
 0x9db   : > { %v17143_v52 = vcombine.low %v16552_v10, %v16554_v29  ;;  %v17150_v33 = vrot.slane %v17142_v45, %v26933_v40  ;;  %v16571_v31 = vcombine.high %v16569_v1, %v16569_v1  ;;  %v17159_v60 = vcombine.low %v16562_v63, %v16570_v53 }
 0x9dc   : > { %v17191_v25 = vrot.slane %v17177_v36, %v26933_v40  ;;  %v17201_v8 = vrot.slane %v26322_v48, %v26933_v40  ;;  %v16404_v21 = vadd.f32 %v26303_v49, %v16361_v44  ;;  %v16359_v15 = vmul.f32 %v26301_v42, %v16185_v4 }
 0x9dd   : > { %v17157_v9 = vrot.slane %v17143_v52, %v26933_v40  ;;  %v17160_v0 = vcombine.low %v16569_v1, %v16571_v31  ;;  %v17167_v61 = vrot.slane %v17159_v60, %v26933_v40  ;;  %v16605_v3 = vcombine.high %v16603_v13, %v16603_v13  ;;  %v20577_v37 = vpop.f32.mrb[44].mxu0 }
 0x9de   : > { %v17192_v34 = vcombine.low %v17184_v26, %v17191_v25  ;;  %v16440_v50 = vmax.f32 %v16404_v21, 0.0  ;;  %v16402_v43 = vadd.f32 %v26303_v49, %v16359_v15  ;;  %v16362_v41 = vmul.f32 %v20574_v28, %v26301_v42  ;;  %v26335_v62 = vpop.f32.mrb[45].mxu0  ;;  %v16473_v15 = vld [vmem:[%s23835_s25 + $0x18] sm:$0xff] }
 0x9df   : > { %v17158_v11 = vcombine.low %v17150_v33, %v17157_v9  ;;  %v17174_v47 = vrot.slane %v17160_v0, %v26933_v40  ;;  %v16360_v39 = vmul.f32 %v26301_v42, %v16188_v24  ;;  %v16365_v55 = vmul.f32 %v20577_v37, %v26301_v42  ;;  %v26341_v35 = vpop.f32.mrb[46].mxu0 }
 0x9e0   : > { %v17720_v54 = vadd.f32 %v17192_v34, %v16472_v18  ;;  %v16639_v6 = vcombine.high %v16440_v50, %v16440_v50  ;;  %v16646_v59 = vrot.slane %v16440_v50, %v26933_v40  ;;  %v16438_v17 = vmax.f32 %v16402_v43, 0.0  ;;  %v26345_v38 = vpop.f32.mrb[47].mxu0 }
 0x9e1   : > { %v17718_v32 = vadd.f32 %v17158_v11, %v16470_v56  ;;  %v17175_v12 = vcombine.low %v17167_v61, %v17174_v47  ;;  %v16405_v30 = vadd.f32 %v26303_v49, %v16362_v41  ;;  %v16403_v58 = vadd.f32 %v26303_v49, %v16360_v39 }
 0x9e2   : > { %17752 = vst [vmem:[%s23835_s25 + $0x10] sm:$0xff] %v17720_v54  ;;  %v16653_v5 = vrot.slane %v16639_v6, %v26933_v40  ;;  %v16654_v19 = vcombine.high %v16646_v59, %v16646_v59  ;;  %v16606_v57 = vcombine.high %v16438_v17, %v16438_v17  ;;  %v16613_v23 = vrot.slane %v16438_v17, %v26933_v40 }
 0x9e3   : > { %17750 = vst [vmem:[%s23835_s25] sm:$0xff] %v17718_v32  ;;  %v17719_v14 = vadd.f32 %v17175_v12, %v16471_v51  ;;  %v16441_v27 = vmax.f32 %v16405_v30, 0.0  ;;  %v16439_v7 = vmax.f32 %v16403_v58, 0.0  ;;  %v16408_v4 = vadd.f32 %v26303_v49, %v16365_v55 }
 0x9e4   : > { %v16655_v10 = vcombine.high %v16653_v5, %v16653_v5  ;;  %v17228_v2 = vcombine.low %v16646_v59, %v16654_v19  ;;  %v16620_v46 = vrot.slane %v16606_v57, %v26933_v40  ;;  %v17194_v63 = vcombine.low %v16605_v3, %v16613_v23  ;;  %v16474_v19 = vld [vmem:[%s23835_s25 + $0x20] sm:$0xff] }
 0x9e5   : > { %17751 = vst [vmem:[%s23835_s25 + $0x8] sm:$0xff] %v17719_v14  ;;  %v16656_v28 = vcombine.high %v16441_v27, %v16441_v27  ;;  %v16663_v22 = vrot.slane %v16441_v27, %v26933_v40  ;;  %v16622_v16 = vcombine.high %v16439_v7, %v16439_v7  ;;  %v16629_v13 = vrot.slane %v16439_v7, %v26933_v40  ;;  %v20581_v20 = vpop.f32.mrb[48].mxu0  ;;  %v16475_v7 = vld [vmem:[%s23835_s25 + $0x28] sm:$0xff] }
 0x9e6   : > { %v17242_v24 = vrot.slane %v17228_v2, %v26933_v40  ;;  %v16621_v29 = vcombine.high %v16620_v46, %v16620_v46  ;;  %v17208_v45 = vrot.slane %v17194_v63, %v26933_v40  ;;  %v16444_v1 = vmax.f32 %v16408_v4, 0.0  ;;  %v26361_v53 = vpop.f32.mrb[49].mxu0 }
 0x9e7   : > { %v26364_v26 = vrot.slane %v16656_v28, %v26933_v40  ;;  %v16671_v36 = vcombine.high %v16663_v22, %v16663_v22  ;;  %v17244_v48 = vcombine.low %v16655_v10, %v16663_v22  ;;  %v16636_v44 = vrot.slane %v16622_v16, %v26933_v40  ;;  %v26367_v52 = vpop.f32.mrb[50].mxu0 }
 0x9e8   : > { %v17209_v33 = vcombine.low %v17201_v8, %v17208_v45  ;;  %v17210_v31 = vcombine.low %v16620_v46, %v16621_v29  ;;  %v16637_v60 = vcombine.high %v16629_v13, %v16629_v13  ;;  %v16706_v25 = vcombine.high %v16444_v1, %v16444_v1  ;;  %v26369_v21 = vpop.f32.mrb[51].mxu0 }
 0x9e9   : > { %v17245_v9 = vcombine.low %v16671_v36, %v26364_v26  ;;  %v17252_v0 = vrot.slane %v17244_v48, %v26933_v40  ;;  %v16638_v61 = vcombine.high %v16636_v44, %v16636_v44  ;;  %v16713_v3 = vrot.slane %v16444_v1, %v26933_v40  ;;  %v16479_v1 = vld [vmem:[%s23835_s25 + $0x48] sm:$0xff] }
 0x9ea   : > { %v17218_v37 = vrot.slane %v17210_v31, %v26933_v40  ;;  %v17721_v34 = vadd.f32 %v17209_v33, %v16473_v15  ;;  %v17211_v50 = vcombine.low %v16629_v13, %v16637_v60  ;;  %v16720_v8 = vrot.slane %v16706_v25, %v26933_v40 }
 0x9eb   : > { %v17259_v43 = vrot.slane %v17245_v9, %v26933_v40  ;;  %v17227_v41 = vcombine.low %v16636_v44, %v16638_v61  ;;  %v16721_v11 = vcombine.high %v16713_v3, %v16713_v3  ;;  %v16363_v18 = vmul.f32 %v26301_v42, %v26335_v62  ;;  %v16476_v62 = vld [vmem:[%s23835_s25 + $0x30] sm:$0xff] }
 0x9ec   : > { %17753 = vst [vmem:[%s23835_s25 + $0x18] sm:$0xff] %v17721_v34  ;;  %v17225_v47 = vrot.slane %v17211_v50, %v26933_v40  ;;  %v16722_v39 = vcombine.high %v16720_v8, %v16720_v8  ;;  %v16672_v55 = vcombine.high %v26364_v26, %v26364_v26  ;;  %v16366_v56 = vmul.f32 %v26341_v35, %v26301_v42 }
 0x9ed   : > { %v17260_v54 = vcombine.low %v17252_v0, %v17259_v43  ;;  %v17235_v6 = vrot.slane %v17227_v41, %v26933_v40  ;;  %v17295_v59 = vcombine.low %v16713_v3, %v16721_v11  ;;  %v16406_v17 = vadd.f32 %v26303_v49, %v16363_v18  ;;  %v26388_v32 = vpop.f32.mrb[52].mxu0 }
 0x9ee   : > { %v17226_v12 = vcombine.low %v17218_v37, %v17225_v47  ;;  %v17296_v30 = vcombine.low %v16720_v8, %v16722_v39  ;;  %v16409_v58 = vadd.f32 %v26303_v49, %v16366_v56  ;;  %v16364_v51 = vmul.f32 %v26301_v42, %v26345_v38  ;;  %v26394_v5 = vpop.f32.mrb[53].mxu0 }
 0x9ef   : > { %v17724_v35 = vadd.f32 %v17260_v54, %v16476_v62  ;;  %v17243_v57 = vcombine.low %v17235_v6, %v17242_v24  ;;  %v17303_v23 = vrot.slane %v17295_v59, %v26933_v40  ;;  %v16442_v14 = vmax.f32 %v16406_v17, 0.0  ;;  %v26398_v27 = vpop.f32.mrb[54].mxu0 }
 0x9f0   : > { %v17722_v4 = vadd.f32 %v17226_v12, %v16474_v19  ;;  %v17310_v10 = vrot.slane %v17296_v30, %v26933_v40  ;;  %v16445_v2 = vmax.f32 %v16409_v58, 0.0  ;;  %v16407_v38 = vadd.f32 %v26303_v49, %v16364_v51  ;;  %v26403_v46 = vpop.f32.mrb[55].mxu0  ;;  %v16477_v12 = vld [vmem:[%s23835_s25 + $0x38] sm:$0xff] }
 0x9f1   : > { %17756 = vst [vmem:[%s23835_s25 + $0x30] sm:$0xff] %v17724_v35  ;;  %v17723_v63 = vadd.f32 %v17243_v57, %v16475_v7  ;;  %v16673_v28 = vcombine.high %v16442_v14, %v16442_v14  ;;  %v16680_v22 = vrot.slane %v16442_v14, %v26933_v40  ;;  %v16369_v16 = vmul.f32 %v20581_v20, %v26301_v42 }
 0x9f2   : > { %17754 = vst [vmem:[%s23835_s25 + $0x20] sm:$0xff] %v17722_v4  ;;  %v17311_v13 = vcombine.low %v17303_v23, %v17310_v10  ;;  %v16723_v24 = vcombine.high %v16445_v2, %v16445_v2  ;;  %v16730_v29 = vrot.slane %v16445_v2, %v26933_v40  ;;  %v16443_v45 = vmax.f32 %v16407_v38, 0.0 }
 0x9f3   : > { %17755 = vst [vmem:[%s23835_s25 + $0x28] sm:$0xff] %v17723_v63  ;;  %v16687_v26 = vrot.slane %v16673_v28, %v26933_v40  ;;  %v16688_v36 = vcombine.high %v16680_v22, %v16680_v22  ;;  %v17261_v48 = vcombine.low %v16672_v55, %v16680_v22  ;;  %v16412_v44 = vadd.f32 %v26303_v49, %v16369_v16 }
 0x9f4   : > { %v17727_v33 = vadd.f32 %v17311_v13, %v16479_v1  ;;  %v16737_v31 = vrot.slane %v16723_v24, %v26933_v40  ;;  %v16738_v60 = vcombine.high %v16730_v29, %v16730_v29  ;;  %v16689_v20 = vcombine.high %v16443_v45, %v16443_v45 }
 0x9f5   : > { %v17262_v25 = vcombine.low %v16688_v36, %v16687_v26  ;;  %v17269_v15 = vrot.slane %v17261_v48, %v26933_v40  ;;  %v16696_v9 = vrot.slane %v16443_v45, %v26933_v40  ;;  %v16448_v0 = vmax.f32 %v16412_v44, 0.0  ;;  %v26417_v61 = vpop.f32.mrb[56].mxu0  ;;  %v16478_v45 = vld [vmem:[%s23835_s25 + $0x40] sm:$0xff] }
 0x9f6   : > { %17759 = vst [vmem:[%s23835_s25 + $0x48] sm:$0xff] %v17727_v33  ;;  %v17312_v3 = vcombine.low %v16738_v60, %v16737_v31  ;;  %v16703_v37 = vrot.slane %v16689_v20, %v26933_v40  ;;  %v16367_v34 = vmul.f32 %v26301_v42, %v26361_v53  ;;  %v16739_v50 = vcombine.high %v16737_v31, %v16737_v31  ;;  %v26423_v8 = vpop.f32.mrb[57].mxu0 }
 0x9f7   : > { %v17276_v43 = vrot.slane %v17262_v25, %v26933_v40  ;;  %v16704_v41 = vcombine.high %v16696_v9, %v16696_v9  ;;  %v16773_v11 = vcombine.high %v16448_v0, %v16448_v0  ;;  %v16780_v18 = vrot.slane %v16448_v0, %v26933_v40  ;;  %v26427_v47 = vpop.f32.mrb[58].mxu0 }
 0x9f8   : > { %v17320_v39 = vrot.slane %v17312_v3, %v26933_v40  ;;  %v16705_v55 = vcombine.high %v16703_v37, %v16703_v37  ;;  %v16410_v56 = vadd.f32 %v26303_v49, %v16367_v34  ;;  %v16370_v53 = vmul.f32 %v26367_v52, %v26301_v42  ;;  %v26433_v54 = vpop.f32.mrb[59].mxu0 }
 0x9f9   : > { %v17277_v6 = vcombine.low %v17269_v15, %v17276_v43  ;;  %v17278_v59 = vcombine.low %v16696_v9, %v16704_v41  ;;  %v16787_v17 = vrot.slane %v16773_v11, %v26933_v40  ;;  %v16788_v62 = vcombine.high %v16780_v18, %v16780_v18  ;;  %v16480_v43 = vld [vmem:[%s23835_s25 + $0x50] sm:$0xff] }
 0x9fa   : > { %v17279_v30 = vcombine.low %v16703_v37, %v16705_v55  ;;  %v16446_v58 = vmax.f32 %v16410_v56, 0.0  ;;  %v16413_v51 = vadd.f32 %v26303_v49, %v16370_v53  ;;  %v16368_v35 = vmul.f32 %v26301_v42, %v26369_v21 }
 0x9fb   : > { %v17725_v19 = vadd.f32 %v17277_v6, %v16477_v12  ;;  %v17286_v57 = vrot.slane %v17278_v59, %v26933_v40  ;;  %v16789_v52 = vcombine.high %v16787_v17, %v16787_v17  ;;  %v26441_v23 = vcombine.low %v16780_v18, %v16788_v62 }
 0x9fc   : > { %v17293_v14 = vrot.slane %v17279_v30, %v26933_v40  ;;  %v16740_v7 = vcombine.high %v16446_v58, %v16446_v58  ;;  %v16747_v4 = vrot.slane %v16446_v58, %v26933_v40  ;;  %v16449_v10 = vmax.f32 %v16413_v51, 0.0 }
 0x9fd   : > { %17757 = vst [vmem:[%s23835_s25 + $0x38] sm:$0xff] %v17725_v19  ;;  %v17361_v2 = vrot.slane %v26441_v23, %v26933_v40  ;;  %v17363_v38 = vcombine.low %v16787_v17, %v16789_v52  ;;  %v16411_v21 = vadd.f32 %v26303_v49, %v16368_v35  ;;  %v16373_v63 = vmul.f32 %v26388_v32, %v26301_v42  ;;  %v26451_v28 = vpop.f32.mrb[60].mxu0 }
 0x9fe   : > { %v17294_v22 = vcombine.low %v17286_v57, %v17293_v14  ;;  %v16754_v16 = vrot.slane %v16740_v7, %v26933_v40  ;;  %v16755_v13 = vcombine.high %v16747_v4, %v16747_v4  ;;  %v17313_v24 = vcombine.low %v16739_v50, %v16747_v4  ;;  %v26454_v29 = vpop.f32.mrb[61].mxu0  ;;  %v16481_v4 = vld [vmem:[%s23835_s25 + $0x58] sm:$0xff] }
 0x9ff   : > { %v17371_v1 = vrot.slane %v17363_v38, %v26933_v40  ;;  %v16790_v26 = vcombine.high %v16449_v10, %v16449_v10  ;;  %v16797_v36 = vrot.slane %v16449_v10, %v26933_v40  ;;  %v16447_v48 = vmax.f32 %v16411_v21, 0.0  ;;  %v26459_v44 = vpop.f32.mrb[62].mxu0 }
 0xa00   : > { %v17726_v32 = vadd.f32 %v17294_v22, %v16478_v45  ;;  %v17327_v33 = vrot.slane %v17313_v24, %v26933_v40  ;;  %v17329_v31 = vcombine.low %v16755_v13, %v16754_v16  ;;  %v16756_v60 = vcombine.high %v16754_v16, %v16754_v16  ;;  %v26462_v20 = vpop.f32.mrb[63].mxu0 }
 0xa01   : > { %v16804_v25 = vrot.slane %v16790_v26, %v26933_v40  ;;  %v16805_v15 = vcombine.high %v16797_v36, %v16797_v36  ;;  %v16757_v9 = vcombine.high %v16447_v48, %v16447_v48  ;;  %v16764_v0 = vrot.slane %v16447_v48, %v26933_v40 }
 0xa02   : > { %17758 = vst [vmem:[%s23835_s25 + $0x40] sm:$0xff] %v17726_v32  ;;  %v17328_v3 = vcombine.low %v17320_v39, %v17327_v33  ;;  %v17337_v37 = vrot.slane %v17329_v31, %v26933_v40  ;;  %v16416_v34 = vadd.f32 %v26303_v49, %v16373_v63  ;;  %v16371_v50 = vmul.f32 %v26301_v42, %v26394_v5 }
 0xa03   : > { %v16806_v41 = vcombine.high %v16804_v25, %v16804_v25  ;;  %v17364_v11 = vcombine.low %v16797_v36, %v16805_v15  ;;  %v16771_v18 = vrot.slane %v16757_v9, %v26933_v40  ;;  %v17330_v55 = vcombine.low %v16756_v60, %v16764_v0  ;;  %v16482_v25 = vld [vmem:[%s23835_s25 + $0x60] sm:$0xff] }
 0xa04   : > { %v17728_v56 = vadd.f32 %v17328_v3, %v16480_v43  ;;  %v16452_v53 = vmax.f32 %v16416_v34, 0.0  ;;  %v16414_v6 = vadd.f32 %v26303_v49, %v16371_v50  ;;  %v16374_v39 = vmul.f32 %v26398_v27, %v26301_v42 }
 0xa05   : > { %v17378_v59 = vrot.slane %v17364_v11, %v26933_v40  ;;  %v16772_v17 = vcombine.high %v16771_v18, %v16771_v18  ;;  %v17344_v5 = vrot.slane %v17330_v55, %v26933_v40  ;;  %v16372_v62 = vmul.f32 %v26301_v42, %v26403_v46  ;;  %v26480_v12 = vpop.f32.mrb[64].mxu0  ;;  %v16483_v46 = vld [vmem:[%s23835_s25 + $0x68] sm:$0xff] }
 0xa06   : > { %17760 = vst [vmem:[%s23835_s25 + $0x50] sm:$0xff] %v17728_v56  ;;  %v16840_v30 = vcombine.high %v16452_v53, %v16452_v53  ;;  %v16847_v58 = vrot.slane %v16452_v53, %v26933_v40  ;;  %v16450_v51 = vmax.f32 %v16414_v6, 0.0  ;;  %v16417_v35 = vadd.f32 %v26303_v49, %v16374_v39  ;;  %v26485_v27 = vpop.f32.mrb[65].mxu0 }
 0xa07   : > { %v17379_v19 = vcombine.low %v17371_v1, %v17378_v59  ;;  %v17345_v57 = vcombine.low %v17337_v37, %v17344_v5  ;;  %v17346_v52 = vcombine.low %v16771_v18, %v16772_v17  ;;  %v16415_v14 = vadd.f32 %v26303_v49, %v16372_v62  ;;  %v26488_v7 = vpop.f32.mrb[66].mxu0 }
 0xa08   : > { %v16854_v10 = vrot.slane %v16840_v30, %v26933_v40  ;;  %v16855_v38 = vcombine.high %v16847_v58, %v16847_v58  ;;  %v16807_v21 = vcombine.high %v16450_v51, %v16450_v51  ;;  %v16814_v63 = vrot.slane %v16450_v51, %v26933_v40  ;;  %v26494_v22 = vpop.f32.mrb[67].mxu0  ;;  %v16486_v51 = vld [vmem:[%s23835_s25 + $0x80] sm:$0xff] }
 0xa09   : > { %v17731_v16 = vadd.f32 %v17379_v19, %v16483_v46  ;;  %v17354_v13 = vrot.slane %v17346_v52, %v26933_v40  ;;  %v17729_v24 = vadd.f32 %v17345_v57, %v16481_v4  ;;  %v16453_v45 = vmax.f32 %v16417_v35, 0.0  ;;  %v16484_v35 = vld [vmem:[%s23835_s25 + $0x70] sm:$0xff] }
 0xa0a   : > { %v16856_v1 = vcombine.high %v16854_v10, %v16854_v10  ;;  %v17414_v26 = vcombine.low %v16847_v58, %v16855_v38  ;;  %v16821_v36 = vrot.slane %v16807_v21, %v26933_v40  ;;  %v16822_v48 = vcombine.high %v16814_v63, %v16814_v63 }
 0xa0b   : > { %17763 = vst [vmem:[%s23835_s25 + $0x68] sm:$0xff] %v17731_v16  ;;  %v17362_v32 = vcombine.low %v17354_v13, %v17361_v2  ;;  %17761 = vst [vmem:[%s23835_s25 + $0x58] sm:$0xff] %v17729_v24  ;;  %v17380_v33 = vcombine.low %v16806_v41, %v16814_v63  ;;  %v16857_v31 = vcombine.high %v16453_v45, %v16453_v45  ;;  %v16451_v3 = vmax.f32 %v16415_v14, 0.0 }
 0xa0c   : > { %v16864_v60 = vrot.slane %v16453_v45, %v26933_v40  ;;  %v17415_v15 = vcombine.low %v16854_v10, %v16856_v1  ;;  %v17422_v9 = vrot.slane %v17414_v26, %v26933_v40  ;;  %v17381_v0 = vcombine.low %v16822_v48, %v16821_v36  ;;  %v16487_v48 = vld [vmem:[%s23835_s25 + $0x88] sm:$0xff] }
 0xa0d   : > { %v17730_v37 = vadd.f32 %v17362_v32, %v16482_v25  ;;  %v17388_v34 = vrot.slane %v17380_v33, %v26933_v40  ;;  %v16871_v50 = vrot.slane %v16857_v31, %v26933_v40  ;;  %v26508_v23 = vpop.f32.mrb[68].mxu0  ;;  %v16823_v11 = vcombine.high %v16821_v36, %v16821_v36 }
 0xa0e   : > { %v16872_v43 = vcombine.high %v16864_v60, %v16864_v60  ;;  %v17429_v2 = vrot.slane %v17415_v15, %v26933_v40  ;;  %v17395_v41 = vrot.slane %v17381_v0, %v26933_v40  ;;  %v16824_v18 = vcombine.high %v16451_v3, %v16451_v3  ;;  %v26512_v55 = vpop.f32.mrb[69].mxu0  ;;  %v16485_v15 = vld [vmem:[%s23835_s25 + $0x78] sm:$0xff] }
 0xa0f   : > { %17762 = vst [vmem:[%s23835_s25 + $0x60] sm:$0xff] %v17730_v37  ;;  %v16873_v56 = vcombine.high %v16871_v50, %v16871_v50  ;;  %v16831_v6 = vrot.slane %v16451_v3, %v26933_v40  ;;  %v16377_v39 = vmul.f32 %v26417_v61, %v26301_v42  ;;  %v26518_v59 = vpop.f32.mrb[70].mxu0  ;;  %v16375_v30 = vmul.f32 %v26301_v42, %v26423_v8 }
 0xa10   : > { %v17431_v53 = vcombine.low %v16864_v60, %v16872_v43  ;;  %v17430_v17 = vcombine.low %v17422_v9, %v17429_v2  ;;  %v17396_v5 = vcombine.low %v17388_v34, %v17395_v41  ;;  %v16838_v62 = vrot.slane %v16824_v18, %v26933_v40  ;;  %v26523_v58 = vpop.f32.mrb[71].mxu0 }
 0xa11   : > { %v17432_v19 = vcombine.low %v16871_v50, %v16873_v56  ;;  %v16839_v52 = vcombine.high %v16831_v6, %v16831_v6  ;;  %v17397_v61 = vcombine.low %v16823_v11, %v16831_v6  ;;  %v16420_v4 = vadd.f32 %v26303_v49, %v16377_v39 }
 0xa12   : > { %v17439_v57 = vrot.slane %v17431_v53, %v26933_v40  ;;  %v17734_v14 = vadd.f32 %v17430_v17, %v16486_v51  ;;  %v17732_v46 = vadd.f32 %v17396_v5, %v16484_v35  ;;  %v16418_v10 = vadd.f32 %v26303_v49, %v16375_v30 }
 0xa13   : > { %v17446_v8 = vrot.slane %v17432_v19, %v26933_v40  ;;  %v17398_v38 = vcombine.low %v16839_v52, %v16838_v62  ;;  %v17405_v21 = vrot.slane %v17397_v61, %v26933_v40  ;;  %v16378_v63 = vmul.f32 %v26427_v47, %v26301_v42 }
 0xa14   : > { %17766 = vst [vmem:[%s23835_s25 + $0x80] sm:$0xff] %v17734_v14  ;;  %17764 = vst [vmem:[%s23835_s25 + $0x70] sm:$0xff] %v17732_v46  ;;  %v16456_v16 = vmax.f32 %v16420_v4, 0.0  ;;  %v16454_v13 = vmax.f32 %v16418_v10, 0.0  ;;  %v16376_v24 = vmul.f32 %v26301_v42, %v26433_v54  ;;  %v16381_v45 = vmul.f32 %v26451_v28, %v26301_v42 }
 0xa15   : > { %v17447_v1 = vcombine.low %v17439_v57, %v17446_v8  ;;  %v17412_v26 = vrot.slane %v17398_v38, %v26933_v40  ;;  %v16421_v36 = vadd.f32 %v26303_v49, %v16378_v63  ;;  %v16379_v31 = vmul.f32 %v26301_v42, %v26454_v29 }
 0xa16   : > { %v16908_v32 = vcombine.high %v16456_v16, %v16456_v16  ;;  %v16874_v47 = vcombine.high %v16454_v13, %v16454_v13  ;;  %v16881_v33 = vrot.slane %v16454_v13, %v26933_v40  ;;  %v16419_v28 = vadd.f32 %v26303_v49, %v16376_v24 }
 0xa17   : > { %v17735_v60 = vadd.f32 %v17447_v1, %v16487_v48  ;;  %v17413_v25 = vcombine.low %v17405_v21, %v17412_v26  ;;  %v16457_v54 = vmax.f32 %v16421_v36, 0.0  ;;  %v16424_v37 = vadd.f32 %v26303_v49, %v16381_v45  ;;  %v16490_v36 = vld [vmem:[%s23835_s25 + $0xa0] sm:$0xff] }
 0xa18   : > { %v16922_v9 = vrot.slane %v16908_v32, %v26933_v40  ;;  %v16888_v0 = vrot.slane %v16874_v47, %v26933_v40  ;;  %v16889_v3 = vcombine.high %v16881_v33, %v16881_v33  ;;  %v16455_v29 = vmax.f32 %v16419_v28, 0.0 }
 0xa19   : > { %17767 = vst [vmem:[%s23835_s25 + $0x88] sm:$0xff] %v17735_v60  ;;  %v17733_v34 = vadd.f32 %v17413_v25, %v16485_v15  ;;  %v16924_v50 = vcombine.high %v16457_v54, %v16457_v54  ;;  %v16931_v43 = vrot.slane %v16457_v54, %v26933_v40  ;;  %v16915_v2 = vrot.slane %v16456_v16, %v26933_v40  ;;  %v16488_v60 = vld [vmem:[%s23835_s25 + $0x90] sm:$0xff] }
 0xa1a   : > { %v16923_v41 = vcombine.high %v16922_v9, %v16922_v9  ;;  %v16890_v11 = vcombine.high %v16888_v0, %v16888_v0  ;;  %v16460_v18 = vmax.f32 %v16424_v37, 0.0  ;;  %v16891_v6 = vcombine.high %v16455_v29, %v16455_v29 }
 0xa1b   : > { %17765 = vst [vmem:[%s23835_s25 + $0x78] sm:$0xff] %v17733_v34  ;;  %v16938_v56 = vrot.slane %v16924_v50, %v26933_v40  ;;  %v16939_v53 = vcombine.high %v16931_v43, %v16931_v43  ;;  %v16898_v39 = vrot.slane %v16455_v29, %v26933_v40  ;;  %v17448_v5 = vcombine.low %v16889_v3, %v16888_v0 }
 0xa1c   : > { %v17482_v17 = vcombine.low %v16922_v9, %v16923_v41  ;;  %v16975_v62 = vcombine.high %v16460_v18, %v16460_v18  ;;  %v26558_v30 = vrot.slane %v16460_v18, %v26933_v40  ;;  %v16905_v19 = vrot.slane %v16891_v6, %v26933_v40 }
 0xa1d   : > { %v16940_v51 = vcombine.high %v16938_v56, %v16938_v56  ;;  %v17483_v35 = vcombine.low %v16931_v43, %v16939_v53  ;;  %v16906_v57 = vcombine.high %v16898_v39, %v16898_v39  ;;  %v17449_v61 = vcombine.low %v16890_v11, %v16898_v39  ;;  %v16489_v43 = vld [vmem:[%s23835_s25 + $0x98] sm:$0xff] }
 0xa1e   : > { %v17490_v52 = vrot.slane %v17482_v17, %v26933_v40  ;;  %v16989_v14 = vrot.slane %v16975_v62, %v26933_v40  ;;  %v16990_v46 = vcombine.high %v26558_v30, %v26558_v30  ;;  %v16907_v8 = vcombine.high %v16905_v19, %v16905_v19 }
 0xa1f   : > { %v17497_v4 = vrot.slane %v17483_v35, %v26933_v40  ;;  %v17499_v10 = vcombine.low %v16938_v56, %v16940_v51  ;;  %v17465_v38 = vcombine.low %v16906_v57, %v16905_v19  ;;  %v17456_v21 = vrot.slane %v17448_v5, %v26933_v40 }
 0xa20   : > { %v17463_v63 = vrot.slane %v17449_v61, %v26933_v40  ;;  %v16422_v16 = vadd.f32 %v26303_v49, %v16379_v31  ;;  %v16382_v13 = vmul.f32 %v26459_v44, %v26301_v42  ;;  %v17466_v1 = vcombine.low %v16907_v8, %v16915_v2 }
 0xa21   : > { %v17498_v24 = vcombine.low %v17490_v52, %v17497_v4  ;;  %v17507_v45 = vrot.slane %v17499_v10, %v26933_v40  ;;  %v26572_v26 = vcombine.low %v16990_v46, %v16989_v14  ;;  %v17473_v32 = vrot.slane %v17465_v38, %v26933_v40 }
 0xa22   : > { %v17464_v48 = vcombine.low %v17456_v21, %v17463_v63  ;;  %v16458_v47 = vmax.f32 %v16422_v16, 0.0  ;;  %v16425_v33 = vadd.f32 %v26303_v49, %v16382_v13  ;;  %v17480_v44 = vrot.slane %v17466_v1, %v26933_v40  ;;  %v16491_v63 = vld [vmem:[%s23835_s25 + $0xa8] sm:$0xff] }
 0xa23   : > { %v17738_v31 = vadd.f32 %v17498_v24, %v16490_v36  ;;  %v16380_v25 = vmul.f32 %v26301_v42, %v26462_v20  ;;  %v16385_v54 = vmul.f32 %v26480_v12, %v26301_v42  ;;  %v16383_v50 = vmul.f32 %v26301_v42, %v26485_v27 }
 0xa24   : > { %v17736_v28 = vadd.f32 %v17464_v48, %v16488_v60  ;;  %v16941_v15 = vcombine.high %v16458_v47, %v16458_v47  ;;  %v16948_v9 = vrot.slane %v16458_v47, %v26933_v40  ;;  %v16461_v0 = vmax.f32 %v16425_v33, 0.0 }
 0xa25   : > { %17770 = vst [vmem:[%s23835_s25 + $0xa0] sm:$0xff] %v17738_v31  ;;  %v17481_v3 = vcombine.low %v17473_v32, %v17480_v44  ;;  %v16423_v37 = vadd.f32 %v26303_v49, %v16380_v25  ;;  %v16428_v34 = vadd.f32 %v26303_v49, %v16385_v54  ;;  %v16426_v56 = vadd.f32 %v26303_v49, %v16383_v50 }
 0xa26   : > { %17768 = vst [vmem:[%s23835_s25 + $0x90] sm:$0xff] %v17736_v28  ;;  %v16955_v20 = vrot.slane %v16941_v15, %v26933_v40  ;;  %v16956_v12 = vcombine.high %v16948_v9, %v16948_v9  ;;  %v16991_v29 = vcombine.high %v16461_v0, %v16461_v0  ;;  %v16998_v2 = vrot.slane %v16461_v0, %v26933_v40  ;;  %v16494_v28 = vld [vmem:[%s23835_s25 + $0xc0] sm:$0xff] }
 0xa27   : > { %v17737_v41 = vadd.f32 %v17481_v3, %v16489_v43  ;;  %v16459_v11 = vmax.f32 %v16423_v37, 0.0  ;;  %v16464_v18 = vmax.f32 %v16428_v34, 0.0  ;;  %v16462_v52 = vmax.f32 %v16426_v56, 0.0  ;;  %v16492_v37 = vld [vmem:[%s23835_s25 + $0xb0] sm:$0xff] }
 0xa28   : > { %v16957_v53 = vcombine.high %v16955_v20, %v16955_v20  ;;  %v17500_v6 = vcombine.low %v16948_v9, %v16956_v12  ;;  %v17005_v39 = vrot.slane %v16991_v29, %v26933_v40  ;;  %v17006_v17 = vcombine.high %v16998_v2, %v16998_v2 }
 0xa29   : > { %17769 = vst [vmem:[%s23835_s25 + $0x98] sm:$0xff] %v17737_v41  ;;  %v16958_v27 = vcombine.high %v16459_v11, %v16459_v11  ;;  %v16965_v5 = vrot.slane %v16459_v11, %v26933_v40  ;;  %v17042_v62 = vcombine.high %v16464_v18, %v16464_v18  ;;  %v26598_v51 = vrot.slane %v16464_v18, %v26933_v40 }
 0xa2a   : > { %v17514_v35 = vrot.slane %v17500_v6, %v26933_v40  ;;  %v17007_v19 = vcombine.high %v17005_v39, %v17005_v39  ;;  %v17550_v57 = vcombine.low %v16998_v2, %v17006_v17  ;;  %v17548_v61 = vrot.slane %v26572_v26, %v26933_v40  ;;  %v16493_v2 = vld [vmem:[%s23835_s25 + $0xb8] sm:$0xff] }
 0xa2b   : > { %v16972_v14 = vrot.slane %v16958_v27, %v26933_v40  ;;  %v16973_v46 = vcombine.high %v16965_v5, %v16965_v5  ;;  %v17516_v4 = vcombine.low %v16957_v53, %v16965_v5  ;;  %v17056_v38 = vrot.slane %v17042_v62, %v26933_v40 }
 0xa2c   : > { %v17515_v10 = vcombine.low %v17507_v45, %v17514_v35  ;;  %v17551_v8 = vcombine.low %v17005_v39, %v17007_v19  ;;  %v17057_v21 = vcombine.high %v26598_v51, %v26598_v51  ;;  %v17008_v1 = vcombine.high %v16462_v52, %v16462_v52 }
 0xa2d   : > { %v16974_v16 = vcombine.high %v16972_v14, %v16972_v14  ;;  %v17517_v13 = vcombine.low %v16973_v46, %v16972_v14  ;;  %v17524_v24 = vrot.slane %v17516_v4, %v26933_v40  ;;  %v17558_v36 = vrot.slane %v17550_v57, %v26933_v40 }
 0xa2e   : > { %v17739_v26 = vadd.f32 %v17515_v10, %v16491_v63  ;;  %v17565_v48 = vrot.slane %v17551_v8, %v26933_v40  ;;  %v17015_v45 = vrot.slane %v16462_v52, %v26933_v40  ;;  %v17022_v33 = vrot.slane %v17008_v1, %v26933_v40 }
 0xa2f   : > { %v17531_v32 = vrot.slane %v17517_v13, %v26933_v40  ;;  %v17533_v47 = vcombine.low %v16974_v16, %v26558_v30  ;;  %v16386_v31 = vmul.f32 %v26488_v7, %v26301_v42  ;;  %v17601_v44 = vcombine.low %v17057_v21, %v17056_v38 }
 0xa30   : > { %17771 = vst [vmem:[%s23835_s25 + $0xa8] sm:$0xff] %v17739_v26  ;;  %v17566_v60 = vcombine.low %v17558_v36, %v17565_v48  ;;  %v17023_v25 = vcombine.high %v17015_v45, %v17015_v45  ;;  %v17058_v54 = vcombine.high %v17056_v38, %v17056_v38  ;;  %v17024_v0 = vcombine.high %v17022_v33, %v17022_v33  ;;  %v22121_v48 = vld [vmem:[#allocation15] ss:$0 sm:$0xff] }
 0xa31   : > { %v17532_v15 = vcombine.low %v17524_v24, %v17531_v32  ;;  %v17541_v9 = vrot.slane %v17533_v47, %v26933_v40  ;;  %v16429_v3 = vadd.f32 %v26303_v49, %v16386_v31  ;;  %v16384_v7 = vmul.f32 %v26301_v42, %v26494_v22 }
 0xa32   : > { %v17742_v30 = vadd.f32 %v17566_v60, %v16494_v28  ;;  %v17567_v34 = vcombine.low %v17015_v45, %v17023_v25  ;;  %v16389_v50 = vmul.f32 %v26508_v23, %v26301_v42  ;;  %v17568_v12 = vcombine.low %v17022_v33, %v17024_v0 }
 0xa33   : > { %v17549_v43 = vcombine.low %v17541_v9, %v17548_v61  ;;  %v17740_v20 = vadd.f32 %v17532_v15, %v16492_v37  ;;  %v16465_v29 = vmax.f32 %v16429_v3, 0.0  ;;  %v16427_v11 = vadd.f32 %v26303_v49, %v16384_v7 }
 0xa34   : > { %17774 = vst [vmem:[%s23835_s25 + $0xc0] sm:$0xff] %v17742_v30  ;;  %v17575_v41 = vrot.slane %v17567_v34, %v26933_v40  ;;  %v16432_v18 = vadd.f32 %v26303_v49, %v16389_v50  ;;  %v16387_v22 = vmul.f32 %v26301_v42, %v26512_v55  ;;  %v17582_v23 = vrot.slane %v17568_v12, %v26933_v40  ;;  %v16495_v55 = vld [vmem:[%s23835_s25 + $0xc8] sm:$0xff] }
 0xa35   : > { %v17741_v56 = vadd.f32 %v17549_v43, %v16493_v2  ;;  %17772 = vst [vmem:[%s23835_s25 + $0xb0] sm:$0xff] %v17740_v20  ;;  %v17059_v53 = vcombine.high %v16465_v29, %v16465_v29  ;;  %v17066_v6 = vrot.slane %v16465_v29, %v26933_v40  ;;  %v16463_v39 = vmax.f32 %v16427_v11, 0.0  ;;  %v16496_v20 = vld [vmem:[%s23835_s25 + $0xd0] sm:$0xff] }
 0xa36   : > { %v16468_v17 = vmax.f32 %v16432_v18, 0.0  ;;  %v16430_v27 = vadd.f32 %v26303_v49, %v16387_v22  ;;  %v17609_v5 = vrot.slane %v17601_v44, %v26933_v40  ;;  %v17583_v62 = vcombine.low %v17575_v41, %v17582_v23  ;;  %v16498_v18 = vld [vmem:[%s23835_s25 + $0xe0] sm:$0xff] }
 0xa37   : > { %17773 = vst [vmem:[%s23835_s25 + $0xb8] sm:$0xff] %v17741_v56  ;;  %v17073_v35 = vrot.slane %v17059_v53, %v26933_v40  ;;  %v17602_v19 = vcombine.low %v17058_v54, %v17066_v6  ;;  %v17025_v57 = vcombine.high %v16463_v39, %v16463_v39  ;;  %v17032_v52 = vrot.slane %v16463_v39, %v26933_v40 }
 0xa38   : > { %v17109_v61 = vcombine.high %v16468_v17, %v16468_v17  ;;  %v16390_v14 = vmul.f32 %v26518_v59, %v26301_v42  ;;  %v17743_v46 = vadd.f32 %v17583_v62, %v16495_v55  ;;  %v16466_v10 = vmax.f32 %v16430_v27, 0.0  ;;  %v16497_v59 = vld [vmem:[%s23835_s25 + $0xd8] sm:$0xff] }
 0xa39   : > { %v17074_v4 = vcombine.high %v17073_v35, %v17073_v35  ;;  %v17616_v49 = vrot.slane %v17602_v19, %v26933_v40  ;;  %v17039_v8 = vrot.slane %v17025_v57, %v26933_v40  ;;  %v17040_v38 = vcombine.high %v17032_v52, %v17032_v52  ;;  %v16501_v19 = vld [vmem:[%s23835_s25 + $0xf8] sm:$0xff] }
 0xa3a   : > { %v16388_v21 = vmul.f32 %v26301_v42, %v26523_v58  ;;  %17775 = vst [vmem:[%s23835_s25 + $0xc8] sm:$0xff] %v17743_v46  ;;  %v17123_v16 = vrot.slane %v17109_v61, %v26933_v40  ;;  %v17075_v13 = vcombine.high %v16466_v10, %v16466_v10  ;;  %v17082_v24 = vrot.slane %v16466_v10, %v26933_v40 }
 0xa3b   : > { %v17617_v63 = vcombine.low %v17609_v5, %v17616_v49  ;;  %v17041_v1 = vcombine.high %v17039_v8, %v17039_v8  ;;  %v17584_v26 = vcombine.low %v17040_v38, %v17039_v8  ;;  %v17116_v36 = vrot.slane %v16468_v17, %v26933_v40  ;;  %v16500_v8 = vld [vmem:[%s23835_s25 + $0xf0] sm:$0xff] }
 0xa3c   : > { %v16433_v45 = vadd.f32 %v22121_v48, %v16390_v14  ;;  %v17618_v32 = vcombine.low %v17073_v35, %v17074_v4  ;;  %v17089_v33 = vrot.slane %v17075_v13, %v26933_v40  ;;  %v17090_v42 = vcombine.high %v17082_v24, %v17082_v24  ;;  %v16499_v4 = vld [vmem:[%s23835_s25 + $0xe8] sm:$0xff] }
 0xa3d   : > { %v17745_v47 = vadd.f32 %v17617_v63, %v16497_v59  ;;  %v17585_v58 = vcombine.low %v17041_v1, %v26598_v51  ;;  %v17125_v25 = vcombine.high %v17123_v16, %v17123_v16  ;;  %v16431_v54 = vadd.f32 %v22121_v48, %v16388_v21 }
 0xa3e   : > { %v16469_v31 = vmax.f32 %v16433_v45, 0.0  ;;  %v17091_v60 = vcombine.high %v17089_v33, %v17089_v33  ;;  %v17619_v44 = vcombine.low %v17082_v24, %v17090_v42  ;;  %v17592_v28 = vrot.slane %v17584_v26, %v26933_v40 }
 0xa3f   : > { %17777 = vst [vmem:[%s23835_s25 + $0xd8] sm:$0xff] %v17745_v47  ;;  %v17599_v15 = vrot.slane %v17585_v58, %v26933_v40  ;;  %v17626_v3 = vrot.slane %v17618_v32, %v26933_v40  ;;  %v17124_v30 = vcombine.high %v17116_v36, %v17116_v36  ;;  %v16467_v37 = vmax.f32 %v16431_v54, 0.0 }
 0xa40   : > { %v17126_v9 = vcombine.high %v16469_v31, %v16469_v31  ;;  %v17133_v0 = vrot.slane %v16469_v31, %v26933_v40  ;;  %v17633_v51 = vrot.slane %v17619_v44, %v26933_v40  ;;  %v17635_v29 = vcombine.low %v17089_v33, %v17091_v60 }
 0xa41   : > { %v17600_v34 = vcombine.low %v17592_v28, %v17599_v15  ;;  %v17092_v2 = vcombine.high %v16467_v37, %v16467_v37  ;;  %v17099_v41 = vrot.slane %v16467_v37, %v26933_v40  ;;  %v17653_v17 = vcombine.low %v17124_v30, %v17123_v16 }
 0xa42   : > { %v17140_v7 = vrot.slane %v17126_v9, %v26933_v40  ;;  %v17141_v50 = vcombine.high %v17133_v0, %v17133_v0  ;;  %v17669_v43 = vcombine.low %v17125_v25, %v17133_v0  ;;  %v17634_v12 = vcombine.low %v17626_v3, %v17633_v51 }
 0xa43   : > { %v17744_v11 = vadd.f32 %v17600_v34, %v16496_v20  ;;  %v17106_v53 = vrot.slane %v17092_v2, %v26933_v40  ;;  %v17107_v6 = vcombine.high %v17099_v41, %v17099_v41  ;;  %v17643_v27 = vrot.slane %v17635_v29, %v26933_v40 }
 0xa44   : > { %v17670_v22 = vcombine.low %v17141_v50, %v17140_v7  ;;  %v17677_v56 = vrot.slane %v17669_v43, %v26933_v40  ;;  %v17746_v23 = vadd.f32 %v17634_v12, %v16498_v18  ;;  %v17667_v61 = vrot.slane %v17653_v17, %v26933_v40 }
 0xa45   : > { %17776 = vst [vmem:[%s23835_s25 + $0xd0] sm:$0xff] %v17744_v11  ;;  %v17108_v5 = vcombine.high %v17106_v53, %v17106_v53  ;;  %v17636_v62 = vcombine.low %v17099_v41, %v17107_v6 }
 0xa46   : > { %v17684_v39 = vrot.slane %v17670_v22, %v26933_v40  ;;  %17778 = vst [vmem:[%s23835_s25 + $0xe0] sm:$0xff] %v17746_v23 }
 0xa47   : > { %v17650_v55 = vrot.slane %v17636_v62, %v26933_v40  ;;  %v17652_v57 = vcombine.low %v17108_v5, %v17116_v36 }
 0xa48   : > { %v17685_v35 = vcombine.low %v17677_v56, %v17684_v39 }
 0xa49   : > { %v17651_v14 = vcombine.low %v17643_v27, %v17650_v55  ;;  %v17660_v46 = vrot.slane %v17652_v57, %v26933_v40 }
 0xa4a   : > { %v17749_v52 = vadd.f32 %v17685_v35, %v16501_v19 }
 0xa4b   : > { %v17668_v49 = vcombine.low %v17660_v46, %v17667_v61  ;;  %v17747_v10 = vadd.f32 %v17651_v14, %v16499_v4 }
 0xa4c   : > { %17781 = vst [vmem:[%s23835_s25 + $0xf8] sm:$0xff] %v17749_v52 }
 0xa4d   : > { %v17748_v38 = vadd.f32 %v17668_v49, %v16500_v8  ;;  %17779 = vst [vmem:[%s23835_s25 + $0xe8] sm:$0xff] %v17747_v10 }
 0xa4f   : > { %17780 = vst [vmem:[%s23835_s25 + $0xf0] sm:$0xff] %v17748_v38 }
 0xa50   : > { %22417 = shalt.err (!%p22414_p0)
}
 0xa51   : > { %s22418_s29 = scalar_lea.hbm %s26683_s11, 4096  ;;  %s22422_s25 = scalar_lea.hbm %s26934_s24, 8192 }
 0xa52   : > { %p22419_p5 = scmp.ne.s32.totalorder %s26683_s11, %s22418_s29  ;;  %p22423_p4 = scmp.lt.u32.totalorder %s26683_s11, %s26934_s24 }
 0xa53   : > { %p22424_p12 = scmp.lt.u32.totalorder %s22422_s25, %s22418_s29  ;;  %p22426_p1 = scmp.lt.u32.totalorder %s22418_s29, %s26683_s11 }
 0xa54   : > { %p22420_p9 = pnand %p22419_p5, %p26935_p3 }
 0xa55   : > { %p22425_p13 = por %p22424_p12, %p22423_p4 }
 0xa56   : > { %p22421_p7 = pneg %p22420_p9 }
 0xa57   : > { %p22427_p2 = por %p22426_p1, %p22425_p13 }
 0xa59   : > { %p22428_p8 = pnand %p22427_p2, %p22421_p7 }
 0xa5b   : > { %22431 = shalt.err (!%p22428_p8)
}
 0xa5c   : > { %s22508_s18 = smov 128   ;;  %s22509_s2 = smov 8  }
 0xa5d   : > { %21524 = dma.vmem_to_hbm [thread:$0]  (%p26935_p3), %s26685_s12, 4096, %s26683_s11, %s17783_s19, %s22508_s18, %s22508_s18, %s22509_s2  }
 0xa5e PF: > { %s17811_s3 = sand.u32 1, %s22478_s13   ;;  %p26936_p6 = scmp.ne.s32.totalorder %s26773_s30, 0 }
 0xa5f   : > { %p26937_p10 = scmp.ge.s32.totalorder %s22490_s16, 2  ;;  %s17812_s26 = scalar_lea.sflag [#allocation5], %s17811_s3 }
 0xa61   : > { %p21559_p11 = pnand %p26937_p10, %p26936_p6 }
 0xa63   : > { %22473 = dma.done.wait (!%p21559_p11), %s17812_s26, 4096  }
 0xa64   : > { %22475 = vsyncadd (!%p21559_p11), %s17812_s26, 4294963200  ;;  %p28_p0 = scmp.ge.s32.totalorder %s22805_s23, 4   ;;  %s26938_s13 = smov %s22482_s14 }
 0xa65   : > { %s26939_s14 = smov %s22486_s15  ;;  %s26940_s15 = smov %s22817_s10 }
 0xa66   : > { %s26941_s16 = smov %s22805_s23  ;;  %30 = sbr.rel (!%p28_p0) target bundleno = 15 (0xf), region = 165 }
 0xa6d   :  { %17817 = vsyncpa [#allocation4], 1 }
 0xa6e   :  { %17819 = vsyncpa [#allocation4 + $0x1], 1 }
 0xa6f   :  { %17820 = vsyncpa [#allocation7], 1 }
 0xa70   :  { %17821 = vsyncpa [#allocation10], 1 }
 0xa71   :  { %17822 = vsyncpa [#allocation13], 1 }
 0xa72   :  { %17823 = vsyncpa [#allocation16], 1 }
 0xa73   :  { %17824 = vsyncpa [#allocation19], 1 }
 0xa74   :  { %17825 = vsyncpa [#allocation5], 1 }
 0xa75   :  { %17827 = vsyncpa [#allocation5 + $0x1], 1 }

</bundles_post_ra>
